<compile_context>
chip_gen: v5e
topology: v5e:2x2
jax: 0.10.0
libtpu: 0.0.40
codegen_flags: <defaults>
</compile_context>

<pallas_src>
import math

import jax
import jax.numpy as jnp
from jax import lax
from jax.experimental import pallas as pl
from jax.experimental.pallas import tpu as pltpu

EMBED_DIM = 128
NUM_HEADS = 8
HEAD_DIM = EMBED_DIM // NUM_HEADS
FFN_DIM = 512
LN_EPS = 1e-5
NEG_INF = -1e30


def spatio_attention_kernel(bias_ref, x_ref, hb_ref,
                            wqkv_ref, bqkv_ref,
                            w1_ref, b1_ref, w2_ref, b2_ref,
                            gamma_ref, beta_ref, out_ref):
    bs, t, e = x_ref.shape                       # (block_seqs, T, 128)
    rows = bs * t

    x = x_ref[...]                               # (bs, T, E) f32
    x2 = x.reshape(rows, e)                      # (rows, 128)

    # ---- fused QKV projection: one (rows,128)@(128,384) bf16 MXU matmul ----
    # (1/sqrt(head_dim) already folded into the Q columns by the wrapper)
    qkv = jnp.dot(x2.astype(jnp.bfloat16), wqkv_ref[...],
                  preferred_element_type=jnp.float32) + bqkv_ref[...]
    q = qkv[:, :e].reshape(bs, t, e)             # (bs, T, E) f32
    k = qkv[:, e:2 * e].reshape(bs, t, e)
    v = qkv[:, 2 * e:].reshape(bs, t, e)

    # ---- all-pair, all-head scores: one block-diagonal (128,128) matmul ----
    # prod[b,i,j,:] = q[b,i,:] * k[b,j,:]; head_block sums each head's 16
    # lanes and replicates the per-head score back over those 16 lanes, so the
    # softmax below is lane-dense.
    prod = q[:, :, None, :] * k[:, None, :, :]                      # (bs,T,T,E)
    s = jnp.dot(prod.reshape(rows * t, e).astype(jnp.bfloat16), hb_ref[...],
                preferred_element_type=jnp.float32).reshape(bs, t, t, e)
    # compact key-padding bias (bs,T,1) broadcast over query rows and lanes
    s = s + bias_ref[...][:, None, :, :]

    # ---- softmax over the key axis (axis=2), f32 on VPU/EUP ----
    m = jnp.max(s, axis=2, keepdims=True)
    p = jnp.exp(s - m)
    denom = jnp.sum(p, axis=2, keepdims=True)
    p = p * pl.reciprocal(denom, approx=True)    # EUP, frees the VPU

    # ---- fused P@V: unrolled accumulation over the T key slots ----
    # (avoids materializing a second (bs,T,T,E) temporary)
    o = p[:, :, 0, :] * v[:, 0:1, :]
    for j in range(1, t):
        o = o + p[:, :, j, :] * v[:, j:j + 1, :]                    # (bs,T,E)

    # ---- (out-proj fused into FFN-1) + FFN + residual + LayerNorm ----
    o2 = o.reshape(rows, e)
    h1 = jnp.maximum(
        jnp.dot(o2.astype(jnp.bfloat16), w1_ref[...],
                preferred_element_type=jnp.float32) + b1_ref[...], 0.0)
    f = jnp.dot(h1.astype(jnp.bfloat16), w2_ref[...],
                preferred_element_type=jnp.float32) + b2_ref[...]
    z = f + x2                                   # residual uses original f32 x
    mean = jnp.mean(z, axis=-1, keepdims=True)
    var = jnp.mean((z - mean) ** 2, axis=-1, keepdims=True)
    y = (z - mean) * lax.rsqrt(var + LN_EPS)
    out_ref[...] = (y * gamma_ref[...] + beta_ref[...]).reshape(bs, t, e)


def make_params(key):
    ks = jax.random.split(key, 8)

    def init(k, shape, scale=0.02):
        return (scale * jax.random.normal(k, shape)).astype(jnp.float32)

    return dict(
        wqkv=init(ks[0], (EMBED_DIM, 3 * EMBED_DIM)),   # in_proj, "x @ W" form
        bqkv=init(ks[1], (1, 3 * EMBED_DIM)),
        wo=init(ks[2], (EMBED_DIM, EMBED_DIM)),         # out_proj, "x @ W" form
        bo=init(ks[3], (1, EMBED_DIM)),
        w1=init(ks[4], (EMBED_DIM, FFN_DIM)),
        b1=init(ks[5], (1, FFN_DIM)),
        w2=init(ks[6], (FFN_DIM, EMBED_DIM)),
        b2=init(ks[7], (1, EMBED_DIM)),
        gamma=jnp.ones((1, EMBED_DIM), jnp.float32),
        beta=jnp.zeros((1, EMBED_DIM), jnp.float32),
    )


def spatio_attention(inputs, x, params, block_seqs=None):
    B, A, T, E = x.shape
    assert E == EMBED_DIM
    assert T % 8 == 0, "time_steps must be a multiple of 8 for (8,128) tiling"
    BA = B * A
    feat = inputs.shape[-1]

    # ---- key padding mask -> compact additive bias (BA, T, 1), f32 ----
    col0 = inputs.reshape(BA, T, feat)[:, :, 0].astype(jnp.float32)
    mask = col0 == 0.0
    all_masked = jnp.all(mask, axis=1, keepdims=True)
    is_last = (jnp.arange(T) == T - 1)[None, :]
    mask = jnp.logical_and(mask,
                           jnp.logical_not(jnp.logical_and(all_masked, is_last)))
    bias = jnp.where(mask, NEG_INF, 0.0).astype(jnp.float32)[:, :, None]

    x_seq = x.reshape(BA, T, E).astype(jnp.float32)

    # ---- blocking: ~512 rows per block, >=2 grid steps (v7x megacore), no
    # forced multiple-of-8 padding of the sequence count ----
    if block_seqs is None:
        bs = max(1, min(max(512 // T, 1), max(8192 // (T * T), 1)))
        bs = min(bs, BA)
        n_blocks = -(-BA // bs)
        if BA > 1 and n_blocks < 2:
            n_blocks = 2                       # keep both v7x TensorCores busy
        bs = -(-BA // n_blocks)                # minimal padding for n_blocks
    else:
        bs = min(max(1, block_seqs), BA)
    n_blocks = -(-BA // bs)
    BA_pad = n_blocks * bs
    if BA_pad != BA:
        pad = BA_pad - BA
        x_seq = jnp.pad(x_seq, ((0, pad), (0, 0), (0, 0)))
        bias = jnp.pad(bias, ((0, pad), (0, 0), (0, 0)))

    # block-diagonal ones(16,16) head matrix: sums each head's lanes and
    # re-expands the per-head score over those lanes in a single matmul
    lane = jnp.arange(E)
    head_block = (lane[:, None] // HEAD_DIM
                  == lane[None, :] // HEAD_DIM).astype(jnp.bfloat16)   # (E,E)

    # ---- weight prep (wrapper-side, hoisted out of the kernel) ----
    scale = 1.0 / math.sqrt(HEAD_DIM)
    wqkv_s = jnp.concatenate([params["wqkv"][:, :E] * scale,
                              params["wqkv"][:, E:]], axis=1).astype(jnp.bfloat16)
    bqkv_s = jnp.concatenate([params["bqkv"][:, :E] * scale,
                              params["bqkv"][:, E:]], axis=1)          # f32
    w1f = (params["wo"] @ params["w1"]).astype(jnp.bfloat16)           # out-proj fused
    b1f = params["bo"] @ params["w1"] + params["b1"]                   # f32 (1,512)
    w2_b = params["w2"].astype(jnp.bfloat16)

    rows_total = BA_pad * T
    pair_rows = BA_pad * T * T
    cost = pl.CostEstimate(
        flops=int(2 * rows_total * E * (3 * E + 2 * FFN_DIM)
                  + 2 * pair_rows * E * E
                  + 12 * pair_rows * E + 10 * rows_total * E),
        transcendentals=int(pair_rows * E + rows_total),
        bytes_accessed=int(8 * rows_total * E + 4 * BA_pad * T
                           + 2 * (E * 3 * E + E * E + 2 * E * FFN_DIM)
                           + 4 * (3 * E + FFN_DIM + 3 * E)),
    )

    grid_spec = pltpu.PrefetchScalarGridSpec(
        num_scalar_prefetch=0,
        grid=(n_blocks,),
        in_specs=[
            pl.BlockSpec((bs, T, 1), lambda i: (i, 0, 0)),          # bias (f32)
            pl.BlockSpec((bs, T, E), lambda i: (i, 0, 0)),          # x (f32)
            pl.BlockSpec((E, E), lambda i: (0, 0)),                 # head_block
            pl.BlockSpec((E, 3 * E), lambda i: (0, 0)),             # wqkv (scaled)
            pl.BlockSpec((1, 3 * E), lambda i: (0, 0)),             # bqkv (scaled)
            pl.BlockSpec((E, FFN_DIM), lambda i: (0, 0)),           # w1 (wo fused)
            pl.BlockSpec((1, FFN_DIM), lambda i: (0, 0)),           # b1 (bo fused)
            pl.BlockSpec((FFN_DIM, E), lambda i: (0, 0)),           # w2
            pl.BlockSpec((1, E), lambda i: (0, 0)),                 # b2
            pl.BlockSpec((1, E), lambda i: (0, 0)),                 # gamma
            pl.BlockSpec((1, E), lambda i: (0, 0)),                 # beta
        ],
        out_specs=pl.BlockSpec((bs, T, E), lambda i: (i, 0, 0)),
    )

    out = pl.pallas_call(
        spatio_attention_kernel,
        out_shape=jax.ShapeDtypeStruct((BA_pad, T, E), jnp.float32),
        grid_spec=grid_spec,
        compiler_params=pltpu.CompilerParams(
            dimension_semantics=("parallel",),
            vmem_limit_bytes=32 * 1024 * 1024),
        cost_estimate=cost,
    )(bias, x_seq, head_block,
      wqkv_s, bqkv_s, w1f, b1f, w2_b, params["b2"],
      params["gamma"], params["beta"])

    return out[:BA].reshape(B, A, T, E)


def reference(inputs, x, params):
    """Pure-JAX f32 reference mirroring the PyTorch forward (eval mode)."""
    B, A, T, E = x.shape
    BA = B * A
    col0 = inputs.reshape(BA, T, -1)[:, :, 0]
    mask = col0 == 0
    all_masked = jnp.all(mask, axis=1)
    mask = mask.at[:, -1].set(jnp.where(all_masked, False, mask[:, -1]))

    xt = x.reshape(BA, T, E)
    qkv = xt @ params["wqkv"] + params["bqkv"]
    q, k, v = jnp.split(qkv, 3, axis=-1)

    def heads(tns):
        return tns.reshape(BA, T, NUM_HEADS, HEAD_DIM).transpose(0, 2, 1, 3)

    qh, kh, vh = heads(q), heads(k), heads(v)
    s = jnp.einsum('bhtd,bhsd->bhts', qh, kh) / math.sqrt(HEAD_DIM)
    s = s + jnp.where(mask, NEG_INF, 0.0)[:, None, None, :]
    p = jax.nn.softmax(s, axis=-1)
    o = jnp.einsum('bhts,bhsd->bhtd', p, vh).transpose(0, 2, 1, 3).reshape(BA, T, E)
    attn = o @ params["wo"] + params["bo"]

    h1 = jnp.maximum(attn @ params["w1"] + params["b1"], 0.0)
    f = h1 @ params["w2"] + params["b2"]
    z = f + xt
    mean = jnp.mean(z, axis=-1, keepdims=True)
    var = jnp.mean((z - mean) ** 2, axis=-1, keepdims=True)
    y = (z - mean) / jnp.sqrt(var + LN_EPS) * params["gamma"] + params["beta"]
    return y.reshape(B, A, T, E)


if __name__ == "__main__":
    key = jax.random.PRNGKey(0)
    k_in, k_x, k_p = jax.random.split(key, 3)
    B, A, T = 2, 9, 8                 # BA=18 -> default heuristic: 2 blocks of 9

    inputs = jax.random.normal(k_in, (B, A, T, 7), jnp.float32)
    # Exercise the key_padding_mask logic: one fully-masked sequence (tests the
    # all_masked fix-up) and one partially-masked sequence.
    inputs = inputs.at[0, 0, :, 0].set(0.0)
    inputs = inputs.at[1, 3, :5, 0].set(0.0)
    x = jax.random.normal(k_x, (B, A, T, EMBED_DIM), jnp.float32)

    params = make_params(k_p)

    out = spatio_attention(inputs, x, params)
    out = jax.block_until_ready(out)

    ref = reference(inputs, x, params)
    assert out.shape == (B, A, T, EMBED_DIM)
    err = float(jnp.max(jnp.abs(out - ref)))
    # bf16 MXU operands + approx softmax reciprocal -> compare at bf16-level tol
    assert jnp.allclose(out, ref, atol=2e-2, rtol=2e-2), f"max abs err {err}"
    print("KERNEL_OK")
</pallas_src>

<mosaic_0001>
module attributes {stable_mosaic.version = 11 : i64} {
  func.func @spatio_attention_kernel(%arg0: i32, %arg1: memref<9x8x1xf32, #tpu.memory_space<vmem>>, %arg2: memref<9x8x128xf32, #tpu.memory_space<vmem>>, %arg3: memref<128x128xbf16, #tpu.memory_space<vmem>>, %arg4: memref<128x384xbf16, #tpu.memory_space<vmem>>, %arg5: memref<1x384xf32, #tpu.memory_space<vmem>>, %arg6: memref<128x512xbf16, #tpu.memory_space<vmem>>, %arg7: memref<1x512xf32, #tpu.memory_space<vmem>>, %arg8: memref<512x128xbf16, #tpu.memory_space<vmem>>, %arg9: memref<1x128xf32, #tpu.memory_space<vmem>>, %arg10: memref<1x128xf32, #tpu.memory_space<vmem>>, %arg11: memref<1x128xf32, #tpu.memory_space<vmem>>, %arg12: memref<9x8x128xf32, #tpu.memory_space<vmem>>) attributes {dimension_semantics = [#tpu.dimension_semantics<parallel>], iteration_bounds = array<i64: 2>, scalar_prefetch = 0 : i64, scratch_operands = 0 : i64, tpu.core_type = #tpu.core_type<tc>, window_params = [{transform_indices = @transform_0, window_bounds = array<i64: 9, 8, 1>}, {transform_indices = @transform_1, window_bounds = array<i64: 9, 8, 128>}, {pipeline_mode = #tpu.pipeline_mode<synchronous>, transform_indices = @transform_2, window_bounds = array<i64: 128, 128>}, {pipeline_mode = #tpu.pipeline_mode<synchronous>, transform_indices = @transform_3, window_bounds = array<i64: 128, 384>}, {pipeline_mode = #tpu.pipeline_mode<synchronous>, transform_indices = @transform_4, window_bounds = array<i64: 1, 384>}, {pipeline_mode = #tpu.pipeline_mode<synchronous>, transform_indices = @transform_5, window_bounds = array<i64: 128, 512>}, {pipeline_mode = #tpu.pipeline_mode<synchronous>, transform_indices = @transform_6, window_bounds = array<i64: 1, 512>}, {pipeline_mode = #tpu.pipeline_mode<synchronous>, transform_indices = @transform_7, window_bounds = array<i64: 512, 128>}, {pipeline_mode = #tpu.pipeline_mode<synchronous>, transform_indices = @transform_8, window_bounds = array<i64: 1, 128>}, {pipeline_mode = #tpu.pipeline_mode<synchronous>, transform_indices = @transform_9, window_bounds = array<i64: 1, 128>}, {pipeline_mode = #tpu.pipeline_mode<synchronous>, transform_indices = @transform_10, window_bounds = array<i64: 1, 128>}, {transform_indices = @transform_11, window_bounds = array<i64: 9, 8, 128>}]} {
    %c0 = arith.constant 0 : index
    %c0_0 = arith.constant 0 : index
    %c0_1 = arith.constant 0 : index
    %0 = vector.load %arg2[%c0, %c0_0, %c0_1] : memref<9x8x128xf32, #tpu.memory_space<vmem>>, vector<9x8x128xf32>
    %1 = vector.shape_cast %0 : vector<9x8x128xf32> to vector<72x128xf32>
    %2 = arith.truncf %1 : vector<72x128xf32> to vector<72x128xbf16>
    %c0_2 = arith.constant 0 : index
    %c0_3 = arith.constant 0 : index
    %3 = vector.load %arg4[%c0_2, %c0_3] : memref<128x384xbf16, #tpu.memory_space<vmem>>, vector<128x384xbf16>
    %cst = arith.constant dense<0.000000e+00> : vector<72x384xf32>
    %4 = tpu.matmul %2, %3, %cst {dimension_numbers = #tpu.dot_dimension_numbers<[1], [0], [0], [1], [0, 0, 1, 1], [], []>} : vector<72x128xbf16>, vector<128x384xbf16>, vector<72x384xf32> -> vector<72x384xf32>
    %c0_4 = arith.constant 0 : index
    %c0_5 = arith.constant 0 : index
    %5 = vector.load %arg5[%c0_4, %c0_5] : memref<1x384xf32, #tpu.memory_space<vmem>>, vector<1x384xf32>
    %6 = vector.broadcast %5 : vector<1x384xf32> to vector<72x384xf32>
    %7 = arith.addf %4, %6 : vector<72x384xf32>
    %8 = vector.extract_strided_slice %7 {offsets = [0, 0], sizes = [72, 128], strides = [1, 1]} : vector<72x384xf32> to vector<72x128xf32>
    %9 = vector.shape_cast %8 : vector<72x128xf32> to vector<9x8x128xf32>
    %10 = vector.extract_strided_slice %7 {offsets = [0, 128], sizes = [72, 128], strides = [1, 1]} : vector<72x384xf32> to vector<72x128xf32>
    %11 = vector.shape_cast %10 : vector<72x128xf32> to vector<9x8x128xf32>
    %12 = vector.extract_strided_slice %7 {offsets = [0, 256], sizes = [72, 128], strides = [1, 1]} : vector<72x384xf32> to vector<72x128xf32>
    %13 = vector.shape_cast %12 : vector<72x128xf32> to vector<9x8x128xf32>
    %14 = vector.shape_cast %9 : vector<9x8x128xf32> to vector<9x8x1x128xf32>
    %15 = vector.shape_cast %11 : vector<9x8x128xf32> to vector<9x1x8x128xf32>
    %16 = vector.broadcast %14 : vector<9x8x1x128xf32> to vector<9x8x8x128xf32>
    %17 = vector.broadcast %15 : vector<9x1x8x128xf32> to vector<9x8x8x128xf32>
    %18 = arith.mulf %16, %17 : vector<9x8x8x128xf32>
    %19 = vector.shape_cast %18 : vector<9x8x8x128xf32> to vector<576x128xf32>
    %20 = arith.truncf %19 : vector<576x128xf32> to vector<576x128xbf16>
    %c0_6 = arith.constant 0 : index
    %c0_7 = arith.constant 0 : index
    %21 = vector.load %arg3[%c0_6, %c0_7] : memref<128x128xbf16, #tpu.memory_space<vmem>>, vector<128x128xbf16>
    %cst_8 = arith.constant dense<0.000000e+00> : vector<576x128xf32>
    %22 = tpu.matmul %20, %21, %cst_8 {dimension_numbers = #tpu.dot_dimension_numbers<[1], [0], [0], [1], [0, 0, 1, 1], [], []>} : vector<576x128xbf16>, vector<128x128xbf16>, vector<576x128xf32> -> vector<576x128xf32>
    %23 = vector.shape_cast %22 : vector<576x128xf32> to vector<9x8x8x128xf32>
    %c0_9 = arith.constant 0 : index
    %c0_10 = arith.constant 0 : index
    %c0_11 = arith.constant 0 : index
    %24 = vector.load %arg1[%c0_9, %c0_10, %c0_11] : memref<9x8x1xf32, #tpu.memory_space<vmem>>, vector<9x8x1xf32>
    %25 = vector.shape_cast %24 : vector<9x8x1xf32> to vector<9x1x8x1xf32>
    %26 = vector.broadcast %25 : vector<9x1x8x1xf32> to vector<9x8x8x128xf32>
    %27 = arith.addf %23, %26 : vector<9x8x8x128xf32>
    %cst_12 = arith.constant dense<0xFF800000> : vector<9x8x128xf32>
    %28 = vector.multi_reduction <maximumf>, %27, %cst_12 [2] : vector<9x8x8x128xf32> to vector<9x8x128xf32>
    %29 = vector.shape_cast %28 : vector<9x8x128xf32> to vector<9x8x1x128xf32>
    %30 = vector.broadcast %29 : vector<9x8x1x128xf32> to vector<9x8x8x128xf32>
    %31 = arith.subf %27, %30 : vector<9x8x8x128xf32>
    %32 = math.exp %31 : vector<9x8x8x128xf32>
    %cst_13 = arith.constant dense<0.000000e+00> : vector<9x8x128xf32>
    %33 = vector.multi_reduction <add>, %32, %cst_13 [2] : vector<9x8x8x128xf32> to vector<9x8x128xf32>
    %34 = vector.shape_cast %33 : vector<9x8x128xf32> to vector<9x8x1x128xf32>
    %35 = tpu.reciprocal %34 {approx = true} : vector<9x8x1x128xf32> -> vector<9x8x1x128xf32>
    %36 = vector.broadcast %35 : vector<9x8x1x128xf32> to vector<9x8x8x128xf32>
    %37 = arith.mulf %32, %36 : vector<9x8x8x128xf32>
    %38 = vector.extract_strided_slice %37 {offsets = [0, 0, 0, 0], sizes = [9, 8, 1, 128], strides = [1, 1, 1, 1]} : vector<9x8x8x128xf32> to vector<9x8x1x128xf32>
    %39 = vector.shape_cast %38 : vector<9x8x1x128xf32> to vector<9x8x128xf32>
    %40 = vector.extract_strided_slice %13 {offsets = [0, 0, 0], sizes = [9, 1, 128], strides = [1, 1, 1]} : vector<9x8x128xf32> to vector<9x1x128xf32>
    %41 = vector.broadcast %40 : vector<9x1x128xf32> to vector<9x8x128xf32>
    %42 = arith.mulf %39, %41 : vector<9x8x128xf32>
    %43 = vector.extract_strided_slice %37 {offsets = [0, 0, 1, 0], sizes = [9, 8, 1, 128], strides = [1, 1, 1, 1]} : vector<9x8x8x128xf32> to vector<9x8x1x128xf32>
    %44 = vector.shape_cast %43 : vector<9x8x1x128xf32> to vector<9x8x128xf32>
    %45 = vector.extract_strided_slice %13 {offsets = [0, 1, 0], sizes = [9, 1, 128], strides = [1, 1, 1]} : vector<9x8x128xf32> to vector<9x1x128xf32>
    %46 = vector.broadcast %45 : vector<9x1x128xf32> to vector<9x8x128xf32>
    %47 = arith.mulf %44, %46 : vector<9x8x128xf32>
    %48 = arith.addf %42, %47 : vector<9x8x128xf32>
    %49 = vector.extract_strided_slice %37 {offsets = [0, 0, 2, 0], sizes = [9, 8, 1, 128], strides = [1, 1, 1, 1]} : vector<9x8x8x128xf32> to vector<9x8x1x128xf32>
    %50 = vector.shape_cast %49 : vector<9x8x1x128xf32> to vector<9x8x128xf32>
    %51 = vector.extract_strided_slice %13 {offsets = [0, 2, 0], sizes = [9, 1, 128], strides = [1, 1, 1]} : vector<9x8x128xf32> to vector<9x1x128xf32>
    %52 = vector.broadcast %51 : vector<9x1x128xf32> to vector<9x8x128xf32>
    %53 = arith.mulf %50, %52 : vector<9x8x128xf32>
    %54 = arith.addf %48, %53 : vector<9x8x128xf32>
    %55 = vector.extract_strided_slice %37 {offsets = [0, 0, 3, 0], sizes = [9, 8, 1, 128], strides = [1, 1, 1, 1]} : vector<9x8x8x128xf32> to vector<9x8x1x128xf32>
    %56 = vector.shape_cast %55 : vector<9x8x1x128xf32> to vector<9x8x128xf32>
    %57 = vector.extract_strided_slice %13 {offsets = [0, 3, 0], sizes = [9, 1, 128], strides = [1, 1, 1]} : vector<9x8x128xf32> to vector<9x1x128xf32>
    %58 = vector.broadcast %57 : vector<9x1x128xf32> to vector<9x8x128xf32>
    %59 = arith.mulf %56, %58 : vector<9x8x128xf32>
    %60 = arith.addf %54, %59 : vector<9x8x128xf32>
    %61 = vector.extract_strided_slice %37 {offsets = [0, 0, 4, 0], sizes = [9, 8, 1, 128], strides = [1, 1, 1, 1]} : vector<9x8x8x128xf32> to vector<9x8x1x128xf32>
    %62 = vector.shape_cast %61 : vector<9x8x1x128xf32> to vector<9x8x128xf32>
    %63 = vector.extract_strided_slice %13 {offsets = [0, 4, 0], sizes = [9, 1, 128], strides = [1, 1, 1]} : vector<9x8x128xf32> to vector<9x1x128xf32>
    %64 = vector.broadcast %63 : vector<9x1x128xf32> to vector<9x8x128xf32>
    %65 = arith.mulf %62, %64 : vector<9x8x128xf32>
    %66 = arith.addf %60, %65 : vector<9x8x128xf32>
    %67 = vector.extract_strided_slice %37 {offsets = [0, 0, 5, 0], sizes = [9, 8, 1, 128], strides = [1, 1, 1, 1]} : vector<9x8x8x128xf32> to vector<9x8x1x128xf32>
    %68 = vector.shape_cast %67 : vector<9x8x1x128xf32> to vector<9x8x128xf32>
    %69 = vector.extract_strided_slice %13 {offsets = [0, 5, 0], sizes = [9, 1, 128], strides = [1, 1, 1]} : vector<9x8x128xf32> to vector<9x1x128xf32>
    %70 = vector.broadcast %69 : vector<9x1x128xf32> to vector<9x8x128xf32>
    %71 = arith.mulf %68, %70 : vector<9x8x128xf32>
    %72 = arith.addf %66, %71 : vector<9x8x128xf32>
    %73 = vector.extract_strided_slice %37 {offsets = [0, 0, 6, 0], sizes = [9, 8, 1, 128], strides = [1, 1, 1, 1]} : vector<9x8x8x128xf32> to vector<9x8x1x128xf32>
    %74 = vector.shape_cast %73 : vector<9x8x1x128xf32> to vector<9x8x128xf32>
    %75 = vector.extract_strided_slice %13 {offsets = [0, 6, 0], sizes = [9, 1, 128], strides = [1, 1, 1]} : vector<9x8x128xf32> to vector<9x1x128xf32>
    %76 = vector.broadcast %75 : vector<9x1x128xf32> to vector<9x8x128xf32>
    %77 = arith.mulf %74, %76 : vector<9x8x128xf32>
    %78 = arith.addf %72, %77 : vector<9x8x128xf32>
    %79 = vector.extract_strided_slice %37 {offsets = [0, 0, 7, 0], sizes = [9, 8, 1, 128], strides = [1, 1, 1, 1]} : vector<9x8x8x128xf32> to vector<9x8x1x128xf32>
    %80 = vector.shape_cast %79 : vector<9x8x1x128xf32> to vector<9x8x128xf32>
    %81 = vector.extract_strided_slice %13 {offsets = [0, 7, 0], sizes = [9, 1, 128], strides = [1, 1, 1]} : vector<9x8x128xf32> to vector<9x1x128xf32>
    %82 = vector.broadcast %81 : vector<9x1x128xf32> to vector<9x8x128xf32>
    %83 = arith.mulf %80, %82 : vector<9x8x128xf32>
    %84 = arith.addf %78, %83 : vector<9x8x128xf32>
    %85 = vector.shape_cast %84 : vector<9x8x128xf32> to vector<72x128xf32>
    %86 = arith.truncf %85 : vector<72x128xf32> to vector<72x128xbf16>
    %c0_14 = arith.constant 0 : index
    %c0_15 = arith.constant 0 : index
    %87 = vector.load %arg6[%c0_14, %c0_15] : memref<128x512xbf16, #tpu.memory_space<vmem>>, vector<128x512xbf16>
    %cst_16 = arith.constant dense<0.000000e+00> : vector<72x512xf32>
    %88 = tpu.matmul %86, %87, %cst_16 {dimension_numbers = #tpu.dot_dimension_numbers<[1], [0], [0], [1], [0, 0, 1, 1], [], []>} : vector<72x128xbf16>, vector<128x512xbf16>, vector<72x512xf32> -> vector<72x512xf32>
    %c0_17 = arith.constant 0 : index
    %c0_18 = arith.constant 0 : index
    %89 = vector.load %arg7[%c0_17, %c0_18] : memref<1x512xf32, #tpu.memory_space<vmem>>, vector<1x512xf32>
    %90 = vector.broadcast %89 : vector<1x512xf32> to vector<72x512xf32>
    %91 = arith.addf %88, %90 : vector<72x512xf32>
    %cst_19 = arith.constant 0.000000e+00 : f32
    %92 = vector.broadcast %cst_19 : f32 to vector<72x512xf32>
    %93 = arith.maximumf %91, %92 : vector<72x512xf32>
    %94 = arith.truncf %93 : vector<72x512xf32> to vector<72x512xbf16>
    %c0_20 = arith.constant 0 : index
    %c0_21 = arith.constant 0 : index
    %95 = vector.load %arg8[%c0_20, %c0_21] : memref<512x128xbf16, #tpu.memory_space<vmem>>, vector<512x128xbf16>
    %cst_22 = arith.constant dense<0.000000e+00> : vector<72x128xf32>
    %96 = tpu.matmul %94, %95, %cst_22 {dimension_numbers = #tpu.dot_dimension_numbers<[1], [0], [0], [1], [0, 0, 1, 1], [], []>} : vector<72x512xbf16>, vector<512x128xbf16>, vector<72x128xf32> -> vector<72x128xf32>
    %c0_23 = arith.constant 0 : index
    %c0_24 = arith.constant 0 : index
    %97 = vector.load %arg9[%c0_23, %c0_24] : memref<1x128xf32, #tpu.memory_space<vmem>>, vector<1x128xf32>
    %98 = vector.broadcast %97 : vector<1x128xf32> to vector<72x128xf32>
    %99 = arith.addf %96, %98 : vector<72x128xf32>
    %100 = arith.addf %99, %1 : vector<72x128xf32>
    %cst_25 = arith.constant dense<0.000000e+00> : vector<72xf32>
    %101 = vector.multi_reduction <add>, %100, %cst_25 [1] : vector<72x128xf32> to vector<72xf32>
    %102 = vector.shape_cast %101 : vector<72xf32> to vector<72x1xf32>
    %cst_26 = arith.constant 1.280000e+02 : f32
    %103 = vector.broadcast %cst_26 : f32 to vector<72x1xf32>
    %104 = arith.divf %102, %103 : vector<72x1xf32>
    %105 = vector.broadcast %104 : vector<72x1xf32> to vector<72x128xf32>
    %106 = arith.subf %100, %105 : vector<72x128xf32>
    %107 = arith.mulf %106, %106 : vector<72x128xf32>
    %cst_27 = arith.constant dense<0.000000e+00> : vector<72xf32>
    %108 = vector.multi_reduction <add>, %107, %cst_27 [1] : vector<72x128xf32> to vector<72xf32>
    %109 = vector.shape_cast %108 : vector<72xf32> to vector<72x1xf32>
    %cst_28 = arith.constant 1.280000e+02 : f32
    %110 = vector.broadcast %cst_28 : f32 to vector<72x1xf32>
    %111 = arith.divf %109, %110 : vector<72x1xf32>
    %112 = vector.broadcast %104 : vector<72x1xf32> to vector<72x128xf32>
    %113 = arith.subf %100, %112 : vector<72x128xf32>
    %cst_29 = arith.constant 9.99999974E-6 : f32
    %114 = vector.broadcast %cst_29 : f32 to vector<72x1xf32>
    %115 = arith.addf %111, %114 : vector<72x1xf32>
    %116 = math.rsqrt %115 : vector<72x1xf32>
    %117 = vector.broadcast %116 : vector<72x1xf32> to vector<72x128xf32>
    %118 = arith.mulf %113, %117 : vector<72x128xf32>
    %c0_30 = arith.constant 0 : index
    %c0_31 = arith.constant 0 : index
    %119 = vector.load %arg10[%c0_30, %c0_31] : memref<1x128xf32, #tpu.memory_space<vmem>>, vector<1x128xf32>
    %120 = vector.broadcast %119 : vector<1x128xf32> to vector<72x128xf32>
    %121 = arith.mulf %118, %120 : vector<72x128xf32>
    %c0_32 = arith.constant 0 : index
    %c0_33 = arith.constant 0 : index
    %122 = vector.load %arg11[%c0_32, %c0_33] : memref<1x128xf32, #tpu.memory_space<vmem>>, vector<1x128xf32>
    %123 = vector.broadcast %122 : vector<1x128xf32> to vector<72x128xf32>
    %124 = arith.addf %121, %123 : vector<72x128xf32>
    %125 = vector.shape_cast %124 : vector<72x128xf32> to vector<9x8x128xf32>
    %c0_34 = arith.constant 0 : index
    %c0_35 = arith.constant 0 : index
    %c0_36 = arith.constant 0 : index
    %126 = vector.load %arg12[%c0_34, %c0_35, %c0_36] : memref<9x8x128xf32, #tpu.memory_space<vmem>>, vector<9x8x128xf32>
    tpu.vector_store %arg12[%c0_34, %c0_35, %c0_36], %125 {strides = array<i32>} : memref<9x8x128xf32, #tpu.memory_space<vmem>>, vector<9x8x128xf32>,
    return
  }
  func.func @transform_0(%arg0: i32) -> (i32, i32, i32) {
    %c0_i32 = arith.constant 0 : i32
    %c0_i32_0 = arith.constant 0 : i32
    %c0_i32_1 = arith.constant 0 : i32
    return %arg0, %c0_i32, %c0_i32_0 : i32, i32, i32
  }
  func.func @transform_1(%arg0: i32) -> (i32, i32, i32) {
    %c0_i32 = arith.constant 0 : i32
    %c0_i32_0 = arith.constant 0 : i32
    %c0_i32_1 = arith.constant 0 : i32
    return %arg0, %c0_i32, %c0_i32_0 : i32, i32, i32
  }
  func.func @transform_2(%arg0: i32) -> (i32, i32) {
    %c0_i32 = arith.constant 0 : i32
    %c0_i32_0 = arith.constant 0 : i32
    %c0_i32_1 = arith.constant 0 : i32
    return %c0_i32, %c0_i32_0 : i32, i32
  }
  func.func @transform_3(%arg0: i32) -> (i32, i32) {
    %c0_i32 = arith.constant 0 : i32
    %c0_i32_0 = arith.constant 0 : i32
    %c0_i32_1 = arith.constant 0 : i32
    return %c0_i32, %c0_i32_0 : i32, i32
  }
  func.func @transform_4(%arg0: i32) -> (i32, i32) {
    %c0_i32 = arith.constant 0 : i32
    %c0_i32_0 = arith.constant 0 : i32
    %c0_i32_1 = arith.constant 0 : i32
    return %c0_i32, %c0_i32_0 : i32, i32
  }
  func.func @transform_5(%arg0: i32) -> (i32, i32) {
    %c0_i32 = arith.constant 0 : i32
    %c0_i32_0 = arith.constant 0 : i32
    %c0_i32_1 = arith.constant 0 : i32
    return %c0_i32, %c0_i32_0 : i32, i32
  }
  func.func @transform_6(%arg0: i32) -> (i32, i32) {
    %c0_i32 = arith.constant 0 : i32
    %c0_i32_0 = arith.constant 0 : i32
    %c0_i32_1 = arith.constant 0 : i32
    return %c0_i32, %c0_i32_0 : i32, i32
  }
  func.func @transform_7(%arg0: i32) -> (i32, i32) {
    %c0_i32 = arith.constant 0 : i32
    %c0_i32_0 = arith.constant 0 : i32
    %c0_i32_1 = arith.constant 0 : i32
    return %c0_i32, %c0_i32_0 : i32, i32
  }
  func.func @transform_8(%arg0: i32) -> (i32, i32) {
    %c0_i32 = arith.constant 0 : i32
    %c0_i32_0 = arith.constant 0 : i32
    %c0_i32_1 = arith.constant 0 : i32
    return %c0_i32, %c0_i32_0 : i32, i32
  }
  func.func @transform_9(%arg0: i32) -> (i32, i32) {
    %c0_i32 = arith.constant 0 : i32
    %c0_i32_0 = arith.constant 0 : i32
    %c0_i32_1 = arith.constant 0 : i32
    return %c0_i32, %c0_i32_0 : i32, i32
  }
  func.func @transform_10(%arg0: i32) -> (i32, i32) {
    %c0_i32 = arith.constant 0 : i32
    %c0_i32_0 = arith.constant 0 : i32
    %c0_i32_1 = arith.constant 0 : i32
    return %c0_i32, %c0_i32_0 : i32, i32
  }
  func.func @transform_11(%arg0: i32) -> (i32, i32, i32) {
    %c0_i32 = arith.constant 0 : i32
    %c0_i32_0 = arith.constant 0 : i32
    %c0_i32_1 = arith.constant 0 : i32
    return %arg0, %c0_i32, %c0_i32_0 : i32, i32, i32
  }
}

</mosaic_0001>

<bundles_post_ra>
// kernel: tpu_custom_call.1
= control target key start
LH: loop header
LB: loop body
LE: loop exit
PB: predicated region body
PF: predicated region fallthrough
CT: control target
= control target key end

     0   :  { %s11670_s0 = inlined_call_operand.vmem [shape: f32[18,8,1], index: 0, kind: input, shape index: {}]   ;;  %s11671_s1 = inlined_call_operand.vmem [shape: f32[18,8,128], index: 1, kind: input, shape index: {}]   ;;  %s11672_s2 = inlined_call_operand.hbm [shape: bf16[128,128], index: 2, kind: input, shape index: {}]   ;;  %s11673_s3 = inlined_call_operand.hbm [shape: bf16[128,384], index: 3, kind: input, shape index: {}]   ;;  %s11674_s4 = inlined_call_operand.vmem [shape: f32[1,384], index: 4, kind: input, shape index: {}]   ;;  %s11675_s5 = inlined_call_operand.hbm [shape: bf16[128,512], index: 5, kind: input, shape index: {}]   ;;  %s11676_s6 = inlined_call_operand.vmem [shape: f32[1,512], index: 6, kind: input, shape index: {}]   ;;  %s11677_s7 = inlined_call_operand.hbm [shape: bf16[512,128], index: 7, kind: input, shape index: {}]   ;;  %s11678_s8 = inlined_call_operand.vmem [shape: f32[1,128], index: 8, kind: input, shape index: {}]   ;;  %s11679_s9 = inlined_call_operand.vmem [shape: f32[1,128], index: 9, kind: input, shape index: {}]   ;;  %s11680_s10 = inlined_call_operand.vmem [shape: f32[1,128], index: 10, kind: input, shape index: {}]   ;;  %s11681_s11 = inlined_call_operand.hbm [shape: f32[18,8,128], index: 11, kind: output, shape index: {}]  }
   0x1   :  { %11877 = sst [smem:[#allocation116_spill]] %s11672_s2 }
   0x2   :  { %11878 = sst [smem:[#allocation117_spill]] %s11673_s3 }
   0x3   :  { %16 = vsyncpa [#allocation3], 0 }
   0x4   :  { %17 = vsyncpa [#allocation6], 0 }
   0x5   :  { %18 = vsyncpa [#allocation9], 0 }
   0x6   :  { %19 = vsyncpa [#allocation4], 0 }
   0x7   :  { %21 = vsyncpa [#allocation4 + $0x1], 0  ;;  %s8058_s17 = smov 0   ;;  %s8060_s18 = smov 0  }
   0x8   :  { %s8062_s19 = smov 0   ;;  %s8064_s20 = smov 0  }
   0x9 LB: > { %11879 = sst [smem:[#allocation15_spill]] %s7970_s17  ;;  %s8079_s21 = sadd.s32 4294967295, %s7982_s20   ;;  %s7982_s20 = sphi %s8064_s20, %s12350_s20   ;;  %s7978_s19 = sphi %s8062_s19, %s12352_s19   ;;  %s7974_s18 = sphi %s8060_s18, %s12354_s18   ;;  %s7970_s17 = sphi %s8058_s17, %s12353_s17  }
   0xa   : > { %11880 = sst [smem:[#allocation16_spill]] %s7978_s19  ;;  %s6852_s22 = sadd.s32 4294967294, %s7982_s20  }
   0xb   : > { %11881 = sst [smem:[#allocation17_spill]] %s7982_s20  ;;  %s8083_s23 = sadd.s32 1, %s7982_s20  }
   0xc   : > { %11882 = sst [smem:[#allocation18_spill]] %s8083_s23  ;;  %s275_s24 = sadd.s32 1, %s7978_s19 }
   0xd   : > { %s272_s25 = ssub.s32 %s7982_s20, %s8083_s23  ;;  %p285_p0 = scmp.ne.s32.totalorder %s7978_s19, %s7974_s18 }
   0xe   : > { %p273_p1 = scmp.eq.s32.totalorder %s272_s25, 0  ;;  %p286_p2 = scmp.eq.s32.totalorder %s8079_s21, 1 }
   0xf   : > { %p291_p3 = scmp.ne.s32.totalorder %s7974_s18, %s7970_s17  ;;  %p292_p4 = scmp.eq.s32.totalorder %s6852_s22, 1 }
  0x10   : > { %s8094_s26 = scalar_select %p273_p1, %s7978_s19, %s275_s24  }
  0x11   : > { %p8096_p5 = por %p286_p2, %p285_p0  ;;  %p8100_p6 = por %p292_p4, %p291_p3 }
  0x12   : > { %11883 = sst [smem:[#allocation19_spill]] %s8094_s26  ;;  %p6853_p7 = scmp.ge.s32.totalorder %s7982_s20, 1 }
  0x13   : > { %s11885_s28 = scalar_select %p8100_p6, 1, 0 }
  0x14   : > { %p299_p8 = scmp.lt.s32.totalorder %s7982_s20, 3  ;;  %p7410_p9 = scmp.eq.s32.totalorder %s8079_s21, 0 }
  0x15   : > { %11886 = sst [smem:[#allocation20_spill]] %s11885_s28  ;;  %s7984_s14 = smov [#allocation5]  }
  0x16   : > { %p8107_p10 = pnand %p6853_p7, %p299_p8  ;;  %s11888_s3 = sld [smem:[#allocation117_spill]] }
  0x17   : > { %s326_s15 = sshll.u32 %s7984_s14, 4  ;;  %s11890_s2 = sld [smem:[#allocation116_spill]]  ;;  %s327_s15 = int_to_ptr.vmem [resolvable:$true] %s326_s15 }
  0x18   : > { %p7393_p11 = pneg %p8107_p10  ;;  %s7985_s30 = smov 192  }
  0x19   : > { %s7986_s12 = smov 12   ;;  %s7988_s26 = smov 64  }
  0x1a   : > { %p8118_p12 = pnand %p7410_p9, %p7393_p11  ;;  %s7989_s19 = smov 4  }
  0x1b   : > { %s341_s22 = sshll.u32 %s11675_s5, 4  ;;  %s7990_s24 = smov [#allocation7]   ;;  %s342_s22 = int_to_ptr.hbm [resolvable:$true] %s341_s22 }
  0x1c   : > { %s324_s13 = sshll.u32 %s11888_s3, 4  ;;  %s7987_s3 = smov [#allocation2]   ;;  %s325_s13 = int_to_ptr.hbm [resolvable:$true] %s324_s13 }
  0x1d   : > { %s310_s25 = sshll.u32 %s11890_s2, 4  ;;  %s312_s14 = sshll.u32 %s7987_s3, 4  ;;  %s311_s25 = int_to_ptr.hbm [resolvable:$true] %s310_s25  ;;  %s313_s14 = int_to_ptr.vmem [resolvable:$true] %s312_s14 }
  0x1e   : > { %7399 = dma.hbm_to_vmem [thread:$0]  (!%p8118_p12), %s325_s13, 3072, %s327_s15, [#allocation6], %s7985_s30, %s7985_s30, %s7986_s12  }
  0x1f   : > { %7396 = dma.hbm_to_vmem [thread:$0]  (!%p8118_p12), %s311_s25, 1024, %s313_s14, [#allocation3], %s7988_s26, %s7988_s26, %s7989_s19  }
  0x20   : > { %s343_s2 = sshll.u32 %s7990_s24, 4  ;;  %s358_s13 = sshll.u32 %s11677_s7, 4  ;;  %s344_s2 = int_to_ptr.vmem [resolvable:$true] %s343_s2  ;;  %s359_s13 = int_to_ptr.hbm [resolvable:$true] %s358_s13 }
  0x21   : > { %s7991_s15 = smov 256   ;;  %s7992_s3 = smov 16  }
  0x22   : > { %7402 = dma.hbm_to_vmem [thread:$0]  (!%p8118_p12), %s342_s22, 4096, %s344_s2, [#allocation6], %s7991_s15, %s7991_s15, %s7992_s3  }
  0x23   : > { %s7993_s30 = smov [#allocation8]   ;;  %403 = sbr.rel (%p8107_p10) target bundleno = 1884 (0x75c), region = 64 }
  0x24   : > { %s360_s12 = sshll.u32 %s7993_s30, 4  ;;  %s361_s12 = int_to_ptr.vmem [resolvable:$true] %s360_s12 }
  0x25   : > { %7405 = dma.hbm_to_vmem [thread:$0]  (!%p8118_p12), %s359_s13, 4096, %s361_s12, [#allocation9], %s7988_s26, %s7988_s26, %s7989_s19  }
  0x28   : > { %7953 = dma.done.wait (%p7410_p9), [#allocation3], 1024  }
  0x29   : > { %7955 = vsyncadd (%p7410_p9), [#allocation3], 4294966272 }
  0x2a   : > { %7957 = dma.done.wait (%p7410_p9), [#allocation6], 7168  }
  0x2b   : > { %7959 = vsyncadd (%p7410_p9), [#allocation6], 4294960128 }
  0x2c   : > { %7961 = dma.done.wait (%p7410_p9), [#allocation9], 4096  }
  0x2d   : > { %7963 = vsyncadd (%p7410_p9), [#allocation9], 4294963200  ;;  %v6952_v0 = vld [vmem:[#allocation5 + $0xa8] sm:$0xf]  ;;  %v7275_v1 = vld [vmem:[#allocation5 + $0xb0] sm:$0xf0] }
  0x2e   : > { %v7274_v2 = vld [vmem:[#allocation5 + $0xac] sm:$0xf]  ;;  %v6953_v3 = vor.u32 %v7275_v1, %v6952_v0  ;;  %v6954_v4 = vld [vmem:[#allocation5 + $0xb4] sm:$0xf0]  ;;  %v6940_v5 = vld [vmem:[#allocation5 + $0x90] sm:$0xf] }
  0x2f   : > { %v7272_v6 = vld [vmem:[#allocation5 + $0x98] sm:$0xf0]  ;;  %v6957_v7 = vor.u32 %v7274_v2, %v6954_v4  ;;  %v7271_v8 = vld [vmem:[#allocation5 + $0x94] sm:$0xf]  ;;  %v6942_v9 = vld [vmem:[#allocation5 + $0x9c] sm:$0xf0] }
  0x30   : > { %659 = vmatpush.bf16.msra.mxu0 %v6953_v3  ;;  %v6941_v10 = vor.u32 %v7272_v6, %v6940_v5  ;;  %v6945_v11 = vor.u32 %v7271_v8, %v6942_v9  ;;  %v6928_v12 = vld [vmem:[#allocation5 + $0x78] sm:$0xf]  ;;  %v7269_v13 = vld [vmem:[#allocation5 + $0x80] sm:$0xf0]  ;;  %v7268_v14 = vld [vmem:[#allocation5 + $0x7c] sm:$0xf] }
  0x31   : > { %692 = vmatpush.bf16.msra.mxu1 %v6957_v7  ;;  %v6930_v15 = vld [vmem:[#allocation5 + $0x84] sm:$0xf0]  ;;  %s464_s2 = smul.u32 9, %s8079_s21  ;;  %v6929_v16 = vor.u32 %v7269_v13, %v6928_v12  ;;  %v6916_v18 = vld [vmem:[#allocation5 + $0x60] sm:$0xf]  ;;  %vm5608_vm0 = vcmask 1041409  }
  0x32   : > { %v6933_v17 = vor.u32 %v7268_v14, %v6930_v15  ;;  %v7266_v19 = vld [vmem:[#allocation5 + $0x68] sm:$0xf0]  ;;  %v7265_v20 = vld [vmem:[#allocation5 + $0x64] sm:$0xf]  ;;  %v6918_v21 = vld [vmem:[#allocation5 + $0x6c] sm:$0xf0] }
  0x33   : > { %p465_p13 = scmp.lt.s32.totalorder %s464_s2, 17  ;;  %v6917_v22 = vor.u32 %v7266_v19, %v6916_v18  ;;  %v6904_v23 = vld [vmem:[#allocation5 + $0x48] sm:$0xf]  ;;  %v7263_v24 = vld [vmem:[#allocation5 + $0x50] sm:$0xf0]  ;;  %v6921_v25 = vor.u32 %v7265_v20, %v6918_v21  ;;  %vm5611_vm1 = vcmask 1042434  }
  0x34   : > { %660 = vmatpush.bf16.msra.mxu0 %v6941_v10  ;;  %v7262_v26 = vld [vmem:[#allocation5 + $0x4c] sm:$0xf]  ;;  %v6906_v27 = vld [vmem:[#allocation5 + $0x54] sm:$0xf0]  ;;  %v6905_v28 = vor.u32 %v7263_v24, %v6904_v23  ;;  %v6892_v30 = vld [vmem:[#allocation5 + $0x30] sm:$0xf] }
  0x35   : > { %693 = vmatpush.bf16.msra.mxu1 %v6945_v11  ;;  %s12356_s2 = smov (!%p465_p13, %s464_s2), 17  ;;  %v6909_v29 = vor.u32 %v7262_v26, %v6906_v27  ;;  %v7260_v31 = vld [vmem:[#allocation5 + $0x38] sm:$0xf0]  ;;  %v7259_v32 = vld [vmem:[#allocation5 + $0x34] sm:$0xf]  ;;  %v7282_v19 = vld [vmem:[#allocation2 + $0x28] sm:$0xff] }
  0x36   : > { %v6894_v33 = vld [vmem:[#allocation5 + $0x3c] sm:$0xf0]  ;;  %s6864_s17 = sshll.u32 %s12356_s2, 3  ;;  %v6893_v34 = vor.u32 %v7260_v31, %v6892_v30  ;;  %v6960_v35 = vld [vmem:[#allocation5 + $0xb0] sm:$0xf]  ;;  %v7280_v24 = vld [vmem:[#allocation2 + $0x18] sm:$0xff] }
  0x37   : > { %v7276_v36 = vld [vmem:[#allocation5 + $0xb8] sm:$0xf0]  ;;  %v6948_v37 = vld [vmem:[#allocation5 + $0x98] sm:$0xf]  ;;  %v6897_v38 = vor.u32 %v7259_v32, %v6894_v33  ;;  %v7257_v40 = vld [vmem:[#allocation5 + $0x20] sm:$0xf0]  ;;  %s8162_s23 = scalar_lea.vmem %s11671_s1, %s6864_s17  ;;  %s8178_s29 = scalar_lea.vmem %s11670_s0, %s6864_s17 }
  0x38   : > { %661 = vmatpush.bf16.msra.mxu0 %v6929_v16  ;;  %v6880_v39 = vld [vmem:[#allocation5 + $0x18] sm:$0xf]  ;;  %v6961_v41 = vor.u32 %v7276_v36, %v6960_v35  ;;  %v7273_v42 = vld [vmem:[#allocation5 + $0xa0] sm:$0xf0]  ;;  %v7256_v43 = vld [vmem:[#allocation5 + $0x1c] sm:$0xf] }
  0x39   : > { %694 = vmatpush.bf16.msra.mxu1 %v6933_v17  ;;  %v6882_v44 = vld [vmem:[#allocation5 + $0x24] sm:$0xf0]  ;;  %v6949_v45 = vor.u32 %v7273_v42, %v6948_v37  ;;  %v6881_v46 = vor.u32 %v7257_v40, %v6880_v39  ;;  %v6936_v47 = vld [vmem:[#allocation5 + $0x80] sm:$0xf]  ;;  %v7270_v48 = vld [vmem:[#allocation5 + $0x88] sm:$0xf0] }
  0x3a   : > { %725 = vmatpush.bf16.msra.mxu2 %v6961_v41  ;;  %v6885_v49 = vor.u32 %v7256_v43, %v6882_v44  ;;  %v6868_v50 = vld [vmem:[#allocation5] sm:$0xf]  ;;  %v7254_v51 = vld [vmem:[#allocation5 + $0x8] sm:$0xf0]  ;;  %v7253_v52 = vld [vmem:[#allocation5 + $0x4] sm:$0xf]  ;;  %v6937_v55 = vor.u32 %v7270_v48, %v6936_v47 }
  0x3b   : > { %v6870_v53 = vld [vmem:[#allocation5 + $0xc] sm:$0xf0]  ;;  %v477_v54 = vld [vmem:[%s8162_s23] sm:$0xff]  ;;  %v6869_v56 = vor.u32 %v7254_v51, %v6868_v50  ;;  %v478_v57 = vld [vmem:[%s8162_s23 + $0x8] sm:$0xff]  ;;  %v7994_v31 = vmov 0   ;;  %vm5614_vm2 = vcmask 1043459  }
  0x3c   : > { %662 = vmatpush.bf16.msra.mxu0 %v6917_v22  ;;  %v6924_v58 = vld [vmem:[#allocation5 + $0x68] sm:$0xf]  ;;  %v7267_v59 = vld [vmem:[#allocation5 + $0x70] sm:$0xf0]  ;;  %v6873_v60 = vor.u32 %v7253_v52, %v6870_v53  ;;  %v486_v61 = vpack.c.bf16 %v478_v57, %v477_v54  ;;  %v6912_v63 = vld [vmem:[#allocation5 + $0x50] sm:$0xf]  ;;  %7465 = vset.pattern.permute.xlu0 %v7994_v31 }
  0x3d   : > { %695 = vmatpush.bf16.msra.mxu1 %v6921_v25  ;;  %v6925_v62 = vor.u32 %v7267_v59, %v6924_v58  ;;  %v7264_v0 = vld [vmem:[#allocation5 + $0x58] sm:$0xf0]  ;;  %v6900_v2 = vld [vmem:[#allocation5 + $0x38] sm:$0xf]  ;;  %v7261_v3 = vld [vmem:[#allocation5 + $0x40] sm:$0xf0]  ;;  %7466 = vset.pattern.permute.xlu1 %v7994_v31 }
  0x3e   : > { %726 = vmatpush.bf16.msra.mxu2 %v6949_v45  ;;  %v6913_v1 = vor.u32 %v7264_v0, %v6912_v63  ;;  %v6901_v4 = vor.u32 %v7261_v3, %v6900_v2  ;;  %v6888_v5 = vld [vmem:[#allocation5 + $0x20] sm:$0xf]  ;;  %v7258_v6 = vld [vmem:[#allocation5 + $0x28] sm:$0xf0]  ;;  %v479_v7 = vld [vmem:[%s8162_s23 + $0x10] sm:$0xff]  ;;  %7467 = vset.pattern.permute.xlu2 %v7994_v31  ;;  %vm5617_vm3 = vcmask 1044484  }
  0x3f   : > { %v6889_v8 = vor.u32 %v7258_v6, %v6888_v5  ;;  %v480_v9 = vld [vmem:[%s8162_s23 + $0x18] sm:$0xff]  ;;  %v6876_v10 = vld [vmem:[#allocation5 + $0x8] sm:$0xf]  ;;  %v7255_v11 = vld [vmem:[#allocation5 + $0x10] sm:$0xf0]  ;;  %vm5620_vm4 = vcmask 1045509  }
  0x40   : > { %663 = vmatpush.bf16.msra.mxu0 %v6905_v28  ;;  %v487_v12 = vpack.c.bf16 %v480_v9, %v479_v7  ;;  %v6877_v13 = vor.u32 %v7255_v11, %v6876_v10  ;;  %v481_v14 = vld [vmem:[%s8162_s23 + $0x20] sm:$0xff]  ;;  %v482_v15 = vld [vmem:[%s8162_s23 + $0x28] sm:$0xff]  ;;  %v7284_v17 = vld [vmem:[#allocation2 + $0x38] sm:$0xff]  ;;  %vm5623_vm5 = vcmask 1046534   ;;  %vm5626_vm6 = vcmask 1047559   ;;  %s461_s15 = sand.u32 1, %s7974_s18  }
  0x41   : > { %696 = vmatpush.bf16.msra.mxu1 %v6909_v29  ;;  %v488_v16 = vpack.c.bf16 %v482_v15, %v481_v14  ;;  %v7283_v18 = vld [vmem:[#allocation2 + $0x30] sm:$0xff]  ;;  %7350 = vmatpush.bf16.msra.mxu3 %v7284_v17  ;;  %v484_v21 = vld [vmem:[%s8162_s23 + $0x38] sm:$0xff]  ;;  %v7281_v22 = vld [vmem:[#allocation2 + $0x20] sm:$0xff]  ;;  %s7374_s12 = smul.u32 72, %s461_s15  ;;  %s6722_s16 = scalar_lea.sflag [#allocation4], %s461_s15 }
  0x42   : > { %727 = vmatpush.bf16.msra.mxu2 %v6937_v55  ;;  %v483_v20 = vld [vmem:[%s8162_s23 + $0x30] sm:$0xff]  ;;  %v485_v25 = vld [vmem:[%s8162_s23 + $0x40] sm:$0xff]  ;;  %v7278_v28 = vld [vmem:[#allocation2 + $0x8] sm:$0xff]  ;;  %s7349_s20 = smul.u32 72, %s8079_s21  ;;  %s7928_s13 = scalar_lea.hbm %s11681_s11, 144 }
  0x43   : > { %v489_v23 = vpack.c.bf16 %v484_v21, %v483_v20  ;;  %v490_v26 = vpack.c.bf16 %v485_v25, %v485_v25  ;;  %v7279_v27 = vld [vmem:[#allocation2 + $0x10] sm:$0xff]  ;;  %v7277_v29 = vld [vmem:[#allocation2] sm:$0xff]  ;;  %v1338_v58 = vld [vmem:[%s8178_s29 + $0x18] sm:$0xff]  ;;  %s11596_s19 = scalar_lea.vmem [#allocation10], %s7374_s12 }
  0x44   : > { %664 = vmatpush.bf16.msra.mxu0 %v6893_v34  ;;  %v8183_v30 = vld [vmem:[%s11674_s4] sm:$0x7]  ;;  %s6733_s28 = scalar_lea.hbm %s11681_s11, %s7349_s20 }
  0x45   : > { %697 = vmatpush.bf16.msra.mxu1 %v6897_v38  ;;  %7351 = vmatpush.bf16.msra.mxu3 %v7283_v18  ;;  %v1335_v32 = vld [vmem:[%s8178_s29] sm:$0xff]  ;;  %v8187_v33 = vperm.slane %v8183_v30, 0  ;;  %v8190_v34 = vperm.slane %v8183_v30, 1  ;;  %s6736_s21 = sshll.u32 %s6733_s28, 4  ;;  %s6737_s21 = int_to_ptr.hbm [resolvable:$true] %s6736_s21 }
  0x46   : > { %728 = vmatpush.bf16.msra.mxu2 %v6925_v62  ;;  %1346 = vperm.xlu0 %7465, %v1335_v32   ;;  %s7922_s25 = sshra.s32 %s6737_s21, 4  ;;  %s7923_s25 = int_to_ptr.hbm [resolvable:$true] %s7922_s25 }
  0x47   : > { %11891 = vst [vmem:[#allocation21_spill] sm:$0xff] %v8187_v33  ;;  %s7924_s14 = scalar_lea.hbm %s7923_s25, 72  ;;  %p7929_p3 = scmp.lt.s32.totalorder %s7923_s25, %s11681_s11 }
  0x48   : > { %665 = vmatpush.bf16.msra.mxu0 %v6881_v46  ;;  %11892 = vst [vmem:[#allocation22_spill] sm:$0xff] %v8190_v34  ;;  %p7925_p0 = scmp.ne.s32.totalorder %s7923_s25, %s7924_s14  ;;  %p7930_p4 = scmp.lt.s32.totalorder %s7928_s13, %s7924_s14 }
  0x49   : > { %698 = vmatpush.bf16.msra.mxu1 %v6885_v49  ;;  %7352 = vmatpush.bf16.msra.mxu3 %v7282_v19  ;;  %v1337_v49 = vld [vmem:[%s8178_s29 + $0x10] sm:$0xff] }
  0x4a   : > { %729 = vmatpush.bf16.msra.mxu2 %v6913_v1  ;;  %1356 = vperm.xlu1 %7466, %v1337_v49   ;;  %p7926_p1 = pnand %p7925_p0, %p8096_p5  ;;  %p7931_p7 = por %p7930_p4, %p7929_p3 }
  0x4c   : > { %666 = vmatpush.bf16.msra.mxu0 %v6869_v56  ;;  %p7927_p2 = pneg %p7926_p1 }
  0x4d   : > { %699 = vmatpush.bf16.msra.mxu1 %v6873_v60  ;;  %7353 = vmatpush.bf16.msra.mxu3 %v7281_v22 }
  0x4e   : > { %730 = vmatpush.bf16.msra.mxu2 %v6901_v4  ;;  %p7932_p8 = pnand %p7931_p7, %p7927_p2 }
  0x4f   : > { %667 = vmatmul.bf16.vlgmr.msra.gmra.mxu0 %v486_v61 }
  0x50   : > { %700 = vmatmul.bf16.vlgmr.msra.gmra.mxu1 %v486_v61 }
  0x51   : > { %7354 = vmatpush.bf16.msra.mxu3 %v7280_v24 }
  0x52   : > { %731 = vmatpush.bf16.msra.mxu2 %v6889_v8  ;;  %1361 = vperm.xlu1 %7466, %v1338_v58  }
  0x55   : > { %7355 = vmatpush.bf16.msra.mxu3 %v7279_v27 }
  0x56   : > { %732 = vmatpush.bf16.msra.mxu2 %v6877_v13 }
  0x59   : > { %733 = vmatmul.bf16.vlgmr.msra.gmra.mxu2 %v486_v61  ;;  %7356 = vmatpush.bf16.msra.mxu3 %v7278_v28 }
  0x5a   : > { %1146 = vmatpush.bf16.msrb.mxu2 %v7284_v17 }
  0x5d   : > { %7357 = vmatpush.bf16.msra.mxu3 %v7277_v29 }
  0x5e   : > { %1147 = vmatpush.bf16.msrb.mxu2 %v7283_v18 }
  0x5f   : > { %672 = vmatmul.bf16.gmra.mxu0 %v487_v12 }
  0x60   : > { %705 = vmatmul.bf16.gmra.mxu1 %v487_v12 }
  0x62   : > { %1148 = vmatpush.bf16.msrb.mxu2 %v7282_v19 }
  0x66   : > { %1149 = vmatpush.bf16.msrb.mxu2 %v7281_v22 }
  0x69   : > { %738 = vmatmul.bf16.gmra.mxu2 %v487_v12 }
  0x6a   : > { %1150 = vmatpush.bf16.msrb.mxu2 %v7280_v24 }
  0x6e   : > { %1151 = vmatpush.bf16.msrb.mxu2 %v7279_v27 }
  0x6f   : > { %677 = vmatmul.bf16.gmra.mxu0 %v488_v16 }
  0x70   : > { %710 = vmatmul.bf16.gmra.mxu1 %v488_v16 }
  0x72   : > { %1152 = vmatpush.bf16.msrb.mxu2 %v7278_v28 }
  0x76   : > { %1153 = vmatpush.bf16.msrb.mxu2 %v7277_v29 }
  0x79   : > { %743 = vmatmul.bf16.gmra.mxu2 %v488_v16 }
  0x7f   : > { %682 = vmatmul.bf16.gmra.mxu0 %v489_v23 }
  0x80   : > { %715 = vmatmul.bf16.gmra.mxu1 %v489_v23 }
  0x89   : > { %748 = vmatmul.bf16.gmra.mxu2 %v489_v23 }
  0x8f   : > { %687 = vmatmul.bf16.gmra.mxu0 %v490_v26 }
  0x90   : > { %720 = vmatmul.bf16.gmra.mxu1 %v490_v26 }
  0x99   : > { %753 = vmatmul.bf16.gmra.mxu2 %v490_v26 }
  0xcc   : > { %v668_v35 = vpop.f32.mrf.mxu0 }
  0xcd   : > { %v8193_v36 = vadd.f32 %v668_v35, %v8187_v33  ;;  %v701_v37 = vpop.f32.mrf.mxu1 }
  0xce   : > { %v8196_v38 = vadd.f32 %v701_v37, %v8190_v34 }
  0xcf   : > { %v767_v39 = vrot.slane %v8193_v36, 1  ;;  %v830_v40 = vperm.slane %v8193_v36, 0  ;;  %v768_v47 = vrot.slane %v8193_v36, 2  ;;  %v769_v48 = vrot.slane %v8193_v36, 3 }
  0xd0   : > { %v770_v29 = vrot.slane %v8193_v36, 4  ;;  %v771_v37 = vrot.slane %v8193_v36, 5 }
  0xd1   : > { %v831_v41 = vperm.slane %v767_v39, 0  ;;  %v974_v42 = vmul.f32 %v830_v40, %v8196_v38  ;;  %v832_v50 = vperm.slane %v768_v47, 0  ;;  %v833_v51 = vperm.slane %v769_v48, 0 }
  0xd2   : > { %v835_v47 = vperm.slane %v771_v37, 0 }
  0xd3   : > { %v975_v43 = vmul.f32 %v831_v41, %v8196_v38  ;;  %v976_v56 = vmul.f32 %v832_v50, %v8196_v38  ;;  %v977_v57 = vmul.f32 %v833_v51, %v8196_v38 }
  0xd4   : > { %v8202_v44 = vpop.f32.mrf.mxu0 }
  0xd5   : > { %v8204_v45 = vpop.f32.mrf.mxu1  ;;  %v1046_v46 = vpack.c.bf16 %v975_v43, %v974_v42  ;;  %v1047_v20 = vpack.c.bf16 %v977_v57, %v976_v56  ;;  %v834_v43 = vperm.slane %v770_v29, 0 }
  0xd7   : > { %1154 = vmatmul.bf16.vlgmr.msrb.gmra.mxu2 %v1046_v46  ;;  %v978_v51 = vmul.f32 %v834_v43, %v8196_v38 }
  0xdc   : > { %v673_v52 = vpop.f32.mrf.mxu0  ;;  %v8239_v28 = vpop.f32.mrf.mxu2 }
  0xdd   : > { %v674_v53 = vadd.f32 %v673_v52, %v8187_v33  ;;  %v706_v54 = vpop.f32.mrf.mxu1  ;;  %v979_v52 = vmul.f32 %v835_v47, %v8196_v38 }
  0xde   : > { %v707_v55 = vadd.f32 %v706_v54, %v8190_v34 }
  0xdf   : > { %v781_v59 = vrot.slane %v674_v53, 1  ;;  %v846_v60 = vperm.slane %v674_v53, 0  ;;  %v782_v61 = vrot.slane %v674_v53, 2  ;;  %v783_v62 = vrot.slane %v674_v53, 3 }
  0xe0   : > { %v784_v63 = vrot.slane %v674_v53, 4  ;;  %v785_v0 = vrot.slane %v674_v53, 5  ;;  %v786_v1 = vrot.slane %v674_v53, 6  ;;  %v787_v2 = vrot.slane %v674_v53, 7 }
  0xe1   : > { %v847_v3 = vperm.slane %v781_v59, 0  ;;  %v8214_v4 = vmul.f32 %v846_v60, %v707_v55  ;;  %v848_v5 = vperm.slane %v782_v61, 0  ;;  %v849_v6 = vperm.slane %v783_v62, 0 }
  0xe2   : > { %v850_v7 = vperm.slane %v784_v63, 0  ;;  %v851_v8 = vperm.slane %v785_v0, 0  ;;  %v852_v9 = vperm.slane %v786_v1, 0  ;;  %v853_v10 = vperm.slane %v787_v2, 0 }
  0xe3   : > { %v8216_v11 = vmul.f32 %v847_v3, %v707_v55  ;;  %v8218_v12 = vmul.f32 %v848_v5, %v707_v55  ;;  %v8220_v13 = vmul.f32 %v849_v6, %v707_v55  ;;  %v1048_v57 = vpack.c.bf16 %v979_v52, %v978_v51 }
  0xe4   : > { %v675_v14 = vpop.f32.mrf.mxu0  ;;  %v8222_v15 = vmul.f32 %v850_v7, %v707_v55  ;;  %v8224_v16 = vmul.f32 %v851_v8, %v707_v55  ;;  %v8226_v17 = vmul.f32 %v852_v9, %v707_v55  ;;  %v8228_v18 = vmul.f32 %v853_v10, %v707_v55  ;;  %v8244_v48 = vpop.f32.mrf.mxu2 }
  0xe5   : > { %v676_v19 = vadd.f32 %v675_v14, %v8187_v33  ;;  %v1054_v21 = vpack.c.bf16 %v8216_v11, %v8214_v4  ;;  %v1055_v22 = vpack.c.bf16 %v8220_v13, %v8218_v12  ;;  %v708_v23 = vpop.f32.mrf.mxu1  ;;  %v8255_v60 = vperm.slane %v8183_v30, 2 }
  0xe6   : > { %v1056_v24 = vpack.c.bf16 %v8224_v16, %v8222_v15  ;;  %v1057_v25 = vpack.c.bf16 %v8228_v18, %v8226_v17  ;;  %v709_v31 = vadd.f32 %v708_v23, %v8190_v34  ;;  %v772_v1 = vrot.slane %v8193_v36, 6 }
  0xe7   : > { %1159 = vmatmul.bf16.gmra.mxu2 %v1047_v20  ;;  %v789_v26 = vrot.slane %v676_v19, 2  ;;  %v790_v27 = vrot.slane %v676_v19, 3  ;;  %v788_v41 = vrot.slane %v676_v19, 1  ;;  %v854_v42 = vperm.slane %v676_v19, 0  ;;  %11893 = vst [vmem:[#allocation23_spill] sm:$0xff] %v8255_v60 }
  0xe8   : > { %v791_v53 = vrot.slane %v676_v19, 4  ;;  %v792_v54 = vrot.slane %v676_v19, 5  ;;  %v773_v2 = vrot.slane %v8193_v36, 7  ;;  %v836_v5 = vperm.slane %v772_v1, 0  ;;  %v1336_v36 = vld [vmem:[%s8178_s29 + $0x8] sm:$0xff] }
  0xe9   : > { %v856_v32 = vperm.slane %v789_v26, 0  ;;  %v857_v35 = vperm.slane %v790_v27, 0  ;;  %v855_v49 = vperm.slane %v788_v41, 0  ;;  %v8246_v50 = vmul.f32 %v854_v42, %v709_v31  ;;  %1351 = vperm.xlu0 %7465, %v1336_v36  }
  0xea   : > { %v858_v58 = vperm.slane %v791_v53, 0  ;;  %v859_v59 = vperm.slane %v792_v54, 0  ;;  %v837_v6 = vperm.slane %v773_v2, 0  ;;  %v980_v30 = vmul.f32 %v836_v5, %v8196_v38 }
  0xeb   : > { %v1000_v39 = vmul.f32 %v856_v32, %v709_v31  ;;  %v1001_v40 = vmul.f32 %v857_v35, %v709_v31  ;;  %v8250_v55 = vmul.f32 %v855_v49, %v709_v31  ;;  %v793_v9 = vrot.slane %v676_v19, 6 }
  0xec   : > { %v739_v61 = vpop.f32.mrf.mxu2  ;;  %v1002_v63 = vmul.f32 %v858_v58, %v709_v31  ;;  %v1003_v0 = vmul.f32 %v859_v59, %v709_v31  ;;  %v981_v8 = vmul.f32 %v837_v6, %v8196_v38  ;;  %v794_v10 = vrot.slane %v676_v19, 7  ;;  %v678_v37 = vpop.f32.mrf.mxu0 }
  0xed   : > { %v1059_v46 = vpack.c.bf16 %v1001_v40, %v1000_v39  ;;  %v1058_v56 = vpack.c.bf16 %v8250_v55, %v8246_v50  ;;  %v8258_v62 = vadd.f32 %v739_v61, %v8255_v60  ;;  %v8268_v14 = vadd.f32 %v8202_v44, %v8187_v33  ;;  %v711_v47 = vpop.f32.mrf.mxu1 }
  0xee   : > { %v1060_v3 = vpack.c.bf16 %v1003_v0, %v1002_v63  ;;  %v1049_v20 = vpack.c.bf16 %v981_v8, %v980_v30  ;;  %v860_v23 = vperm.slane %v793_v9, 0  ;;  %v861_v26 = vperm.slane %v794_v10, 0 }
  0xef   : > { %1219 = vmatmul.bf16.vlgmr.msra.gmra.mxu3 %v1059_v46  ;;  %v774_v38 = vrot.slane %v8268_v14, 1  ;;  %v8276_v19 = vadd.f32 %v678_v37, %v8187_v33  ;;  %v704_v40 = vadd.f32 %v8204_v45, %v8190_v34  ;;  %v838_v41 = vperm.slane %v8268_v14, 0 }
  0xf0   : > { %v1004_v32 = vmul.f32 %v860_v23, %v709_v31  ;;  %v1005_v35 = vmul.f32 %v861_v26, %v709_v31  ;;  %v712_v49 = vadd.f32 %v711_v47, %v8190_v34  ;;  %v775_v59 = vrot.slane %v8268_v14, 2 }
  0xf1   : > { %v839_v39 = vperm.slane %v774_v38, 0  ;;  %v795_v46 = vrot.slane %v8276_v19, 1  ;;  %v982_v31 = vmul.f32 %v838_v41, %v704_v40  ;;  %v862_v52 = vperm.slane %v8276_v19, 0 }
  0xf2   : > { %v1061_v44 = vpack.c.bf16 %v1005_v35, %v1004_v32  ;;  %v776_v61 = vrot.slane %v8268_v14, 3  ;;  %v840_v0 = vperm.slane %v775_v59, 0  ;;  %v796_v6 = vrot.slane %v8276_v19, 2 }
  0xf3   : > { %v983_v43 = vmul.f32 %v839_v39, %v704_v40  ;;  %v863_v53 = vperm.slane %v795_v46, 0  ;;  %v797_v30 = vrot.slane %v8276_v19, 3  ;;  %v777_v32 = vrot.slane %v8268_v14, 4 }
  0xf4   : > { %v8262_v7 = vpop.f32.mrf.mxu2  ;;  %v841_v1 = vperm.slane %v776_v61, 0  ;;  %v864_v9 = vperm.slane %v796_v6, 0  ;;  %v778_v35 = vrot.slane %v8268_v14, 5  ;;  %v798_v46 = vrot.slane %v8276_v19, 4 }
  0xf5   : > { %v1050_v51 = vpack.c.bf16 %v983_v43, %v982_v31  ;;  %v1007_v58 = vmul.f32 %v863_v53, %v712_v49  ;;  %v865_v10 = vperm.slane %v797_v30, 0  ;;  %v842_v37 = vperm.slane %v777_v32, 0 }
  0xf6   : > { %v985_v5 = vmul.f32 %v841_v1, %v704_v40  ;;  %v1008_v36 = vmul.f32 %v864_v9, %v712_v49  ;;  %v799_v31 = vrot.slane %v8276_v19, 5 }
  0xf7   : > { %1164 = vmatmul.bf16.gmra.mxu2 %v1048_v57  ;;  %v1006_v57 = vmul.f32 %v862_v52, %v712_v49  ;;  %v986_v41 = vmul.f32 %v842_v37, %v704_v40 }
  0xf8   : > { %v867_v52 = vperm.slane %v799_v31, 0 }
  0xf9   : > { %v1062_v63 = vpack.c.bf16 %v1007_v58, %v1006_v57  ;;  %v779_v57 = vrot.slane %v8268_v14, 6  ;;  %v780_v58 = vrot.slane %v8268_v14, 7 }
  0xfb   : > { %v844_v61 = vperm.slane %v779_v57, 0 }
  0xfc   : > { %v744_v27 = vpop.f32.mrf.mxu2 }
  0xfd   : > { %v8272_v29 = vadd.f32 %v744_v27, %v8255_v60  ;;  %v1009_v27 = vmul.f32 %v865_v10, %v712_v49 }
  0xff   : > { %1224 = vmatmul.bf16.gmra.mxu3 %v1060_v3  ;;  %v984_v3 = vmul.f32 %v840_v0, %v704_v40  ;;  %v1063_v38 = vpack.c.bf16 %v1009_v27, %v1008_v36  ;;  %v988_v0 = vmul.f32 %v844_v61, %v704_v40  ;;  %v713_v27 = vpop.f32.mrf.mxu1 }
 0x100   : > { %v714_v32 = vadd.f32 %v713_v27, %v8190_v34 }
 0x101   : > { %v1051_v8 = vpack.c.bf16 %v985_v5, %v984_v3  ;;  %v800_v3 = vrot.slane %v8276_v19, 6  ;;  %v801_v5 = vrot.slane %v8276_v19, 7 }
 0x103   : > { %v868_v30 = vperm.slane %v800_v3, 0 }
 0x104   : > { %v8281_v42 = vpop.f32.mrf.mxu2 }
 0x105   : > { %v1012_v9 = vmul.f32 %v868_v30, %v712_v49 }
 0x107   : > { %1169 = vmatmul.bf16.gmra.mxu2 %v1049_v20  ;;  %v1339_v20 = vld [vmem:[%s8178_s29 + $0x20] sm:$0xff] }
 0x108   : > { %1366 = vperm.xlu2 %7467, %v1339_v20   ;;  %v680_v20 = vpop.f32.mrf.mxu0 }
 0x10c   : > { %v749_v54 = vpop.f32.mrf.mxu2 }
 0x10d   : > { %v8287_v45 = vadd.f32 %v749_v54, %v8255_v60  ;;  %v1011_v54 = vmul.f32 %v867_v52, %v712_v49 }
 0x10f   : > { %1229 = vmatmul.bf16.gmra.mxu3 %v1061_v44  ;;  %11894 = vst [vmem:[#allocation24_spill] sm:$0xff] %v8287_v45  ;;  %v843_v44 = vperm.slane %v778_v35, 0 }
 0x110   : > { %v683_v3 = vpop.f32.mrf.mxu0 }
 0x111   : > { %v987_v43 = vmul.f32 %v843_v44, %v704_v40  ;;  %v8323_v15 = vadd.f32 %v683_v3, %v8187_v33 }
 0x113   : > { %v1052_v47 = vpack.c.bf16 %v987_v43, %v986_v41  ;;  %v878_v18 = vperm.slane %v8323_v15, 0 }
 0x114   : > { %v8291_v2 = vpop.f32.mrf.mxu2 }
 0x115   : > { %11895 = vst [vmem:[#allocation25_spill] sm:$0xff] %v8291_v2 }
 0x117   : > { %1174 = vmatmul.bf16.gmra.mxu2 %v1050_v51  ;;  %v866_v51 = vperm.slane %v798_v46, 0 }
 0x119   : > { %v1010_v53 = vmul.f32 %v866_v51, %v712_v49 }
 0x11b   : > { %v1064_v59 = vpack.c.bf16 %v1011_v54, %v1010_v53 }
 0x11c   : > { %v754_v23 = vpop.f32.mrf.mxu2 }
 0x11d   : > { %v8297_v26 = vadd.f32 %v754_v23, %v8255_v60  ;;  %v681_v23 = vadd.f32 %v680_v20, %v8187_v33 }
 0x11f   : > { %1234 = vmatmul.bf16.gmra.mxu3 %v1062_v63  ;;  %11896 = vst [vmem:[#allocation26_spill] sm:$0xff] %v8297_v26  ;;  %v845_v63 = vperm.slane %v780_v58, 0  ;;  %v802_v36 = vrot.slane %v681_v23, 1  ;;  %v804_v44 = vrot.slane %v681_v23, 3  ;;  %v805_v4 = vrot.slane %v681_v23, 4 }
 0x120   : > { %v806_v11 = vrot.slane %v681_v23, 5  ;;  %v808_v58 = vrot.slane %v681_v23, 7 }
 0x121   : > { %v989_v1 = vmul.f32 %v845_v63, %v704_v40  ;;  %v870_v40 = vperm.slane %v681_v23, 0  ;;  %v871_v35 = vperm.slane %v802_v36, 0  ;;  %v873_v41 = vperm.slane %v804_v44, 0 }
 0x122   : > { %v874_v52 = vperm.slane %v805_v4, 0  ;;  %v875_v53 = vperm.slane %v806_v11, 0  ;;  %v877_v61 = vperm.slane %v808_v58, 0 }
 0x123   : > { %v1053_v6 = vpack.c.bf16 %v989_v1, %v988_v0  ;;  %v1014_v19 = vmul.f32 %v870_v40, %v714_v32  ;;  %v1017_v46 = vmul.f32 %v873_v41, %v714_v32 }
 0x124   : > { %v756_v39 = vpop.f32.mrf.mxu2  ;;  %v1018_v54 = vmul.f32 %v874_v52, %v714_v32  ;;  %v1019_v57 = vmul.f32 %v875_v53, %v714_v32  ;;  %v1021_v1 = vmul.f32 %v877_v61, %v714_v32  ;;  %v810_v52 = vrot.slane %v8323_v15, 2 }
 0x125   : > { %v811_v53 = vrot.slane %v8323_v15, 3 }
 0x126   : > { %v1068_v12 = vpack.c.bf16 %v1019_v57, %v1018_v54 }
 0x127   : > { %1179 = vmatmul.bf16.gmra.mxu2 %v1051_v8  ;;  %v869_v8 = vperm.slane %v801_v5, 0  ;;  %v809_v5 = vrot.slane %v8323_v15, 1 }
 0x129   : > { %v1013_v10 = vmul.f32 %v869_v8, %v712_v49  ;;  %v803_v49 = vrot.slane %v681_v23, 2  ;;  %v716_v8 = vpop.f32.mrf.mxu1 }
 0x12a   : > { %v8332_v17 = vadd.f32 %v716_v8, %v8190_v34 }
 0x12b   : > { %v1065_v14 = vpack.c.bf16 %v1013_v10, %v1012_v9  ;;  %v872_v39 = vperm.slane %v803_v49, 0 }
 0x12d   : > { %v1016_v43 = vmul.f32 %v872_v39, %v714_v32 }
 0x12f   : > { %1239 = vmatmul.bf16.gmra.mxu3 %v1063_v38  ;;  %v1015_v38 = vmul.f32 %v871_v35, %v714_v32  ;;  %v1067_v51 = vpack.c.bf16 %v1017_v46, %v1016_v43 }
 0x131   : > { %v1066_v37 = vpack.c.bf16 %v1015_v38, %v1014_v19 }
 0x137   : > { %1184 = vmatmul.bf16.gmra.mxu2 %v1052_v47  ;;  %v1340_v47 = vld [vmem:[%s8178_s29 + $0x28] sm:$0xff] }
 0x138   : > { %1371 = vperm.xlu2 %7467, %v1340_v47  }
 0x13f   : > { %1244 = vmatmul.bf16.gmra.mxu3 %v1064_v59 }
 0x147   : > { %1189 = vmatmul.bf16.gmra.mxu2 %v1053_v6 }
 0x14f   : > { %1249 = vmatmul.bf16.gmra.mxu3 %v1065_v14  ;;  %v1022_v14 = vmul.f32 %v878_v18, %v8332_v17 }
 0x157   : > { %1194 = vmatmul.bf16.gmra.mxu2 %v1054_v21 }
 0x15a   : > { %v1155_v31 = vpop.f32.mrf.mxu2 }
 0x15f   : > { %1254 = vmatmul.bf16.gmra.mxu3 %v1066_v37 }
 0x162   : > { %v1157_v21 = vpop.f32.mrf.mxu2 }
 0x167   : > { %1199 = vmatmul.bf16.gmra.mxu2 %v1055_v22  ;;  %v807_v22 = vrot.slane %v681_v23, 6  ;;  %v8342_v23 = vpop.permute.xlu1 %1356 }
 0x168   : > { %11897 = vst [vmem:[#allocation27_spill] sm:$0xff] %v8342_v23 }
 0x169   : > { %v876_v59 = vperm.slane %v807_v22, 0 }
 0x16a   : > { %v1160_v13 = vpop.f32.mrf.mxu2 }
 0x16b   : > { %v1020_v0 = vmul.f32 %v876_v59, %v714_v32 }
 0x16d   : > { %v1069_v16 = vpack.c.bf16 %v1021_v1, %v1020_v0  ;;  %v881_v0 = vperm.slane %v811_v53, 0 }
 0x16f   : > { %1259 = vmatmul.bf16.gmra.mxu3 %v1067_v51  ;;  %v8358_v39 = vpop.permute.xlu1 %1361 }
 0x170   : > { %11898 = vst [vmem:[#allocation28_spill] sm:$0xff] %v8358_v39 }
 0x172   : > { %v1162_v63 = vpop.f32.mrf.mxu2  ;;  %v1220_v10 = vpop.f32.mrf.mxu3 }
 0x173   : > { %v8365_v51 = vadd.f32 %v8358_v39, %v1220_v10 }
 0x175   : > { %v1617_v22 = vrot.slane %v8365_v51, 4 }
 0x177   : > { %1204 = vmatmul.bf16.gmra.mxu2 %v1056_v24  ;;  %v8325_v24 = vpop.permute.xlu0 %1346  ;;  %v1618_v18 = vmax.f32 %v8365_v51, %v1617_v22 }
 0x178   : > { %v8329_v30 = vadd.f32 %v8325_v24, %v1155_v31  ;;  %v8340_v20 = vadd.f32 %v8325_v24, %v1157_v21  ;;  %v8347_v27 = vadd.f32 %v8325_v24, %v1160_v13  ;;  %v8361_v41 = vadd.f32 %v8325_v24, %v1162_v63  ;;  %v1341_v31 = vld [vmem:[%s8178_s29 + $0x30] sm:$0xff] }
 0x179   : > { %1376 = vperm.xlu0 %7465, %v1341_v31   ;;  %v880_v63 = vperm.slane %v810_v52, 0 }
 0x17a   : > { %v1165_v6 = vpop.f32.mrf.mxu2  ;;  %v1461_v9 = vrot.slane %v8329_v30, 4  ;;  %v1467_v50 = vrot.slane %v8340_v20, 4  ;;  %v1473_v40 = vrot.slane %v8347_v27, 4  ;;  %v1222_v44 = vpop.f32.mrf.mxu3  ;;  %v1479_v11 = vrot.slane %v8361_v41, 4 }
 0x17b   : > { %v8353_v35 = vadd.f32 %v8325_v24, %v1165_v6  ;;  %v8372_v57 = vadd.f32 %v8358_v39, %v1222_v44 }
 0x17c   : > { %v1462_v32 = vmax.f32 %v8329_v30, %v1461_v9  ;;  %v1468_v38 = vmax.f32 %v8340_v20, %v1467_v50  ;;  %v1474_v37 = vmax.f32 %v8347_v27, %v1473_v40  ;;  %v1480_v61 = vmax.f32 %v8361_v41, %v1479_v11 }
 0x17d   : > { %v1485_v49 = vrot.slane %v8353_v35, 4  ;;  %v1623_v3 = vrot.slane %v8372_v57, 4 }
 0x17e   : > { %v1463_v19 = vrot.slane %v1462_v32, 2  ;;  %v1469_v46 = vrot.slane %v1468_v38, 2  ;;  %v1475_v47 = vrot.slane %v1474_v37, 2  ;;  %v1481_v10 = vrot.slane %v1480_v61, 2 }
 0x17f   : > { %1264 = vmatmul.bf16.gmra.mxu3 %v1068_v12  ;;  %v1486_v4 = vmax.f32 %v8353_v35, %v1485_v49 }
 0x180   : > { %v1464_v43 = vmax.f32 %v1462_v32, %v1463_v19  ;;  %v1470_v12 = vmax.f32 %v1468_v38, %v1469_v46  ;;  %v1476_v13 = vmax.f32 %v1474_v37, %v1475_v47  ;;  %v1025_v32 = vmul.f32 %v881_v0, %v8332_v17 }
 0x181   : > { %v1487_v58 = vrot.slane %v1486_v4, 2  ;;  %v1619_v37 = vrot.slane %v1618_v18, 2 }
 0x182   : > { %v1167_v55 = vpop.f32.mrf.mxu2  ;;  %v1465_v54 = vrot.slane %v1464_v43, 1  ;;  %v1477_v8 = vrot.slane %v1476_v13, 1 }
 0x183   : > { %v8381_v6 = vadd.f32 %v8325_v24, %v1167_v55  ;;  %v735_v55 = vadd.f32 %v8239_v28, %v8255_v60  ;;  %v1620_v52 = vmax.f32 %v1618_v18, %v1619_v37 }
 0x184   : > { %v1466_v1 = vmax.f32 %v1464_v43, %v1465_v54  ;;  %v1478_v38 = vmax.f32 %v1476_v13, %v1477_v8  ;;  %v1482_v43 = vmax.f32 %v1480_v61, %v1481_v10 }
 0x185   : > { %v1491_v19 = vrot.slane %v8381_v6, 4  ;;  %v8404_v13 = vperm.slane %v735_v55, 2  ;;  %v8407_v61 = vperm.slane %v735_v55, 3  ;;  %v8411_v0 = vperm.slane %v735_v55, 4 }
 0x186   : > { %v1893_v50 = vsub.f32 %v8329_v30, %v1466_v1  ;;  %v8397_v30 = vperm.slane %v735_v55, 0  ;;  %v1483_v22 = vrot.slane %v1482_v43, 1  ;;  %v8418_v10 = vperm.slane %v735_v55, 7 }
 0x187   : > { %1209 = vmatmul.bf16.gmra.mxu2 %v1057_v25  ;;  %v879_v25 = vperm.slane %v809_v5, 0  ;;  %v1471_v5 = vrot.slane %v1470_v12, 1  ;;  %v1492_v28 = vmax.f32 %v8381_v6, %v1491_v19  ;;  %11899 = vst [vmem:[#allocation29_spill] sm:$0xff] %v8404_v13 }
 0x188   : > { %v1965_v47 = vmul.f32 1.442695, %v1893_v50  ;;  %11900 = vst [vmem:[#allocation30_spill] sm:$0xff] %v8407_v61 }
 0x189   : > { %v1023_v36 = vmul.f32 %v879_v25, %v8332_v17  ;;  %v1488_v25 = vmax.f32 %v1486_v4, %v1487_v58  ;;  %v1472_v40 = vmax.f32 %v1470_v12, %v1471_v5  ;;  %v8402_v12 = vperm.slane %v735_v55, 1  ;;  %11901 = vst [vmem:[#allocation31_spill] sm:$0xff] %v8411_v0 }
 0x18a   : > { %v1170_v21 = vpop.f32.mrf.mxu2  ;;  %7471 = vpow2.f32 %v1965_v47  ;;  %v1621_v5 = vrot.slane %v1620_v52, 1  ;;  %11904 = vst [vmem:[#allocation34_spill] sm:$0xff] %v8418_v10 }
 0x18b   : > { %v8376_v59 = vadd.f32 %v8325_v24, %v1170_v21  ;;  %v1489_v49 = vrot.slane %v1488_v25, 1  ;;  %v1894_v11 = vsub.f32 %v8340_v20, %v1472_v40  ;;  %v1895_v21 = vsub.f32 %v8347_v27, %v1478_v38 }
 0x18c   : > { %v737_v20 = vadd.f32 %v8244_v48, %v8255_v60  ;;  %v8413_v27 = vperm.slane %v735_v55, 5 }
 0x18d   : > { %v1497_v9 = vrot.slane %v8376_v59, 4  ;;  %v1490_v53 = vmax.f32 %v1488_v25, %v1489_v49  ;;  %v1967_v1 = vmul.f32 1.442695, %v1894_v11 }
 0x18e   : > { %11902 = vst [vmem:[#allocation32_spill] sm:$0xff] %v8413_v27  ;;  %v8422_v50 = vperm.slane %v737_v20, 1  ;;  %v8426_v19 = vperm.slane %v737_v20, 3  ;;  %v8438_v11 = vperm.slane %v737_v20, 6 }
 0x18f   : > { %1269 = vmatmul.bf16.gmra.mxu3 %v1069_v16  ;;  %v1225_v16 = vpop.f32.mrf.mxu3  ;;  %v1498_v44 = vmax.f32 %v8376_v59, %v1497_v9  ;;  %v1897_v8 = vsub.f32 %v8353_v35, %v1490_v53  ;;  %v8416_v9 = vperm.slane %v735_v55, 6  ;;  %7473 = vpow2.f32 %v1967_v1 }
 0x190   : > { %11906 = vst [vmem:[#allocation36_spill] sm:$0xff] %v8422_v50  ;;  %v8431_v37 = vpop.eup %7471  ;;  %v1622_v55 = vmax.f32 %v1620_v52, %v1621_v5  ;;  %v8446_v52 = vperm.slane %v8258_v62, 1 }
 0x191   : > { %v1499_v54 = vrot.slane %v1498_v44, 2  ;;  %11903 = vst [vmem:[#allocation33_spill] sm:$0xff] %v8416_v9  ;;  %v1973_v49 = vmul.f32 1.442695, %v1897_v8 }
 0x192   : > { %11908 = vst [vmem:[#allocation38_spill] sm:$0xff] %v8426_v19 }
 0x193   : > { %v1500_v18 = vmax.f32 %v1498_v44, %v1499_v54  ;;  %11911 = vst [vmem:[#allocation41_spill] sm:$0xff] %v8438_v11  ;;  %v2109_v54 = vrot.slane %v8431_v37, 4 }
 0x194   : > { %11914 = vst [vmem:[#allocation44_spill] sm:$0xff] %v8446_v52 }
 0x195   : > { %v1501_v44 = vrot.slane %v1500_v18, 1 }
 0x197   : > { %1214 = vmatmul.bf16.gmra.mxu2 %v1058_v56  ;;  %v1070_v56 = vpack.c.bf16 %v1023_v36, %v1022_v14  ;;  %v8386_v14 = vadd.f32 %v8358_v39, %v1225_v16  ;;  %v1024_v36 = vmul.f32 %v880_v63, %v8332_v17  ;;  %v1969_v16 = vmul.f32 1.442695, %v1895_v21  ;;  %v1227_v25 = vpop.f32.mrf.mxu3 }
 0x198   : > { %v8429_v35 = vadd.f32 %v8358_v39, %v1227_v25  ;;  %v8443_v21 = vperm.slane %v8258_v62, 0 }
 0x199   : > { %v1629_v46 = vrot.slane %v8386_v14, 4  ;;  %v1071_v31 = vpack.c.bf16 %v1025_v32, %v1024_v36  ;;  %v1484_v36 = vmax.f32 %v1482_v43, %v1483_v22  ;;  %v8420_v32 = vperm.slane %v737_v20, 0 }
 0x19a   : > { %7475 = vpow2.f32 %v1969_v16  ;;  %v8433_v43 = vperm.slane %v737_v20, 4  ;;  %11913 = vst [vmem:[#allocation43_spill] sm:$0xff] %v8443_v21  ;;  %v1635_v1 = vrot.slane %v8429_v35, 4  ;;  %v8456_v16 = vperm.slane %v8258_v62, 2 }
 0x19b   : > { %v1630_v58 = vmax.f32 %v8386_v14, %v1629_v46  ;;  %11905 = vst [vmem:[#allocation35_spill] sm:$0xff] %v8420_v32  ;;  %v8435_v46 = vperm.slane %v737_v20, 5  ;;  %7477 = vpow2.f32 %v1973_v49  ;;  %v813_v21 = vrot.slane %v8323_v15, 5 }
 0x19c   : > { %11909 = vst [vmem:[#allocation39_spill] sm:$0xff] %v8433_v43  ;;  %v1636_v49 = vmax.f32 %v8429_v35, %v1635_v1 }
 0x19d   : > { %v1631_v48 = vrot.slane %v1630_v58, 2  ;;  %11910 = vst [vmem:[#allocation40_spill] sm:$0xff] %v8435_v46 }
 0x19e   : > { %11915 = vst [vmem:[#allocation45_spill] sm:$0xff] %v8456_v16 }
 0x19f   : > { %1274 = vmatmul.bf16.gmra.mxu3 %v1070_v56  ;;  %v1624_v56 = vmax.f32 %v8372_v57, %v1623_v3  ;;  %v1493_v3 = vrot.slane %v1492_v28, 2  ;;  %v1632_v47 = vmax.f32 %v1630_v58, %v1631_v48  ;;  %v1919_v58 = vsub.f32 %v8365_v51, %v1622_v55 }
 0x1a0   : > { %v8470_v51 = vperm.slane %v8258_v62, 6  ;;  %v8474_v48 = vperm.slane %v8258_v62, 7 }
 0x1a1   : > { %v1625_v4 = vrot.slane %v1624_v56, 2  ;;  %v1494_v38 = vmax.f32 %v1492_v28, %v1493_v3  ;;  %v8440_v28 = vperm.slane %v737_v20, 7  ;;  %v8453_v3 = vpop.eup %7473  ;;  %v1633_v8 = vrot.slane %v1632_v47, 1 }
 0x1a2   : > { %v8461_v25 = vpop.eup %7475  ;;  %11919 = vst [vmem:[#allocation49_spill] sm:$0xff] %v8470_v51  ;;  %v2115_v26 = vrot.slane %v8453_v3, 4  ;;  %v2017_v2 = vmul.f32 1.442695, %v1919_v58  ;;  %v1637_v51 = vrot.slane %v1636_v49, 2 }
 0x1a3   : > { %v1626_v63 = vmax.f32 %v1624_v56, %v1625_v4  ;;  %v8424_v56 = vperm.slane %v737_v20, 2  ;;  %v1172_v4 = vpop.f32.mrf.mxu2  ;;  %11912 = vst [vmem:[#allocation42_spill] sm:$0xff] %v8440_v28  ;;  %v1495_v22 = vrot.slane %v1494_v38, 1  ;;  %v1502_v20 = vmax.f32 %v1500_v18, %v1501_v44  ;;  %v1230_v44 = vpop.f32.mrf.mxu3 }
 0x1a4   : > { %11920 = vst [vmem:[#allocation50_spill] sm:$0xff] %v8474_v48 }
 0x1a5   : > { %11907 = vst [vmem:[#allocation37_spill] sm:$0xff] %v8424_v56  ;;  %v1627_v40 = vrot.slane %v1626_v63, 1  ;;  %v1496_v55 = vmax.f32 %v1494_v38, %v1495_v22  ;;  %v1899_v45 = vsub.f32 %v8376_v59, %v1502_v20  ;;  %v8495_v59 = vadd.f32 %v8325_v24, %v1172_v4 }
 0x1a6   : > { %v8508_v24 = vperm.slane %v8272_v29, 0  ;;  %v812_v4 = vrot.slane %v8323_v15, 4 }
 0x1a7   : > { %v1628_v53 = vmax.f32 %v1626_v63, %v1627_v40  ;;  %v8459_v63 = vperm.slane %v8258_v62, 3  ;;  %v2110_v40 = vadd.f32 %v8431_v37, %v2109_v54  ;;  %v1898_v58 = vsub.f32 %v8381_v6, %v1496_v55 }
 0x1a8   : > { %11929 = vst [vmem:[#allocation59_spill] sm:$0xff] %v8508_v24  ;;  %v1503_v52 = vrot.slane %v8495_v59, 4 }
 0x1a9   : > { %11916 = vst [vmem:[#allocation46_spill] sm:$0xff] %v8459_v63  ;;  %v1920_v18 = vsub.f32 %v8372_v57, %v1628_v53  ;;  %v2121_v57 = vrot.slane %v8461_v25, 4  ;;  %v8485_v53 = vpop.eup %7477  ;;  %v2111_v48 = vrot.slane %v2110_v40, 2 }
 0x1ab   : > { %v2019_v1 = vmul.f32 1.442695, %v1920_v18  ;;  %v1175_v20 = vpop.f32.mrf.mxu2  ;;  %v2122_v63 = vadd.f32 %v8461_v25, %v2121_v57  ;;  %v2133_v18 = vrot.slane %v8485_v53, 4 }
 0x1af   : > { %1279 = vmatmul.bf16.gmra.mxu3 %v1071_v31  ;;  %v1896_v31 = vsub.f32 %v8361_v41, %v1484_v36  ;;  %v742_v41 = vadd.f32 %v8262_v7, %v8255_v60  ;;  %v8464_v36 = vperm.slane %v8258_v62, 4  ;;  %v8467_v7 = vperm.slane %v8258_v62, 5 }
 0x1b0   : > { %v1634_v62 = vmax.f32 %v1632_v47, %v1633_v8  ;;  %v2116_v47 = vadd.f32 %v8453_v3, %v2115_v26  ;;  %v1638_v26 = vmax.f32 %v1636_v49, %v1637_v51  ;;  %v8524_v51 = vperm.slane %v8272_v29, 2 }
 0x1b1   : > { %v1971_v5 = vmul.f32 1.442695, %v1896_v31  ;;  %11917 = vst [vmem:[#allocation47_spill] sm:$0xff] %v8464_v36  ;;  %v8478_v31 = vperm.slane %v742_v41, 0  ;;  %v8487_v54 = vperm.slane %v742_v41, 2  ;;  %v8489_v38 = vperm.slane %v742_v41, 3 }
 0x1b2   : > { %11918 = vst [vmem:[#allocation48_spill] sm:$0xff] %v8467_v7  ;;  %v8482_v7 = vperm.slane %v742_v41, 1  ;;  %v8491_v22 = vperm.slane %v742_v41, 4  ;;  %v8497_v36 = vperm.slane %v742_v41, 5  ;;  %v8500_v8 = vperm.slane %v742_v41, 6 }
 0x1b3   : > { %11921 = vst [vmem:[#allocation51_spill] sm:$0xff] %v8478_v31  ;;  %7479 = vpow2.f32 %v1971_v5  ;;  %v1977_v5 = vmul.f32 1.442695, %v1899_v45  ;;  %v1921_v16 = vsub.f32 %v8386_v14, %v1634_v62  ;;  %v8505_v6 = vperm.slane %v742_v41, 7 }
 0x1b4   : > { %11922 = vst [vmem:[#allocation52_spill] sm:$0xff] %v8482_v7  ;;  %7481 = vpow2.f32 %v2017_v2  ;;  %v2112_v2 = vadd.f32 %v2111_v48, %v2110_v40  ;;  %v1975_v45 = vmul.f32 1.442695, %v1898_v58  ;;  %v2117_v57 = vrot.slane %v2116_v47, 2 }
 0x1b5   : > { %11923 = vst [vmem:[#allocation53_spill] sm:$0xff] %v8487_v54  ;;  %7483 = vpow2.f32 %v2019_v1  ;;  %v882_v14 = vperm.slane %v812_v4, 0  ;;  %v8516_v41 = vperm.slane %v8272_v29, 1  ;;  %v2123_v62 = vrot.slane %v2122_v63, 2 }
 0x1b6   : > { %11924 = vst [vmem:[#allocation54_spill] sm:$0xff] %v8489_v38  ;;  %7485 = vpow2.f32 %v1977_v5  ;;  %v2134_v1 = vadd.f32 %v8485_v53, %v2133_v18  ;;  %v2021_v24 = vmul.f32 1.442695, %v1921_v16  ;;  %v883_v40 = vperm.slane %v813_v21, 0 }
 0x1b7   : > { %11925 = vst [vmem:[#allocation55_spill] sm:$0xff] %v8491_v22  ;;  %v1026_v49 = vmul.f32 %v882_v14, %v8332_v17  ;;  %7487 = vpow2.f32 %v1975_v45  ;;  %v1639_v58 = vrot.slane %v1638_v26, 1  ;;  %v1504_v5 = vmax.f32 %v8495_v59, %v1503_v52  ;;  %v8539_v45 = vpop.permute.xlu0 %1351  ;;  %v8541_v52 = vpop.f32.mrf.mxu2 }
 0x1b8   : > { %11926 = vst [vmem:[#allocation56_spill] sm:$0xff] %v8497_v36  ;;  %v8530_v4 = vadd.f32 %v8358_v39, %v1230_v44  ;;  %v8535_v18 = vperm.slane %v8272_v29, 3  ;;  %v2118_v36 = vadd.f32 %v2117_v57, %v2116_v47  ;;  %v2124_v22 = vadd.f32 %v2123_v62, %v2122_v63 }
 0x1b9   : > { %11927 = vst [vmem:[#allocation57_spill] sm:$0xff] %v8500_v8  ;;  %v8511_v55 = vpop.eup %7479  ;;  %v2135_v14 = vrot.slane %v2134_v1, 2  ;;  %7489 = vpow2.f32 %v2021_v24  ;;  %v8546_v38 = vperm.slane %v8272_v29, 4  ;;  %v1640_v62 = vmax.f32 %v1638_v26, %v1639_v58 }
 0x1ba   : > { %11928 = vst [vmem:[#allocation58_spill] sm:$0xff] %v8505_v6  ;;  %v8519_v6 = vpop.f32.mrf.mxu3  ;;  %v8521_v8 = vpop.eup %7481  ;;  %v2127_v48 = vrot.slane %v8511_v55, 4  ;;  %v1641_v24 = vrot.slane %v8530_v4, 4  ;;  %v8555_v54 = vperm.slane %v8272_v29, 6  ;;  %v2119_v31 = vrot.slane %v2118_v36, 1 }
 0x1bb   : > { %11930 = vst [vmem:[#allocation60_spill] sm:$0xff] %v8516_v41  ;;  %v8532_v16 = vpop.eup %7483  ;;  %v2113_v41 = vrot.slane %v2112_v2, 1  ;;  %v2265_v21 = vrot.slane %v8521_v8, 4  ;;  %v8558_v28 = vadd.f32 %v8539_v45, %v1175_v20 }
 0x1bc   : > { %11931 = vst [vmem:[#allocation61_spill] sm:$0xff] %v8524_v51  ;;  %v1027_v51 = vmul.f32 %v883_v40, %v8332_v17  ;;  %v8543_v44 = vpop.eup %7485  ;;  %v2128_v47 = vadd.f32 %v8511_v55, %v2127_v48  ;;  %v2271_v63 = vrot.slane %v8532_v16, 4  ;;  %v1505_v40 = vrot.slane %v1504_v5, 2 }
 0x1bd   : > { %11932 = vst [vmem:[#allocation62_spill] sm:$0xff] %v8535_v18  ;;  %v8549_v18 = vperm.slane %v8272_v29, 5  ;;  %v2114_v7 = vadd.f32 %v2113_v41, %v2112_v2  ;;  %v2136_v48 = vadd.f32 %v2135_v14, %v2134_v1  ;;  %v2145_v26 = vrot.slane %v8543_v44, 4 }
 0x1be   : > { %11933 = vst [vmem:[#allocation63_spill] sm:$0xff] %v8546_v38  ;;  %v1072_v57 = vpack.c.bf16 %v1027_v51, %v1026_v49  ;;  %v8560_v38 = vpop.eup %7487  ;;  %v2266_v51 = vadd.f32 %v8521_v8, %v2265_v21  ;;  %v8565_v49 = vperm.slane %v8272_v29, 7  ;;  %v2129_v58 = vrot.slane %v2128_v47, 2 }
 0x1bf   : > { %11934 = vst [vmem:[#allocation64_spill] sm:$0xff] %v8549_v18  ;;  %v2125_v18 = vrot.slane %v2124_v22, 1  ;;  %v815_v2 = vrot.slane %v8323_v15, 7  ;;  %v8569_v41 = vpop.eup %7489  ;;  %v2272_v20 = vadd.f32 %v8532_v16, %v2271_v63  ;;  %v1506_v10 = vmax.f32 %v1504_v5, %v1505_v40 }
 0x1c0   : > { %11935 = vst [vmem:[#allocation65_spill] sm:$0xff] %v8555_v54  ;;  %1284 = vmatmul.bf16.gmra.mxu3 %v1072_v57  ;;  %v814_v54 = vrot.slane %v8323_v15, 6  ;;  %v1922_v57 = vsub.f32 %v8429_v35, %v1640_v62  ;;  %v1642_v21 = vmax.f32 %v8530_v4, %v1641_v24  ;;  %7491 = vrcp.f32 %v2114_v7  ;;  %v8580_v7 = vpop.f32.mrf.mxu2 }
 0x1c1   : > { %11936 = vst [vmem:[#allocation66_spill] sm:$0xff] %v8565_v49  ;;  %v2120_v14 = vadd.f32 %v2119_v31, %v2118_v36  ;;  %v2139_v29 = vrot.slane %v8560_v38, 4  ;;  %v1509_v49 = vrot.slane %v8558_v28, 4  ;;  %v2126_v11 = vadd.f32 %v2125_v18, %v2124_v22 }
 0x1c2   : > { %v8574_v1 = vpop.f32.mrf.mxu3  ;;  %v2267_v9 = vrot.slane %v2266_v51, 2  ;;  %v2137_v15 = vrot.slane %v2136_v48, 1  ;;  %v2146_v46 = vadd.f32 %v8543_v44, %v2145_v26  ;;  %v2130_v27 = vadd.f32 %v2129_v58, %v2128_v47 }
 0x1c3   : > { %v2277_v63 = vrot.slane %v8569_v41, 4  ;;  %v884_v35 = vperm.slane %v814_v54, 0  ;;  %v885_v5 = vperm.slane %v815_v2, 0  ;;  %v2273_v62 = vrot.slane %v2272_v20, 2 }
 0x1c4   : > { %v2023_v40 = vmul.f32 1.442695, %v1922_v57  ;;  %v1507_v24 = vrot.slane %v1506_v10, 1  ;;  %v1643_v43 = vrot.slane %v1642_v21, 2  ;;  %v8584_v36 = vadd.f32 %v8281_v42, %v8255_v60  ;;  %v685_v57 = vpop.f32.mrf.mxu0 }
 0x1c5   : > { %7493 = vrcp.f32 %v2120_v14  ;;  %v2140_v31 = vadd.f32 %v8560_v38, %v2139_v29  ;;  %v1510_v22 = vmax.f32 %v8558_v28, %v1509_v49  ;;  %v2268_v18 = vadd.f32 %v2267_v9, %v2266_v51  ;;  %v718_v29 = vpop.f32.mrf.mxu1 }
 0x1c6   : > { %7495 = vrcp.f32 %v2126_v11  ;;  %v2138_v47 = vadd.f32 %v2137_v15, %v2136_v48  ;;  %v2147_v54 = vrot.slane %v2146_v46, 2  ;;  %v7492_v26 = vpop.eup %7491  ;;  %v2131_v58 = vrot.slane %v2130_v27, 1 }
 0x1c7   : > { %v2278_v2 = vadd.f32 %v8569_v41, %v2277_v63  ;;  %v1028_v0 = vmul.f32 %v884_v35, %v8332_v17  ;;  %v1029_v19 = vmul.f32 %v885_v5, %v8332_v17  ;;  %v2274_v42 = vadd.f32 %v2273_v62, %v2272_v20  ;;  %v8610_v35 = vpop.permute.xlu2 %1366 }
 0x1c8   : > { %7497 = vpow2.f32 %v2023_v40  ;;  %v1508_v14 = vmax.f32 %v1506_v10, %v1507_v24  ;;  %v1644_v60 = vmax.f32 %v1642_v21, %v1643_v43  ;;  %v8592_v49 = vperm.slane %v8584_v36, 0 }
 0x1c9   : > { %v2141_v9 = vrot.slane %v2140_v31, 2  ;;  %v1511_v11 = vrot.slane %v1510_v22, 2  ;;  %v8596_v51 = vadd.f32 %v8358_v39, %v8519_v6  ;;  %7499 = vrcp.f32 %v2138_v47 }
 0x1ca   : > { %11937 = vst [vmem:[#allocation67_spill] sm:$0xff] %v8592_v49  ;;  %v2148_v48 = vadd.f32 %v2147_v54, %v2146_v46  ;;  %v8599_v15 = vadd.f32 %v685_v57, %v8187_v33  ;;  %v8603_v17 = vadd.f32 %v8539_v45, %v8541_v52  ;;  %v8605_v10 = vpop.f32.mrf.mxu3  ;;  %v2269_v20 = vrot.slane %v2268_v18, 1 }
 0x1cb   : > { %v7494_v43 = vpop.eup %7493  ;;  %v2279_v21 = vrot.slane %v2278_v2, 2  ;;  %v8608_v63 = vadd.f32 %v718_v29, %v8190_v34  ;;  %v1073_v6 = vpack.c.bf16 %v1029_v19, %v1028_v0  ;;  %v2132_v46 = vadd.f32 %v2131_v58, %v2130_v27 }
 0x1cc   : > { %v7496_v5 = vpop.eup %7495  ;;  %v2275_v62 = vrot.slane %v2274_v42, 1  ;;  %v1900_v40 = vsub.f32 %v8495_v59, %v1508_v14  ;;  %v1645_v24 = vrot.slane %v1644_v60, 1  ;;  %v8614_v52 = vmul.f32 %v7492_v26, %v8431_v37  ;;  %v8627_v59 = vpop.f32.mrf.mxu2 }
 0x1cd   : > { %v2142_v47 = vadd.f32 %v2141_v9, %v2140_v31  ;;  %v1512_v54 = vmax.f32 %v1510_v22, %v1511_v11  ;;  %v1647_v57 = vrot.slane %v8596_v51, 4  ;;  %v8620_v29 = vmul.f32 %v7494_v43, %v8453_v3 }
 0x1ce   : > { %11938 = vst [vmem:[#allocation68_spill] sm:$0xff] %v8614_v52  ;;  %v8617_v49 = vpop.eup %7497  ;;  %v2149_v0 = vrot.slane %v2148_v48, 1  ;;  %v1515_v27 = vrot.slane %v8603_v17, 4  ;;  %v8625_v19 = vadd.f32 %v8610_v35, %v8574_v1  ;;  %v8630_v37 = vmul.f32 %v7496_v5, %v8461_v25 }
 0x1cf   : > { %11939 = vst [vmem:[#allocation69_spill] sm:$0xff] %v8620_v29  ;;  %v2270_v31 = vadd.f32 %v2269_v20, %v2268_v18  ;;  %v2280_v22 = vadd.f32 %v2279_v21, %v2278_v2  ;;  %v816_v26 = vrot.slane %v8599_v15, 1  ;;  %v7500_v58 = vpop.eup %7499  ;;  %7501 = vrcp.f32 %v2132_v46 }
 0x1d0   : > { %1289 = vmatmul.bf16.gmra.mxu3 %v1073_v6  ;;  %11940 = vst [vmem:[#allocation70_spill] sm:$0xff] %v8630_v37  ;;  %v2276_v3 = vadd.f32 %v2275_v62, %v2274_v42  ;;  %v1979_v14 = vmul.f32 1.442695, %v1900_v40  ;;  %v1646_v9 = vmax.f32 %v1644_v60, %v1645_v24  ;;  %v2143_v11 = vrot.slane %v2142_v47, 1 }
 0x1d1   : > { %v2283_v43 = vrot.slane %v8617_v49, 4  ;;  %v1513_v6 = vrot.slane %v1512_v54, 1  ;;  %v1648_v1 = vmax.f32 %v8596_v51, %v1647_v57  ;;  %v2150_v39 = vadd.f32 %v2149_v0, %v2148_v48 }
 0x1d2   : > { %v1516_v61 = vmax.f32 %v8603_v17, %v1515_v27  ;;  %v1653_v25 = vrot.slane %v8625_v19, 4  ;;  %v8639_v18 = vmul.f32 %v8397_v30, %v8614_v52  ;;  %v8642_v2 = vmul.f32 %v7500_v58, %v8485_v53  ;;  %v8646_v5 = vpop.f32.mrf.mxu3 }
 0x1d3   : > { %v2281_v42 = vrot.slane %v2280_v22, 1  ;;  %v886_v60 = vperm.slane %v8599_v15, 0  ;;  %v887_v20 = vperm.slane %v816_v26, 0  ;;  %7503 = vpow2.f32 %v1979_v14 }
 0x1d4   : > { %11941 = vst [vmem:[#allocation71_spill] sm:$0xff] %v8642_v2  ;;  %v1923_v21 = vsub.f32 %v8530_v4, %v1646_v9  ;;  %v8650_v48 = vmul.f32 %v8397_v30, %v8620_v29  ;;  %v8654_v46 = vmul.f32 %v8397_v30, %v8630_v37  ;;  %7505 = vrcp.f32 %v2270_v31 }
 0x1d5   : > { %v2144_v53 = vadd.f32 %v2143_v11, %v2142_v47  ;;  %v1514_v62 = vmax.f32 %v1512_v54, %v1513_v6  ;;  %v1649_v40 = vrot.slane %v1648_v1, 2  ;;  %v7502_v24 = vpop.eup %7501  ;;  %7507 = vrcp.f32 %v2150_v39  ;;  %v8664_v54 = vpop.f32.mrf.mxu2 }
 0x1d6   : > { %v2284_v57 = vadd.f32 %v8617_v49, %v2283_v43  ;;  %v1517_v0 = vrot.slane %v1516_v61, 2  ;;  %v1654_v4 = vmax.f32 %v8625_v19, %v1653_v25  ;;  %v2282_v27 = vadd.f32 %v2281_v42, %v2280_v22 }
 0x1d7   : > { %v8660_v26 = vadd.f32 %v8539_v45, %v8580_v7  ;;  %v1030_v58 = vmul.f32 %v886_v60, %v8608_v63  ;;  %v1031_v14 = vmul.f32 %v887_v20, %v8608_v63  ;;  %7509 = vrcp.f32 %v2276_v3 }
 0x1d8   : > { %v2025_v47 = vmul.f32 1.442695, %v1923_v21  ;;  %v8668_v39 = vmul.f32 %v8397_v30, %v8642_v2  ;;  %v8672_v31 = vmul.f32 %v8402_v12, %v8614_v52  ;;  %7511 = vrcp.f32 %v2144_v53 }
 0x1d9   : > { %v1901_v7 = vsub.f32 %v8558_v28, %v1514_v62  ;;  %v1650_v22 = vmax.f32 %v1648_v1, %v1649_v40  ;;  %v8677_v9 = vmul.f32 %v8402_v12, %v8620_v29  ;;  %v8679_v3 = vpop.eup %7503  ;;  %v2285_v11 = vrot.slane %v2284_v57, 2 }
 0x1da   : > { %v1518_v43 = vmax.f32 %v1516_v61, %v1517_v0  ;;  %v1655_v6 = vrot.slane %v1654_v4, 2  ;;  %v8683_v25 = vmul.f32 %v8402_v12, %v8630_v37  ;;  %v7506_v42 = vpop.eup %7505  ;;  %v8686_v60 = vperm.slane %v8584_v36, 1  ;;  %v8706_v56 = vpop.f32.mrf.mxu3 }
 0x1db   : > { %7513 = vrcp.f32 %v2282_v27  ;;  %v1521_v28 = vrot.slane %v8660_v26, 4  ;;  %v1074_v1 = vpack.c.bf16 %v1031_v14, %v1030_v58  ;;  %v7508_v20 = vpop.eup %7507  ;;  %v8690_v21 = vperm.slane %v8584_v36, 2 }
 0x1dc   : > { %11942 = vst [vmem:[#allocation72_spill] sm:$0xff] %v8686_v60  ;;  %v8693_v53 = vperm.slane %v8584_v36, 3  ;;  %v8696_v61 = vperm.slane %v8584_v36, 4  ;;  %7515 = vpow2.f32 %v2025_v47  ;;  %v2151_v62 = vrot.slane %v8679_v3, 4 }
 0x1dd   : > { %11943 = vst [vmem:[#allocation73_spill] sm:$0xff] %v8690_v21  ;;  %v1981_v40 = vmul.f32 1.442695, %v1901_v7  ;;  %v1651_v0 = vrot.slane %v1650_v22, 1  ;;  %v8701_v27 = vmul.f32 %v8402_v12, %v8642_v2  ;;  %v7510_v58 = vpop.eup %7509  ;;  %v8704_v14 = vperm.slane %v8584_v36, 5 }
 0x1de   : > { %11944 = vst [vmem:[#allocation74_spill] sm:$0xff] %v8693_v53  ;;  %v2286_v21 = vadd.f32 %v2285_v11, %v2284_v57  ;;  %v1519_v60 = vrot.slane %v1518_v43, 1  ;;  %v1656_v53 = vmax.f32 %v1654_v4, %v1655_v6  ;;  %v8709_v47 = vmul.f32 %v7508_v20, %v8543_v44 }
 0x1df   : > { %11945 = vst [vmem:[#allocation75_spill] sm:$0xff] %v8696_v61  ;;  %v7512_v61 = vpop.eup %7511  ;;  %v1522_v7 = vmax.f32 %v8660_v26, %v1521_v28  ;;  %v818_v34 = vrot.slane %v8599_v15, 3  ;;  %v8715_v33 = vperm.slane %v8584_v36, 6  ;;  %v8721_v57 = vmul.f32 %v7502_v24, %v8511_v55 }
 0x1e0   : > { %1294 = vmatmul.bf16.gmra.mxu3 %v1074_v1  ;;  %11946 = vst [vmem:[#allocation76_spill] sm:$0xff] %v8704_v14  ;;  %v817_v1 = vrot.slane %v8599_v15, 2  ;;  %v8718_v14 = vperm.slane %v8584_v36, 7  ;;  %v8725_v4 = vadd.f32 %v8610_v35, %v8605_v10  ;;  %v8728_v11 = vmul.f32 %v7506_v42, %v8521_v8 }
 0x1e1   : > { %11947 = vst [vmem:[#allocation77_spill] sm:$0xff] %v8709_v47  ;;  %v7514_v44 = vpop.eup %7513  ;;  %v2152_v6 = vadd.f32 %v8679_v3, %v2151_v62  ;;  %7517 = vpow2.f32 %v1981_v40  ;;  %v1652_v28 = vmax.f32 %v1650_v22, %v1651_v0  ;;  %v8734_v36 = vmul.f32 %v7510_v58, %v8532_v16 }
 0x1e2   : > { %11948 = vst [vmem:[#allocation78_spill] sm:$0xff] %v8715_v33  ;;  %v8731_v20 = vpop.eup %7515  ;;  %v1520_v55 = vmax.f32 %v1518_v43, %v1519_v60  ;;  %v1657_v24 = vrot.slane %v1656_v53, 1  ;;  %v1187_v33 = vpop.f32.mrf.mxu2  ;;  %v1523_v2 = vrot.slane %v1522_v7, 2  ;;  %v888_v10 = vperm.slane %v817_v1, 0 }
 0x1e3   : > { %11949 = vst [vmem:[#allocation79_spill] sm:$0xff] %v8718_v14  ;;  %v2287_v14 = vrot.slane %v2286_v21, 1  ;;  %v889_v37 = vperm.slane %v818_v34, 0  ;;  %v8738_v8 = vmul.f32 %v8397_v30, %v8709_v47  ;;  %v8741_v42 = vmul.f32 %v7512_v61, %v8560_v38 }
 0x1e4   : > { %11950 = vst [vmem:[#allocation80_spill] sm:$0xff] %v8728_v11  ;;  %v8744_v22 = vmul.f32 %v7514_v44, %v8569_v41  ;;  %v1659_v16 = vrot.slane %v8725_v4, 4  ;;  %v8749_v43 = vadd.f32 %v8539_v45, %v8627_v59  ;;  %v2153_v60 = vrot.slane %v2152_v6, 2 }
 0x1e5   : > { %11951 = vst [vmem:[#allocation81_spill] sm:$0xff] %v8734_v36  ;;  %v1924_v62 = vsub.f32 %v8596_v51, %v1652_v28  ;;  %v8754_v34 = vadd.f32 %v8610_v35, %v8646_v5  ;;  %v2919_v40 = vrot.slane %v8672_v31, 1  ;;  %v2288_v38 = vadd.f32 %v2287_v14, %v2286_v21  ;;  %v1245_v31 = vpop.f32.mrf.mxu3 }
 0x1e6   : > { %11952 = vst [vmem:[#allocation82_spill] sm:$0xff] %v8744_v22  ;;  %v2289_v61 = vrot.slane %v8731_v20, 4  ;;  %v1902_v41 = vsub.f32 %v8603_v17, %v1520_v55  ;;  %v1658_v0 = vmax.f32 %v1656_v53, %v1657_v24  ;;  %v1524_v1 = vmax.f32 %v1522_v7, %v1523_v2 }
 0x1e7   : > { %v8759_v58 = vpop.eup %7517  ;;  %v1032_v59 = vmul.f32 %v888_v10, %v8608_v63  ;;  %v1033_v44 = vmul.f32 %v889_v37, %v8608_v63  ;;  %v2920_v51 = vrot.slane %v8677_v9, 1  ;;  %v1660_v5 = vmax.f32 %v8725_v4, %v1659_v16 }
 0x1e8   : > { %v1527_v28 = vrot.slane %v8749_v43, 4  ;;  %v8768_v21 = vmul.f32 %v8402_v12, %v8709_v47  ;;  %v2921_v17 = vrot.slane %v8683_v25, 1  ;;  %v2154_v53 = vadd.f32 %v2153_v60, %v2152_v6 }
 0x1e9   : > { %v1665_v2 = vrot.slane %v8754_v34, 4  ;;  %v8774_v14 = vadd.f32 %v8539_v45, %v8664_v54  ;;  %v8777_v37 = vadd.f32 %v2919_v40, %v8639_v18  ;;  %7519 = vrcp.f32 %v2288_v38 }
 0x1ea   : > { %v2290_v9 = vadd.f32 %v8731_v20, %v2289_v61  ;;  %v2157_v7 = vrot.slane %v8759_v58, 4  ;;  %v2027_v55 = vmul.f32 1.442695, %v1924_v62  ;;  %v1983_v24 = vmul.f32 1.442695, %v1902_v41  ;;  %v1190_v22 = vpop.f32.mrf.mxu2 }
 0x1eb   : > { %11953 = vst [vmem:[#allocation83_spill] sm:$0xff] %v8777_v37  ;;  %v1525_v10 = vrot.slane %v1524_v1, 1  ;;  %v1075_v16 = vpack.c.bf16 %v1033_v44, %v1032_v59  ;;  %v8782_v25 = vadd.f32 %v2920_v51, %v8650_v48  ;;  %v1925_v6 = vsub.f32 %v8625_v19, %v1658_v0 }
 0x1ec   : > { %v1661_v60 = vrot.slane %v1660_v5, 2  ;;  %v1528_v54 = vmax.f32 %v8749_v43, %v1527_v28  ;;  %v8787_v18 = vadd.f32 %v2921_v17, %v8654_v46  ;;  %v2155_v40 = vrot.slane %v2154_v53, 1 }
 0x1ed   : > { %11954 = vst [vmem:[#allocation84_spill] sm:$0xff] %v8782_v25  ;;  %v1666_v38 = vmax.f32 %v8754_v34, %v1665_v2  ;;  %v1533_v62 = vrot.slane %v8774_v14, 4  ;;  %v2923_v61 = vrot.slane %v8701_v27, 1  ;;  %v2291_v41 = vrot.slane %v2290_v9, 2 }
 0x1ee   : > { %11955 = vst [vmem:[#allocation85_spill] sm:$0xff] %v8787_v18  ;;  %v2158_v48 = vadd.f32 %v8759_v58, %v2157_v7  ;;  %7521 = vpow2.f32 %v2027_v55  ;;  %v8794_v19 = vadd.f32 %v8539_v45, %v1187_v33  ;;  %v1526_v0 = vmax.f32 %v1524_v1, %v1525_v10 }
 0x1ef   : > { %7523 = vpow2.f32 %v1983_v24  ;;  %v819_v46 = vrot.slane %v8599_v15, 4  ;;  %v820_v59 = vrot.slane %v8599_v15, 5  ;;  %v7520_v44 = vpop.eup %7519  ;;  %v2029_v51 = vmul.f32 1.442695, %v1925_v6 }
 0x1f0   : > { %1299 = vmatmul.bf16.gmra.mxu3 %v1075_v16  ;;  %v1662_v28 = vmax.f32 %v1660_v5, %v1661_v60  ;;  %v1529_v17 = vrot.slane %v1528_v54, 2  ;;  %v8799_v2 = vadd.f32 %v8610_v35, %v1245_v31  ;;  %v2156_v27 = vadd.f32 %v2155_v40, %v2154_v53  ;;  %v1247_v5 = vpop.f32.mrf.mxu3 }
 0x1f1   : > { %v1667_v16 = vrot.slane %v1666_v38, 2  ;;  %v1534_v7 = vmax.f32 %v8774_v14, %v1533_v62  ;;  %v8803_v33 = vadd.f32 %v2923_v61, %v8668_v39  ;;  %v2292_v55 = vadd.f32 %v2291_v41, %v2290_v9 }
 0x1f2   : > { %v2159_v1 = vrot.slane %v2158_v48, 2  ;;  %v8807_v24 = vadd.f32 %v8610_v35, %v8706_v56  ;;  %v1539_v10 = vrot.slane %v8794_v19, 4  ;;  %v1903_v6 = vsub.f32 %v8660_v26, %v1526_v0  ;;  %v1192_v36 = vpop.f32.mrf.mxu2 }
 0x1f3   : > { %11956 = vst [vmem:[#allocation86_spill] sm:$0xff] %v8803_v33  ;;  %v890_v31 = vperm.slane %v819_v46, 0  ;;  %v891_v60 = vperm.slane %v820_v59, 0  ;;  %v8813_v53 = vmul.f32 %v8404_v13, %v8614_v52  ;;  %v1663_v39 = vrot.slane %v1662_v28, 1 }
 0x1f4   : > { %v8815_v40 = vpop.eup %7521  ;;  %v1530_v9 = vmax.f32 %v1528_v54, %v1529_v17  ;;  %v1677_v62 = vrot.slane %v8799_v2, 4  ;;  %v8820_v56 = vmul.f32 %v8404_v13, %v8620_v29  ;;  %7525 = vpow2.f32 %v2029_v51 }
 0x1f5   : > { %11957 = vst [vmem:[#allocation87_spill] sm:$0xff] %v8813_v53  ;;  %v8822_v61 = vpop.eup %7523  ;;  %v1668_v26 = vmax.f32 %v1666_v38, %v1667_v16  ;;  %v1535_v41 = vrot.slane %v1534_v7, 2  ;;  %v8825_v0 = vadd.f32 %v8539_v45, %v1190_v22  ;;  %v8828_v46 = vmul.f32 %v7520_v44, %v8617_v49 }
 0x1f6   : > { %11958 = vst [vmem:[#allocation88_spill] sm:$0xff] %v8820_v56  ;;  %v2293_v59 = vrot.slane %v2292_v55, 1  ;;  %v1671_v54 = vrot.slane %v8807_v24, 4  ;;  %v1540_v17 = vmax.f32 %v8794_v19, %v1539_v10  ;;  %v2160_v11 = vadd.f32 %v2159_v1, %v2158_v48 }
 0x1f7   : > { %11959 = vst [vmem:[#allocation89_spill] sm:$0xff] %v8828_v46  ;;  %v2295_v29 = vrot.slane %v8815_v40, 4  ;;  %v1034_v52 = vmul.f32 %v890_v31, %v8608_v63  ;;  %v1035_v38 = vmul.f32 %v891_v60, %v8608_v63  ;;  %v1985_v51 = vmul.f32 1.442695, %v1903_v6 }
 0x1f8   : > { %v1664_v16 = vmax.f32 %v1662_v28, %v1663_v39  ;;  %v1531_v22 = vrot.slane %v1530_v9, 1  ;;  %v1678_v33 = vmax.f32 %v8799_v2, %v1677_v62  ;;  %v1669_v49 = vrot.slane %v1668_v26, 1 }
 0x1f9   : > { %v1536_v44 = vmax.f32 %v1534_v7, %v1535_v41  ;;  %v1545_v46 = vrot.slane %v8825_v0, 4  ;;  %v8838_v10 = vadd.f32 %v8539_v45, %v1192_v36  ;;  %7527 = vrcp.f32 %v2156_v27  ;;  %v1250_v36 = vpop.f32.mrf.mxu3  ;;  %v1342_v27 = vld [vmem:[%s8178_s29 + $0x38] sm:$0xff] }
 0x1fa   : > { %v2294_v48 = vadd.f32 %v2293_v59, %v2292_v55  ;;  %v1672_v1 = vmax.f32 %v8807_v24, %v1671_v54  ;;  %v1541_v31 = vrot.slane %v1540_v17, 2  ;;  %v8841_v18 = vpop.eup %7525  ;;  %v2161_v6 = vrot.slane %v2160_v11, 1  ;;  %1381 = vperm.xlu1 %7466, %v1342_v27  }
 0x1fb   : > { %v2296_v28 = vadd.f32 %v8815_v40, %v2295_v29  ;;  %v8845_v60 = vadd.f32 %v8610_v35, %v1247_v5  ;;  %v1076_v7 = vpack.c.bf16 %v1035_v38, %v1034_v52  ;;  %7529 = vpow2.f32 %v1985_v51 }
 0x1fc   : > { %v1926_v39 = vsub.f32 %v8725_v4, %v1664_v16  ;;  %v1532_v62 = vmax.f32 %v1530_v9, %v1531_v22  ;;  %v1679_v45 = vrot.slane %v1678_v33, 2  ;;  %v1670_v55 = vmax.f32 %v1668_v26, %v1669_v49 }
 0x1fd   : > { %v1537_v41 = vrot.slane %v1536_v44, 1  ;;  %v1546_v59 = vmax.f32 %v8825_v0, %v1545_v46  ;;  %v1551_v54 = vrot.slane %v8838_v10, 4  ;;  %v1673_v29 = vrot.slane %v1672_v1, 2 }
 0x1fe   : > { %v1542_v25 = vmax.f32 %v1540_v17, %v1541_v31  ;;  %v821_v5 = vrot.slane %v8599_v15, 6  ;;  %v822_v52 = vrot.slane %v8599_v15, 7  ;;  %7531 = vrcp.f32 %v2294_v48 }
 0x1ff   : > { %v2163_v4 = vrot.slane %v8822_v61, 4  ;;  %v1683_v9 = vrot.slane %v8845_v60, 4  ;;  %v8856_v26 = vadd.f32 %v8610_v35, %v1250_v36  ;;  %v8858_v38 = vpop.eup %7527  ;;  %v8860_v46 = vadd.f32 %v2161_v6, %v2160_v11 }
 0x200   : > { %1304 = vmatmul.bf16.gmra.mxu3 %v1076_v7  ;;  %v2031_v51 = vmul.f32 1.442695, %v1926_v39  ;;  %v1904_v16 = vsub.f32 %v8749_v43, %v1532_v62  ;;  %v1680_v17 = vmax.f32 %v1678_v33, %v1679_v45  ;;  %v1927_v22 = vsub.f32 %v8754_v34, %v1670_v55 }
 0x201   : > { %v1538_v49 = vmax.f32 %v1536_v44, %v1537_v41  ;;  %v1547_v15 = vrot.slane %v1546_v59, 2  ;;  %v1552_v48 = vmax.f32 %v8838_v10, %v1551_v54  ;;  %v8865_v31 = vpop.eup %7529  ;;  %v1674_v7 = vmax.f32 %v1672_v1, %v1673_v29 }
 0x202   : > { %v1543_v27 = vrot.slane %v1542_v25, 1  ;;  %v892_v36 = vperm.slane %v821_v5, 0  ;;  %v893_v37 = vperm.slane %v822_v52, 0  ;;  %v2297_v56 = vrot.slane %v2296_v28, 2 }
 0x203   : > { %v1684_v11 = vmax.f32 %v8845_v60, %v1683_v9  ;;  %v1689_v6 = vrot.slane %v8856_v26, 4  ;;  %v2925_v43 = vrot.slane %v8768_v21, 1  ;;  %v2301_v33 = vrot.slane %v8841_v18, 4 }
 0x204   : > { %7533 = vpow2.f32 %v2031_v51  ;;  %v1987_v34 = vmul.f32 1.442695, %v1904_v16  ;;  %v1681_v44 = vrot.slane %v1680_v17, 1  ;;  %v8871_v39 = vpop.eup %7531  ;;  %v2033_v62 = vmul.f32 1.442695, %v1927_v22 }
 0x205   : > { %v1905_v1 = vsub.f32 %v8774_v14, %v1538_v49  ;;  %v1548_v45 = vmax.f32 %v1546_v59, %v1547_v15  ;;  %v1553_v55 = vrot.slane %v1552_v48, 2  ;;  %v1675_v41 = vrot.slane %v1674_v7, 1  ;;  %v7108_v51 = vld [vmem:[#allocation7 + $0xe0] sm:$0xf]  ;;  %v7315_v16 = vld [vmem:[#allocation7 + $0xec] sm:$0xf0]  ;;  %v1252_v49 = vpop.f32.mrf.mxu3 }
 0x206   : > { %v1544_v54 = vmax.f32 %v1542_v25, %v1543_v27  ;;  %v1036_v29 = vmul.f32 %v892_v36, %v8608_v63  ;;  %v1037_v5 = vmul.f32 %v893_v37, %v8608_v63  ;;  %v2169_v21 = vrot.slane %v8865_v31, 4  ;;  %v1195_v25 = vpop.f32.mrf.mxu2  ;;  %v7313_v15 = vld [vmem:[#allocation7 + $0xe4] sm:$0xf]  ;;  %v7110_v27 = vld [vmem:[#allocation7 + $0xf0] sm:$0xf0] }
 0x207   : > { %v1685_v52 = vrot.slane %v1684_v11, 2  ;;  %v1690_v9 = vmax.f32 %v8856_v26, %v1689_v6  ;;  %v8879_v53 = vadd.f32 %v2925_v43, %v8738_v8  ;;  %v2298_v22 = vadd.f32 %v2297_v56, %v2296_v28  ;;  %v7116_v63 = vld [vmem:[#allocation7 + $0xe8] sm:$0xf]  ;;  %v7316_v6 = vld [vmem:[#allocation7 + $0xf4] sm:$0xf0] }
 0x208   : > { %v2164_v14 = vadd.f32 %v8822_v61, %v2163_v4  ;;  %7535 = vpow2.f32 %v1987_v34  ;;  %v1682_v59 = vmax.f32 %v1680_v17, %v1681_v44  ;;  %v1549_v37 = vrot.slane %v1548_v45, 1 }
 0x209   : > { %11960 = vst [vmem:[#allocation90_spill] sm:$0xff] %v8879_v53  ;;  %v1554_v36 = vmax.f32 %v1552_v48, %v1553_v55  ;;  %v7109_v47 = vor.u32 %v7315_v16, %v7108_v51  ;;  %v7113_v13 = vor.u32 %v7313_v15, %v7110_v27  ;;  %v1989_v32 = vmul.f32 1.442695, %v1905_v1  ;;  %v7092_v15 = vld [vmem:[#allocation7 + $0xc0] sm:$0xf] }
 0x20a   : > { %v8882_v50 = vpop.eup %7533  ;;  %v1676_v8 = vmax.f32 %v1674_v7, %v1675_v41  ;;  %v1906_v56 = vsub.f32 %v8794_v19, %v1544_v54  ;;  %v1077_v28 = vpack.c.bf16 %v1037_v5, %v1036_v29  ;;  %v1691_v4 = vrot.slane %v1690_v9, 2  ;;  %v7311_v27 = vld [vmem:[#allocation7 + $0xcc] sm:$0xf0] }
 0x20b   : > { %11961 = vst [vmem:[#allocation91_spill] sm:$0xff] %v8882_v50  ;;  %v8886_v17 = vadd.f32 %v8342_v23, %v1195_v25  ;;  %v8889_v43 = vadd.f32 %v8610_v35, %v1252_v49  ;;  %5910 = vmatpush.bf16.msrb.mxu0 %v7109_v47  ;;  %5943 = vmatpush.bf16.msrb.mxu1 %v7113_v13  ;;  %v2165_v34 = vrot.slane %v2164_v14, 2  ;;  %v2299_v7 = vrot.slane %v2298_v22, 1 }
 0x20c   : > { %v7117_v48 = vor.u32 %v7316_v6, %v7116_v63  ;;  %v2302_v44 = vadd.f32 %v8841_v18, %v2301_v33  ;;  %v1929_v55 = vsub.f32 %v8799_v2, %v1682_v59  ;;  %v1686_v1 = vmax.f32 %v1684_v11, %v1685_v52  ;;  %v7309_v63 = vld [vmem:[#allocation7 + $0xc4] sm:$0xf] }
 0x20d   : > { %7537 = vpow2.f32 %v2033_v62  ;;  %v1550_v19 = vmax.f32 %v1548_v45, %v1549_v37  ;;  %v1555_v41 = vrot.slane %v1554_v36, 1  ;;  %v8897_v35 = vmul.f32 %v8858_v38, %v8679_v3 }
 0x20e   : > { %5976 = vmatpush.bf16.msra.mxu2 %v7117_v48  ;;  %v8893_v54 = vpop.eup %7535  ;;  %v2170_v13 = vadd.f32 %v8865_v31, %v2169_v21  ;;  %7539 = vpow2.f32 %v1989_v32  ;;  %v1928_v47 = vsub.f32 %v8807_v24, %v1676_v8  ;;  %v1991_v33 = vmul.f32 1.442695, %v1906_v56  ;;  %v7094_v8 = vld [vmem:[#allocation7 + $0xd0] sm:$0xf0]  ;;  %v7100_v56 = vld [vmem:[#allocation7 + $0xc8] sm:$0xf] }
 0x20f   : > { %v1692_v2 = vmax.f32 %v1690_v9, %v1691_v4  ;;  %v1557_v11 = vrot.slane %v8886_v17, 4  ;;  %v1695_v62 = vrot.slane %v8889_v43, 4  ;;  %7541 = vrcp.f32 %v8860_v46 }
 0x210   : > { %1309 = vmatmul.bf16.gmra.mxu3 %v1077_v28  ;;  %v2303_v45 = vrot.slane %v2302_v44, 2  ;;  %v2037_v29 = vmul.f32 1.442695, %v1929_v55  ;;  %v1687_v5 = vrot.slane %v1686_v1, 1  ;;  %v2300_v52 = vadd.f32 %v2299_v7, %v2298_v22 }
 0x211   : > { %v8904_v51 = vadd.f32 %v2165_v34, %v2164_v14  ;;  %v1907_v3 = vsub.f32 %v8825_v0, %v1550_v19  ;;  %v1556_v38 = vmax.f32 %v1554_v36, %v1555_v41  ;;  %v2171_v32 = vrot.slane %v2170_v13, 2  ;;  %v7312_v34 = vld [vmem:[#allocation7 + $0xd4] sm:$0xf0] }
 0x212   : > { %v2307_v24 = vrot.slane %v8882_v50, 4  ;;  %v2175_v21 = vrot.slane %v8893_v54, 4  ;;  %v2035_v9 = vmul.f32 1.442695, %v1928_v47  ;;  %7543 = vpow2.f32 %v1991_v33  ;;  %v7076_v47 = vld [vmem:[#allocation7 + $0xa0] sm:$0xf] }
 0x213   : > { %v8909_v16 = vpop.eup %7537  ;;  %v1693_v59 = vrot.slane %v1692_v2, 1  ;;  %v1558_v46 = vmax.f32 %v8886_v17, %v1557_v11  ;;  %v1696_v25 = vmax.f32 %v8889_v43, %v1695_v62  ;;  %v8917_v0 = vmul.f32 %v8871_v39, %v8731_v20  ;;  %v7307_v33 = vld [vmem:[#allocation7 + $0xac] sm:$0xf0] }
 0x214   : > { %v8913_v22 = vpop.eup %7539  ;;  %v8919_v14 = vadd.f32 %v2303_v45, %v2302_v44  ;;  %7545 = vpow2.f32 %v2037_v29  ;;  %v1688_v49 = vmax.f32 %v1686_v1, %v1687_v5  ;;  %v1993_v37 = vmul.f32 1.442695, %v1907_v3  ;;  %v7305_v29 = vld [vmem:[#allocation7 + $0xa4] sm:$0xf] }
 0x215   : > { %11962 = vst [vmem:[#allocation92_spill] sm:$0xff] %v8917_v0  ;;  %7547 = vrcp.f32 %v2300_v52  ;;  %v1908_v36 = vsub.f32 %v8838_v10, %v1556_v38  ;;  %v7093_v6 = vor.u32 %v7311_v27, %v7092_v15  ;;  %v7542_v28 = vpop.eup %7541  ;;  %v8923_v4 = vadd.f32 %v8882_v50, %v2307_v24  ;;  %v7078_v24 = vld [vmem:[#allocation7 + $0xb0] sm:$0xf0]  ;;  %v7308_v15 = vld [vmem:[#allocation7 + $0xb4] sm:$0xf0] }
 0x216   : > { %v8926_v20 = vadd.f32 %v8893_v54, %v2175_v21  ;;  %v2313_v39 = vrot.slane %v8909_v16, 4  ;;  %v7097_v48 = vor.u32 %v7309_v63, %v7094_v8  ;;  %v1694_v44 = vmax.f32 %v1692_v2, %v1693_v59  ;;  %v7084_v21 = vld [vmem:[#allocation7 + $0xa8] sm:$0xf]  ;;  %v7303_v8 = vld [vmem:[#allocation7 + $0x8c] sm:$0xf0] }
 0x217   : > { %v1559_v55 = vrot.slane %v1558_v46, 2  ;;  %v1697_v1 = vrot.slane %v1696_v25, 2  ;;  %5911 = vmatpush.bf16.msrb.mxu0 %v7093_v6  ;;  %v7101_v7 = vor.u32 %v7312_v34, %v7100_v56  ;;  %v2167_v10 = vrot.slane %v8904_v51, 1  ;;  %v7060_v6 = vld [vmem:[#allocation7 + $0x80] sm:$0xf] }
 0x218   : > { %v2181_v19 = vrot.slane %v8913_v22, 4  ;;  %7549 = vpow2.f32 %v2035_v9  ;;  %v1930_v41 = vsub.f32 %v8845_v60, %v1688_v49  ;;  %5944 = vmatpush.bf16.msrb.mxu1 %v7097_v48  ;;  %v8932_v11 = vpop.eup %7543  ;;  %v2305_v62 = vrot.slane %v8919_v14, 1  ;;  %v1197_v48 = vpop.f32.mrf.mxu2 }
 0x219   : > { %v8935_v45 = vadd.f32 %v2171_v32, %v2170_v13  ;;  %7551 = vpow2.f32 %v1993_v37  ;;  %v1995_v2 = vmul.f32 1.442695, %v1908_v36  ;;  %5977 = vmatpush.bf16.msra.mxu2 %v7101_v7  ;;  %v2309_v52 = vrot.slane %v8923_v4, 2  ;;  %v7068_v7 = vld [vmem:[#allocation7 + $0x88] sm:$0xf] }
 0x21a   : > { %v8937_v5 = vpop.eup %7545  ;;  %v2177_v3 = vrot.slane %v8926_v20, 2  ;;  %v2314_v60 = vadd.f32 %v8909_v16, %v2313_v39  ;;  %v7077_v38 = vor.u32 %v7307_v33, %v7076_v47  ;;  %v1931_v13 = vsub.f32 %v8856_v26, %v1694_v44 }
 0x21b   : > { %v8942_v9 = vpop.eup %7547  ;;  %v1560_v32 = vmax.f32 %v1558_v46, %v1559_v55  ;;  %v1698_v59 = vmax.f32 %v1696_v25, %v1697_v1  ;;  %v7081_v49 = vor.u32 %v7305_v29, %v7078_v24  ;;  %v2168_v27 = vadd.f32 %v2167_v10, %v8904_v51  ;;  %v7301_v46 = vld [vmem:[#allocation7 + $0x84] sm:$0xf]  ;;  %v7062_v25 = vld [vmem:[#allocation7 + $0x90] sm:$0xf0]  ;;  %v7304_v10 = vld [vmem:[#allocation7 + $0x94] sm:$0xf0]  ;;  %v1255_v29 = vpop.f32.mrf.mxu3 }
 0x21c   : > { %v2182_v63 = vadd.f32 %v8913_v22, %v2181_v19  ;;  %v2039_v37 = vmul.f32 1.442695, %v1930_v41  ;;  %5912 = vmatpush.bf16.msrb.mxu0 %v7077_v38  ;;  %v7085_v36 = vor.u32 %v7308_v15, %v7084_v21  ;;  %v2187_v56 = vrot.slane %v8932_v11, 4 }
 0x21d   : > { %v2325_v39 = vrot.slane %v8937_v5, 4  ;;  %7553 = vpow2.f32 %v1995_v2  ;;  %5945 = vmatpush.bf16.msrb.mxu1 %v7081_v49  ;;  %v7061_v26 = vor.u32 %v7303_v8, %v7060_v6  ;;  %v8952_v51 = vmul.f32 %v7542_v28, %v8759_v58  ;;  %v8957_v2 = vpop.permute.xlu2 %1371 }
 0x21e   : > { %v8949_v34 = vpop.eup %7549  ;;  %v2173_v44 = vrot.slane %v8935_v45, 1  ;;  %v2315_v55 = vrot.slane %v2314_v60, 2  ;;  %5978 = vmatpush.bf16.msra.mxu2 %v7085_v36  ;;  %v7065_v1 = vor.u32 %v7301_v46, %v7062_v25  ;;  %v2041_v41 = vmul.f32 1.442695, %v1931_v13  ;;  %11966 = vst [vmem:[#allocation96_spill] sm:$0xff] %v8957_v2 }
 0x21f   : > { %11963 = vst [vmem:[#allocation93_spill] sm:$0xff] %v8949_v34  ;;  %v8955_v19 = vpop.eup %7551  ;;  %v1561_v47 = vrot.slane %v1560_v32, 1  ;;  %v1699_v33 = vrot.slane %v1698_v59, 1  ;;  %v7069_v38 = vor.u32 %v7304_v10, %v7068_v7  ;;  %v8960_v24 = vadd.f32 %v2309_v52, %v8923_v4  ;;  %v8975_v52 = vpop.f32.mrf.mxu0  ;;  %v7297_v10 = vld [vmem:[#allocation7 + $0x64] sm:$0xf] }
 0x220   : > { %11964 = vst [vmem:[#allocation94_spill] sm:$0xff] %v8952_v51  ;;  %v2178_v58 = vadd.f32 %v2177_v3, %v8926_v20  ;;  %v2183_v28 = vrot.slane %v2182_v63, 2  ;;  %v8964_v21 = vadd.f32 %v8342_v23, %v1197_v48  ;;  %5913 = vmatpush.bf16.msrb.mxu0 %v7061_v26  ;;  %v2319_v49 = vrot.slane %v8949_v34, 4  ;;  %v7012_v51 = vld [vmem:[#allocation7 + $0x20] sm:$0xf] }
 0x221   : > { %11965 = vst [vmem:[#allocation95_spill] sm:$0xff] %v8955_v19  ;;  %v2188_v13 = vadd.f32 %v8932_v11, %v2187_v56  ;;  %v2326_v15 = vadd.f32 %v8937_v5, %v2325_v39  ;;  %7555 = vpow2.f32 %v2039_v37  ;;  %5946 = vmatpush.bf16.msrb.mxu1 %v7065_v1  ;;  %v8969_v36 = vadd.f32 %v2315_v55, %v2314_v60  ;;  %v7044_v55 = vld [vmem:[#allocation7 + $0x60] sm:$0xf]  ;;  %v7299_v1 = vld [vmem:[#allocation7 + $0x6c] sm:$0xf0] }
 0x222   : > { %7557 = vrcp.f32 %v2168_v27  ;;  %v2193_v4 = vrot.slane %v8955_v19, 4  ;;  %v8973_v20 = vadd.f32 %v8957_v2, %v1255_v29  ;;  %5979 = vmatpush.bf16.msra.mxu2 %v7069_v38  ;;  %11967 = vst [vmem:[#allocation97_spill] sm:$0xff] %v8975_v52  ;;  %v2306_v6 = vadd.f32 %v2305_v62, %v8919_v14 }
 0x223   : > { %v8977_v3 = vpop.eup %7553  ;;  %7559 = vpow2.f32 %v2041_v41  ;;  %v1562_v37 = vmax.f32 %v1560_v32, %v1561_v47  ;;  %v1700_v8 = vmax.f32 %v1698_v59, %v1699_v33  ;;  %v2174_v60 = vadd.f32 %v2173_v44, %v8935_v45  ;;  %v7046_v41 = vld [vmem:[#allocation7 + $0x70] sm:$0xf0]  ;;  %v7052_v47 = vld [vmem:[#allocation7 + $0x68] sm:$0xf] }
 0x224   : > { %v2311_v27 = vrot.slane %v8960_v24, 1  ;;  %v2179_v56 = vrot.slane %v2178_v58, 1  ;;  %v1563_v39 = vrot.slane %v8964_v21, 4  ;;  %v2184_v48 = vadd.f32 %v2183_v28, %v2182_v63 }
 0x225   : > { %v2320_v26 = vadd.f32 %v8949_v34, %v2319_v49  ;;  %v2189_v46 = vrot.slane %v2188_v13, 2  ;;  %v2327_v25 = vrot.slane %v2326_v15, 2  ;;  %v2317_v7 = vrot.slane %v8969_v36, 1  ;;  %v7300_v49 = vld [vmem:[#allocation7 + $0x74] sm:$0xf0] }
 0x226   : > { %v8988_v14 = vadd.f32 %v8955_v19, %v2193_v4  ;;  %v2199_v62 = vrot.slane %v8977_v3, 4  ;;  %v1701_v45 = vrot.slane %v8973_v20, 4  ;;  %v8996_v59 = vmul.f32 %v8942_v9, %v8815_v40  ;;  %v7028_v4 = vld [vmem:[#allocation7 + $0x40] sm:$0xf]  ;;  %v7295_v34 = vld [vmem:[#allocation7 + $0x4c] sm:$0xf0] }
 0x227   : > { %v8992_v32 = vpop.eup %7555  ;;  %7561 = vrcp.f32 %v2306_v6  ;;  %v1909_v63 = vsub.f32 %v8886_v17, %v1562_v37  ;;  %v1932_v44 = vsub.f32 %v8889_v43, %v1700_v8  ;;  %v2180_v29 = vadd.f32 %v2179_v56, %v2178_v58  ;;  %v7293_v37 = vld [vmem:[#allocation7 + $0x44] sm:$0xf]  ;;  %v7030_v8 = vld [vmem:[#allocation7 + $0x50] sm:$0xf0] }
 0x228   : > { %11968 = vst [vmem:[#allocation98_spill] sm:$0xff] %v8992_v32  ;;  %v9000_v33 = vpop.eup %7557  ;;  %7563 = vrcp.f32 %v2174_v60  ;;  %v1564_v38 = vmax.f32 %v8964_v21, %v1563_v39  ;;  %v7045_v28 = vor.u32 %v7299_v1, %v7044_v55  ;;  %v2185_v9 = vrot.slane %v2184_v48, 1  ;;  %v9012_v39 = vpop.f32.mrf.mxu1  ;;  %v7036_v55 = vld [vmem:[#allocation7 + $0x48] sm:$0xf]  ;;  %v7296_v1 = vld [vmem:[#allocation7 + $0x54] sm:$0xf0] }
 0x229   : > { %11969 = vst [vmem:[#allocation99_spill] sm:$0xff] %v8996_v59  ;;  %v9003_v40 = vpop.eup %7559  ;;  %v2321_v6 = vrot.slane %v2320_v26, 2  ;;  %v9005_v17 = vadd.f32 %v2189_v46, %v2188_v13  ;;  %v9007_v43 = vadd.f32 %v2327_v25, %v2326_v15  ;;  %v2195_v50 = vrot.slane %v8988_v14, 2  ;;  %v690_v59 = vpop.f32.mrf.mxu0 }
 0x22a   : > { %11970 = vst [vmem:[#allocation100_spill] sm:$0xff] %v9003_v40  ;;  %v2331_v58 = vrot.slane %v8992_v32, 4  ;;  %v2200_v60 = vadd.f32 %v8977_v3, %v2199_v62  ;;  %5914 = vmatpush.bf16.msrb.mxu0 %v7045_v28  ;;  %v7049_v56 = vor.u32 %v7297_v10, %v7046_v41  ;;  %v1997_v0 = vmul.f32 1.442695, %v1909_v63  ;;  %v7291_v63 = vld [vmem:[#allocation7 + $0x2c] sm:$0xf0] }
 0x22b   : > { %v2043_v13 = vmul.f32 1.442695, %v1932_v44  ;;  %v7053_v46 = vor.u32 %v7300_v49, %v7052_v47  ;;  %v7029_v15 = vor.u32 %v7295_v34, %v7028_v4  ;;  %v2337_v25 = vrot.slane %v9003_v40, 4  ;;  %v7289_v44 = vld [vmem:[#allocation7 + $0x24] sm:$0xf] }
 0x22c   : > { %v1565_v53 = vrot.slane %v1564_v38, 2  ;;  %v1702_v52 = vmax.f32 %v8973_v20, %v1701_v45  ;;  %5947 = vmatpush.bf16.msrb.mxu1 %v7049_v56  ;;  %v7033_v19 = vor.u32 %v7293_v37, %v7030_v8  ;;  %v2312_v10 = vadd.f32 %v2311_v27, %v8960_v24  ;;  %v7014_v34 = vld [vmem:[#allocation7 + $0x30] sm:$0xf0]  ;;  %v1200_v37 = vpop.f32.mrf.mxu2  ;;  %v7020_v8 = vld [vmem:[#allocation7 + $0x28] sm:$0xf] }
 0x22d   : > { %v9016_v62 = vpop.eup %7561  ;;  %7565 = vrcp.f32 %v2180_v29  ;;  %v2318_v41 = vadd.f32 %v2317_v7, %v8969_v36  ;;  %5980 = vmatpush.bf16.msra.mxu2 %v7053_v46  ;;  %v7037_v59 = vor.u32 %v7296_v1, %v7036_v55  ;;  %v2186_v28 = vadd.f32 %v2185_v9, %v2184_v48  ;;  %v7292_v56 = vld [vmem:[#allocation7 + $0x34] sm:$0xf0]  ;;  %v1257_v7 = vpop.f32.mrf.mxu3  ;;  %v6996_v9 = vld [vmem:[#allocation7] sm:$0xf] }
 0x22e   : > { %v9020_v47 = vpop.eup %7563  ;;  %v2322_v49 = vadd.f32 %v2321_v6, %v2320_v26  ;;  %v2191_v45 = vrot.slane %v9005_v17, 1  ;;  %v2201_v4 = vrot.slane %v2200_v60, 2  ;;  %5915 = vmatpush.bf16.msrb.mxu0 %v7029_v15  ;;  %v2329_v24 = vrot.slane %v9007_v43, 1  ;;  %v7287_v6 = vld [vmem:[#allocation7 + $0xc] sm:$0xf0] }
 0x22f   : > { %v2196_v36 = vadd.f32 %v2195_v50, %v8988_v14  ;;  %v2332_v27 = vadd.f32 %v8992_v32, %v2331_v58  ;;  %7567 = vpow2.f32 %v1997_v0  ;;  %v2338_v29 = vadd.f32 %v9003_v40, %v2337_v25  ;;  %v7285_v50 = vld [vmem:[#allocation7 + $0x4] sm:$0xf]  ;;  %v7004_v25 = vld [vmem:[#allocation7 + $0x8] sm:$0xf]  ;;  %v12005_v40 = vld [vmem:[#allocation22_spill] sm:$0xff] }
 0x230   : > { %v1703_v55 = vrot.slane %v1702_v52, 2  ;;  %5948 = vmatpush.bf16.msrb.mxu1 %v7033_v19  ;;  %v7013_v48 = vor.u32 %v7291_v63, %v7012_v51  ;;  %v7017_v26 = vor.u32 %v7289_v44, %v7014_v34  ;;  %7569 = vpow2.f32 %v2043_v13  ;;  %v723_v58 = vpop.f32.mrf.mxu1  ;;  %v6998_v51 = vld [vmem:[#allocation7 + $0x10] sm:$0xf0]  ;;  %v7288_v44 = vld [vmem:[#allocation7 + $0x14] sm:$0xf0] }
 0x231   : > { %v1566_v1 = vmax.f32 %v1564_v38, %v1565_v53  ;;  %v9028_v46 = vadd.f32 %v8342_v23, %v1200_v37  ;;  %5981 = vmatpush.bf16.msra.mxu2 %v7037_v59  ;;  %v7021_v15 = vor.u32 %v7292_v56, %v7020_v8  ;;  %7571 = vrcp.f32 %v2318_v41 }
 0x232   : > { %v2202_v14 = vadd.f32 %v2201_v4, %v2200_v60  ;;  %v9031_v0 = vadd.f32 %v8957_v2, %v1257_v7  ;;  %5916 = vmatpush.bf16.msrb.mxu0 %v7013_v48  ;;  %v6997_v19 = vor.u32 %v7287_v6, %v6996_v9  ;;  %7573 = vrcp.f32 %v2186_v28 }
 0x233   : > { %11971 = vst [vmem:[#allocation101_spill] sm:$0xff] %v9028_v46  ;;  %v7566_v63 = vpop.eup %7565  ;;  %v2192_v53 = vadd.f32 %v2191_v45, %v9005_v17  ;;  %v2197_v38 = vrot.slane %v2196_v36, 1  ;;  %v2333_v13 = vrot.slane %v2332_v27, 2  ;;  %v2323_v59 = vrot.slane %v2322_v49, 1 }
 0x234   : > { %11972 = vst [vmem:[#allocation102_spill] sm:$0xff] %v9031_v0  ;;  %v2339_v34 = vrot.slane %v2338_v29, 2  ;;  %v1704_v37 = vmax.f32 %v1702_v52, %v1703_v55  ;;  %5949 = vmatpush.bf16.msrb.mxu1 %v7017_v26  ;;  %v7001_v60 = vor.u32 %v7285_v50, %v6998_v51  ;;  %v2330_v4 = vadd.f32 %v2329_v24, %v9007_v43 }
 0x235   : > { %v9034_v41 = vpop.eup %7567  ;;  %v1567_v8 = vrot.slane %v1566_v1, 1  ;;  %v1569_v56 = vrot.slane %v9028_v46, 4  ;;  %5982 = vmatpush.bf16.msra.mxu2 %v7021_v15  ;;  %v7005_v7 = vor.u32 %v7288_v44, %v7004_v25  ;;  %v9040_v17 = vmul.f32 %v9000_v33, %v8822_v61 }
 0x236   : > { %11973 = vst [vmem:[#allocation103_spill] sm:$0xff] %v9034_v41  ;;  %7575 = vrcp.f32 %v2312_v10  ;;  %v2203_v28 = vrot.slane %v2202_v14, 1  ;;  %v1707_v45 = vrot.slane %v9031_v0, 4  ;;  %5917 = vmatpush.bf16.msrb.mxu0 %v6997_v19  ;;  %v9043_v52 = vpop.eup %7569  ;;  %v9047_v55 = vmul.f32 %v9016_v62, %v8841_v18 }
 0x237   : > { %11974 = vst [vmem:[#allocation104_spill] sm:$0xff] %v9043_v52  ;;  %7577 = vrcp.f32 %v2192_v53  ;;  %v2198_v43 = vadd.f32 %v2197_v38, %v2196_v36  ;;  %v2334_v24 = vadd.f32 %v2333_v13, %v2332_v27  ;;  %v7572_v48 = vpop.eup %7571  ;;  %v9051_v26 = vmul.f32 %v9020_v47, %v8865_v31 }
 0x238   : > { %11975 = vst [vmem:[#allocation105_spill] sm:$0xff] %v9047_v55  ;;  %v2324_v61 = vadd.f32 %v2323_v59, %v2322_v49  ;;  %v2340_v33 = vadd.f32 %v2339_v34, %v2338_v29  ;;  %v1705_v10 = vrot.slane %v1704_v37, 1  ;;  %5950 = vmatpush.bf16.msrb.mxu1 %v7001_v60  ;;  %v7574_v9 = vpop.eup %7573  ;;  %7579 = vrcp.f32 %v2330_v4  ;;  %v1202_v4 = vpop.f32.mrf.mxu2 }
 0x239   : > { %v2205_v6 = vrot.slane %v9034_v41, 4  ;;  %v1568_v15 = vmax.f32 %v1566_v1, %v1567_v8  ;;  %v1570_v18 = vmax.f32 %v9028_v46, %v1569_v56  ;;  %5983 = vmatpush.bf16.msra.mxu2 %v7005_v7  ;;  %v2204_v62 = vadd.f32 %v2203_v28, %v2202_v14 }
 0x23a   : > { %v2343_v36 = vrot.slane %v9043_v52, 4  ;;  %v1708_v27 = vmax.f32 %v9031_v0, %v1707_v45  ;;  %v2778_v31 = vmul.f32 %v8402_v12, %v8721_v57  ;;  %v9060_v47 = vmul.f32 %v7566_v63, %v8893_v54  ;;  %v12014_v0 = vld [vmem:[#allocation86_spill] sm:$0xff] }
 0x23b   : > { %7581 = vrcp.f32 %v2198_v43  ;;  %v2335_v49 = vrot.slane %v2334_v24, 1  ;;  %v2780_v29 = vmul.f32 %v8402_v12, %v8741_v42  ;;  %v9067_v50 = vmul.f32 %v7572_v48, %v8909_v16 }
 0x23c   : > { %11976 = vst [vmem:[#allocation106_spill] sm:$0xff] %v9060_v47  ;;  %v9064_v1 = vpop.eup %7575  ;;  %7583 = vrcp.f32 %v2324_v61  ;;  %v2341_v14 = vrot.slane %v2340_v33, 1  ;;  %v1706_v58 = vmax.f32 %v1704_v37, %v1705_v10  ;;  %v9070_v51 = vmul.f32 %v7574_v9, %v8913_v22  ;;  %v11984_v10 = vld [vmem:[#allocation94_spill] sm:$0xff]  ;;  %v11985_v9 = vld [vmem:[#allocation35_spill] sm:$0xff] }
 0x23d   : > { %11977 = vst [vmem:[#allocation107_spill] sm:$0xff] %v9064_v1  ;;  %v7578_v19 = vpop.eup %7577  ;;  %v2206_v54 = vadd.f32 %v9034_v41, %v2205_v6  ;;  %v1910_v25 = vsub.f32 %v8964_v21, %v1568_v15  ;;  %v1571_v63 = vrot.slane %v1570_v18, 2  ;;  %7585 = vrcp.f32 %v2204_v62 }
 0x23e   : > { %11978 = vst [vmem:[#allocation108_spill] sm:$0xff] %v9067_v50  ;;  %v2344_v53 = vadd.f32 %v9043_v52, %v2343_v36  ;;  %v1709_v38 = vrot.slane %v1708_v27, 2  ;;  %v2922_v13 = vrot.slane %v2778_v31, 1  ;;  %v7580_v44 = vpop.eup %7579  ;;  %v2336_v16 = vadd.f32 %v2335_v49, %v2334_v24  ;;  %v12002_v52 = vld [vmem:[#allocation21_spill] sm:$0xff] }
 0x23f   : > { %11979 = vst [vmem:[#allocation109_spill] sm:$0xff] %v9070_v51  ;;  %v2697_v59 = vmul.f32 %v8397_v30, %v8721_v57  ;;  %v2699_v34 = vmul.f32 %v8397_v30, %v8741_v42  ;;  %v2924_v22 = vrot.slane %v2780_v29, 1  ;;  %v9080_v37 = vmul.f32 %v7578_v19, %v8932_v11  ;;  %v11991_v19 = vld [vmem:[#allocation36_spill] sm:$0xff] }
 0x240   : > { %v2342_v60 = vadd.f32 %v2341_v14, %v2340_v33  ;;  %v1933_v21 = vsub.f32 %v8973_v20, %v1706_v58  ;;  %v9085_v8 = vmul.f32 %v8402_v12, %v8897_v35  ;;  %v2207_v7 = vrot.slane %v2206_v54, 2  ;;  %v1260_v33 = vpop.f32.mrf.mxu3 }
 0x241   : > { %11980 = vst [vmem:[#allocation110_spill] sm:$0xff] %v9080_v37  ;;  %v7582_v56 = vpop.eup %7581  ;;  %v1999_v28 = vmul.f32 1.442695, %v1910_v25  ;;  %v1572_v45 = vmax.f32 %v1570_v18, %v1571_v63  ;;  %v2701_v43 = vmul.f32 %v8397_v30, %v8897_v35  ;;  %v9092_v11 = vmul.f32 %v7580_v44, %v8937_v5  ;;  %v11986_v18 = vld [vmem:[#allocation95_spill] sm:$0xff]  ;;  %v11993_v44 = vld [vmem:[#allocation29_spill] sm:$0xff] }
 0x242   : > { %v9089_v24 = vpop.eup %7583  ;;  %v2345_v48 = vrot.slane %v2344_v53, 2  ;;  %v1710_v61 = vmax.f32 %v1708_v27, %v1709_v38  ;;  %v9094_v20 = vadd.f32 %v2922_v13, %v2697_v59  ;;  %7587 = vrcp.f32 %v2336_v16  ;;  %v11992_v13 = vld [vmem:[#allocation70_spill] sm:$0xff] }
 0x243   : > { %11981 = vst [vmem:[#allocation111_spill] sm:$0xff] %v9089_v24  ;;  %v9097_v12 = vadd.f32 %v8342_v23, %v1202_v4  ;;  %v2702_v6 = vmul.f32 %v11985_v9, %v11984_v10  ;;  %v9101_v15 = vadd.f32 %v2924_v22, %v2699_v34  ;;  %v7586_v30 = vpop.eup %7585  ;;  %v9104_v62 = vmul.f32 %v7582_v56, %v11986_v18  ;;  %v12003_v24 = vld [vmem:[#allocation97_spill] sm:$0xff] }
 0x244   : > { %11982 = vst [vmem:[#allocation112_spill] sm:$0xff] %v9092_v11  ;;  %7589 = vrcp.f32 %v2342_v60  ;;  %v2045_v5 = vmul.f32 1.442695, %v1933_v21  ;;  %v2926_v36 = vrot.slane %v9085_v8, 1  ;;  %v9107_v27 = vadd.f32 %v2207_v7, %v2206_v54  ;;  %v11996_v8 = vld [vmem:[#allocation77_spill] sm:$0xff] }
 0x245   : > { %11983 = vst [vmem:[#allocation113_spill] sm:$0xff] %v9097_v12  ;;  %7591 = vpow2.f32 %v1999_v28  ;;  %v1573_v31 = vrot.slane %v1572_v45, 1  ;;  %v2703_v49 = vmul.f32 %v11985_v9, %v9040_v17  ;;  %v9111_v29 = vadd.f32 %v2345_v48, %v2344_v53 }
 0x246   : > { %11987 = vst [vmem:[#allocation94_spill] sm:$0xff] %v9104_v62  ;;  %v1711_v14 = vrot.slane %v1710_v61, 1  ;;  %v9114_v58 = vadd.f32 %v8957_v2, %v1260_v33  ;;  %v2783_v25 = vmul.f32 %v11991_v19, %v11984_v10  ;;  %v9119_v63 = vmul.f32 %v7586_v30, %v8977_v3  ;;  %v11994_v3 = vld [vmem:[#allocation71_spill] sm:$0xff] }
 0x247   : > { %11988 = vst [vmem:[#allocation35_spill] sm:$0xff] %v9107_v27  ;;  %v1575_v54 = vrot.slane %v9097_v12, 4  ;;  %v2784_v38 = vmul.f32 %v11991_v19, %v9040_v17  ;;  %v9126_v16 = vmul.f32 %v11993_v44, %v11992_v13  ;;  %v2785_v53 = vmul.f32 %v11991_v19, %v9051_v26 }
 0x248   : > { %11989 = vst [vmem:[#allocation95_spill] sm:$0xff] %v9111_v29  ;;  %v2786_v59 = vmul.f32 %v11991_v19, %v9060_v47  ;;  %v2787_v34 = vmul.f32 %v11991_v19, %v9070_v51  ;;  %v3148_v22 = vmul.f32 %v11993_v44, %v11994_v3  ;;  %v9136_v60 = vpop.eup %7587  ;;  %7593 = vpow2.f32 %v2045_v5 }
 0x249   : > { %11990 = vst [vmem:[#allocation114_spill] sm:$0xff] %v9114_v58  ;;  %v2788_v21 = vmul.f32 %v11991_v19, %v9080_v37  ;;  %v2789_v4 = vmul.f32 %v11991_v19, %v9104_v62  ;;  %v3150_v56 = vmul.f32 %v11993_v44, %v11996_v8  ;;  %v9147_v48 = vmax.f32 %v1572_v45, %v1573_v31 }
 0x24a   : > { %11995 = vst [vmem:[#allocation36_spill] sm:$0xff] %v9136_v60  ;;  %v9144_v7 = vpop.eup %7589  ;;  %v9149_v33 = vmax.f32 %v1710_v61, %v1711_v14  ;;  %v2927_v30 = vrot.slane %v2783_v25, 1  ;;  %v9154_v5 = vmax.f32 %v9097_v12, %v1575_v54  ;;  %v2704_v1 = vmul.f32 %v11985_v9, %v9051_v26 }
 0x24b   : > { %11997 = vst [vmem:[#allocation70_spill] sm:$0xff] %v9144_v7  ;;  %v9151_v18 = vpop.eup %7591  ;;  %v2790_v11 = vmul.f32 %v11991_v19, %v9119_v63  ;;  %v2928_v50 = vrot.slane %v2784_v38, 1  ;;  %v2929_v28 = vrot.slane %v2785_v53, 1  ;;  %v2930_v45 = vrot.slane %v2786_v59, 1 }
 0x24c   : > { %11998 = vst [vmem:[#allocation29_spill] sm:$0xff] %v9147_v48  ;;  %v2931_v31 = vrot.slane %v2787_v34, 1  ;;  %v2705_v61 = vmul.f32 %v11985_v9, %v9060_v47  ;;  %v2706_v14 = vmul.f32 %v11985_v9, %v9070_v51  ;;  %v2932_v25 = vrot.slane %v2788_v21, 1 }
 0x24d   : > { %11999 = vst [vmem:[#allocation71_spill] sm:$0xff] %v9149_v33  ;;  %v2933_v54 = vrot.slane %v2789_v4, 1  ;;  %v9167_v7 = vadd.f32 %v12003_v24, %v12002_v52  ;;  %v9171_v55 = vadd.f32 %v9012_v39, %v12005_v40  ;;  %v2707_v19 = vmul.f32 %v11985_v9, %v9080_v37 }
 0x24e   : > { %12000 = vst [vmem:[#allocation77_spill] sm:$0xff] %v9151_v18  ;;  %v2708_v38 = vmul.f32 %v11985_v9, %v9104_v62  ;;  %v9177_v53 = vpop.eup %7593  ;;  %v2709_v59 = vmul.f32 %v11985_v9, %v9119_v63  ;;  %v2934_v34 = vrot.slane %v2790_v11, 1  ;;  %v3070_v21 = vadd.f32 %v2926_v36, %v2701_v43  ;;  %v12008_v9 = vld [vmem:[#allocation37_spill] sm:$0xff]  ;;  %v12009_v36 = vld [vmem:[#allocation87_spill] sm:$0xff] }
 0x24f   : > { %12001 = vst [vmem:[#allocation115_spill] sm:$0xff] %v9154_v5  ;;  %v3071_v4 = vadd.f32 %v2927_v30, %v2702_v6  ;;  %v3072_v52 = vadd.f32 %v2928_v50, %v2703_v49  ;;  %v3073_v24 = vadd.f32 %v2929_v28, %v2704_v1  ;;  %v3074_v41 = vadd.f32 %v2930_v45, %v2705_v61  ;;  %v12010_v28 = vld [vmem:[#allocation88_spill] sm:$0xff] }
 0x250   : > { %12004 = vst [vmem:[#allocation21_spill] sm:$0xff] %v9167_v7  ;;  %v3075_v60 = vadd.f32 %v2931_v31, %v2706_v14  ;;  %v3076_v40 = vadd.f32 %v2932_v25, %v2707_v19  ;;  %v3077_v39 = vadd.f32 %v2933_v54, %v2708_v38  ;;  %v3147_v32 = vmul.f32 %v11993_v44, %v8721_v57  ;;  %v12011_v54 = vld [vmem:[#allocation83_spill] sm:$0xff]  ;;  %v12012_v38 = vld [vmem:[#allocation84_spill] sm:$0xff] }
 0x251   : > { %12006 = vst [vmem:[#allocation97_spill] sm:$0xff] %v9171_v55  ;;  %v3149_v12 = vmul.f32 %v11993_v44, %v8741_v42  ;;  %v3151_v27 = vmul.f32 %v11993_v44, %v8897_v35  ;;  %v3152_v11 = vmul.f32 %v12008_v9, %v11984_v10  ;;  %v3153_v50 = vmul.f32 %v12008_v9, %v9040_v17  ;;  %v12015_v55 = vld [vmem:[#allocation90_spill] sm:$0xff] }
 0x252   : > { %12007 = vst [vmem:[#allocation22_spill] sm:$0xff] %v9177_v53  ;;  %v3154_v1 = vmul.f32 %v12008_v9, %v9051_v26  ;;  %v3155_v43 = vmul.f32 %v12008_v9, %v9060_v47  ;;  %v3156_v6 = vmul.f32 %v12008_v9, %v9070_v51  ;;  %v3288_v49 = vrot.slane %v12009_v36, 2 }
 0x253   : > { %v3289_v30 = vrot.slane %v12010_v28, 2  ;;  %v3157_v44 = vmul.f32 %v12008_v9, %v9080_v37  ;;  %v3158_v45 = vmul.f32 %v12008_v9, %v9104_v62  ;;  %v3290_v31 = vrot.slane %v9126_v16, 2  ;;  %v12013_v28 = vld [vmem:[#allocation85_spill] sm:$0xff] }
 0x254   : > { %v3292_v61 = vrot.slane %v3148_v22, 2  ;;  %v3159_v14 = vmul.f32 %v12008_v9, %v9119_v63  ;;  %v3294_v25 = vrot.slane %v3150_v56, 2  ;;  %v3432_v19 = vadd.f32 %v3288_v49, %v12011_v54 }
 0x255   : > { %v3433_v53 = vadd.f32 %v3289_v30, %v12012_v38  ;;  %v3078_v36 = vadd.f32 %v2934_v34, %v2709_v59  ;;  %v3291_v2 = vrot.slane %v3147_v32, 2  ;;  %v3434_v18 = vadd.f32 %v3290_v31, %v12013_v28  ;;  %v12016_v31 = vld [vmem:[#allocation68_spill] sm:$0xff] }
 0x256   : > { %v3436_v33 = vadd.f32 %v3292_v61, %v12014_v0  ;;  %v3293_v23 = vrot.slane %v3149_v12, 2  ;;  %v3295_v29 = vrot.slane %v3151_v27, 2  ;;  %v3296_v5 = vrot.slane %v3152_v11, 2  ;;  %v12017_v0 = vld [vmem:[#allocation30_spill] sm:$0xff]  ;;  %v12018_v61 = vld [vmem:[#allocation69_spill] sm:$0xff] }
 0x257   : > { %v3438_v16 = vadd.f32 %v3294_v25, %v12015_v55  ;;  %v3297_v22 = vrot.slane %v3153_v50, 2  ;;  %v3298_v46 = vrot.slane %v3154_v1, 2  ;;  %v3299_v48 = vrot.slane %v3155_v43, 2 }
 0x258   : > { %v3300_v9 = vrot.slane %v3156_v6, 2  ;;  %v3301_v56 = vrot.slane %v3157_v44, 2  ;;  %v3302_v58 = vrot.slane %v3158_v45, 2  ;;  %v3303_v49 = vrot.slane %v3159_v14, 2 }
 0x259   : > { %v3435_v30 = vadd.f32 %v3291_v2, %v9094_v20  ;;  %v3437_v32 = vadd.f32 %v3293_v23, %v9101_v15  ;;  %v3439_v59 = vadd.f32 %v3295_v29, %v3070_v21  ;;  %v3440_v34 = vadd.f32 %v3296_v5, %v3071_v4 }
 0x25a   : > { %v3513_v12 = vmul.f32 %v12017_v0, %v12016_v31  ;;  %v3441_v27 = vadd.f32 %v3297_v22, %v3072_v52  ;;  %v3442_v11 = vadd.f32 %v3298_v46, %v3073_v24  ;;  %v3514_v55 = vmul.f32 %v12017_v0, %v12018_v61 }
 0x25b   : > { %v3515_v50 = vmul.f32 %v12017_v0, %v11992_v13  ;;  %v3443_v1 = vadd.f32 %v3299_v48, %v3074_v41  ;;  %v3444_v43 = vadd.f32 %v3300_v9, %v3075_v60  ;;  %v3445_v6 = vadd.f32 %v3301_v56, %v3076_v40  ;;  %v12019_v41 = vld [vmem:[#allocation38_spill] sm:$0xff] }
 0x25c   : > { %v3517_v2 = vmul.f32 %v12017_v0, %v11994_v3  ;;  %v3446_v23 = vadd.f32 %v3302_v58, %v3077_v39  ;;  %v3516_v20 = vmul.f32 %v12017_v0, %v8721_v57  ;;  %v3518_v15 = vmul.f32 %v12017_v0, %v8741_v42 }
 0x25d   : > { %v3519_v46 = vmul.f32 %v12017_v0, %v11996_v8  ;;  %v3447_v29 = vadd.f32 %v3303_v49, %v3078_v36  ;;  %v3520_v5 = vmul.f32 %v12017_v0, %v8897_v35  ;;  %v3521_v60 = vmul.f32 %v12019_v41, %v11984_v10 }
 0x25e   : > { %v3522_v48 = vmul.f32 %v12019_v41, %v9040_v17  ;;  %v3523_v58 = vmul.f32 %v12019_v41, %v9051_v26  ;;  %v3524_v21 = vmul.f32 %v12019_v41, %v9060_v47  ;;  %v3525_v4 = vmul.f32 %v12019_v41, %v9070_v51 }
 0x25f   : > { %v3526_v52 = vmul.f32 %v12019_v41, %v9080_v37  ;;  %v3527_v24 = vmul.f32 %v12019_v41, %v9104_v62  ;;  %v3528_v40 = vmul.f32 %v12019_v41, %v9119_v63  ;;  %v3657_v39 = vrot.slane %v3513_v12, 3 }
 0x260   : > { %v3658_v44 = vrot.slane %v3514_v55, 3  ;;  %v3659_v45 = vrot.slane %v3515_v50, 3  ;;  %v3660_v14 = vrot.slane %v3516_v20, 3  ;;  %v3661_v25 = vrot.slane %v3517_v2, 3 }
 0x261   : > { %v3662_v54 = vrot.slane %v3518_v15, 3  ;;  %v3663_v38 = vrot.slane %v3519_v46, 3  ;;  %v3664_v36 = vrot.slane %v3520_v5, 3  ;;  %v3665_v28 = vrot.slane %v3521_v60, 3 }
 0x262   : > { %v3666_v22 = vrot.slane %v3522_v48, 3  ;;  %v3667_v9 = vrot.slane %v3523_v58, 3  ;;  %v3668_v56 = vrot.slane %v3524_v21, 3  ;;  %v3669_v49 = vrot.slane %v3525_v4, 3  ;;  %v12020_v21 = vld [vmem:[#allocation31_spill] sm:$0xff] }
 0x263   : > { %v3670_v0 = vrot.slane %v3526_v52, 3  ;;  %v3671_v7 = vrot.slane %v3527_v24, 3  ;;  %v3801_v37 = vadd.f32 %v3657_v39, %v3432_v19  ;;  %v3802_v62 = vadd.f32 %v3658_v44, %v3433_v53  ;;  %v12024_v52 = vld [vmem:[#allocation110_spill] sm:$0xff] }
 0x264   : > { %v3803_v51 = vadd.f32 %v3659_v45, %v3434_v18  ;;  %v3672_v47 = vrot.slane %v3528_v40, 3  ;;  %v3804_v41 = vadd.f32 %v3660_v14, %v3435_v30  ;;  %v3805_v12 = vadd.f32 %v3661_v25, %v3436_v33 }
 0x265   : > { %v3807_v55 = vadd.f32 %v3663_v38, %v3438_v16  ;;  %v3806_v50 = vadd.f32 %v3662_v54, %v3437_v32  ;;  %v3808_v20 = vadd.f32 %v3664_v36, %v3439_v59  ;;  %v3809_v2 = vadd.f32 %v3665_v28, %v3440_v34  ;;  %v12021_v59 = vld [vmem:[#allocation39_spill] sm:$0xff] }
 0x266   : > { %v3810_v15 = vadd.f32 %v3666_v22, %v3441_v27  ;;  %v3811_v46 = vadd.f32 %v3667_v9, %v3442_v11  ;;  %v3812_v5 = vadd.f32 %v3668_v56, %v3443_v1  ;;  %v3813_v60 = vadd.f32 %v3669_v49, %v3444_v43  ;;  %v12022_v1 = vld [vmem:[#allocation106_spill] sm:$0xff] }
 0x267   : > { %v3814_v48 = vadd.f32 %v3670_v0, %v3445_v6  ;;  %v3815_v58 = vadd.f32 %v3671_v7, %v3446_v23  ;;  %v3882_v4 = vmul.f32 %v12020_v21, %v12016_v31  ;;  %v3883_v53 = vmul.f32 %v12020_v21, %v12018_v61  ;;  %v12023_v6 = vld [vmem:[#allocation109_spill] sm:$0xff] }
 0x268   : > { %v3884_v18 = vmul.f32 %v12020_v21, %v11992_v13  ;;  %v3885_v33 = vmul.f32 %v12020_v21, %v8721_v57  ;;  %v3886_v19 = vmul.f32 %v12020_v21, %v11994_v3  ;;  %v3887_v16 = vmul.f32 %v12020_v21, %v8741_v42 }
 0x269   : > { %v3888_v7 = vmul.f32 %v12020_v21, %v11996_v8  ;;  %v3816_v30 = vadd.f32 %v3672_v47, %v3447_v29  ;;  %v3889_v32 = vmul.f32 %v12020_v21, %v8897_v35  ;;  %v3890_v34 = vmul.f32 %v12021_v59, %v11984_v10  ;;  %v12025_v29 = vld [vmem:[#allocation94_spill] sm:$0xff] }
 0x26a   : > { %v3891_v27 = vmul.f32 %v12021_v59, %v9040_v17  ;;  %v3892_v11 = vmul.f32 %v12021_v59, %v9051_v26  ;;  %v3893_v43 = vmul.f32 %v12021_v59, %v12022_v1  ;;  %v3894_v23 = vmul.f32 %v12021_v59, %v12023_v6 }
 0x26b   : > { %v3895_v47 = vmul.f32 %v12021_v59, %v12024_v52  ;;  %v3896_v24 = vmul.f32 %v12021_v59, %v12025_v29  ;;  %v3897_v40 = vmul.f32 %v12021_v59, %v9119_v63  ;;  %v4026_v39 = vrot.slane %v3882_v4, 4 }
 0x26c   : > { %v4027_v44 = vrot.slane %v3883_v53, 4  ;;  %v4028_v45 = vrot.slane %v3884_v18, 4  ;;  %v4029_v14 = vrot.slane %v3885_v33, 4  ;;  %v4030_v25 = vrot.slane %v3886_v19, 4 }
 0x26d   : > { %v4031_v54 = vrot.slane %v3887_v16, 4  ;;  %v4032_v38 = vrot.slane %v3888_v7, 4  ;;  %v4033_v36 = vrot.slane %v3889_v32, 4  ;;  %v4034_v28 = vrot.slane %v3890_v34, 4 }
 0x26e   : > { %v4035_v22 = vrot.slane %v3891_v27, 4  ;;  %v4036_v9 = vrot.slane %v3892_v11, 4  ;;  %v4037_v56 = vrot.slane %v3893_v43, 4  ;;  %v4038_v49 = vrot.slane %v3894_v23, 4  ;;  %v12026_v43 = vld [vmem:[#allocation32_spill] sm:$0xff] }
 0x26f   : > { %v4039_v0 = vrot.slane %v3895_v47, 4  ;;  %v4040_v21 = vrot.slane %v3896_v24, 4  ;;  %v4170_v52 = vadd.f32 %v4026_v39, %v3801_v37  ;;  %v4171_v29 = vadd.f32 %v4027_v44, %v3802_v62  ;;  %v12030_v24 = vld [vmem:[#allocation110_spill] sm:$0xff] }
 0x270   : > { %v4172_v6 = vadd.f32 %v4028_v45, %v3803_v51  ;;  %v4041_v1 = vrot.slane %v3897_v40, 4  ;;  %v4173_v59 = vadd.f32 %v4029_v14, %v3804_v41  ;;  %v4174_v4 = vadd.f32 %v4030_v25, %v3805_v12 }
 0x271   : > { %v4176_v53 = vadd.f32 %v4032_v38, %v3807_v55  ;;  %v4175_v18 = vadd.f32 %v4031_v54, %v3806_v50  ;;  %v4177_v33 = vadd.f32 %v4033_v36, %v3808_v20  ;;  %v4178_v19 = vadd.f32 %v4034_v28, %v3809_v2  ;;  %v12027_v2 = vld [vmem:[#allocation40_spill] sm:$0xff] }
 0x272   : > { %v4179_v16 = vadd.f32 %v4035_v22, %v3810_v15  ;;  %v4180_v7 = vadd.f32 %v4036_v9, %v3811_v46  ;;  %v4181_v32 = vadd.f32 %v4037_v56, %v3812_v5  ;;  %v4182_v34 = vadd.f32 %v4038_v49, %v3813_v60  ;;  %v12028_v60 = vld [vmem:[#allocation106_spill] sm:$0xff] }
 0x273   : > { %v4183_v27 = vadd.f32 %v4039_v0, %v3814_v48  ;;  %v4184_v11 = vadd.f32 %v4040_v21, %v3815_v58  ;;  %v4251_v23 = vmul.f32 %v12026_v43, %v12016_v31  ;;  %v4252_v37 = vmul.f32 %v12026_v43, %v12018_v61  ;;  %v12029_v58 = vld [vmem:[#allocation109_spill] sm:$0xff] }
 0x274   : > { %v4253_v51 = vmul.f32 %v12026_v43, %v11992_v13  ;;  %v4254_v62 = vmul.f32 %v12026_v43, %v8721_v57  ;;  %v4255_v41 = vmul.f32 %v12026_v43, %v11994_v3  ;;  %v4256_v12 = vmul.f32 %v12026_v43, %v8741_v42 }
 0x275   : > { %v4257_v55 = vmul.f32 %v12026_v43, %v11996_v8  ;;  %v4185_v50 = vadd.f32 %v4041_v1, %v3816_v30  ;;  %v4258_v20 = vmul.f32 %v12026_v43, %v8897_v35  ;;  %v4259_v15 = vmul.f32 %v12027_v2, %v11984_v10  ;;  %v12031_v1 = vld [vmem:[#allocation94_spill] sm:$0xff] }
 0x276   : > { %v4260_v46 = vmul.f32 %v12027_v2, %v9040_v17  ;;  %v4261_v5 = vmul.f32 %v12027_v2, %v9051_v26  ;;  %v4262_v48 = vmul.f32 %v12027_v2, %v12028_v60  ;;  %v4263_v47 = vmul.f32 %v12027_v2, %v12029_v58 }
 0x277   : > { %v4264_v30 = vmul.f32 %v12027_v2, %v12030_v24  ;;  %v4265_v40 = vmul.f32 %v12027_v2, %v12031_v1  ;;  %v4266_v39 = vmul.f32 %v12027_v2, %v9119_v63  ;;  %v4395_v44 = vrot.slane %v4251_v23, 5 }
 0x278   : > { %v4396_v45 = vrot.slane %v4252_v37, 5  ;;  %v4397_v14 = vrot.slane %v4253_v51, 5  ;;  %v4398_v25 = vrot.slane %v4254_v62, 5  ;;  %v4399_v54 = vrot.slane %v4255_v41, 5 }
 0x279   : > { %v4400_v38 = vrot.slane %v4256_v12, 5  ;;  %v4401_v36 = vrot.slane %v4257_v55, 5  ;;  %v4402_v28 = vrot.slane %v4258_v20, 5  ;;  %v4403_v22 = vrot.slane %v4259_v15, 5 }
 0x27a   : > { %v4404_v9 = vrot.slane %v4260_v46, 5  ;;  %v4405_v56 = vrot.slane %v4261_v5, 5  ;;  %v4406_v49 = vrot.slane %v4262_v48, 5  ;;  %v4407_v0 = vrot.slane %v4263_v47, 5  ;;  %v12032_v48 = vld [vmem:[#allocation33_spill] sm:$0xff] }
 0x27b   : > { %v4408_v21 = vrot.slane %v4264_v30, 5  ;;  %v4409_v43 = vrot.slane %v4265_v40, 5  ;;  %v4539_v24 = vadd.f32 %v4395_v44, %v4170_v52  ;;  %v4540_v1 = vadd.f32 %v4396_v45, %v4171_v29  ;;  %v12036_v40 = vld [vmem:[#allocation110_spill] sm:$0xff] }
 0x27c   : > { %v4541_v58 = vadd.f32 %v4397_v14, %v4172_v6  ;;  %v4410_v60 = vrot.slane %v4266_v39, 5  ;;  %v4542_v2 = vadd.f32 %v4398_v25, %v4173_v59  ;;  %v4543_v23 = vadd.f32 %v4399_v54, %v4174_v4 }
 0x27d   : > { %v4545_v37 = vadd.f32 %v4401_v36, %v4176_v53  ;;  %v4544_v51 = vadd.f32 %v4400_v38, %v4175_v18  ;;  %v4546_v62 = vadd.f32 %v4402_v28, %v4177_v33  ;;  %v4547_v41 = vadd.f32 %v4403_v22, %v4178_v19  ;;  %v12033_v19 = vld [vmem:[#allocation41_spill] sm:$0xff] }
 0x27e   : > { %v4548_v12 = vadd.f32 %v4404_v9, %v4179_v16  ;;  %v4549_v55 = vadd.f32 %v4405_v56, %v4180_v7  ;;  %v4550_v20 = vadd.f32 %v4406_v49, %v4181_v32  ;;  %v4551_v15 = vadd.f32 %v4407_v0, %v4182_v34  ;;  %v12034_v34 = vld [vmem:[#allocation106_spill] sm:$0xff] }
 0x27f   : > { %v4552_v46 = vadd.f32 %v4408_v21, %v4183_v27  ;;  %v4553_v5 = vadd.f32 %v4409_v43, %v4184_v11  ;;  %v4620_v47 = vmul.f32 %v12032_v48, %v12016_v31  ;;  %v4621_v52 = vmul.f32 %v12032_v48, %v12018_v61  ;;  %v12035_v11 = vld [vmem:[#allocation109_spill] sm:$0xff] }
 0x280   : > { %v4622_v6 = vmul.f32 %v12032_v48, %v11992_v13  ;;  %v4623_v29 = vmul.f32 %v12032_v48, %v8721_v57  ;;  %v4624_v59 = vmul.f32 %v12032_v48, %v11994_v3  ;;  %v4625_v4 = vmul.f32 %v12032_v48, %v8741_v42 }
 0x281   : > { %v4626_v53 = vmul.f32 %v12032_v48, %v11996_v8  ;;  %v4554_v18 = vadd.f32 %v4410_v60, %v4185_v50  ;;  %v4627_v33 = vmul.f32 %v12032_v48, %v8897_v35  ;;  %v4628_v16 = vmul.f32 %v12033_v19, %v11984_v10  ;;  %v12037_v60 = vld [vmem:[#allocation94_spill] sm:$0xff] }
 0x282   : > { %v4629_v7 = vmul.f32 %v12033_v19, %v9040_v17  ;;  %v4630_v32 = vmul.f32 %v12033_v19, %v9051_v26  ;;  %v4631_v27 = vmul.f32 %v12033_v19, %v12034_v34  ;;  %v4632_v30 = vmul.f32 %v12033_v19, %v12035_v11 }
 0x283   : > { %v4633_v50 = vmul.f32 %v12033_v19, %v12036_v40  ;;  %v4634_v39 = vmul.f32 %v12033_v19, %v12037_v60  ;;  %v4635_v44 = vmul.f32 %v12033_v19, %v9119_v63  ;;  %v4764_v45 = vrot.slane %v4620_v47, 6 }
 0x284   : > { %v4765_v14 = vrot.slane %v4621_v52, 6  ;;  %v4766_v25 = vrot.slane %v4622_v6, 6  ;;  %v4767_v54 = vrot.slane %v4623_v29, 6  ;;  %v4768_v38 = vrot.slane %v4624_v59, 6 }
 0x285   : > { %v4769_v36 = vrot.slane %v4625_v4, 6  ;;  %v4770_v28 = vrot.slane %v4626_v53, 6  ;;  %v4771_v22 = vrot.slane %v4627_v33, 6  ;;  %v4772_v9 = vrot.slane %v4628_v16, 6 }
 0x286   : > { %v4773_v56 = vrot.slane %v4629_v7, 6  ;;  %v4774_v49 = vrot.slane %v4630_v32, 6  ;;  %v4775_v0 = vrot.slane %v4631_v27, 6  ;;  %v4776_v21 = vrot.slane %v4632_v30, 6  ;;  %v12038_v27 = vld [vmem:[#allocation34_spill] sm:$0xff] }
 0x287   : > { %v4777_v43 = vrot.slane %v4633_v50, 6  ;;  %v4778_v48 = vrot.slane %v4634_v39, 6  ;;  %v4908_v40 = vadd.f32 %v4764_v45, %v4539_v24  ;;  %v4909_v60 = vadd.f32 %v4765_v14, %v4540_v1 }
 0x288   : > { %v4910_v11 = vadd.f32 %v4766_v25, %v4541_v58  ;;  %v4779_v34 = vrot.slane %v4635_v44, 6  ;;  %v4911_v19 = vadd.f32 %v4767_v54, %v4542_v2  ;;  %v4912_v47 = vadd.f32 %v4768_v38, %v4543_v23 }
 0x289   : > { %v4914_v52 = vadd.f32 %v4770_v28, %v4545_v37  ;;  %v4913_v6 = vadd.f32 %v4769_v36, %v4544_v51  ;;  %v4915_v29 = vadd.f32 %v4771_v22, %v4546_v62  ;;  %v4916_v59 = vadd.f32 %v4772_v9, %v4547_v41 }
 0x28a   : > { %v4917_v4 = vadd.f32 %v4773_v56, %v4548_v12  ;;  %v4918_v53 = vadd.f32 %v4774_v49, %v4549_v55  ;;  %v4919_v33 = vadd.f32 %v4775_v0, %v4550_v20  ;;  %v4920_v16 = vadd.f32 %v4776_v21, %v4551_v15  ;;  %v12043_v20 = vld [vmem:[#allocation94_spill] sm:$0xff] }
 0x28b   : > { %v4921_v7 = vadd.f32 %v4777_v43, %v4552_v46  ;;  %v4922_v32 = vadd.f32 %v4778_v48, %v4553_v5  ;;  %v4989_v30 = vmul.f32 %v12038_v27, %v12016_v31  ;;  %v4990_v24 = vmul.f32 %v12038_v27, %v12018_v61  ;;  %v12039_v61 = vld [vmem:[#allocation42_spill] sm:$0xff] }
 0x28c   : > { %v4991_v58 = vmul.f32 %v12038_v27, %v11992_v13  ;;  %v4992_v1 = vmul.f32 %v12038_v27, %v8721_v57  ;;  %v4993_v2 = vmul.f32 %v12038_v27, %v11994_v3  ;;  %v4994_v23 = vmul.f32 %v12038_v27, %v8741_v42  ;;  %v12040_v3 = vld [vmem:[#allocation106_spill] sm:$0xff]  ;;  %v12041_v42 = vld [vmem:[#allocation109_spill] sm:$0xff] }
 0x28d   : > { %v4995_v37 = vmul.f32 %v12038_v27, %v11996_v8  ;;  %v4923_v51 = vadd.f32 %v4779_v34, %v4554_v18  ;;  %v4996_v31 = vmul.f32 %v12038_v27, %v8897_v35  ;;  %v4997_v62 = vmul.f32 %v12039_v61, %v11984_v10  ;;  %v12042_v8 = vld [vmem:[#allocation110_spill] sm:$0xff] }
 0x28e   : > { %v4998_v13 = vmul.f32 %v12039_v61, %v9040_v17  ;;  %v4999_v57 = vmul.f32 %v12039_v61, %v9051_v26  ;;  %v5000_v41 = vmul.f32 %v12039_v61, %v12040_v3  ;;  %v5001_v12 = vmul.f32 %v12039_v61, %v12041_v42 }
 0x28f   : > { %v5002_v55 = vmul.f32 %v12039_v61, %v12042_v8  ;;  %v5003_v35 = vmul.f32 %v12039_v61, %v12043_v20  ;;  %v5004_v10 = vmul.f32 %v12039_v61, %v9119_v63  ;;  %v5133_v15 = vrot.slane %v4989_v30, 7 }
 0x290   : > { %v5134_v17 = vrot.slane %v4990_v24, 7  ;;  %v5135_v46 = vrot.slane %v4991_v58, 7  ;;  %v5136_v5 = vrot.slane %v4992_v1, 7  ;;  %v5137_v26 = vrot.slane %v4993_v2, 7 }
 0x291   : > { %v5138_v18 = vrot.slane %v4994_v23, 7  ;;  %v5139_v34 = vrot.slane %v4995_v37, 7  ;;  %v5140_v50 = vrot.slane %v4996_v31, 7  ;;  %v5141_v39 = vrot.slane %v4997_v62, 7 }
 0x292   : > { %v5142_v44 = vrot.slane %v4998_v13, 7  ;;  %v5143_v45 = vrot.slane %v4999_v57, 7  ;;  %v5144_v14 = vrot.slane %v5000_v41, 7  ;;  %v5145_v25 = vrot.slane %v5001_v12, 7  ;;  %v9373_v12 = vpop.f32.mrf.mxu2 }
 0x293   : > { %v5146_v54 = vrot.slane %v5002_v55, 7  ;;  %v5147_v38 = vrot.slane %v5003_v35, 7  ;;  %v5277_v36 = vadd.f32 %v5133_v15, %v4908_v40  ;;  %v5278_v28 = vadd.f32 %v5134_v17, %v4909_v60 }
 0x294   : > { %v5279_v22 = vadd.f32 %v5135_v46, %v4910_v11  ;;  %v5280_v9 = vadd.f32 %v5136_v5, %v4911_v19  ;;  %v5281_v63 = vadd.f32 %v5137_v26, %v4912_v47  ;;  %v5282_v56 = vadd.f32 %v5138_v18, %v4913_v6 }
 0x295   : > { %v5283_v49 = vadd.f32 %v5139_v34, %v4914_v52  ;;  %v5148_v0 = vrot.slane %v5004_v10, 7  ;;  %v5284_v21 = vadd.f32 %v5140_v50, %v4915_v29  ;;  %v5285_v43 = vadd.f32 %v5141_v39, %v4916_v59 }
 0x296   : > { %v5286_v48 = vadd.f32 %v5142_v44, %v4917_v4  ;;  %v5287_v27 = vadd.f32 %v5143_v45, %v4918_v53  ;;  %v5288_v30 = vadd.f32 %v5144_v14, %v4919_v33  ;;  %v5289_v24 = vadd.f32 %v5145_v25, %v4920_v16 }
 0x297   : > { %v5290_v58 = vadd.f32 %v5146_v54, %v4921_v7  ;;  %v5291_v1 = vadd.f32 %v5147_v38, %v4922_v32  ;;  %v5292_v2 = vadd.f32 %v5148_v0, %v4923_v51  ;;  %v5350_v23 = vpack.c.bf16 %v5278_v28, %v5278_v28  ;;  %v12044_v0 = vld [vmem:[#allocation21_spill] sm:$0xff] }
 0x298   : > { %v5351_v37 = vpack.c.bf16 %v5279_v22, %v5279_v22  ;;  %v5349_v31 = vpack.c.bf16 %v5277_v36, %v5277_v36  ;;  %v5352_v40 = vpack.c.bf16 %v5280_v9, %v5280_v9  ;;  %v5353_v60 = vpack.c.bf16 %v5281_v63, %v5281_v63 }
 0x299   : > { %v5354_v11 = vpack.c.bf16 %v5282_v56, %v5282_v56  ;;  %v5355_v19 = vpack.c.bf16 %v5283_v49, %v5283_v49  ;;  %v5356_v47 = vpack.c.bf16 %v5284_v21, %v5284_v21  ;;  %v5357_v6 = vpack.c.bf16 %v5285_v43, %v5285_v43 }
 0x29a   : > { %v5358_v52 = vpack.c.bf16 %v5286_v48, %v5286_v48  ;;  %v5359_v61 = vpack.c.bf16 %v5287_v27, %v5287_v27  ;;  %v5360_v29 = vpack.c.bf16 %v5288_v30, %v5288_v30  ;;  %v5361_v59 = vpack.c.bf16 %v5289_v24, %v5289_v24  ;;  %v12045_v24 = vld [vmem:[#allocation80_spill] sm:$0xff] }
 0x29b   : > { %v5362_v4 = vpack.c.bf16 %v5290_v58, %v5290_v58  ;;  %v5363_v53 = vpack.c.bf16 %v5291_v1, %v5291_v1  ;;  %v5364_v33 = vpack.c.bf16 %v5292_v2, %v5292_v2  ;;  %v5536_v16 = vunpack.c.l.b16 %v5350_v23  ;;  %v12046_v58 = vld [vmem:[#allocation51_spill] sm:$0xff]  ;;  %v12047_v2 = vld [vmem:[#allocation114_spill] sm:$0xff] }
 0x29c   : > { %v5537_v7 = vunpack.c.l.b16 %v5351_v37  ;;  %v5535_v32 = vunpack.c.l.b16 %v5349_v31  ;;  %v5538_v51 = vunpack.c.l.b16 %v5352_v40  ;;  %v5539_v62 = vunpack.c.l.b16 %v5353_v60  ;;  %v9392_v31 = vpop.f32.mrf.mxu2 }
 0x29d   : > { %v5540_v13 = vunpack.c.l.b16 %v5354_v11  ;;  %v5541_v57 = vunpack.c.l.b16 %v5355_v19  ;;  %v5542_v3 = vunpack.c.l.b16 %v5356_v47  ;;  %v5543_v41 = vunpack.c.l.b16 %v5357_v6  ;;  %v12049_v11 = vld [vmem:[#allocation81_spill] sm:$0xff] }
 0x29e   : > { %v5544_v42 = vunpack.c.l.b16 %v5358_v52  ;;  %v5545_v8 = vunpack.c.l.b16 %v5359_v61  ;;  %v5546_v55 = vunpack.c.l.b16 %v5360_v29  ;;  %v5547_v20 = vunpack.c.l.b16 %v5361_v59  ;;  %v12050_v47 = vld [vmem:[#allocation29_spill] sm:$0xff] }
 0x29f   : > { %v5548_v35 = vunpack.c.l.b16 %v5362_v4  ;;  %v5549_v10 = vunpack.c.l.b16 %v5363_v53  ;;  %v5607_v15 = vrot.slane %v5536_v16, 7  ;;  %v5610_v17 = vrot.slane %v5537_v7, 6  ;;  %v12051_v6 = vld [vmem:[#allocation101_spill] sm:$0xff]  ;;  %v12053_v4 = vld [vmem:[#allocation82_spill] sm:$0xff]  ;;  %v12054_v7 = vld [vmem:[#allocation92_spill] sm:$0xff] }
 0x2a0   : > { %v5613_v46 = vrot.slane %v5538_v51, 5  ;;  %v5616_v5 = vrot.slane %v5539_v62, 4  ;;  %v5550_v26 = vunpack.c.l.b16 %v5364_v33  ;;  %v5619_v34 = vrot.slane %v5540_v13, 3  ;;  %v12052_v29 = vld [vmem:[#allocation97_spill] sm:$0xff]  ;;  %v12055_v51 = vld [vmem:[#allocation52_spill] sm:$0xff]  ;;  %v12056_v13 = vld [vmem:[#allocation115_spill] sm:$0xff] }
 0x2a1   : > { %v5609_v18 = vsel %vm5608_vm0, %v5607_v15, %v5535_v32  ;;  %v5622_v39 = vrot.slane %v5541_v57, 2  ;;  %v5625_v45 = vrot.slane %v5542_v3, 1  ;;  %v5628_v14 = vrot.slane %v5544_v42, 7  ;;  %v1262_v15 = vpop.f32.mrf.mxu3 }
 0x2a2   : > { %v5612_v50 = vsel %vm5611_vm1, %v5610_v17, %v5609_v18  ;;  %v5630_v25 = vrot.slane %v5545_v8, 6  ;;  %v5632_v38 = vrot.slane %v5546_v55, 5  ;;  %v5634_v36 = vrot.slane %v5547_v20, 4  ;;  %v12057_v8 = vld [vmem:[#allocation95_spill] sm:$0xff] }
 0x2a3   : > { %v5615_v44 = vsel %vm5614_vm2, %v5613_v46, %v5612_v50  ;;  %v5629_v22 = vsel %vm5608_vm0, %v5628_v14, %v5543_v41  ;;  %v5636_v9 = vrot.slane %v5548_v35, 3  ;;  %v5638_v63 = vrot.slane %v5549_v10, 2  ;;  %v12059_v18 = vld [vmem:[#allocation27_spill] sm:$0xff] }
 0x2a4   : > { %v5618_v54 = vsel %vm5617_vm3, %v5616_v5, %v5615_v44  ;;  %v5631_v49 = vsel %vm5611_vm1, %v5630_v25, %v5629_v22  ;;  %v823_v21 = vrot.slane %v12044_v0, 1  ;;  %v894_v43 = vperm.slane %v12044_v0, 0  ;;  %v12061_v25 = vld [vmem:[#allocation71_spill] sm:$0xff] }
 0x2a5   : > { %v5621_v28 = vsel %vm5620_vm4, %v5619_v34, %v5618_v54  ;;  %v5633_v27 = vsel %vm5614_vm2, %v5632_v38, %v5631_v49  ;;  %v5640_v30 = vrot.slane %v5550_v26, 1  ;;  %v2720_v1 = vmul.f32 %v12046_v58, %v12045_v24  ;;  %v12062_v54 = vld [vmem:[#allocation102_spill] sm:$0xff] }
 0x2a6   : > { %v5624_v56 = vsel %vm5623_vm5, %v5622_v39, %v5621_v28  ;;  %v12048_v23 = vrot.slane %v12047_v2, 4  ;;  %v5635_v40 = vsel %vm5617_vm3, %v5634_v36, %v5633_v27  ;;  %v895_v60 = vperm.slane %v823_v21, 0  ;;  %v12060_v39 = vld [vmem:[#allocation53_spill] sm:$0xff]  ;;  %v12064_v21 = vld [vmem:[#allocation96_spill] sm:$0xff] }
 0x2a7   : > { %v5627_v48 = vsel %vm5626_vm6, %v5625_v45, %v5624_v56  ;;  %v2721_v19 = vmul.f32 %v12046_v58, %v12049_v11  ;;  %v1911_v52 = vsub.f32 %v12051_v6, %v12050_v47  ;;  %v5637_v61 = vsel %vm5620_vm4, %v5636_v9, %v5635_v40  ;;  %v12063_v28 = vld [vmem:[#allocation77_spill] sm:$0xff]  ;;  %v12066_v47 = vld [vmem:[#allocation22_spill] sm:$0xff] }
 0x2a8   : > { %v1714_v37 = vmax.f32 %v12047_v2, %v12048_v23  ;;  %v1038_v59 = vmul.f32 %v894_v43, %v12052_v29  ;;  %v2722_v53 = vmul.f32 %v12046_v58, %v12053_v4  ;;  %v5639_v33 = vsel %vm5623_vm5, %v5638_v63, %v5637_v61  ;;  %v9443_v23 = vpop.f32.mrf.mxu2 }
 0x2a9   : > { %v1039_v16 = vmul.f32 %v895_v60, %v12052_v29  ;;  %v2724_v32 = vmul.f32 %v12046_v58, %v12054_v7  ;;  %v2801_v62 = vmul.f32 %v12055_v51, %v12045_v24  ;;  %v1577_v57 = vrot.slane %v12056_v13, 2  ;;  %v12065_v60 = vld [vmem:[#allocation54_spill] sm:$0xff] }
 0x2aa   : > { %v5641_v3 = vsel %vm5626_vm6, %v5640_v30, %v5639_v33  ;;  %v2802_v41 = vmul.f32 %v12055_v51, %v12049_v11  ;;  %v2803_v42 = vmul.f32 %v12055_v51, %v12053_v4  ;;  %v2347_v55 = vrot.slane %v12057_v8, 1 }
 0x2ab   : > { %v1715_v20 = vrot.slane %v1714_v37, 2  ;;  %v9416_v35 = vpack.c.b16 %v5641_v3, %v5627_v48  ;;  %v2805_v10 = vmul.f32 %v12055_v51, %v12054_v7  ;;  %v1078_v17 = vpack.c.bf16 %v1039_v16, %v1038_v59 }
 0x2ac   : > { %v2945_v46 = vrot.slane %v2801_v62, 1  ;;  %v2946_v5 = vrot.slane %v2802_v41, 1  ;;  %v2947_v26 = vrot.slane %v2803_v42, 1  ;;  %v9422_v34 = vadd.f32 %v12059_v18, %v9373_v12 }
 0x2ad   : > { %12058 = vst [vmem:[#allocation37_spill] sm:$0xff] %v9416_v35  ;;  %5918 = vmatmul.bf16.vlgmr.msrb.gmra.mxu0 %v9416_v35  ;;  %5951 = vmatmul.bf16.vlgmr.msrb.gmra.mxu1 %v9416_v35  ;;  %v2949_v50 = vrot.slane %v2805_v10, 1  ;;  %v3170_v44 = vmul.f32 %v12060_v39, %v12045_v24  ;;  %v3171_v45 = vmul.f32 %v12060_v39, %v12049_v11  ;;  %v2001_v14 = vmul.f32 1.442695, %v1911_v52 }
 0x2ae   : > { %v1934_v38 = vsub.f32 %v12062_v54, %v12061_v25  ;;  %v1578_v36 = vmax.f32 %v12056_v13, %v1577_v57  ;;  %5984 = vmatmul.bf16.vlgmr.msra.gmra.mxu2 %v9416_v35  ;;  %1314 = vmatmul.bf16.gmra.mxu3 %v1078_v17  ;;  %v3089_v12 = vadd.f32 %v2945_v46, %v2720_v1  ;;  %v2211_v22 = vrot.slane %v12063_v28, 4 }
 0x2af   : > { %v3090_v9 = vadd.f32 %v2946_v5, %v2721_v19  ;;  %v3091_v63 = vadd.f32 %v2947_v26, %v2722_v53  ;;  %v3093_v56 = vadd.f32 %v2949_v50, %v2724_v32  ;;  %v1716_v49 = vmax.f32 %v1714_v37, %v1715_v20  ;;  %v12067_v32 = vld [vmem:[#allocation35_spill] sm:$0xff]  ;;  %v1265_v5 = vpop.f32.mrf.mxu3 }
 0x2b0   : > { %v9436_v43 = vadd.f32 %v12064_v21, %v1262_v15  ;;  %v3172_v48 = vmul.f32 %v12060_v39, %v12053_v4  ;;  %v3174_v27 = vmul.f32 %v12060_v39, %v12054_v7  ;;  %v1581_v30 = vrot.slane %v9422_v34, 4 }
 0x2b1   : > { %v3314_v1 = vrot.slane %v3170_v44, 2  ;;  %v3315_v40 = vrot.slane %v3171_v45, 2  ;;  %v3539_v19 = vmul.f32 %v12065_v60, %v12045_v24  ;;  %v2349_v37 = vrot.slane %v12066_v47, 4 }
 0x2b2   : > { %v2047_v6 = vmul.f32 1.442695, %v1934_v38  ;;  %v1579_v52 = vrot.slane %v1578_v36, 1  ;;  %v3316_v61 = vrot.slane %v3172_v48, 2  ;;  %v3318_v59 = vrot.slane %v3174_v27, 2 }
 0x2b3   : > { %v3458_v53 = vadd.f32 %v3314_v1, %v3089_v12  ;;  %v3459_v33 = vadd.f32 %v3315_v40, %v3090_v9  ;;  %v3540_v16 = vmul.f32 %v12065_v60, %v12049_v11  ;;  %v12068_v62 = vrot.slane %v12067_v32, 1  ;;  %v12069_v12 = vld [vmem:[#allocation55_spill] sm:$0xff]  ;;  %v12070_v9 = vld [vmem:[#allocation113_spill] sm:$0xff] }
 0x2b4   : > { %v2212_v57 = vadd.f32 %v12063_v28, %v2211_v22  ;;  %v1719_v3 = vrot.slane %v9436_v43, 4  ;;  %v3460_v41 = vadd.f32 %v3316_v61, %v3091_v63  ;;  %v1717_v42 = vrot.slane %v1716_v49, 1 }
 0x2b5   : > { %v2210_v13 = vadd.f32 %v12068_v62, %v12067_v32  ;;  %v1582_v20 = vmax.f32 %v9422_v34, %v1581_v30  ;;  %v3462_v10 = vadd.f32 %v3318_v59, %v3093_v56  ;;  %v3541_v15 = vmul.f32 %v12065_v60, %v12053_v4  ;;  %v9473_v30 = vpop.f32.mrf.mxu2 }
 0x2b6   : > { %v2348_v17 = vadd.f32 %v2347_v55, %v12057_v8  ;;  %7595 = vpow2.f32 %v2001_v14  ;;  %v1580_v46 = vmax.f32 %v1578_v36, %v1579_v52  ;;  %v3543_v26 = vmul.f32 %v12065_v60, %v12054_v7  ;;  %v12071_v52 = vld [vmem:[#allocation56_spill] sm:$0xff] }
 0x2b7   : > { %v2350_v50 = vadd.f32 %v12066_v47, %v2349_v37  ;;  %7597 = vpow2.f32 %v2047_v6  ;;  %v9464_v44 = vadd.f32 %v12059_v18, %v9392_v31  ;;  %v3683_v45 = vrot.slane %v3539_v19, 3 }
 0x2b8   : > { %v2213_v25 = vrot.slane %v2212_v57, 2  ;;  %v3684_v54 = vrot.slane %v3540_v16, 3  ;;  %v3685_v38 = vrot.slane %v3541_v15, 3  ;;  %v3908_v8 = vmul.f32 %v12069_v12, %v12045_v24 }
 0x2b9   : > { %v1718_v55 = vmax.f32 %v1716_v49, %v1717_v42  ;;  %v1583_v14 = vrot.slane %v1582_v20, 2  ;;  %v1720_v36 = vmax.f32 %v9436_v43, %v1719_v3  ;;  %v3827_v22 = vadd.f32 %v3683_v45, %v3458_v53 }
 0x2ba   : > { %v1912_v63 = vsub.f32 %v12070_v9, %v1580_v46  ;;  %v3828_v56 = vadd.f32 %v3684_v54, %v3459_v33  ;;  %v3829_v48 = vadd.f32 %v3685_v38, %v3460_v41  ;;  %v3909_v31 = vmul.f32 %v12069_v12, %v12049_v11  ;;  %v12073_v54 = vld [vmem:[#allocation98_spill] sm:$0xff]  ;;  %v12074_v38 = vld [vmem:[#allocation36_spill] sm:$0xff] }
 0x2bb   : > { %v1587_v27 = vrot.slane %v9464_v44, 4  ;;  %v3687_v1 = vrot.slane %v3543_v26, 3  ;;  %v3910_v40 = vmul.f32 %v12069_v12, %v12053_v4  ;;  %v3912_v49 = vmul.f32 %v12069_v12, %v12054_v7 }
 0x2bc   : > { %v9479_v19 = vpop.eup %7595  ;;  %v4052_v37 = vrot.slane %v3908_v8, 4  ;;  %v4053_v6 = vrot.slane %v3909_v31, 4  ;;  %v4277_v61 = vmul.f32 %v12071_v52, %v12045_v24  ;;  %v4278_v59 = vmul.f32 %v12071_v52, %v12049_v11 }
 0x2bd   : > { %v9485_v53 = vpop.eup %7597  ;;  %v1584_v33 = vmax.f32 %v1582_v20, %v1583_v14  ;;  %v1721_v16 = vrot.slane %v1720_v36, 2  ;;  %v3831_v32 = vadd.f32 %v3687_v1, %v3462_v10  ;;  %v4054_v62 = vrot.slane %v3910_v40, 4  ;;  %v1267_v10 = vpop.f32.mrf.mxu3 }
 0x2be   : > { %12072 = vst [vmem:[#allocation87_spill] sm:$0xff] %v9485_v53  ;;  %v2351_v3 = vrot.slane %v2350_v50, 2  ;;  %v9488_v41 = vadd.f32 %v12064_v21, %v1265_v5  ;;  %v4196_v42 = vadd.f32 %v4052_v37, %v3827_v22  ;;  %v4197_v15 = vadd.f32 %v4053_v6, %v3828_v56 }
 0x2bf   : > { %7599 = vrcp.f32 %v2210_v13  ;;  %v2217_v46 = vrot.slane %v9479_v19, 4  ;;  %v1935_v26 = vsub.f32 %v12047_v2, %v1718_v55  ;;  %v4198_v45 = vadd.f32 %v4054_v62, %v3829_v48 }
 0x2c0   : > { %v9494_v8 = vmul.f32 %v12074_v38, %v12073_v54  ;;  %7601 = vrcp.f32 %v2348_v17  ;;  %v1588_v20 = vmax.f32 %v9464_v44, %v1587_v27  ;;  %v4279_v5 = vmul.f32 %v12071_v52, %v12053_v4 }
 0x2c1   : > { %v2003_v14 = vmul.f32 1.442695, %v1912_v63  ;;  %v1585_v22 = vrot.slane %v1584_v33, 1  ;;  %v1722_v9 = vmax.f32 %v1720_v36, %v1721_v16  ;;  %v4281_v13 = vmul.f32 %v12071_v52, %v12054_v7 }
 0x2c2   : > { %12075 = vst [vmem:[#allocation88_spill] sm:$0xff] %v9494_v8  ;;  %v9501_v56 = vadd.f32 %v2213_v25, %v2212_v57  ;;  %v9503_v2 = vadd.f32 %v2351_v3, %v2350_v50  ;;  %v1725_v55 = vrot.slane %v9488_v41, 4  ;;  %v4056_v48 = vrot.slane %v3912_v49, 4  ;;  %v1215_v25 = vpop.f32.mrf.mxu2 }
 0x2c3   : > { %v9507_v17 = vadd.f32 %v9479_v19, %v2217_v46  ;;  %v2355_v31 = vrot.slane %v9485_v53, 4  ;;  %v2049_v27 = vmul.f32 1.442695, %v1935_v26  ;;  %v4421_v1 = vrot.slane %v4277_v61, 5 }
 0x2c4   : > { %v1589_v63 = vrot.slane %v1588_v20, 2  ;;  %v4200_v40 = vadd.f32 %v4056_v48, %v3831_v32  ;;  %v4422_v36 = vrot.slane %v4278_v59, 5  ;;  %v4423_v37 = vrot.slane %v4279_v5, 5  ;;  %v12076_v59 = vld [vmem:[#allocation57_spill] sm:$0xff] }
 0x2c5   : > { %v9510_v6 = vpop.eup %7599  ;;  %7603 = vpow2.f32 %v2003_v14  ;;  %v1586_v57 = vmax.f32 %v1584_v33, %v1585_v22  ;;  %v1723_v50 = vrot.slane %v1722_v9, 1  ;;  %v4565_v16 = vadd.f32 %v4421_v1, %v4196_v42 }
 0x2c6   : > { %v9512_v62 = vpop.eup %7601  ;;  %v1726_v49 = vmax.f32 %v9488_v41, %v1725_v55  ;;  %v9517_v3 = vadd.f32 %v12059_v18, %v9443_v23  ;;  %v4566_v61 = vadd.f32 %v4422_v36, %v4197_v15  ;;  %v4567_v46 = vadd.f32 %v4423_v37, %v4198_v45  ;;  %v12077_v15 = vld [vmem:[#allocation58_spill] sm:$0xff] }
 0x2c7   : > { %7605 = vpow2.f32 %v2049_v27  ;;  %v4646_v32 = vmul.f32 %v12076_v59, %v12045_v24  ;;  %v4647_v33 = vmul.f32 %v12076_v59, %v12049_v11  ;;  %v4648_v42 = vmul.f32 %v12076_v59, %v12053_v4 }
 0x2c8   : > { %v1590_v26 = vmax.f32 %v1588_v20, %v1589_v63  ;;  %v9526_v54 = vadd.f32 %v12064_v21, %v1267_v10  ;;  %v4650_v23 = vmul.f32 %v12076_v59, %v12054_v7  ;;  %v5015_v45 = vmul.f32 %v12077_v15, %v12045_v24  ;;  %v1270_v10 = vpop.f32.mrf.mxu3 }
 0x2c9   : > { %v1724_v38 = vmax.f32 %v1722_v9, %v1723_v50  ;;  %v4790_v5 = vrot.slane %v4646_v32, 6  ;;  %v4791_v14 = vrot.slane %v4647_v33, 6  ;;  %v4792_v22 = vrot.slane %v4648_v42, 6 }
 0x2ca   : > { %v1913_v55 = vsub.f32 %v9422_v34, %v1586_v57  ;;  %v1727_v48 = vrot.slane %v1726_v49, 2  ;;  %v1593_v27 = vrot.slane %v9517_v3, 4  ;;  %v9536_v20 = vadd.f32 %v12059_v18, %v9473_v30  ;;  %v12078_v30 = vld [vmem:[#allocation28_spill] sm:$0xff]  ;;  %v1217_v35 = vpop.f32.mrf.mxu2 }
 0x2cb   : > { %v9538_v1 = vpop.eup %7603  ;;  %v4425_v63 = vrot.slane %v4281_v13, 5  ;;  %v4934_v36 = vadd.f32 %v4790_v5, %v4565_v16  ;;  %v4935_v37 = vadd.f32 %v4791_v14, %v4566_v61  ;;  %v4936_v24 = vadd.f32 %v4792_v22, %v4567_v46 }
 0x2cc   : > { %v1591_v9 = vrot.slane %v1590_v26, 1  ;;  %v1731_v50 = vrot.slane %v9526_v54, 4  ;;  %v824_v32 = vrot.slane %v12044_v0, 2  ;;  %v825_v34 = vrot.slane %v12044_v0, 3 }
 0x2cd   : > { %v9543_v57 = vpop.eup %7605  ;;  %v9546_v33 = vadd.f32 %v9485_v53, %v2355_v31  ;;  %v1936_v18 = vsub.f32 %v9436_v43, %v1724_v38  ;;  %v9550_v42 = vadd.f32 %v12078_v30, %v1215_v25  ;;  %v4569_v13 = vadd.f32 %v4425_v63, %v4200_v40 }
 0x2ce   : > { %v1728_v16 = vmax.f32 %v1726_v49, %v1727_v48  ;;  %v1594_v61 = vmax.f32 %v9517_v3, %v1593_v27  ;;  %v896_v46 = vperm.slane %v824_v32, 0  ;;  %v897_v5 = vperm.slane %v825_v34, 0 }
 0x2cf   : > { %v2005_v14 = vmul.f32 1.442695, %v1913_v55  ;;  %v1599_v22 = vrot.slane %v9536_v20, 4  ;;  %v5016_v59 = vmul.f32 %v12077_v15, %v12049_v11  ;;  %v5017_v31 = vmul.f32 %v12077_v15, %v12053_v4 }
 0x2d0   : > { %v1592_v43 = vmax.f32 %v1590_v26, %v1591_v9  ;;  %v1732_v25 = vmax.f32 %v9526_v54, %v1731_v50  ;;  %v1040_v40 = vmul.f32 %v896_v46, %v12052_v29  ;;  %v1041_v49 = vmul.f32 %v897_v5, %v12052_v29  ;;  %v1272_v5 = vpop.f32.mrf.mxu3 }
 0x2d1   : > { %v2223_v38 = vrot.slane %v9538_v1, 4  ;;  %v2051_v48 = vmul.f32 1.442695, %v1936_v18  ;;  %v1605_v55 = vrot.slane %v9550_v42, 4  ;;  %v9565_v27 = vmul.f32 %v12077_v15, %v12054_v7 }
 0x2d2   : > { %v1729_v11 = vrot.slane %v1728_v16, 1  ;;  %v1595_v63 = vrot.slane %v1594_v61, 2  ;;  %v9568_v4 = vadd.f32 %v12078_v30, %v1217_v35  ;;  %v1079_v26 = vpack.c.bf16 %v1041_v49, %v1040_v40 }
 0x2d3   : > { %v1600_v9 = vmax.f32 %v9536_v20, %v1599_v22  ;;  %v9572_v50 = vadd.f32 %v12064_v21, %v1270_v10  ;;  %v4794_v32 = vrot.slane %v4650_v23, 6  ;;  %v5159_v34 = vrot.slane %v5015_v45, 7 }
 0x2d4   : > { %v1914_v18 = vsub.f32 %v9464_v44, %v1592_v43  ;;  %v1733_v46 = vrot.slane %v1732_v25, 2  ;;  %1319 = vmatmul.bf16.gmra.mxu3 %v1079_v26  ;;  %v5160_v7 = vrot.slane %v5016_v59, 7  ;;  %v5161_v53 = vrot.slane %v5017_v31, 7 }
 0x2d5   : > { %v2361_v15 = vrot.slane %v9543_v57, 4  ;;  %v1606_v35 = vmax.f32 %v9550_v42, %v1605_v55  ;;  %v9577_v30 = vadd.f32 %v4794_v32, %v4569_v13  ;;  %v9579_v40 = vadd.f32 %v5159_v34, %v4934_v36 }
 0x2d6   : > { %v1596_v22 = vmax.f32 %v1594_v61, %v1595_v63  ;;  %v1611_v10 = vrot.slane %v9568_v4, 4  ;;  %v9582_v23 = vadd.f32 %v5160_v7, %v4935_v37  ;;  %v9584_v45 = vadd.f32 %v5161_v53, %v4936_v24 }
 0x2d7   : > { %12079 = vst [vmem:[#allocation83_spill] sm:$0xff] %v9579_v40  ;;  %7607 = vpow2.f32 %v2005_v14  ;;  %v1601_v44 = vrot.slane %v1600_v9, 2  ;;  %v1737_v59 = vrot.slane %v9572_v50, 4  ;;  %v9588_v31 = vadd.f32 %v12064_v21, %v1272_v5 }
 0x2d8   : > { %12080 = vst [vmem:[#allocation84_spill] sm:$0xff] %v9582_v23  ;;  %v2215_v43 = vrot.slane %v9501_v56, 1  ;;  %v2007_v13 = vmul.f32 1.442695, %v1914_v18  ;;  %v1730_v49 = vmax.f32 %v1728_v16, %v1729_v11  ;;  %v1734_v36 = vmax.f32 %v1732_v25, %v1733_v46  ;;  %v12088_v23 = vld [vmem:[#allocation43_spill] sm:$0xff] }
 0x2d9   : > { %12081 = vst [vmem:[#allocation85_spill] sm:$0xff] %v9584_v45  ;;  %v2353_v61 = vrot.slane %v9503_v2, 1  ;;  %v2219_v55 = vrot.slane %v9507_v17, 2  ;;  %v2224_v37 = vadd.f32 %v9538_v1, %v2223_v38  ;;  %v1607_v53 = vrot.slane %v1606_v35, 2 }
 0x2da   : > { %v2357_v24 = vrot.slane %v9546_v33, 2  ;;  %7609 = vpow2.f32 %v2051_v48  ;;  %v1597_v14 = vrot.slane %v1596_v22, 1  ;;  %v1612_v63 = vmax.f32 %v9568_v4, %v1611_v10 }
 0x2db   : > { %v2362_v21 = vadd.f32 %v9543_v57, %v2361_v15  ;;  %v1602_v26 = vmax.f32 %v1600_v9, %v1601_v44  ;;  %v1738_v32 = vmax.f32 %v9572_v50, %v1737_v59  ;;  %v1743_v16 = vrot.slane %v9588_v31, 4  ;;  %v12082_v15 = vld [vmem:[#allocation103_spill] sm:$0xff] }
 0x2dc   : > { %v2216_v25 = vadd.f32 %v2215_v43, %v9501_v56  ;;  %7611 = vpow2.f32 %v2007_v13  ;;  %v1937_v11 = vsub.f32 %v9488_v41, %v1730_v49  ;;  %v1735_v38 = vrot.slane %v1734_v36, 1 }
 0x2dd   : > { %v9601_v34 = vpop.eup %7607  ;;  %v2354_v48 = vadd.f32 %v2353_v61, %v9503_v2  ;;  %v2220_v18 = vadd.f32 %v2219_v55, %v9507_v17  ;;  %v2225_v46 = vrot.slane %v2224_v37, 2  ;;  %v1608_v5 = vmax.f32 %v1606_v35, %v1607_v53 }
 0x2de   : > { %v9607_v9 = vmul.f32 %v9510_v6, %v12082_v15  ;;  %v9610_v7 = vadd.f32 %v2357_v24, %v9546_v33  ;;  %v1598_v56 = vmax.f32 %v1596_v22, %v1597_v14  ;;  %v1613_v10 = vrot.slane %v1612_v63, 2 }
 0x2df   : > { %v2363_v44 = vrot.slane %v2362_v21, 2  ;;  %v1603_v41 = vrot.slane %v1602_v26, 1  ;;  %v1739_v59 = vrot.slane %v1738_v32, 2  ;;  %v1744_v43 = vmax.f32 %v9588_v31, %v1743_v16 }
 0x2e0   : > { %v9613_v13 = vpop.eup %7609  ;;  %7613 = vrcp.f32 %v2216_v25  ;;  %v2229_v2 = vrot.slane %v9601_v34, 4  ;;  %v2053_v17 = vmul.f32 1.442695, %v1937_v11  ;;  %v1736_v35 = vmax.f32 %v1734_v36, %v1735_v38 }
 0x2e1   : > { %12083 = vst [vmem:[#allocation86_spill] sm:$0xff] %v9613_v13  ;;  %7615 = vrcp.f32 %v2354_v48  ;;  %v2221_v6 = vrot.slane %v2220_v18, 1  ;;  %v2226_v49 = vadd.f32 %v2225_v46, %v2224_v37  ;;  %v1609_v61 = vrot.slane %v1608_v5, 1 }
 0x2e2   : > { %v9616_v33 = vpop.eup %7611  ;;  %v2359_v22 = vrot.slane %v9610_v7, 1  ;;  %v1915_v55 = vsub.f32 %v9517_v3, %v1598_v56  ;;  %v1614_v53 = vmax.f32 %v1612_v63, %v1613_v10  ;;  %v5163_v24 = vrot.slane %v9565_v27, 7 }
 0x2e3   : > { %v2364_v14 = vadd.f32 %v2363_v44, %v2362_v21  ;;  %v1604_v16 = vmax.f32 %v1602_v26, %v1603_v41  ;;  %v1740_v25 = vmax.f32 %v1738_v32, %v1739_v59  ;;  %v1745_v15 = vrot.slane %v1744_v43, 2  ;;  %v12086_v41 = vld [vmem:[#allocation59_spill] sm:$0xff] }
 0x2e4   : > { %v2230_v11 = vadd.f32 %v9601_v34, %v2229_v2  ;;  %7617 = vpow2.f32 %v2053_v17  ;;  %v1938_v36 = vsub.f32 %v9526_v54, %v1736_v35  ;;  %v9624_v37 = vadd.f32 %v5163_v24, %v9577_v30  ;;  %v12085_v30 = vld [vmem:[#allocation105_spill] sm:$0xff] }
 0x2e5   : > { %v2227_v38 = vrot.slane %v2226_v49, 1  ;;  %v2367_v48 = vrot.slane %v9613_v13, 4  ;;  %v2235_v3 = vrot.slane %v9616_v33, 4  ;;  %v1610_v63 = vmax.f32 %v1608_v5, %v1609_v61 }
 0x2e6   : > { %12084 = vst [vmem:[#allocation90_spill] sm:$0xff] %v9624_v37  ;;  %v7614_v46 = vpop.eup %7613  ;;  %v2009_v27 = vmul.f32 1.442695, %v1915_v55  ;;  %v1615_v21 = vrot.slane %v1614_v53, 1  ;;  %v826_v26 = vrot.slane %v12044_v0, 4  ;;  %v827_v32 = vrot.slane %v12044_v0, 5 }
 0x2e7   : > { %v7616_v56 = vpop.eup %7615  ;;  %v1916_v10 = vsub.f32 %v9536_v20, %v1604_v16  ;;  %v1741_v54 = vrot.slane %v1740_v25, 1  ;;  %v1746_v44 = vmax.f32 %v1744_v43, %v1745_v15  ;;  %v9633_v59 = vmul.f32 %v12086_v41, %v12085_v30 }
 0x2e8   : > { %v2231_v2 = vrot.slane %v2230_v11, 2  ;;  %v2055_v17 = vmul.f32 1.442695, %v1938_v36  ;;  %v898_v35 = vperm.slane %v826_v26, 0  ;;  %v899_v5 = vperm.slane %v827_v32, 0 }
 0x2e9   : > { %12087 = vst [vmem:[#allocation68_spill] sm:$0xff] %v9633_v59  ;;  %v2222_v61 = vadd.f32 %v2221_v6, %v2220_v18  ;;  %v2365_v55 = vrot.slane %v2364_v14, 1  ;;  %v2236_v24 = vadd.f32 %v9616_v33, %v2235_v3  ;;  %v1917_v37 = vsub.f32 %v9550_v42, %v1610_v63 }
 0x2ea   : > { %v9637_v45 = vpop.eup %7617  ;;  %v2368_v20 = vadd.f32 %v9613_v13, %v2367_v48  ;;  %v1616_v16 = vmax.f32 %v1614_v53, %v1615_v21  ;;  %v1042_v43 = vmul.f32 %v898_v35, %v12052_v29  ;;  %v1043_v15 = vmul.f32 %v899_v5, %v12052_v29  ;;  %v12089_v53 = vld [vmem:[#allocation100_spill] sm:$0xff]  ;;  %v12090_v21 = vld [vmem:[#allocation70_spill] sm:$0xff] }
 0x2eb   : > { %7619 = vpow2.f32 %v2009_v27  ;;  %v2011_v59 = vmul.f32 1.442695, %v1916_v10  ;;  %v1742_v36 = vmax.f32 %v1740_v25, %v1741_v54  ;;  %v1747_v26 = vrot.slane %v1746_v44, 1 }
 0x2ec   : > { %v2228_v32 = vadd.f32 %v2227_v38, %v2226_v49  ;;  %v2232_v18 = vadd.f32 %v2231_v2, %v2230_v11  ;;  %7621 = vpow2.f32 %v2055_v17  ;;  %v1080_v6 = vpack.c.bf16 %v1043_v15, %v1042_v43  ;;  %v12092_v49 = vld [vmem:[#allocation44_spill] sm:$0xff] }
 0x2ed   : > { %v2237_v3 = vrot.slane %v2236_v24, 2  ;;  %v2373_v42 = vrot.slane %v9637_v45, 4  ;;  %v2013_v63 = vmul.f32 1.442695, %v1917_v37  ;;  %v2710_v48 = vmul.f32 %v12088_v23, %v9607_v9 }
 0x2ee   : > { %v9647_v35 = vmul.f32 %v12090_v21, %v12089_v53  ;;  %7623 = vrcp.f32 %v2222_v61  ;;  %v1918_v27 = vsub.f32 %v9568_v4, %v1616_v16  ;;  %1324 = vmatmul.bf16.gmra.mxu3 %v1080_v6  ;;  %v2791_v25 = vmul.f32 %v12092_v49, %v9607_v9 }
 0x2ef   : > { %v2369_v11 = vrot.slane %v2368_v20, 2  ;;  %7625 = vpow2.f32 %v2011_v59  ;;  %v1939_v38 = vsub.f32 %v9572_v50, %v1742_v36  ;;  %v1748_v10 = vmax.f32 %v1746_v44, %v1747_v26  ;;  %v12094_v59 = vld [vmem:[#allocation104_spill] sm:$0xff] }
 0x2f0   : > { %12091 = vst [vmem:[#allocation30_spill] sm:$0xff] %v9647_v35  ;;  %v9654_v37 = vmul.f32 %v7614_v46, %v12063_v28  ;;  %v2360_v54 = vadd.f32 %v2359_v22, %v9610_v7  ;;  %7627 = vrcp.f32 %v2228_v32  ;;  %v2233_v2 = vrot.slane %v2232_v18, 1  ;;  %v12097_v22 = vld [vmem:[#allocation45_spill] sm:$0xff] }
 0x2f1   : > { %v9657_v17 = vpop.eup %7619  ;;  %v2366_v4 = vadd.f32 %v2365_v55, %v2364_v14  ;;  %v2238_v5 = vadd.f32 %v2237_v3, %v2236_v24  ;;  %v2374_v61 = vadd.f32 %v9637_v45, %v2373_v42  ;;  %7629 = vpow2.f32 %v2013_v63  ;;  %v1343_v55 = vld [vmem:[%s8178_s29 + $0x40] sm:$0xff]  ;;  %s6734_s29 = sshll.u32 %s11596_s19, 4  ;;  %s6735_s29 = int_to_ptr.vmem [resolvable:$true] %s6734_s29 }
 0x2f2   : > { %v9660_v16 = vpop.eup %7621  ;;  %v9664_v50 = vmul.f32 %v9512_v62, %v12094_v59  ;;  %v9667_v28 = vmul.f32 %v7616_v56, %v12066_v47  ;;  %v2015_v7 = vmul.f32 1.442695, %v1918_v27  ;;  %v3160_v46 = vmul.f32 %v12097_v22, %v9607_v9  ;;  %1386 = vperm.xlu2 %7467, %v1343_v55   ;;  %v12100_v27 = vld [vmem:[#allocation46_spill] sm:$0xff] }
 0x2f3   : > { %12093 = vst [vmem:[#allocation69_spill] sm:$0xff] %v9660_v16  ;;  %v2370_v44 = vadd.f32 %v2369_v11, %v2368_v20  ;;  %v2057_v43 = vmul.f32 1.442695, %v1939_v38  ;;  %v1940_v14 = vsub.f32 %v9588_v31, %v1748_v10  ;;  %v2935_v24 = vrot.slane %v2791_v25, 1 }
 0x2f4   : > { %12095 = vst [vmem:[#allocation38_spill] sm:$0xff] %v9664_v50  ;;  %v7624_v15 = vpop.eup %7623  ;;  %7631 = vrcp.f32 %v2360_v54  ;;  %v2234_v36 = vadd.f32 %v2233_v2, %v2232_v18  ;;  %v2241_v26 = vrot.slane %v9657_v17, 4  ;;  %v2711_v47 = vmul.f32 %v12088_v23, %v9654_v37  ;;  %v12098_v18 = vld [vmem:[#allocation108_spill] sm:$0xff] }
 0x2f5   : > { %12096 = vst [vmem:[#allocation31_spill] sm:$0xff] %v9667_v28  ;;  %v9676_v62 = vpop.eup %7625  ;;  %7633 = vrcp.f32 %v2366_v4  ;;  %v2239_v56 = vrot.slane %v2238_v5, 1  ;;  %v2375_v32 = vrot.slane %v2374_v61, 2  ;;  %v2379_v20 = vrot.slane %v9660_v16, 4 }
 0x2f6   : > { %v7628_v6 = vpop.eup %7627  ;;  %7635 = vpow2.f32 %v2015_v7  ;;  %v2792_v31 = vmul.f32 %v12092_v49, %v9654_v37  ;;  %v3079_v3 = vadd.f32 %v2935_v24, %v2710_v48  ;;  %v9683_v42 = vmul.f32 %v12086_v41, %v12098_v18 }
 0x2f7   : > { %v9685_v63 = vpop.eup %7629  ;;  %v2371_v53 = vrot.slane %v2370_v44, 1  ;;  %7637 = vpow2.f32 %v2057_v43  ;;  %v2059_v21 = vmul.f32 1.442695, %v1940_v14  ;;  %v9689_v25 = vmul.f32 %v12100_v27, %v9607_v9 }
 0x2f8   : > { %12099 = vst [vmem:[#allocation39_spill] sm:$0xff] %v9683_v42  ;;  %v9692_v11 = vmul.f32 %v7624_v15, %v9479_v19  ;;  %7639 = vrcp.f32 %v2234_v36  ;;  %v2242_v38 = vadd.f32 %v9657_v17, %v2241_v26  ;;  %v2247_v48 = vrot.slane %v9676_v62, 4 }
 0x2f9   : > { %v9697_v10 = vmul.f32 %v7628_v6, %v9538_v1  ;;  %v2240_v54 = vadd.f32 %v2239_v56, %v2238_v5  ;;  %v2376_v2 = vadd.f32 %v2375_v32, %v2374_v61  ;;  %v2380_v4 = vadd.f32 %v9660_v16, %v2379_v20  ;;  %v12104_v6 = vld [vmem:[#allocation47_spill] sm:$0xff] }
 0x2fa   : > { %v9700_v59 = vpop.eup %7631  ;;  %v2253_v7 = vrot.slane %v9685_v63, 4  ;;  %v828_v43 = vrot.slane %v12044_v0, 6  ;;  %v829_v19 = vrot.slane %v12044_v0, 7  ;;  %v3161_v14 = vmul.f32 %v12097_v22, %v9654_v37 }
 0x2fb   : > { %12101 = vst [vmem:[#allocation32_spill] sm:$0xff] %v9700_v59  ;;  %v7634_v55 = vpop.eup %7633  ;;  %v2372_v24 = vadd.f32 %v2371_v53, %v2370_v44  ;;  %7641 = vpow2.f32 %v2059_v21  ;;  %v2936_v1 = vrot.slane %v2792_v31, 1  ;;  %v3304_v15 = vrot.slane %v3160_v46, 2 }
 0x2fc   : > { %v9707_v5 = vpop.eup %7635  ;;  %v2243_v61 = vrot.slane %v2242_v38, 2  ;;  %v2248_v36 = vadd.f32 %v9676_v62, %v2247_v48  ;;  %v900_v26 = vperm.slane %v828_v43, 0  ;;  %v901_v56 = vperm.slane %v829_v19, 0  ;;  %v9722_v43 = vpop.permute.xlu0 %1376 }
 0x2fd   : > { %12102 = vst [vmem:[#allocation40_spill] sm:$0xff] %v9707_v5  ;;  %v9710_v32 = vpop.eup %7637  ;;  %7643 = vrcp.f32 %v2240_v54  ;;  %v2377_v20 = vrot.slane %v2376_v2, 1  ;;  %v3448_v0 = vadd.f32 %v3304_v15, %v3079_v3  ;;  %v9714_v16 = vmul.f32 %v12104_v6, %v9607_v9  ;;  %v1275_v3 = vpop.f32.mrf.mxu3 }
 0x2fe   : > { %12103 = vst [vmem:[#allocation33_spill] sm:$0xff] %v9710_v32  ;;  %v7640_v44 = vpop.eup %7639  ;;  %v2381_v53 = vrot.slane %v2380_v4, 2  ;;  %v2254_v46 = vadd.f32 %v9685_v63, %v2253_v7  ;;  %v1044_v31 = vmul.f32 %v900_v26, %v12052_v29  ;;  %v1045_v21 = vmul.f32 %v901_v56, %v12052_v29 }
 0x2ff   : > { %v9720_v48 = vmul.f32 %v7634_v55, %v9543_v57  ;;  %12106 = vst [vmem:[#allocation34_spill] sm:$0xff] %v9722_v43  ;;  %v2259_v54 = vrot.slane %v9707_v5, 4  ;;  %v3080_v19 = vadd.f32 %v2936_v1, %v2711_v47  ;;  %v9727_v15 = vmul.f32 %v12100_v27, %v9654_v37  ;;  %v12109_v57 = vld [vmem:[#allocation89_spill] sm:$0xff]  ;;  %v12110_v47 = vld [vmem:[#allocation60_spill] sm:$0xff] }
 0x300   : > { %v2244_v13 = vadd.f32 %v2243_v61, %v2242_v38  ;;  %v2249_v42 = vrot.slane %v2248_v36, 2  ;;  %v2385_v7 = vrot.slane %v9710_v32, 4  ;;  %v1081_v26 = vpack.c.bf16 %v1045_v21, %v1044_v31 }
 0x301   : > { %12105 = vst [vmem:[#allocation41_spill] sm:$0xff] %v9720_v48  ;;  %v9730_v59 = vpop.eup %7641  ;;  %v9733_v29 = vmul.f32 %v7640_v44, %v9601_v34  ;;  %7645 = vrcp.f32 %v2372_v24  ;;  %v2804_v55 = vmul.f32 %v12055_v51, %v12109_v57  ;;  %v9739_v1 = vmul.f32 %v12110_v47, %v12085_v30  ;;  %v12113_v44 = vld [vmem:[#allocation48_spill] sm:$0xff] }
 0x302   : > { %12107 = vst [vmem:[#allocation42_spill] sm:$0xff] %v9730_v59  ;;  %v2378_v56 = vadd.f32 %v2377_v20, %v2376_v2  ;;  %v2382_v48 = vadd.f32 %v2381_v53, %v2380_v4  ;;  %v2255_v38 = vrot.slane %v2254_v46, 2  ;;  %v9742_v61 = vadd.f32 %v9722_v43, %v1275_v3  ;;  %1329 = vmatmul.bf16.gmra.mxu3 %v1081_v26 }
 0x303   : > { %12108 = vst [vmem:[#allocation106_spill] sm:$0xff] %v9733_v29  ;;  %v7644_v31 = vpop.eup %7643  ;;  %v2260_v21 = vadd.f32 %v9707_v5, %v2259_v54  ;;  %v3305_v34 = vrot.slane %v3161_v14, 2  ;;  %v3673_v24 = vrot.slane %v9689_v25, 3  ;;  %v9748_v28 = vmul.f32 %v12113_v44, %v9607_v9 }
 0x304   : > { %12111 = vst [vmem:[#allocation109_spill] sm:$0xff] %v9739_v1  ;;  %v2245_v50 = vrot.slane %v2244_v13, 1  ;;  %v2250_v30 = vadd.f32 %v2249_v42, %v2248_v36  ;;  %v2386_v2 = vadd.f32 %v9710_v32, %v2385_v7  ;;  %v2391_v4 = vrot.slane %v9730_v59, 4 }
 0x305   : > { %12112 = vst [vmem:[#allocation110_spill] sm:$0xff] %v9742_v61  ;;  %v2948_v20 = vrot.slane %v2804_v55, 1  ;;  %v3449_v53 = vadd.f32 %v3305_v34, %v3080_v19  ;;  %v3817_v3 = vadd.f32 %v3673_v24, %v3448_v0  ;;  %v9754_v26 = vmul.f32 %v12104_v6, %v9654_v37  ;;  %v12116_v55 = vld [vmem:[#allocation99_spill] sm:$0xff] }
 0x306   : > { %v9757_v14 = vmul.f32 %v7644_v31, %v9616_v33  ;;  %7647 = vrcp.f32 %v2378_v56  ;;  %v2256_v25 = vadd.f32 %v2255_v38, %v2254_v46  ;;  %v1749_v54 = vrot.slane %v9742_v61, 4  ;;  %v12117_v33 = vld [vmem:[#allocation49_spill] sm:$0xff]  ;;  %v12119_v46 = vld [vmem:[#allocation112_spill] sm:$0xff] }
 0x307   : > { %v9760_v1 = vpop.eup %7645  ;;  %v2383_v42 = vrot.slane %v2382_v48, 1  ;;  %v2261_v36 = vrot.slane %v2260_v21, 2  ;;  %v2723_v7 = vmul.f32 %v12046_v58, %v12109_v57  ;;  %v3173_v0 = vmul.f32 %v12060_v39, %v12109_v57 }
 0x308   : > { %12114 = vst [vmem:[#allocation94_spill] sm:$0xff] %v9757_v14  ;;  %v2387_v19 = vrot.slane %v2386_v2, 2  ;;  %v2806_v34 = vmul.f32 %v12055_v51, %v12116_v55  ;;  %v9770_v56 = vmul.f32 %v12117_v33, %v9607_v9  ;;  %v9774_v38 = vmul.f32 %v12086_v41, %v12119_v46 }
 0x309   : > { %12115 = vst [vmem:[#allocation21_spill] sm:$0xff] %v9760_v1  ;;  %v2246_v31 = vadd.f32 %v2245_v50, %v2244_v13  ;;  %v2251_v24 = vrot.slane %v2250_v30, 1  ;;  %v2392_v32 = vadd.f32 %v9730_v59, %v2391_v4  ;;  %v3092_v1 = vadd.f32 %v2948_v20, %v2723_v7 }
 0x30a   : > { %12118 = vst [vmem:[#allocation80_spill] sm:$0xff] %v9770_v56  ;;  %v2257_v14 = vrot.slane %v2256_v25, 1  ;;  %v1750_v6 = vmax.f32 %v9742_v61, %v1749_v54  ;;  %v4042_v27 = vrot.slane %v9714_v16, 4  ;;  %v9781_v51 = vmul.f32 %v12113_v44, %v9654_v37  ;;  %v1277_v61 = vpop.f32.mrf.mxu3 }
 0x30b   : > { %12120 = vst [vmem:[#allocation51_spill] sm:$0xff] %v9774_v38  ;;  %v2262_v29 = vadd.f32 %v2261_v36, %v2260_v21  ;;  %v3317_v5 = vrot.slane %v3173_v0, 2  ;;  %v3542_v46 = vmul.f32 %v12065_v60, %v12109_v57  ;;  %v3674_v13 = vrot.slane %v9727_v15, 3 }
 0x30c   : > { %v7648_v50 = vpop.eup %7647  ;;  %v2384_v38 = vadd.f32 %v2383_v42, %v2382_v48  ;;  %v2388_v4 = vadd.f32 %v2387_v19, %v2386_v2  ;;  %v2950_v20 = vrot.slane %v2806_v34, 1  ;;  %v4186_v7 = vadd.f32 %v4042_v27, %v3817_v3 }
 0x30d   : > { %v2252_v59 = vadd.f32 %v2251_v24, %v2250_v30  ;;  %v2393_v54 = vrot.slane %v2392_v32, 2  ;;  %v3461_v16 = vadd.f32 %v3317_v5, %v3092_v1  ;;  %v3818_v40 = vadd.f32 %v3674_v13, %v3449_v53  ;;  %v12121_v1 = vld [vmem:[#allocation50_spill] sm:$0xff] }
 0x30e   : > { %7649 = vrcp.f32 %v2246_v31  ;;  %v1751_v44 = vrot.slane %v1750_v6, 2  ;;  %v2725_v21 = vmul.f32 %v12046_v58, %v12116_v55  ;;  %v3175_v36 = vmul.f32 %v12060_v39, %v12116_v55 }
 0x30f   : > { %v2258_v0 = vadd.f32 %v2257_v14, %v2256_v25  ;;  %v2263_v15 = vrot.slane %v2262_v29, 1  ;;  %v3686_v56 = vrot.slane %v3542_v46, 3  ;;  %v3911_v48 = vmul.f32 %v12069_v12, %v12109_v57 }
 0x310   : > { %v2389_v27 = vrot.slane %v2388_v4, 1  ;;  %v3094_v30 = vadd.f32 %v2950_v20, %v2725_v21  ;;  %v9794_v5 = vmul.f32 %v12117_v33, %v9654_v37  ;;  %v9798_v2 = vmul.f32 %v12121_v1, %v9607_v9 }
 0x311   : > { %7651 = vrcp.f32 %v2252_v59  ;;  %v2394_v53 = vadd.f32 %v2393_v54, %v2392_v32  ;;  %v3830_v3 = vadd.f32 %v3686_v56, %v3461_v16  ;;  %v9802_v14 = vmul.f32 %v12086_v41, %v9494_v8 }
 0x312   : > { %v1752_v25 = vmax.f32 %v1750_v6, %v1751_v44  ;;  %v3319_v42 = vrot.slane %v3175_v36, 2  ;;  %v3544_v19 = vmul.f32 %v12065_v60, %v12116_v55  ;;  %v4043_v34 = vrot.slane %v9754_v26, 4 }
 0x313   : > { %12122 = vst [vmem:[#allocation114_spill] sm:$0xff] %v9802_v14  ;;  %7653 = vrcp.f32 %v2258_v0  ;;  %v2264_v46 = vadd.f32 %v2263_v15, %v2262_v29  ;;  %v4055_v31 = vrot.slane %v3911_v48, 4  ;;  %v4280_v9 = vmul.f32 %v12071_v52, %v12109_v57 }
 0x314   : > { %v7650_v59 = vpop.eup %7649  ;;  %v9810_v32 = vmul.f32 %v7648_v50, %v9637_v45  ;;  %v9813_v56 = vadd.f32 %v9722_v43, %v1277_v61  ;;  %v3463_v6 = vadd.f32 %v3319_v42, %v3094_v30  ;;  %v4187_v44 = vadd.f32 %v4043_v34, %v3818_v40  ;;  %v1280_v45 = vpop.f32.mrf.mxu3  ;;  %v12125_v61 = vld [vmem:[#allocation57_spill] sm:$0xff] }
 0x315   : > { %7655 = vrcp.f32 %v2384_v38  ;;  %v2390_v24 = vadd.f32 %v2389_v27, %v2388_v4  ;;  %v4199_v13 = vadd.f32 %v4055_v31, %v3830_v3  ;;  %v4411_v26 = vrot.slane %v9748_v28, 5 }
 0x316   : > { %12123 = vst [vmem:[#allocation81_spill] sm:$0xff] %v9810_v32  ;;  %v2395_v20 = vrot.slane %v2394_v53, 1  ;;  %v1753_v29 = vrot.slane %v1752_v25, 1  ;;  %v3688_v54 = vrot.slane %v3544_v19, 3  ;;  %v3913_v16 = vmul.f32 %v12069_v12, %v12116_v55 }
 0x317   : > { %12124 = vst [vmem:[#allocation29_spill] sm:$0xff] %v9813_v56  ;;  %v7652_v21 = vpop.eup %7651  ;;  %7657 = vrcp.f32 %v2264_v46  ;;  %v4424_v50 = vrot.slane %v4280_v9, 5  ;;  %v4555_v36 = vadd.f32 %v4411_v26, %v4186_v7  ;;  %v4649_v0 = vmul.f32 %v12125_v61, %v12109_v57 }
 0x318   : > { %v1755_v40 = vrot.slane %v9813_v56, 4  ;;  %v3832_v38 = vadd.f32 %v3688_v54, %v3463_v6  ;;  %v4282_v28 = vmul.f32 %v12071_v52, %v12116_v55  ;;  %v9825_v4 = vmul.f32 %v12121_v1, %v9654_v37 }
 0x319   : > { %v7654_v15 = vpop.eup %7653  ;;  %v2793_v48 = vmul.f32 %v12092_v49, %v9692_v11  ;;  %v4568_v27 = vadd.f32 %v4424_v50, %v4199_v13  ;;  %v9831_v7 = vmul.f32 %v12086_v41, %v9647_v35  ;;  %v9835_v30 = vmul.f32 %v12110_v47, %v12098_v18  ;;  %v12134_v50 = vld [vmem:[#allocation80_spill] sm:$0xff] }
 0x31a   : > { %v9838_v3 = vmul.f32 %v7650_v59, %v9657_v17  ;;  %7659 = vrcp.f32 %v2390_v24  ;;  %v9841_v37 = vadd.f32 %v9722_v43, %v1280_v45  ;;  %v9845_v42 = vmul.f32 %v12125_v61, %v12116_v55 }
 0x31b   : > { %12126 = vst [vmem:[#allocation101_spill] sm:$0xff] %v9831_v7  ;;  %v9847_v19 = vpop.eup %7655  ;;  %v9850_v34 = vmul.f32 %v7652_v21, %v9676_v62  ;;  %v9852_v46 = vadd.f32 %v2395_v20, %v2394_v53  ;;  %v4057_v31 = vrot.slane %v3913_v16, 4  ;;  %v4793_v9 = vrot.slane %v4649_v0, 6 }
 0x31c   : > { %12127 = vst [vmem:[#allocation97_spill] sm:$0xff] %v9835_v30  ;;  %v9855_v17 = vmul.f32 %v7654_v15, %v9685_v63  ;;  %v9857_v59 = vmax.f32 %v1752_v25, %v1753_v29  ;;  %v9860_v6 = vmax.f32 %v9813_v56, %v1755_v40  ;;  %v4426_v24 = vrot.slane %v4282_v28, 5  ;;  %v12133_v25 = vld [vmem:[#allocation58_spill] sm:$0xff]  ;;  %v12135_v40 = vld [vmem:[#allocation83_spill] sm:$0xff]  ;;  %v12137_v15 = vld [vmem:[#allocation40_spill] sm:$0xff]  ;;  %v1282_v53 = vpop.f32.mrf.mxu3 }
 0x31d   : > { %12128 = vst [vmem:[#allocation82_spill] sm:$0xff] %v9841_v37  ;;  %v7658_v13 = vpop.eup %7657  ;;  %v2794_v26 = vmul.f32 %v12092_v49, %v9697_v10  ;;  %v2937_v54 = vrot.slane %v2793_v48, 1  ;;  %v4201_v62 = vadd.f32 %v4057_v31, %v3832_v38  ;;  %v4937_v21 = vadd.f32 %v4793_v9, %v4568_v27  ;;  %v12138_v27 = vld [vmem:[#allocation84_spill] sm:$0xff]  ;;  %v12139_v31 = vld [vmem:[#allocation85_spill] sm:$0xff] }
 0x31e   : > { %12129 = vst [vmem:[#allocation92_spill] sm:$0xff] %v9847_v19  ;;  %v4412_v20 = vrot.slane %v9781_v51, 5  ;;  %v5018_v29 = vmul.f32 %v12133_v25, %v12109_v57  ;;  %v2712_v16 = vmul.f32 %v12088_v23, %v9692_v11  ;;  %v3162_v45 = vmul.f32 %v12097_v22, %v9692_v11 }
 0x31f   : > { %12130 = vst [vmem:[#allocation115_spill] sm:$0xff] %v9852_v46  ;;  %v4780_v0 = vrot.slane %v12134_v50, 6  ;;  %v5375_v38 = vpack.c.bf16 %v12135_v40, %v12135_v40  ;;  %v9879_v51 = vmul.f32 %v7658_v13, %v12137_v15  ;;  %v5376_v57 = vpack.c.bf16 %v12138_v27, %v12138_v27  ;;  %v12140_v40 = vld [vmem:[#allocation106_spill] sm:$0xff] }
 0x320   : > { %12131 = vst [vmem:[#allocation95_spill] sm:$0xff] %v9857_v59  ;;  %v9876_v28 = vpop.eup %7659  ;;  %v4556_v48 = vadd.f32 %v4412_v20, %v4187_v44  ;;  %v5377_v9 = vpack.c.bf16 %v12139_v31, %v12139_v31  ;;  %v2938_v63 = vrot.slane %v2794_v26, 1  ;;  %v3081_v56 = vadd.f32 %v2937_v54, %v2712_v16  ;;  %v12141_v44 = vld [vmem:[#allocation46_spill] sm:$0xff]  ;;  %v12143_v16 = vld [vmem:[#allocation47_spill] sm:$0xff] }
 0x321   : > { %12132 = vst [vmem:[#allocation27_spill] sm:$0xff] %v9860_v6  ;;  %v9885_v7 = vadd.f32 %v4780_v0, %v4555_v36  ;;  %v9889_v50 = vmul.f32 %v12133_v25, %v12116_v55  ;;  %v2795_v13 = vmul.f32 %v12092_v49, %v12140_v40  ;;  %v3531_v20 = vmul.f32 %v12141_v44, %v9692_v11 }
 0x322   : > { %12136 = vst [vmem:[#allocation53_spill] sm:$0xff] %v9876_v28  ;;  %v9895_v15 = vadd.f32 %v4426_v24, %v4201_v62  ;;  %v5162_v27 = vrot.slane %v5018_v29, 7  ;;  %v2713_v31 = vmul.f32 %v12088_v23, %v9697_v10  ;;  %v3163_v36 = vmul.f32 %v12097_v22, %v9697_v10 }
 0x323   : > { %v3306_v26 = vrot.slane %v3162_v45, 2  ;;  %v9901_v54 = vunpack.c.l.b16 %v5375_v38  ;;  %v9904_v55 = vadd.f32 %v9722_v43, %v1282_v53  ;;  %v3900_v0 = vmul.f32 %v12143_v16, %v9692_v11  ;;  %v12146_v45 = vld [vmem:[#allocation94_spill] sm:$0xff] }
 0x324   : > { %v9908_v14 = vunpack.c.l.b16 %v5376_v57  ;;  %v9910_v24 = vunpack.c.l.b16 %v5377_v9  ;;  %v3082_v62 = vadd.f32 %v2938_v63, %v2713_v31  ;;  %v3532_v28 = vmul.f32 %v12141_v44, %v9697_v10 }
 0x325   : > { %12142 = vst [vmem:[#allocation71_spill] sm:$0xff] %v9904_v55  ;;  %v3450_v29 = vadd.f32 %v3306_v26, %v3081_v56  ;;  %v9914_v19 = vadd.f32 %v5162_v27, %v4937_v21  ;;  %v2796_v38 = vmul.f32 %v12092_v49, %v12146_v45  ;;  %v2939_v18 = vrot.slane %v2795_v13, 1  ;;  %v12147_v56 = vld [vmem:[#allocation48_spill] sm:$0xff] }
 0x326   : > { %12144 = vst [vmem:[#allocation102_spill] sm:$0xff] %v9908_v14  ;;  %v3675_v53 = vrot.slane %v3531_v20, 3  ;;  %v4781_v43 = vrot.slane %v9794_v5, 6  ;;  %v2714_v57 = vmul.f32 %v12088_v23, %v12140_v40  ;;  %v3164_v9 = vmul.f32 %v12097_v22, %v12140_v40 }
 0x327   : > { %12145 = vst [vmem:[#allocation77_spill] sm:$0xff] %v9910_v24  ;;  %v3307_v63 = vrot.slane %v3163_v36, 2  ;;  %v4269_v31 = vmul.f32 %v12147_v56, %v9692_v11  ;;  %v2715_v21 = vmul.f32 %v12088_v23, %v12146_v45  ;;  %v3901_v27 = vmul.f32 %v12143_v16, %v9697_v10 }
 0x328   : > { %v4044_v13 = vrot.slane %v3900_v0, 4  ;;  %v9929_v20 = vadd.f32 %v4781_v43, %v4556_v48  ;;  %v3533_v26 = vmul.f32 %v12141_v44, %v12140_v40  ;;  %v3676_v6 = vrot.slane %v3532_v28, 3 }
 0x329   : > { %v3451_v5 = vadd.f32 %v3307_v63, %v3082_v62  ;;  %v3819_v59 = vadd.f32 %v3675_v53, %v3450_v29  ;;  %v2940_v32 = vrot.slane %v2796_v38, 1  ;;  %v3083_v36 = vadd.f32 %v2939_v18, %v2714_v57 }
 0x32a   : > { %v3165_v46 = vmul.f32 %v12097_v22, %v12146_v45  ;;  %v4270_v55 = vmul.f32 %v12147_v56, %v9697_v10  ;;  %v2797_v30 = vmul.f32 %v12092_v49, %v9838_v3  ;;  %v3308_v0 = vrot.slane %v3164_v9, 2 }
 0x32b   : > { %v4413_v43 = vrot.slane %v4269_v31, 5  ;;  %v4638_v48 = vmul.f32 %v12117_v33, %v9692_v11  ;;  %v3534_v28 = vmul.f32 %v12141_v44, %v12146_v45  ;;  %v3902_v18 = vmul.f32 %v12143_v16, %v12140_v40 }
 0x32c   : > { %v4045_v62 = vrot.slane %v3901_v27, 4  ;;  %v2716_v38 = vmul.f32 %v12088_v23, %v9838_v3  ;;  %v3677_v53 = vrot.slane %v3533_v26, 3  ;;  %v3820_v57 = vadd.f32 %v3676_v6, %v3451_v5 }
 0x32d   : > { %v4188_v63 = vadd.f32 %v4044_v13, %v3819_v59  ;;  %v3084_v9 = vadd.f32 %v2940_v32, %v2715_v21  ;;  %v3309_v31 = vrot.slane %v3165_v46, 2  ;;  %v3452_v37 = vadd.f32 %v3308_v0, %v3083_v36  ;;  %v12148_v13 = vld [vmem:[#allocation52_spill] sm:$0xff] }
 0x32e   : > { %v4414_v35 = vrot.slane %v4270_v55, 5  ;;  %v2798_v8 = vmul.f32 %v12092_v49, %v9850_v34  ;;  %v2941_v47 = vrot.slane %v2797_v30, 1  ;;  %v9952_v24 = vmul.f32 %v12147_v56, %v12140_v40 }
 0x32f   : > { %v9956_v27 = vmul.f32 %v12117_v33, %v9697_v10  ;;  %v3166_v6 = vmul.f32 %v12097_v22, %v9838_v3  ;;  %v3678_v59 = vrot.slane %v3534_v28, 3  ;;  %v4046_v32 = vrot.slane %v3902_v18, 4 }
 0x330   : > { %v4782_v46 = vrot.slane %v4638_v48, 6  ;;  %v2717_v55 = vmul.f32 %v12088_v23, %v9850_v34  ;;  %v3903_v49 = vmul.f32 %v12143_v16, %v12146_v45  ;;  %v4189_v30 = vadd.f32 %v4045_v62, %v3820_v57 }
 0x331   : > { %v9966_v21 = vmul.f32 %v12121_v1, %v9692_v11  ;;  %v2799_v5 = vmul.f32 %v12148_v13, %v9855_v17  ;;  %v3535_v26 = vmul.f32 %v12141_v44, %v9838_v3  ;;  %v3821_v36 = vadd.f32 %v3677_v53, %v3452_v37 }
 0x332   : > { %v4557_v0 = vadd.f32 %v4413_v43, %v4188_v63  ;;  %v2942_v48 = vrot.slane %v2798_v8, 1  ;;  %v3085_v28 = vadd.f32 %v2941_v47, %v2716_v38  ;;  %v3453_v18 = vadd.f32 %v3309_v31, %v3084_v9 }
 0x333   : > { %v4415_v23 = vrot.slane %v9952_v24, 5  ;;  %v3167_v62 = vmul.f32 %v12097_v22, %v9850_v34  ;;  %v3310_v57 = vrot.slane %v3166_v6, 2  ;;  %v9977_v11 = vmul.f32 %v12117_v33, %v12140_v40 }
 0x334   : > { %v9981_v29 = vmul.f32 %v12121_v1, %v9697_v10  ;;  %v4047_v14 = vrot.slane %v3903_v49, 4  ;;  %v9985_v8 = vmul.f32 %v12147_v56, %v12146_v45  ;;  %v2718_v22 = vmul.f32 %v12046_v58, %v9855_v17 }
 0x335   : > { %v2943_v24 = vrot.slane %v2799_v5, 1  ;;  %v3679_v43 = vrot.slane %v3535_v26, 3  ;;  %v4190_v38 = vadd.f32 %v4046_v32, %v3821_v36  ;;  %v2800_v53 = vmul.f32 %v12148_v13, %v9879_v51 }
 0x336   : > { %v3086_v10 = vadd.f32 %v2942_v48, %v2717_v55  ;;  %v3454_v63 = vadd.f32 %v3310_v57, %v3085_v28  ;;  %v9993_v9 = vadd.f32 %v4414_v35, %v4189_v30  ;;  %v3168_v31 = vmul.f32 %v12060_v39, %v9855_v17 }
 0x337   : > { %v3311_v6 = vrot.slane %v3167_v62, 2  ;;  %v3536_v49 = vmul.f32 %v12141_v44, %v9850_v34  ;;  %v3822_v37 = vadd.f32 %v3678_v59, %v3453_v18  ;;  %v3904_v5 = vmul.f32 %v12143_v16, %v9838_v3 }
 0x338   : > { %v4416_v32 = vrot.slane %v9985_v8, 5  ;;  %v10004_v13 = vmul.f32 %v12117_v33, %v12146_v45  ;;  %v10006_v55 = vadd.f32 %v4782_v46, %v4557_v0  ;;  %v3087_v35 = vadd.f32 %v2943_v24, %v2718_v22 }
 0x339   : > { %v4784_v30 = vrot.slane %v9977_v11, 6  ;;  %v10011_v26 = vmul.f32 %v12121_v1, %v12140_v40  ;;  %v2944_v59 = vrot.slane %v2800_v53, 1  ;;  %v3169_v36 = vmul.f32 %v12060_v39, %v9879_v51 }
 0x33a   : > { %v3455_v48 = vadd.f32 %v3311_v6, %v3086_v10  ;;  %v4273_v28 = vmul.f32 %v12147_v56, %v9838_v3  ;;  %v2719_v46 = vmul.f32 %v12046_v58, %v9879_v51  ;;  %v3312_v0 = vrot.slane %v3168_v31, 2 }
 0x33b   : > { %v3537_v18 = vmul.f32 %v12065_v60, %v9855_v17  ;;  %v3905_v40 = vmul.f32 %v12143_v16, %v9850_v34  ;;  %v3680_v62 = vrot.slane %v3536_v49, 3  ;;  %v3823_v57 = vadd.f32 %v3679_v43, %v3454_v63 }
 0x33c   : > { %v4048_v11 = vrot.slane %v3904_v5, 4  ;;  %v5152_v8 = vrot.slane %v9981_v29, 7  ;;  %v3088_v39 = vadd.f32 %v2944_v59, %v2719_v46  ;;  %v3456_v22 = vadd.f32 %v3312_v0, %v3087_v35 }
 0x33d   : > { %v3906_v24 = vmul.f32 %v12069_v12, %v9855_v17  ;;  %v4191_v53 = vadd.f32 %v4047_v14, %v3822_v37  ;;  %v3313_v10 = vrot.slane %v3169_v36, 2  ;;  %v3538_v58 = vmul.f32 %v12065_v60, %v9879_v51 }
 0x33e   : > { %v3824_v31 = vadd.f32 %v3680_v62, %v3455_v48  ;;  %v4417_v6 = vrot.slane %v4273_v28, 5  ;;  %v3681_v44 = vrot.slane %v3537_v18, 3  ;;  %v4049_v47 = vrot.slane %v3905_v40, 4 }
 0x33f   : > { %v4559_v16 = vadd.f32 %v4415_v23, %v4190_v38  ;;  %v4642_v43 = vmul.f32 %v12117_v33, %v9838_v3  ;;  %v3457_v63 = vadd.f32 %v3313_v10, %v3088_v39  ;;  %v3682_v49 = vrot.slane %v3538_v58, 3 }
 0x340   : > { %v4192_v5 = vadd.f32 %v4048_v11, %v3823_v57  ;;  %v4274_v35 = vmul.f32 %v12147_v56, %v9850_v34  ;;  %v3825_v59 = vadd.f32 %v3681_v44, %v3456_v22  ;;  %v3907_v14 = vmul.f32 %v12069_v12, %v9879_v51 }
 0x341   : > { %v4050_v37 = vrot.slane %v3906_v24, 4  ;;  %v4785_v60 = vrot.slane %v10004_v13, 6  ;;  %v3826_v36 = vadd.f32 %v3682_v49, %v3457_v63  ;;  %v4193_v48 = vadd.f32 %v4049_v47, %v3824_v31 }
 0x342   : > { %v4275_v23 = vmul.f32 %v12071_v52, %v9855_v17  ;;  %v5010_v38 = vmul.f32 %v12121_v1, %v12146_v45  ;;  %v4051_v28 = vrot.slane %v3907_v14, 4  ;;  %v4276_v56 = vmul.f32 %v12071_v52, %v9879_v51 }
 0x343   : > { %v4194_v46 = vadd.f32 %v4050_v37, %v3825_v59  ;;  %v4560_v44 = vadd.f32 %v4416_v32, %v4191_v53  ;;  %v4418_v0 = vrot.slane %v4274_v35, 5  ;;  %v4561_v12 = vadd.f32 %v4417_v6, %v4192_v5 }
 0x344   : > { %v4419_v18 = vrot.slane %v4275_v23, 5  ;;  %v4643_v13 = vmul.f32 %v12117_v33, %v9850_v34  ;;  %v4195_v40 = vadd.f32 %v4051_v28, %v3826_v36  ;;  %v4420_v47 = vrot.slane %v4276_v56, 5 }
 0x345   : > { %v4644_v62 = vmul.f32 %v12125_v61, %v9855_v17  ;;  %v4645_v45 = vmul.f32 %v12125_v61, %v9879_v51  ;;  %v4562_v57 = vadd.f32 %v4418_v0, %v4193_v48  ;;  %v12149_v52 = vrot.slane %v9956_v27, 6 }
 0x346   : > { %v4563_v11 = vadd.f32 %v4419_v18, %v4194_v46  ;;  %v4928_v39 = vadd.f32 %v4784_v30, %v4559_v16  ;;  %v4564_v22 = vadd.f32 %v4420_v47, %v4195_v40  ;;  %v4786_v24 = vrot.slane %v4642_v43, 6 }
 0x347   : > { %v4927_v32 = vadd.f32 %v12149_v52, %v9993_v9  ;;  %v5011_v33 = vmul.f32 %v12121_v1, %v9838_v3  ;;  %v5153_v53 = vrot.slane %v10011_v26, 7  ;;  %v4787_v10 = vrot.slane %v4643_v13, 6 }
 0x348   : > { %v4788_v58 = vrot.slane %v4644_v62, 6  ;;  %v4789_v31 = vrot.slane %v4645_v45, 6  ;;  %v5012_v61 = vmul.f32 %v12121_v1, %v9850_v34  ;;  %v4929_v6 = vadd.f32 %v4785_v60, %v4560_v44 }
 0x349   : > { %v4930_v63 = vadd.f32 %v4786_v24, %v4561_v12  ;;  %v5013_v27 = vmul.f32 %v12133_v25, %v9855_v17  ;;  %v5154_v9 = vrot.slane %v5010_v38, 7  ;;  %v4931_v30 = vadd.f32 %v4787_v10, %v4562_v57 }
 0x34a   : > { %v4932_v16 = vadd.f32 %v4788_v58, %v4563_v11  ;;  %v4933_v43 = vadd.f32 %v4789_v31, %v4564_v22  ;;  %v5014_v3 = vmul.f32 %v12133_v25, %v9879_v51  ;;  %v5155_v49 = vrot.slane %v5011_v33, 7  ;;  %v10080_v11 = vpop.f32.mrf.mxu3 }
 0x34b   : > { %v5156_v26 = vrot.slane %v5012_v61, 7  ;;  %v12150_v5 = vrot.slane %v9798_v2, 7  ;;  %v12151_v1 = vrot.slane %v9825_v4, 7  ;;  %v5157_v59 = vrot.slane %v5013_v27, 7 }
 0x34c   : > { %v5158_v14 = vrot.slane %v5014_v3, 7  ;;  %v12152_v17 = vrot.slane %v9966_v21, 7  ;;  %v5296_v60 = vadd.f32 %v5152_v8, %v4927_v32  ;;  %v12153_v25 = vrot.slane %v9845_v42, 6  ;;  %v12156_v3 = vld [vmem:[#allocation31_spill] sm:$0xff] }
 0x34d   : > { %v5293_v35 = vadd.f32 %v12150_v5, %v9885_v7  ;;  %v5294_v34 = vadd.f32 %v12151_v1, %v9929_v20  ;;  %v5297_v36 = vadd.f32 %v5153_v53, %v4928_v39  ;;  %v5298_v2 = vadd.f32 %v5154_v9, %v4929_v6 }
 0x34e   : > { %v5295_v37 = vadd.f32 %v12152_v17, %v10006_v55  ;;  %v4939_v51 = vadd.f32 %v12153_v25, %v9895_v15  ;;  %v5299_v7 = vadd.f32 %v5155_v49, %v4930_v63  ;;  %v5164_v48 = vrot.slane %v9889_v50, 7  ;;  %v12154_v15 = vld [vmem:[#allocation90_spill] sm:$0xff]  ;;  %v12157_v49 = vld [vmem:[#allocation67_spill] sm:$0xff]  ;;  %v12160_v25 = vld [vmem:[#allocation41_spill] sm:$0xff] }
 0x34f   : > { %v5300_v4 = vadd.f32 %v5156_v26, %v4931_v30  ;;  %v5301_v20 = vadd.f32 %v5157_v59, %v4932_v16  ;;  %v5302_v23 = vadd.f32 %v5158_v14, %v4933_v43  ;;  %v5365_v38 = vpack.c.bf16 %v5293_v35, %v5293_v35  ;;  %v12155_v16 = vld [vmem:[#allocation38_spill] sm:$0xff] }
 0x350   : > { %v5366_v28 = vpack.c.bf16 %v5294_v34, %v5294_v34  ;;  %v5367_v46 = vpack.c.bf16 %v5295_v37, %v5295_v37  ;;  %v5368_v21 = vpack.c.bf16 %v5296_v60, %v5296_v60  ;;  %v5369_v55 = vpack.c.bf16 %v5297_v36, %v5297_v36  ;;  %v12158_v34 = vld [vmem:[#allocation102_spill] sm:$0xff]  ;;  %v12159_v37 = vld [vmem:[#allocation77_spill] sm:$0xff] }
 0x351   : > { %v5370_v56 = vpack.c.bf16 %v5298_v2, %v5298_v2  ;;  %v5371_v29 = vpack.c.bf16 %v5299_v7, %v5299_v7  ;;  %v5372_v8 = vpack.c.bf16 %v5300_v4, %v5300_v4  ;;  %v5308_v44 = vadd.f32 %v5164_v48, %v4939_v51 }
 0x352   : > { %v5374_v0 = vpack.c.bf16 %v5302_v23, %v5302_v23  ;;  %v5378_v42 = vpack.c.bf16 %v9914_v19, %v9914_v19  ;;  %v5379_v18 = vpack.c.bf16 %v12154_v15, %v12154_v15  ;;  %v5552_v50 = vunpack.c.l.b16 %v5366_v28  ;;  %v12161_v23 = vld [vmem:[#allocation112_spill] sm:$0xff] }
 0x353   : > { %v5553_v12 = vunpack.c.l.b16 %v5367_v46  ;;  %v5554_v13 = vunpack.c.l.b16 %v5368_v21  ;;  %v5555_v40 = vunpack.c.l.b16 %v5369_v55  ;;  %v5373_v47 = vpack.c.bf16 %v5301_v20, %v5301_v20  ;;  %v12163_v46 = vld [vmem:[#allocation88_spill] sm:$0xff] }
 0x354   : > { %v5556_v62 = vunpack.c.l.b16 %v5370_v56  ;;  %v5557_v45 = vunpack.c.l.b16 %v5371_v29  ;;  %v5658_v57 = vrot.slane %v9901_v54, 6  ;;  %v5551_v52 = vunpack.c.l.b16 %v5365_v38  ;;  %v12162_v38 = vld [vmem:[#allocation60_spill] sm:$0xff]  ;;  %v12164_v29 = vld [vmem:[#allocation30_spill] sm:$0xff] }
 0x355   : > { %v5558_v32 = vunpack.c.l.b16 %v5372_v8  ;;  %v5560_v39 = vunpack.c.l.b16 %v5374_v0  ;;  %v5642_v22 = vrot.slane %v5552_v50, 7  ;;  %v5380_v24 = vpack.c.bf16 %v5308_v44, %v5308_v44  ;;  %v12165_v0 = vld [vmem:[#allocation82_spill] sm:$0xff] }
 0x356   : > { %v5644_v19 = vrot.slane %v5553_v12, 6  ;;  %v5646_v33 = vrot.slane %v5554_v13, 5  ;;  %v5648_v53 = vrot.slane %v5555_v40, 4  ;;  %v5564_v10 = vunpack.c.l.b16 %v5378_v42  ;;  %v12167_v12 = vld [vmem:[#allocation109_spill] sm:$0xff] }
 0x357   : > { %v5565_v58 = vunpack.c.l.b16 %v5379_v18  ;;  %v5643_v31 = vsel %vm5608_vm0, %v5642_v22, %v5551_v52  ;;  %v5650_v61 = vrot.slane %v5556_v62, 3  ;;  %v5559_v6 = vunpack.c.l.b16 %v5373_v47  ;;  %v1287_v18 = vpop.f32.mrf.mxu3  ;;  %v12168_v40 = vld [vmem:[#allocation97_spill] sm:$0xff]  ;;  %v12169_v62 = vld [vmem:[#allocation91_spill] sm:$0xff] }
 0x358   : > { %v5645_v63 = vsel %vm5611_vm1, %v5644_v19, %v5643_v31  ;;  %v5652_v27 = vrot.slane %v5557_v45, 2  ;;  %v5656_v54 = vrot.slane %v5560_v39, 7  ;;  %v5654_v30 = vrot.slane %v5558_v32, 1  ;;  %v12170_v45 = vld [vmem:[#allocation107_spill] sm:$0xff]  ;;  %v12177_v31 = vld [vmem:[#allocation93_spill] sm:$0xff] }
 0x359   : > { %v5647_v9 = vsel %vm5614_vm2, %v5646_v33, %v5645_v63  ;;  %v10087_v43 = vmul.f32 %v12086_v41, %v12155_v16  ;;  %v10091_v26 = vmul.f32 %v12157_v49, %v12156_v3  ;;  %v5566_v5 = vunpack.c.l.b16 %v5380_v24  ;;  %v12172_v52 = vld [vmem:[#allocation71_spill] sm:$0xff]  ;;  %v12175_v33 = vld [vmem:[#allocation81_spill] sm:$0xff] }
 0x35a   : > { %v5649_v35 = vsel %vm5617_vm3, %v5648_v53, %v5647_v9  ;;  %v5657_v1 = vsel %vm5608_vm0, %v5656_v54, %v5559_v6  ;;  %v5660_v59 = vrot.slane %v12158_v34, 5  ;;  %v5662_v60 = vrot.slane %v12159_v37, 4  ;;  %v12173_v24 = vld [vmem:[#allocation115_spill] sm:$0xff] }
 0x35b   : > { %v5651_v14 = vsel %vm5620_vm4, %v5650_v61, %v5649_v35  ;;  %v5659_v17 = vsel %vm5611_vm1, %v5658_v57, %v5657_v1  ;;  %v10101_v51 = vmul.f32 %v12157_v49, %v12160_v25  ;;  %v5664_v7 = vrot.slane %v5564_v10, 3  ;;  %v12176_v10 = vld [vmem:[#allocation68_spill] sm:$0xff]  ;;  %v12178_v61 = vld [vmem:[#allocation111_spill] sm:$0xff] }
 0x35c   : > { %v5653_v36 = vsel %vm5623_vm5, %v5652_v27, %v5651_v14  ;;  %v5661_v2 = vsel %vm5614_vm2, %v5660_v59, %v5659_v17  ;;  %v5666_v48 = vrot.slane %v5565_v58, 2  ;;  %v2811_v28 = vmul.f32 %v12162_v38, %v12161_v23  ;;  %v12179_v63 = vld [vmem:[#allocation87_spill] sm:$0xff]  ;;  %v12180_v27 = vld [vmem:[#allocation32_spill] sm:$0xff] }
 0x35d   : > { %v5655_v4 = vsel %vm5626_vm6, %v5654_v30, %v5653_v36  ;;  %v5663_v20 = vsel %vm5617_vm3, %v5662_v60, %v5661_v2  ;;  %v2812_v21 = vmul.f32 %v12162_v38, %v12163_v46  ;;  %v5668_v56 = vrot.slane %v5566_v5, 1  ;;  %v12181_v9 = vld [vmem:[#allocation95_spill] sm:$0xff]  ;;  %v12182_v30 = vld [vmem:[#allocation110_spill] sm:$0xff]  ;;  %v12186_v60 = vld [vmem:[#allocation105_spill] sm:$0xff] }
 0x35e   : > { %v5665_v55 = vsel %vm5620_vm4, %v5664_v7, %v5663_v20  ;;  %v10114_v8 = vmul.f32 %v12162_v38, %v12164_v29  ;;  %v10118_v44 = vmul.f32 %v12162_v38, %v12155_v16  ;;  %v12166_v42 = vrot.slane %v12165_v0, 4  ;;  %v12183_v35 = vld [vmem:[#allocation39_spill] sm:$0xff]  ;;  %v12187_v36 = vld [vmem:[#allocation61_spill] sm:$0xff]  ;;  %v12190_v20 = vld [vmem:[#allocation72_spill] sm:$0xff] }
 0x35f   : > { %v5667_v50 = vsel %vm5623_vm5, %v5666_v48, %v5665_v55  ;;  %v2951_v13 = vrot.slane %v12167_v12, 1  ;;  %v2953_v47 = vrot.slane %v12168_v40, 1  ;;  %v10128_v57 = vmul.f32 %v12170_v45, %v12169_v62  ;;  %v12184_v34 = vld [vmem:[#allocation27_spill] sm:$0xff]  ;;  %v12188_v48 = vld [vmem:[#allocation34_spill] sm:$0xff]  ;;  %v12191_v55 = vld [vmem:[#allocation108_spill] sm:$0xff] }
 0x360   : > { %v1762_v15 = vmax.f32 %v12165_v0, %v12166_v42  ;;  %v1767_v32 = vrot.slane %v12172_v52, 4  ;;  %v5669_v39 = vsel %vm5626_vm6, %v5668_v56, %v5667_v50  ;;  %v2955_v22 = vrot.slane %v2811_v28, 1  ;;  %v12185_v17 = vld [vmem:[#allocation51_spill] sm:$0xff]  ;;  %v12192_v42 = vld [vmem:[#allocation86_spill] sm:$0xff]  ;;  %v12193_v50 = vld [vmem:[#allocation21_spill] sm:$0xff] }
 0x361   : > { %12171 = vst [vmem:[#allocation96_spill] sm:$0xff] %v10128_v57  ;;  %7661 = vrcp.f32 %v12173_v24  ;;  %v10133_v19 = vpack.c.b16 %v5669_v39, %v5655_v4  ;;  %v10137_v53 = vmul.f32 %v12157_v49, %v12175_v33  ;;  %v3095_v58 = vadd.f32 %v2951_v13, %v12176_v10  ;;  %v12194_v13 = vld [vmem:[#allocation69_spill] sm:$0xff]  ;;  %v12195_v40 = vld [vmem:[#allocation92_spill] sm:$0xff]  ;;  %v12200_v10 = vld [vmem:[#allocation62_spill] sm:$0xff] }
 0x362   : > { %v10142_v6 = vmul.f32 %v12178_v61, %v12177_v31  ;;  %v10146_v54 = vmul.f32 %v12180_v27, %v12179_v63  ;;  %v1941_v5 = vsub.f32 %v12182_v30, %v12181_v9  ;;  %v3097_v1 = vadd.f32 %v2953_v47, %v12183_v35  ;;  %v12197_v45 = vld [vmem:[#allocation33_spill] sm:$0xff] }
 0x363   : > { %12174 = vst [vmem:[#allocation54_spill] sm:$0xff] %v10133_v19  ;;  %v1757_v59 = vrot.slane %v12184_v34, 2  ;;  %v1763_v14 = vrot.slane %v1762_v15, 2  ;;  %5923 = vmatmul.bf16.gmra.mxu0 %v10133_v19  ;;  %5956 = vmatmul.bf16.gmra.mxu1 %v10133_v19  ;;  %v3099_v37 = vadd.f32 %v2955_v22, %v12185_v17  ;;  %v3176_v2 = vmul.f32 %v12187_v36, %v12186_v60 }
 0x364   : > { %v1768_v7 = vmax.f32 %v12172_v52, %v1767_v32  ;;  %v10160_v4 = vadd.f32 %v12188_v48, %v10080_v11  ;;  %5989 = vmatmul.bf16.gmra.mxu2 %v10133_v19  ;;  %v10165_v28 = vmul.f32 %v12190_v20, %v12156_v3  ;;  %v3178_v56 = vmul.f32 %v12187_v36, %v12191_v55  ;;  %v12198_v32 = vld [vmem:[#allocation53_spill] sm:$0xff] }
 0x365   : > { %v10171_v12 = vmul.f32 %v12193_v50, %v12192_v42  ;;  %v10175_v47 = vmul.f32 %v12195_v40, %v12194_v13  ;;  %v3180_v11 = vmul.f32 %v12187_v36, %v12161_v23  ;;  %v3320_v62 = vrot.slane %v3176_v2, 2  ;;  %v1290_v50 = vpop.f32.mrf.mxu3  ;;  %v12203_v13 = vld [vmem:[#allocation114_spill] sm:$0xff] }
 0x366   : > { %12189 = vst [vmem:[#allocation22_spill] sm:$0xff] %v10160_v4  ;;  %v10181_v39 = vmul.f32 %v12198_v32, %v12197_v45  ;;  %v2061_v22 = vmul.f32 1.442695, %v1941_v5  ;;  %v3322_v24 = vrot.slane %v3178_v56, 2  ;;  %v3545_v31 = vmul.f32 %v12200_v10, %v12186_v60 }
 0x367   : > { %12196 = vst [vmem:[#allocation35_spill] sm:$0xff] %v10175_v47  ;;  %v7662_v61 = vpop.eup %7661  ;;  %v10186_v63 = vmax.f32 %v12184_v34, %v1757_v59  ;;  %v2956_v27 = vrot.slane %v2812_v21, 1  ;;  %v3324_v9 = vrot.slane %v3180_v11, 2  ;;  %v3464_v30 = vadd.f32 %v3320_v62, %v3095_v58  ;;  %v12204_v21 = vld [vmem:[#allocation42_spill] sm:$0xff] }
 0x368   : > { %12199 = vst [vmem:[#allocation55_spill] sm:$0xff] %v10181_v39  ;;  %v10188_v35 = vmax.f32 %v1762_v15, %v1763_v14  ;;  %v1769_v17 = vrot.slane %v1768_v7, 2  ;;  %v1773_v2 = vrot.slane %v10160_v4, 4  ;;  %v3466_v42 = vadd.f32 %v3322_v24, %v3097_v1 }
 0x369   : > { %12201 = vst [vmem:[#allocation113_spill] sm:$0xff] %v10186_v63  ;;  %v2808_v5 = vmul.f32 %v12162_v38, %v10128_v57  ;;  %v2810_v56 = vmul.f32 %v12162_v38, %v10142_v6  ;;  %v10196_v40 = vadd.f32 %v2956_v27, %v12203_v13  ;;  %v10198_v34 = vadd.f32 %v3324_v9, %v3099_v37  ;;  %v12215_v63 = vld [vmem:[#allocation101_spill] sm:$0xff] }
 0x36a   : > { %12202 = vst [vmem:[#allocation56_spill] sm:$0xff] %v10188_v35  ;;  %v10201_v58 = vmul.f32 %v7662_v61, %v12204_v21  ;;  %7663 = vpow2.f32 %v2061_v22  ;;  %v10204_v15 = vadd.f32 %v12188_v48, %v1287_v18  ;;  %v3547_v1 = vmul.f32 %v12200_v10, %v12191_v55  ;;  %v12213_v21 = vld [vmem:[#allocation64_spill] sm:$0xff] }
 0x36b   : > { %v10211_v38 = vmul.f32 %v12187_v36, %v12163_v46  ;;  %v10215_v14 = vmul.f32 %v12200_v10, %v12161_v23  ;;  %v3689_v37 = vrot.slane %v3545_v31, 3  ;;  %v10218_v62 = vmax.f32 %v1768_v7, %v1769_v17 }
 0x36c   : > { %12205 = vst [vmem:[#allocation98_spill] sm:$0xff] %v10201_v58  ;;  %v10221_v18 = vadd.f32 %v12188_v48, %v1290_v50  ;;  %v3691_v45 = vrot.slane %v3547_v1, 3  ;;  %v10224_v32 = vmax.f32 %v10160_v4, %v1773_v2  ;;  %v2952_v22 = vrot.slane %v2808_v5, 1  ;;  %v12211_v50 = vld [vmem:[#allocation63_spill] sm:$0xff] }
 0x36d   : > { %12206 = vst [vmem:[#allocation36_spill] sm:$0xff] %v10204_v15  ;;  %v2954_v24 = vrot.slane %v2810_v56, 1  ;;  %v10226_v61 = vadd.f32 %v3689_v37, %v3464_v30  ;;  %v2727_v31 = vmul.f32 %v12086_v41, %v10128_v57  ;;  %v10233_v7 = vmul.f32 %v12200_v10, %v12163_v46 }
 0x36e   : > { %12207 = vst [vmem:[#allocation28_spill] sm:$0xff] %v10218_v62  ;;  %v10235_v9 = vadd.f32 %v3691_v45, %v3466_v42  ;;  %v2729_v17 = vmul.f32 %v12086_v41, %v10142_v6  ;;  %v3177_v2 = vmul.f32 %v12187_v36, %v10128_v57  ;;  %v3179_v30 = vmul.f32 %v12187_v36, %v10142_v6 }
 0x36f   : > { %12208 = vst [vmem:[#allocation103_spill] sm:$0xff] %v10221_v18  ;;  %v10245_v5 = vmul.f32 %v12211_v50, %v12186_v60  ;;  %v10252_v42 = vmul.f32 %v12211_v50, %v12191_v55  ;;  %v10256_v41 = vmul.f32 %v12211_v50, %v12161_v23  ;;  %v10260_v1 = vmul.f32 %v12213_v21, %v12186_v60 }
 0x370   : > { %12209 = vst [vmem:[#allocation59_spill] sm:$0xff] %v10224_v32  ;;  %v10247_v56 = vpop.eup %7663  ;;  %v2735_v37 = vmul.f32 %v12157_v49, %v10146_v54  ;;  %v2740_v45 = vmul.f32 %v12157_v49, %v10181_v39  ;;  %v3096_v11 = vadd.f32 %v2952_v22, %v2727_v31  ;;  %v3098_v13 = vadd.f32 %v2954_v24, %v2729_v17 }
 0x371   : > { %12210 = vst [vmem:[#allocation43_spill] sm:$0xff] %v10235_v9  ;;  %v2817_v27 = vmul.f32 %v12190_v20, %v12160_v25  ;;  %v2819_v59 = vmul.f32 %v12190_v20, %v12175_v33  ;;  %v2957_v19 = vrot.slane %v10114_v8, 1  ;;  %v3546_v4 = vmul.f32 %v12200_v10, %v10128_v57 }
 0x372   : > { %12212 = vst [vmem:[#allocation100_spill] sm:$0xff] %v10247_v56  ;;  %v2821_v56 = vmul.f32 %v12190_v20, %v10181_v39  ;;  %v3321_v52 = vrot.slane %v3177_v2, 2  ;;  %v3323_v0 = vrot.slane %v3179_v30, 2  ;;  %v3548_v22 = vmul.f32 %v12200_v10, %v10142_v6 }
 0x373   : > { %12214 = vst [vmem:[#allocation70_spill] sm:$0xff] %v10260_v1  ;;  %v2737_v24 = vmul.f32 %v12157_v49, %v10171_v12  ;;  %v2958_v31 = vrot.slane %v10118_v44, 1  ;;  %v2959_v17 = vrot.slane %v10165_v28, 1  ;;  %v2961_v62 = vrot.slane %v2817_v27, 1 }
 0x374   : > { %v2816_v8 = vmul.f32 %v12190_v20, %v10146_v54  ;;  %v2963_v18 = vrot.slane %v2819_v59, 1  ;;  %v3465_v35 = vadd.f32 %v3321_v52, %v3096_v11  ;;  %v3467_v15 = vadd.f32 %v3323_v0, %v3098_v13  ;;  %v12216_v11 = vld [vmem:[#allocation73_spill] sm:$0xff] }
 0x375   : > { %v2739_v2 = vmul.f32 %v12157_v49, %v10175_v47  ;;  %v2965_v30 = vrot.slane %v2821_v56, 1  ;;  %v3101_v32 = vadd.f32 %v2957_v19, %v12215_v63  ;;  %v3690_v48 = vrot.slane %v3546_v4, 3 }
 0x376   : > { %v3102_v60 = vadd.f32 %v2958_v31, %v10087_v43  ;;  %v3103_v44 = vadd.f32 %v2959_v17, %v10091_v26  ;;  %v3325_v28 = vrot.slane %v10211_v38, 2  ;;  %v3692_v27 = vrot.slane %v3548_v22, 3 }
 0x377   : > { %v2818_v1 = vmul.f32 %v12190_v20, %v10171_v12  ;;  %v2820_v0 = vmul.f32 %v12190_v20, %v10175_v47  ;;  %v3105_v52 = vadd.f32 %v2961_v62, %v10101_v51  ;;  %v3107_v59 = vadd.f32 %v2963_v18, %v10137_v53 }
 0x378   : > { %v2822_v19 = vmul.f32 %v12190_v20, %v10201_v58  ;;  %v2960_v4 = vrot.slane %v2816_v8, 1  ;;  %v3109_v43 = vadd.f32 %v2965_v30, %v2740_v45  ;;  %v3693_v26 = vrot.slane %v10215_v14, 3 }
 0x379   : > { %v3182_v63 = vmul.f32 %v12187_v36, %v12164_v29  ;;  %v3183_v38 = vmul.f32 %v12187_v36, %v12155_v16  ;;  %v3184_v56 = vmul.f32 %v12216_v11, %v12156_v3  ;;  %v10304_v13 = vadd.f32 %v3690_v48, %v3465_v35 }
 0x37a   : > { %v3186_v51 = vmul.f32 %v12216_v11, %v12160_v25  ;;  %v3188_v53 = vmul.f32 %v12216_v11, %v12175_v33  ;;  %v10310_v20 = vadd.f32 %v3692_v27, %v3467_v15  ;;  %v10314_v14 = vmul.f32 %v12211_v50, %v10128_v57 }
 0x37b   : > { %12217 = vst [vmem:[#allocation44_spill] sm:$0xff] %v10304_v13  ;;  %v2741_v36 = vmul.f32 %v12157_v49, %v10201_v58  ;;  %v2962_v62 = vrot.slane %v2818_v1, 1  ;;  %v2964_v18 = vrot.slane %v2820_v0, 1  ;;  %v3190_v48 = vmul.f32 %v12216_v11, %v10181_v39 }
 0x37c   : > { %12218 = vst [vmem:[#allocation104_spill] sm:$0xff] %v10310_v20  ;;  %v2966_v35 = vrot.slane %v2822_v19, 1  ;;  %v3104_v45 = vadd.f32 %v2960_v4, %v2735_v37  ;;  %v3185_v22 = vmul.f32 %v12216_v11, %v10146_v54  ;;  %v3187_v15 = vmul.f32 %v12216_v11, %v10171_v12 }
 0x37d   : > { %v3189_v31 = vmul.f32 %v12216_v11, %v10175_v47  ;;  %v3326_v17 = vrot.slane %v3182_v63, 2  ;;  %v3327_v8 = vrot.slane %v3183_v38, 2  ;;  %v3328_v30 = vrot.slane %v3184_v56, 2 }
 0x37e   : > { %v3191_v49 = vmul.f32 %v12216_v11, %v10201_v58  ;;  %v3330_v1 = vrot.slane %v3186_v51, 2  ;;  %v3332_v27 = vrot.slane %v3188_v53, 2  ;;  %v3469_v0 = vadd.f32 %v3325_v28, %v10196_v40  ;;  %v12219_v40 = vld [vmem:[#allocation74_spill] sm:$0xff] }
 0x37f   : > { %v3334_v37 = vrot.slane %v3190_v48, 2  ;;  %v3470_v19 = vadd.f32 %v3326_v17, %v3101_v32  ;;  %v3471_v4 = vadd.f32 %v3327_v8, %v3102_v60  ;;  %v3472_v23 = vadd.f32 %v3328_v30, %v3103_v44 }
 0x380   : > { %v3106_v55 = vadd.f32 %v2962_v62, %v2737_v24  ;;  %v3108_v21 = vadd.f32 %v2964_v18, %v2739_v2  ;;  %v3474_v57 = vadd.f32 %v3330_v1, %v3105_v52  ;;  %v3476_v20 = vadd.f32 %v3332_v27, %v3107_v59 }
 0x381   : > { %v3110_v9 = vadd.f32 %v2966_v35, %v2741_v36  ;;  %v3329_v13 = vrot.slane %v3185_v22, 2  ;;  %v3331_v63 = vrot.slane %v3187_v15, 2  ;;  %v3478_v38 = vadd.f32 %v3334_v37, %v3109_v43 }
 0x382   : > { %v3333_v56 = vrot.slane %v3189_v31, 2  ;;  %v3551_v11 = vmul.f32 %v12200_v10, %v12164_v29  ;;  %v3552_v51 = vmul.f32 %v12200_v10, %v12155_v16  ;;  %v3553_v32 = vmul.f32 %v12219_v40, %v12156_v3 }
 0x383   : > { %v3335_v60 = vrot.slane %v3191_v49, 2  ;;  %v3554_v24 = vmul.f32 %v12219_v40, %v10146_v54  ;;  %v3555_v2 = vmul.f32 %v12219_v40, %v12160_v25  ;;  %v3556_v44 = vmul.f32 %v12219_v40, %v10171_v12 }
 0x384   : > { %v3473_v28 = vadd.f32 %v3329_v13, %v3104_v45  ;;  %v3557_v52 = vmul.f32 %v12219_v40, %v12175_v33  ;;  %v3559_v10 = vmul.f32 %v12219_v40, %v10181_v39  ;;  %v10347_v59 = vmul.f32 %v12211_v50, %v10142_v6 }
 0x385   : > { %v3475_v43 = vadd.f32 %v3331_v63, %v3106_v55  ;;  %v3477_v53 = vadd.f32 %v3333_v56, %v3108_v21  ;;  %v3479_v36 = vadd.f32 %v3335_v60, %v3110_v9  ;;  %v3558_v62 = vmul.f32 %v12219_v40, %v10175_v47 }
 0x386   : > { %v3560_v18 = vmul.f32 %v12219_v40, %v10201_v58  ;;  %v3694_v13 = vrot.slane %v10233_v7, 3  ;;  %v3695_v48 = vrot.slane %v3551_v11, 3  ;;  %v3696_v35 = vrot.slane %v3552_v51, 3 }
 0x387   : > { %v3697_v45 = vrot.slane %v3553_v32, 3  ;;  %v3698_v22 = vrot.slane %v3554_v24, 3  ;;  %v3699_v15 = vrot.slane %v3555_v2, 3  ;;  %v3700_v31 = vrot.slane %v3556_v44, 3  ;;  %v10359_v32 = vpop.f32.mrf.mxu3 }
 0x388   : > { %v3701_v17 = vrot.slane %v3557_v52, 3  ;;  %v3837_v8 = vadd.f32 %v3693_v26, %v10198_v34  ;;  %v3838_v55 = vadd.f32 %v3694_v13, %v3469_v0  ;;  %v3839_v21 = vadd.f32 %v3695_v48, %v3470_v19  ;;  %12220 = vst [vmem:[#allocation45_spill] sm:$0xff] %v10359_v32 }
 0x389   : > { %v3702_v9 = vrot.slane %v3558_v62, 3  ;;  %v3703_v30 = vrot.slane %v3559_v10, 3  ;;  %v3840_v49 = vadd.f32 %v3696_v35, %v3471_v4  ;;  %v3841_v1 = vadd.f32 %v3697_v45, %v3472_v23  ;;  %v12221_v23 = vld [vmem:[#allocation75_spill] sm:$0xff] }
 0x38a   : > { %v3704_v27 = vrot.slane %v3560_v18, 3  ;;  %v3842_v37 = vadd.f32 %v3698_v22, %v3473_v28  ;;  %v3843_v63 = vadd.f32 %v3699_v15, %v3474_v57  ;;  %v3845_v56 = vadd.f32 %v3701_v17, %v3476_v20 }
 0x38b   : > { %v3844_v7 = vadd.f32 %v3700_v31, %v3475_v43  ;;  %v3847_v11 = vadd.f32 %v3703_v30, %v3478_v38  ;;  %v3919_v51 = vmul.f32 %v12211_v50, %v12163_v46  ;;  %v3920_v40 = vmul.f32 %v12211_v50, %v12164_v29 }
 0x38c   : > { %v3846_v34 = vadd.f32 %v3702_v9, %v3477_v53  ;;  %v3921_v26 = vmul.f32 %v12211_v50, %v12155_v16  ;;  %v3922_v0 = vmul.f32 %v12221_v23, %v12156_v3  ;;  %v3924_v57 = vmul.f32 %v12221_v23, %v12160_v25 }
 0x38d   : > { %v3923_v20 = vmul.f32 %v12221_v23, %v10146_v54  ;;  %v3925_v19 = vmul.f32 %v12221_v23, %v10171_v12  ;;  %v3926_v4 = vmul.f32 %v12221_v23, %v12175_v33  ;;  %v3928_v38 = vmul.f32 %v12221_v23, %v10181_v39 }
 0x38e   : > { %v3848_v60 = vadd.f32 %v3704_v27, %v3479_v36  ;;  %v3927_v50 = vmul.f32 %v12221_v23, %v10175_v47  ;;  %v3929_v24 = vmul.f32 %v12221_v23, %v10201_v58  ;;  %v4058_v2 = vrot.slane %v10245_v5, 4 }
 0x38f   : > { %v4059_v44 = vrot.slane %v10314_v14, 4  ;;  %v4060_v28 = vrot.slane %v10252_v42, 4  ;;  %v4061_v52 = vrot.slane %v10347_v59, 4  ;;  %v4062_v10 = vrot.slane %v10256_v41, 4  ;;  %v12222_v14 = vld [vmem:[#allocation44_spill] sm:$0xff]  ;;  %v12223_v42 = vld [vmem:[#allocation43_spill] sm:$0xff] }
 0x390   : > { %v4063_v43 = vrot.slane %v3919_v51, 4  ;;  %v4064_v53 = vrot.slane %v3920_v40, 4  ;;  %v4065_v62 = vrot.slane %v3921_v26, 4  ;;  %v4066_v36 = vrot.slane %v3922_v0, 4  ;;  %v12224_v41 = vld [vmem:[#allocation104_spill] sm:$0xff] }
 0x391   : > { %v4067_v18 = vrot.slane %v3923_v20, 4  ;;  %v4068_v13 = vrot.slane %v3924_v57, 4  ;;  %v4069_v48 = vrot.slane %v3925_v19, 4  ;;  %v4070_v35 = vrot.slane %v3926_v4, 4  ;;  %v10388_v20 = vpop.f32.mrf.mxu3 }
 0x392   : > { %v4071_v45 = vrot.slane %v3927_v50, 4  ;;  %v4072_v22 = vrot.slane %v3928_v38, 4  ;;  %v4073_v15 = vrot.slane %v3929_v24, 4  ;;  %v4202_v5 = vadd.f32 %v4058_v2, %v10226_v61  ;;  %12225 = vst [vmem:[#allocation89_spill] sm:$0xff] %v10388_v20  ;;  %v12226_v61 = vld [vmem:[#allocation96_spill] sm:$0xff] }
 0x393   : > { %v4203_v31 = vadd.f32 %v4059_v44, %v12222_v14  ;;  %v4204_v17 = vadd.f32 %v4060_v28, %v12223_v42  ;;  %v4206_v59 = vadd.f32 %v4062_v10, %v3837_v8  ;;  %v4207_v9 = vadd.f32 %v4063_v43, %v3838_v55  ;;  %v12227_v38 = vld [vmem:[#allocation64_spill] sm:$0xff] }
 0x394   : > { %v4205_v30 = vadd.f32 %v4061_v52, %v12224_v41  ;;  %v4208_v27 = vadd.f32 %v4064_v53, %v3839_v21  ;;  %v4209_v51 = vadd.f32 %v4065_v62, %v3840_v49  ;;  %v4210_v40 = vadd.f32 %v4066_v36, %v3841_v1  ;;  %v12228_v24 = vld [vmem:[#allocation108_spill] sm:$0xff]  ;;  %v12231_v53 = vld [vmem:[#allocation70_spill] sm:$0xff] }
 0x395   : > { %v4211_v26 = vadd.f32 %v4067_v18, %v3842_v37  ;;  %v4212_v23 = vadd.f32 %v4068_v13, %v3843_v63  ;;  %v4213_v0 = vadd.f32 %v4069_v48, %v3844_v7  ;;  %v4214_v57 = vadd.f32 %v4070_v35, %v3845_v56  ;;  %v12229_v21 = vld [vmem:[#allocation112_spill] sm:$0xff] }
 0x396   : > { %v4215_v19 = vadd.f32 %v4071_v45, %v3846_v34  ;;  %v4216_v4 = vadd.f32 %v4072_v22, %v3847_v11  ;;  %v4284_v50 = vmul.f32 %v12227_v38, %v12226_v61  ;;  %v4285_v8 = vmul.f32 %v12227_v38, %v12228_v24  ;;  %v12230_v56 = vld [vmem:[#allocation76_spill] sm:$0xff] }
 0x397   : > { %v4286_v55 = vmul.f32 %v12227_v38, %v10142_v6  ;;  %v4287_v49 = vmul.f32 %v12227_v38, %v12229_v21  ;;  %v4288_v1 = vmul.f32 %v12227_v38, %v12163_v46  ;;  %v4289_v37 = vmul.f32 %v12227_v38, %v12164_v29 }
 0x398   : > { %v4290_v63 = vmul.f32 %v12227_v38, %v12155_v16  ;;  %v4291_v7 = vmul.f32 %v12230_v56, %v12156_v3  ;;  %v4292_v11 = vmul.f32 %v12230_v56, %v10146_v54  ;;  %v4293_v34 = vmul.f32 %v12230_v56, %v12160_v25 }
 0x399   : > { %v4294_v2 = vmul.f32 %v12230_v56, %v10171_v12  ;;  %v4295_v44 = vmul.f32 %v12230_v56, %v12175_v33  ;;  %v4296_v28 = vmul.f32 %v12230_v56, %v10175_v47  ;;  %v4297_v52 = vmul.f32 %v12230_v56, %v10181_v39 }
 0x39a   : > { %v4217_v10 = vadd.f32 %v4073_v15, %v3848_v60  ;;  %v4298_v43 = vmul.f32 %v12230_v56, %v10201_v58  ;;  %v4427_v62 = vrot.slane %v12231_v53, 5  ;;  %v4428_v36 = vrot.slane %v4284_v50, 5 }
 0x39b   : > { %v4429_v18 = vrot.slane %v4285_v8, 5  ;;  %v4430_v13 = vrot.slane %v4286_v55, 5  ;;  %v4431_v48 = vrot.slane %v4287_v49, 5  ;;  %v4432_v35 = vrot.slane %v4288_v1, 5  ;;  %v10421_v8 = vpop.f32.mrf.mxu3 }
 0x39c   : > { %v4433_v45 = vrot.slane %v4289_v37, 5  ;;  %v4434_v22 = vrot.slane %v4290_v63, 5  ;;  %v4435_v14 = vrot.slane %v4291_v7, 5  ;;  %v4436_v42 = vrot.slane %v4292_v11, 5  ;;  %12232 = vst [vmem:[#allocation99_spill] sm:$0xff] %v10421_v8 }
 0x39d   : > { %v4437_v41 = vrot.slane %v4293_v34, 5  ;;  %v4438_v38 = vrot.slane %v4294_v2, 5  ;;  %v4439_v20 = vrot.slane %v4295_v44, 5  ;;  %v4440_v32 = vrot.slane %v4296_v28, 5  ;;  %v12233_v44 = vld [vmem:[#allocation105_spill] sm:$0xff] }
 0x39e   : > { %v4441_v39 = vrot.slane %v4297_v52, 5  ;;  %v4442_v60 = vrot.slane %v4298_v43, 5  ;;  %v4571_v15 = vadd.f32 %v4427_v62, %v4202_v5  ;;  %v4573_v47 = vadd.f32 %v4429_v18, %v4204_v17  ;;  %v12234_v28 = vld [vmem:[#allocation65_spill] sm:$0xff]  ;;  %v12238_v43 = vld [vmem:[#allocation98_spill] sm:$0xff] }
 0x39f   : > { %v4572_v56 = vadd.f32 %v4428_v36, %v4203_v31  ;;  %v4575_v58 = vadd.f32 %v4431_v48, %v4206_v59  ;;  %v4576_v53 = vadd.f32 %v4432_v35, %v4207_v9  ;;  %v4577_v50 = vadd.f32 %v4433_v45, %v4208_v27 }
 0x3a0   : > { %v4574_v55 = vadd.f32 %v4430_v13, %v4205_v30  ;;  %v4578_v49 = vadd.f32 %v4434_v22, %v4209_v51  ;;  %v4579_v1 = vadd.f32 %v4435_v14, %v4210_v40  ;;  %v4581_v37 = vadd.f32 %v4437_v41, %v4212_v23  ;;  %v12235_v30 = vld [vmem:[#allocation78_spill] sm:$0xff] }
 0x3a1   : > { %v4580_v63 = vadd.f32 %v4436_v42, %v4211_v26  ;;  %v4582_v7 = vadd.f32 %v4438_v38, %v4213_v0  ;;  %v4583_v11 = vadd.f32 %v4439_v20, %v4214_v57  ;;  %v4585_v34 = vadd.f32 %v4441_v39, %v4216_v4  ;;  %v12236_v0 = vld [vmem:[#allocation35_spill] sm:$0xff] }
 0x3a2   : > { %v4584_v2 = vadd.f32 %v4440_v32, %v4215_v19  ;;  %v4652_v52 = vmul.f32 %v12234_v28, %v12233_v44  ;;  %v4653_v5 = vmul.f32 %v12234_v28, %v12226_v61  ;;  %v4654_v31 = vmul.f32 %v12234_v28, %v12228_v24  ;;  %v12237_v20 = vld [vmem:[#allocation55_spill] sm:$0xff] }
 0x3a3   : > { %v4655_v17 = vmul.f32 %v12234_v28, %v10142_v6  ;;  %v4656_v59 = vmul.f32 %v12234_v28, %v12229_v21  ;;  %v4657_v9 = vmul.f32 %v12234_v28, %v12163_v46  ;;  %v4658_v39 = vmul.f32 %v12234_v28, %v12164_v29 }
 0x3a4   : > { %v4659_v32 = vmul.f32 %v12234_v28, %v12155_v16  ;;  %v4660_v27 = vmul.f32 %v12235_v30, %v12156_v3  ;;  %v4661_v51 = vmul.f32 %v12235_v30, %v10146_v54  ;;  %v4662_v40 = vmul.f32 %v12235_v30, %v12160_v25 }
 0x3a5   : > { %v4663_v26 = vmul.f32 %v12235_v30, %v10171_v12  ;;  %v4664_v23 = vmul.f32 %v12235_v30, %v12175_v33  ;;  %v4665_v57 = vmul.f32 %v12235_v30, %v12236_v0  ;;  %v4666_v19 = vmul.f32 %v12235_v30, %v12237_v20  ;;  %v10455_v33 = vpop.f32.mrf.mxu3 }
 0x3a6   : > { %v4586_v4 = vadd.f32 %v4442_v60, %v4217_v10  ;;  %v4667_v62 = vmul.f32 %v12235_v30, %v12238_v43  ;;  %v4796_v36 = vrot.slane %v4652_v52, 6  ;;  %v4797_v18 = vrot.slane %v4653_v5, 6  ;;  %12239 = vst [vmem:[#allocation49_spill] sm:$0xff] %v10455_v33 }
 0x3a7   : > { %v4798_v13 = vrot.slane %v4654_v31, 6  ;;  %v4799_v48 = vrot.slane %v4655_v17, 6  ;;  %v4800_v35 = vrot.slane %v4656_v59, 6  ;;  %v4801_v45 = vrot.slane %v4657_v9, 6 }
 0x3a8   : > { %v4802_v22 = vrot.slane %v4658_v39, 6  ;;  %v4803_v14 = vrot.slane %v4659_v32, 6  ;;  %v4804_v42 = vrot.slane %v4660_v27, 6  ;;  %v4805_v41 = vrot.slane %v4661_v51, 6 }
 0x3a9   : > { %v4806_v38 = vrot.slane %v4662_v40, 6  ;;  %v4807_v28 = vrot.slane %v4663_v26, 6  ;;  %v4808_v8 = vrot.slane %v4664_v23, 6  ;;  %v4809_v0 = vrot.slane %v4665_v57, 6  ;;  %v12240_v57 = vld [vmem:[#allocation66_spill] sm:$0xff] }
 0x3aa   : > { %v4810_v10 = vrot.slane %v4666_v19, 6  ;;  %v4811_v60 = vrot.slane %v4667_v62, 6  ;;  %v4940_v20 = vadd.f32 %v4796_v36, %v4571_v15  ;;  %v4942_v30 = vadd.f32 %v4798_v13, %v4573_v47 }
 0x3ab   : > { %v4941_v52 = vadd.f32 %v4797_v18, %v4572_v56  ;;  %v4944_v5 = vadd.f32 %v4800_v35, %v4575_v58  ;;  %v4945_v31 = vadd.f32 %v4801_v45, %v4576_v53  ;;  %v4946_v17 = vadd.f32 %v4802_v22, %v4577_v50 }
 0x3ac   : > { %v4943_v59 = vadd.f32 %v4799_v48, %v4574_v55  ;;  %v4947_v9 = vadd.f32 %v4803_v14, %v4578_v49  ;;  %v4948_v39 = vadd.f32 %v4804_v42, %v4579_v1  ;;  %v4950_v32 = vadd.f32 %v4806_v38, %v4581_v37  ;;  %v12242_v49 = vld [vmem:[#allocation81_spill] sm:$0xff]  ;;  %v12243_v1 = vld [vmem:[#allocation35_spill] sm:$0xff] }
 0x3ad   : > { %v4949_v27 = vadd.f32 %v4805_v41, %v4580_v63  ;;  %v4951_v51 = vadd.f32 %v4807_v28, %v4582_v7  ;;  %v4952_v40 = vadd.f32 %v4808_v8, %v4583_v11  ;;  %v4954_v26 = vadd.f32 %v4810_v10, %v4585_v34  ;;  %v12244_v37 = vld [vmem:[#allocation55_spill] sm:$0xff] }
 0x3ae   : > { %v4953_v23 = vadd.f32 %v4809_v0, %v4584_v2  ;;  %v5021_v33 = vmul.f32 %v12240_v57, %v12233_v44  ;;  %v5022_v15 = vmul.f32 %v12240_v57, %v12226_v61  ;;  %v5023_v47 = vmul.f32 %v12240_v57, %v12228_v24  ;;  %v12241_v61 = vld [vmem:[#allocation79_spill] sm:$0xff] }
 0x3af   : > { %v5024_v58 = vmul.f32 %v12240_v57, %v10142_v6  ;;  %v5025_v56 = vmul.f32 %v12240_v57, %v12229_v21  ;;  %v5026_v53 = vmul.f32 %v12240_v57, %v12163_v46  ;;  %v5027_v50 = vmul.f32 %v12240_v57, %v12164_v29 }
 0x3b0   : > { %v5028_v8 = vmul.f32 %v12240_v57, %v12155_v16  ;;  %v5029_v55 = vmul.f32 %v12241_v61, %v12156_v3  ;;  %v5030_v24 = vmul.f32 %v12241_v61, %v10146_v54  ;;  %v5031_v6 = vmul.f32 %v12241_v61, %v12160_v25 }
 0x3b1   : > { %v5032_v21 = vmul.f32 %v12241_v61, %v10171_v12  ;;  %v5033_v46 = vmul.f32 %v12241_v61, %v12242_v49  ;;  %v5034_v29 = vmul.f32 %v12241_v61, %v12243_v1  ;;  %v5035_v16 = vmul.f32 %v12241_v61, %v12244_v37  ;;  %v10489_v12 = vpop.f32.mrf.mxu3 }
 0x3b2   : > { %v4955_v63 = vadd.f32 %v4811_v60, %v4586_v4  ;;  %v5036_v3 = vmul.f32 %v12241_v61, %v12238_v43  ;;  %v5165_v54 = vrot.slane %v5021_v33, 7  ;;  %v5166_v7 = vrot.slane %v5022_v15, 7 }
 0x3b3   : > { %v5167_v11 = vrot.slane %v5023_v47, 7  ;;  %v5168_v25 = vrot.slane %v5024_v58, 7  ;;  %v5169_v34 = vrot.slane %v5025_v56, 7  ;;  %v5170_v2 = vrot.slane %v5026_v53, 7  ;;  %v12245_v58 = vld [vmem:[#allocation45_spill] sm:$0xff]  ;;  %v12246_v56 = vld [vmem:[#allocation34_spill] sm:$0xff] }
 0x3b4   : > { %v5171_v44 = vrot.slane %v5027_v50, 7  ;;  %v5172_v0 = vrot.slane %v5028_v8, 7  ;;  %v5173_v19 = vrot.slane %v5029_v55, 7  ;;  %v5174_v62 = vrot.slane %v5030_v24, 7 }
 0x3b5   : > { %v5175_v36 = vrot.slane %v5031_v6, 7  ;;  %v5176_v18 = vrot.slane %v5032_v21, 7  ;;  %v5177_v13 = vrot.slane %v5033_v46, 7  ;;  %v5178_v48 = vrot.slane %v5034_v29, 7 }
 0x3b6   : > { %v5179_v4 = vrot.slane %v5035_v16, 7  ;;  %v5309_v35 = vadd.f32 %v5165_v54, %v4940_v20  ;;  %v5310_v45 = vadd.f32 %v5166_v7, %v4941_v52  ;;  %v5311_v43 = vadd.f32 %v5167_v11, %v4942_v30  ;;  %v10497_v11 = vpop.permute.xlu1 %1381 }
 0x3b7   : > { %v5312_v33 = vadd.f32 %v5168_v25, %v4943_v59  ;;  %v5313_v22 = vadd.f32 %v5169_v34, %v4944_v5  ;;  %v5314_v14 = vadd.f32 %v5170_v2, %v4945_v31  ;;  %v5315_v42 = vadd.f32 %v5171_v44, %v4946_v17 }
 0x3b8   : > { %v5316_v41 = vadd.f32 %v5172_v0, %v4947_v9  ;;  %v5317_v38 = vadd.f32 %v5173_v19, %v4948_v39  ;;  %v5318_v28 = vadd.f32 %v5174_v62, %v4949_v27  ;;  %v5319_v10 = vadd.f32 %v5175_v36, %v4950_v32 }
 0x3b9   : > { %v5180_v60 = vrot.slane %v5036_v3, 7  ;;  %v5320_v57 = vadd.f32 %v5176_v18, %v4951_v51  ;;  %v5321_v15 = vadd.f32 %v5177_v13, %v4952_v40  ;;  %v5323_v47 = vadd.f32 %v5179_v4, %v4954_v26  ;;  %v10495_v26 = vpop.f32.mrf.mxu3 }
 0x3ba   : > { %v10493_v53 = vadd.f32 %v12246_v56, %v12245_v58  ;;  %v5322_v50 = vadd.f32 %v5178_v48, %v4953_v23  ;;  %v5382_v20 = vpack.c.bf16 %v5310_v45, %v5310_v45  ;;  %v5383_v52 = vpack.c.bf16 %v5311_v43, %v5311_v43 }
 0x3bb   : > { %v5324_v30 = vadd.f32 %v5180_v60, %v4955_v63  ;;  %v5384_v59 = vpack.c.bf16 %v5312_v33, %v5312_v33  ;;  %v5385_v5 = vpack.c.bf16 %v5313_v22, %v5313_v22  ;;  %v5386_v31 = vpack.c.bf16 %v5314_v14, %v5314_v14 }
 0x3bc   : > { %v5381_v17 = vpack.c.bf16 %v5309_v35, %v5309_v35  ;;  %v5387_v9 = vpack.c.bf16 %v5315_v42, %v5315_v42  ;;  %v5390_v39 = vpack.c.bf16 %v5318_v28, %v5318_v28  ;;  %v5391_v27 = vpack.c.bf16 %v5319_v10, %v5319_v10  ;;  %v12247_v35 = vld [vmem:[#allocation89_spill] sm:$0xff]  ;;  %v12248_v28 = vld [vmem:[#allocation99_spill] sm:$0xff] }
 0x3bd   : > { %v5388_v32 = vpack.c.bf16 %v5316_v41, %v5316_v41  ;;  %v5389_v8 = vpack.c.bf16 %v5317_v38, %v5317_v38  ;;  %v5392_v51 = vpack.c.bf16 %v5320_v57, %v5320_v57  ;;  %v5393_v40 = vpack.c.bf16 %v5321_v15, %v5321_v15 }
 0x3be   : > { %v5394_v61 = vpack.c.bf16 %v5322_v50, %v5322_v50  ;;  %v5395_v55 = vpack.c.bf16 %v5323_v47, %v5323_v47  ;;  %v5568_v24 = vunpack.c.l.b16 %v5382_v20  ;;  %v5569_v23 = vunpack.c.l.b16 %v5383_v52  ;;  %v12249_v47 = vld [vmem:[#allocation49_spill] sm:$0xff] }
 0x3bf   : > { %v5396_v6 = vpack.c.bf16 %v5324_v30, %v5324_v30  ;;  %v5570_v21 = vunpack.c.l.b16 %v5384_v59  ;;  %v5571_v49 = vunpack.c.l.b16 %v5385_v5  ;;  %v5572_v46 = vunpack.c.l.b16 %v5386_v31 }
 0x3c0   : > { %v5567_v1 = vunpack.c.l.b16 %v5381_v17  ;;  %v5573_v29 = vunpack.c.l.b16 %v5387_v9  ;;  %v5576_v37 = vunpack.c.l.b16 %v5390_v39  ;;  %v5577_v16 = vunpack.c.l.b16 %v5391_v27  ;;  %v12250_v17 = vld [vmem:[#allocation59_spill] sm:$0xff] }
 0x3c1   : > { %v5574_v63 = vunpack.c.l.b16 %v5388_v32  ;;  %v5575_v3 = vunpack.c.l.b16 %v5389_v8  ;;  %v5578_v54 = vunpack.c.l.b16 %v5392_v51  ;;  %v5579_v7 = vunpack.c.l.b16 %v5393_v40  ;;  %v1307_v52 = vpop.f32.mrf.mxu3  ;;  %v12251_v8 = vld [vmem:[#allocation113_spill] sm:$0xff] }
 0x3c2   : > { %v5580_v25 = vunpack.c.l.b16 %v5394_v61  ;;  %v5670_v34 = vrot.slane %v5568_v24, 7  ;;  %v5672_v2 = vrot.slane %v5569_v23, 6  ;;  %v5674_v44 = vrot.slane %v5570_v21, 5  ;;  %v12253_v61 = vld [vmem:[#allocation36_spill] sm:$0xff] }
 0x3c3   : > { %v5581_v0 = vunpack.c.l.b16 %v5395_v55  ;;  %v5582_v19 = vunpack.c.l.b16 %v5396_v6  ;;  %v5676_v62 = vrot.slane %v5571_v49, 4  ;;  %v5678_v36 = vrot.slane %v5572_v46, 3  ;;  %v12255_v6 = vld [vmem:[#allocation56_spill] sm:$0xff]  ;;  %v12257_v46 = vld [vmem:[#allocation103_spill] sm:$0xff] }
 0x3c4   : > { %v5671_v18 = vsel %vm5608_vm0, %v5670_v34, %v5567_v1  ;;  %v5684_v13 = vrot.slane %v5576_v37, 7  ;;  %v5686_v48 = vrot.slane %v5577_v16, 6  ;;  %v5688_v4 = vrot.slane %v5578_v54, 5 }
 0x3c5   : > { %v10502_v45 = vadd.f32 %v10497_v11, %v12247_v35  ;;  %v5673_v43 = vsel %vm5611_vm1, %v5672_v2, %v5671_v18  ;;  %v5680_v33 = vrot.slane %v5573_v29, 2  ;;  %v5690_v22 = vrot.slane %v5579_v7, 4 }
 0x3c6   : > { %v5675_v14 = vsel %vm5614_vm2, %v5674_v44, %v5673_v43  ;;  %v5682_v42 = vrot.slane %v5574_v63, 1  ;;  %v5685_v41 = vsel %vm5608_vm0, %v5684_v13, %v5575_v3  ;;  %v5692_v38 = vrot.slane %v5580_v25, 3  ;;  %v12260_v25 = vld [vmem:[#allocation28_spill] sm:$0xff] }
 0x3c7   : > { %v10509_v10 = vadd.f32 %v10497_v11, %v12248_v28  ;;  %v5677_v60 = vsel %vm5617_vm3, %v5676_v62, %v5675_v14  ;;  %v5687_v57 = vsel %vm5611_vm1, %v5686_v48, %v5685_v41  ;;  %v5694_v15 = vrot.slane %v5581_v0, 2 }
 0x3c8   : > { %v10515_v58 = vadd.f32 %v10497_v11, %v12249_v47  ;;  %v5679_v56 = vsel %vm5620_vm4, %v5678_v36, %v5677_v60  ;;  %v5689_v50 = vsel %vm5614_vm2, %v5688_v4, %v5687_v57  ;;  %v5696_v20 = vrot.slane %v5582_v19, 1  ;;  %v12261_v19 = vld [vmem:[#allocation29_spill] sm:$0xff] }
 0x3c9   : > { %v1791_v30 = vrot.slane %v10493_v53, 4  ;;  %v10522_v59 = vadd.f32 %v10497_v11, %v10489_v12  ;;  %v5681_v5 = vsel %vm5623_vm5, %v5680_v33, %v5679_v56  ;;  %v5691_v31 = vsel %vm5617_vm3, %v5690_v22, %v5689_v50 }
 0x3ca   : > { %v1775_v9 = vrot.slane %v12250_v17, 2  ;;  %v1797_v39 = vrot.slane %v10502_v45, 4  ;;  %v5683_v27 = vsel %vm5626_vm6, %v5682_v42, %v5681_v5  ;;  %v5693_v32 = vsel %vm5620_vm4, %v5692_v38, %v5691_v31  ;;  %v1310_v38 = vpop.f32.mrf.mxu3  ;;  %v12263_v31 = vld [vmem:[#allocation71_spill] sm:$0xff] }
 0x3cb   : > { %v12252_v51 = vrot.slane %v12251_v8, 1  ;;  %v12254_v55 = vrot.slane %v12253_v61, 4  ;;  %v1803_v24 = vrot.slane %v10509_v10, 4  ;;  %v5695_v23 = vsel %vm5623_vm5, %v5694_v15, %v5693_v32  ;;  %v12264_v32 = vld [vmem:[#allocation100_spill] sm:$0xff] }
 0x3cc   : > { %v12256_v21 = vrot.slane %v12255_v6, 1  ;;  %v12258_v1 = vrot.slane %v12257_v46, 4  ;;  %v1809_v37 = vrot.slane %v10515_v58, 4  ;;  %v5697_v16 = vsel %vm5626_vm6, %v5696_v20, %v5695_v23 }
 0x3cd   : > { %v1760_v40 = vmax.f32 %v12251_v8, %v12252_v51  ;;  %v1780_v12 = vmax.f32 %v12253_v61, %v12254_v55  ;;  %v1792_v63 = vmax.f32 %v10493_v53, %v1791_v30  ;;  %v1815_v3 = vrot.slane %v10522_v59, 4  ;;  %v12265_v55 = vld [vmem:[#allocation24_spill] sm:$0xff] }
 0x3ce   : > { %v1766_v49 = vmax.f32 %v12255_v6, %v12256_v21  ;;  %v1786_v29 = vmax.f32 %v12257_v46, %v12258_v1  ;;  %v10550_v54 = vadd.f32 %v10497_v11, %v10495_v26  ;;  %v10552_v7 = vpack.c.b16 %v5697_v16, %v5683_v27  ;;  %v12262_v26 = vld [vmem:[#allocation82_spill] sm:$0xff] }
 0x3cf   : > { %v1771_v34 = vrot.slane %v12260_v25, 1  ;;  %v1776_v2 = vmax.f32 %v12250_v17, %v1775_v9  ;;  %v1798_v44 = vmax.f32 %v10502_v45, %v1797_v39  ;;  %v10558_v0 = vadd.f32 %v10497_v11, %v1307_v52 }
 0x3d0   : > { %12259 = vst [vmem:[#allocation50_spill] sm:$0xff] %v10552_v7  ;;  %v1942_v62 = vsub.f32 %v12261_v19, %v1760_v40  ;;  %v1781_v36 = vrot.slane %v1780_v12, 2  ;;  %v1804_v18 = vmax.f32 %v10509_v10, %v1803_v24  ;;  %5928 = vmatmul.bf16.gmra.mxu0 %v10552_v7  ;;  %5961 = vmatmul.bf16.gmra.mxu1 %v10552_v7  ;;  %v1787_v48 = vrot.slane %v1786_v29, 2 }
 0x3d1   : > { %v1943_v13 = vsub.f32 %v12262_v26, %v1766_v49  ;;  %v1810_v4 = vmax.f32 %v10515_v58, %v1809_v37  ;;  %5994 = vmatmul.bf16.gmra.mxu2 %v10552_v7  ;;  %v1793_v35 = vrot.slane %v1792_v63, 2  ;;  %v1816_v43 = vmax.f32 %v10522_v59, %v1815_v3  ;;  %v12266_v37 = vld [vmem:[#allocation22_spill] sm:$0xff] }
 0x3d2   : > { %v1821_v33 = vrot.slane %v10550_v54, 4  ;;  %v1772_v22 = vmax.f32 %v12260_v25, %v1771_v34  ;;  %v1777_v14 = vrot.slane %v1776_v2, 1  ;;  %v1799_v42 = vrot.slane %v1798_v44, 2 }
 0x3d3   : > { %v1827_v41 = vrot.slane %v10558_v0, 4  ;;  %v2063_v28 = vmul.f32 1.442695, %v1942_v62  ;;  %v1782_v60 = vmax.f32 %v1780_v12, %v1781_v36  ;;  %v1805_v57 = vrot.slane %v1804_v18, 2 }
 0x3d4   : > { %v10572_v15 = vadd.f32 %v10497_v11, %v1310_v38  ;;  %v2065_v47 = vmul.f32 1.442695, %v1943_v13  ;;  %v1788_v56 = vmax.f32 %v1786_v29, %v1787_v48  ;;  %v1811_v50 = vrot.slane %v1810_v4, 2 }
 0x3d5   : > { %v1794_v20 = vmax.f32 %v1792_v63, %v1793_v35  ;;  %v1817_v52 = vrot.slane %v1816_v43, 2  ;;  %v1822_v30 = vmax.f32 %v10550_v54, %v1821_v33  ;;  %v1944_v17 = vsub.f32 %v12263_v31, %v1772_v22 }
 0x3d6   : > { %v1833_v5 = vrot.slane %v10572_v15, 4  ;;  %v1778_v9 = vmax.f32 %v1776_v2, %v1777_v14  ;;  %v1800_v39 = vmax.f32 %v1798_v44, %v1799_v42  ;;  %v1828_v27 = vmax.f32 %v10558_v0, %v1827_v41 }
 0x3d7   : > { %v2397_v8 = vrot.slane %v12264_v32, 4  ;;  %7665 = vpow2.f32 %v2063_v28  ;;  %v1783_v51 = vrot.slane %v1782_v60, 1  ;;  %v1806_v40 = vmax.f32 %v1804_v18, %v1805_v57 }
 0x3d8   : > { %v10580_v12 = vperm.slane %v12265_v55, 0  ;;  %v1789_v24 = vrot.slane %v1788_v56, 1  ;;  %v1812_v23 = vmax.f32 %v1810_v4, %v1811_v50  ;;  %v1834_v6 = vmax.f32 %v10572_v15, %v1833_v5  ;;  %v1312_v50 = vpop.f32.mrf.mxu3 }
 0x3d9   : > { %7667 = vpow2.f32 %v2065_v47  ;;  %v1795_v21 = vrot.slane %v1794_v20, 1  ;;  %v1818_v49 = vmax.f32 %v1816_v43, %v1817_v52  ;;  %v1823_v1 = vrot.slane %v1822_v30, 2 }
 0x3da   : > { %v2067_v29 = vmul.f32 1.442695, %v1944_v17  ;;  %v1945_v16 = vsub.f32 %v12266_v37, %v1778_v9  ;;  %v1801_v63 = vrot.slane %v1800_v39, 1  ;;  %v1829_v3 = vrot.slane %v1828_v27, 2 }
 0x3db   : > { %v10585_v25 = vperm.slane %v12265_v55, 1  ;;  %v2398_v34 = vadd.f32 %v12264_v32, %v2397_v8  ;;  %v1784_v2 = vmax.f32 %v1782_v60, %v1783_v51  ;;  %v1807_v44 = vrot.slane %v1806_v40, 1 }
 0x3dc   : > { %v10589_v19 = vperm.slane %v12265_v55, 2  ;;  %v1790_v62 = vmax.f32 %v1788_v56, %v1789_v24  ;;  %v1813_v36 = vrot.slane %v1812_v23, 1  ;;  %v1835_v18 = vrot.slane %v1834_v6, 2 }
 0x3dd   : > { %v10591_v26 = vpop.eup %7665  ;;  %v10594_v13 = vperm.slane %v12265_v55, 3  ;;  %v1796_v48 = vmax.f32 %v1794_v20, %v1795_v21  ;;  %v1819_v4 = vrot.slane %v1818_v49, 1  ;;  %v1824_v35 = vmax.f32 %v1822_v30, %v1823_v1 }
 0x3de   : > { %7669 = vpow2.f32 %v2067_v29  ;;  %v2069_v43 = vmul.f32 1.442695, %v1945_v16  ;;  %v1802_v33 = vmax.f32 %v1800_v39, %v1801_v63  ;;  %v1830_v22 = vmax.f32 %v1828_v27, %v1829_v3 }
 0x3df   : > { %v10596_v14 = vpop.eup %7667  ;;  %v10599_v42 = vperm.slane %v12265_v55, 4  ;;  %v2399_v41 = vrot.slane %v2398_v34, 2  ;;  %v1946_v38 = vsub.f32 %v12253_v61, %v1784_v2  ;;  %v1808_v28 = vmax.f32 %v1806_v40, %v1807_v44 }
 0x3e0   : > { %v2403_v60 = vrot.slane %v10591_v26, 4  ;;  %v1947_v57 = vsub.f32 %v12257_v46, %v1790_v62  ;;  %v1814_v47 = vmax.f32 %v1812_v23, %v1813_v36  ;;  %v1836_v56 = vmax.f32 %v1834_v6, %v1835_v18  ;;  %v12267_v62 = vld [vmem:[#allocation23_spill] sm:$0xff]  ;;  %v12268_v36 = vld [vmem:[#allocation25_spill] sm:$0xff] }
 0x3e1   : > { %v1948_v20 = vsub.f32 %v10493_v53, %v1796_v48  ;;  %v1820_v52 = vmax.f32 %v1818_v49, %v1819_v4  ;;  %v1825_v30 = vrot.slane %v1824_v35, 1  ;;  %v10606_v5 = vadd.f32 %v10497_v11, %v1312_v50 }
 0x3e2   : > { %v2409_v31 = vrot.slane %v10596_v14, 4  ;;  %7671 = vpow2.f32 %v2069_v43  ;;  %v1949_v61 = vsub.f32 %v10502_v45, %v1802_v33  ;;  %v1831_v17 = vrot.slane %v1830_v22, 1 }
 0x3e3   : > { %v10611_v9 = vperm.slane %v12265_v55, 5  ;;  %v2071_v46 = vmul.f32 1.442695, %v1946_v38  ;;  %v1950_v39 = vsub.f32 %v10509_v10, %v1808_v28  ;;  %v1839_v27 = vrot.slane %v10606_v5, 4 }
 0x3e4   : > { %v10615_v53 = vpop.eup %7669  ;;  %v2404_v8 = vadd.f32 %v10591_v26, %v2403_v60  ;;  %v2073_v11 = vmul.f32 1.442695, %v1947_v57  ;;  %v1951_v51 = vsub.f32 %v10515_v58, %v1814_v47  ;;  %v1837_v40 = vrot.slane %v1836_v56, 1 }
 0x3e5   : > { %v2075_v24 = vmul.f32 1.442695, %v1948_v20  ;;  %v1952_v45 = vsub.f32 %v10522_v59, %v1820_v52  ;;  %v1826_v23 = vmax.f32 %v1824_v35, %v1825_v30  ;;  %v1840_v6 = vmax.f32 %v10606_v5, %v1839_v27  ;;  %v10650_v52 = vpop.permute.xlu2 %1386 }
 0x3e6   : > { %v2400_v21 = vadd.f32 %v2399_v41, %v2398_v34  ;;  %v2410_v49 = vadd.f32 %v10596_v14, %v2409_v31  ;;  %v2077_v10 = vmul.f32 1.442695, %v1949_v61  ;;  %v1832_v1 = vmax.f32 %v1830_v22, %v1831_v17 }
 0x3e7   : > { %v2415_v29 = vrot.slane %v10615_v53, 4  ;;  %7673 = vpow2.f32 %v2071_v46  ;;  %v2079_v37 = vmul.f32 1.442695, %v1950_v39  ;;  %v1841_v16 = vrot.slane %v1840_v6, 2  ;;  %v1315_v46 = vpop.f32.mrf.mxu3 }
 0x3e8   : > { %v10623_v63 = vpop.eup %7671  ;;  %v2405_v58 = vrot.slane %v2404_v8, 2  ;;  %7675 = vpow2.f32 %v2073_v11  ;;  %v2081_v3 = vmul.f32 1.442695, %v1951_v51  ;;  %v1838_v2 = vmax.f32 %v1836_v56, %v1837_v40 }
 0x3e9   : > { %7677 = vpow2.f32 %v2075_v24  ;;  %v2083_v59 = vmul.f32 1.442695, %v1952_v45  ;;  %v1953_v44 = vsub.f32 %v10550_v54, %v1826_v23  ;;  %v1842_v34 = vmax.f32 %v1840_v6, %v1841_v16 }
 0x3ea   : > { %v10628_v18 = vadd.f32 %v12268_v36, %v12267_v62  ;;  %v2411_v48 = vrot.slane %v2410_v49, 2  ;;  %7679 = vpow2.f32 %v2077_v10  ;;  %v1954_v4 = vsub.f32 %v10558_v0, %v1832_v1 }
 0x3eb   : > { %v2416_v35 = vadd.f32 %v10615_v53, %v2415_v29  ;;  %v2421_v43 = vrot.slane %v10623_v63, 4  ;;  %7681 = vpow2.f32 %v2079_v37  ;;  %v1843_v33 = vrot.slane %v1842_v34, 1 }
 0x3ec   : > { %v10634_v22 = vperm.slane %v12265_v55, 6  ;;  %v2401_v41 = vrot.slane %v2400_v21, 1  ;;  %7683 = vpow2.f32 %v2081_v3  ;;  %v1955_v54 = vsub.f32 %v10572_v15, %v1838_v2 }
 0x3ed   : > { %v10637_v38 = vpop.eup %7673  ;;  %v2406_v28 = vadd.f32 %v2405_v58, %v2404_v8  ;;  %7685 = vpow2.f32 %v2083_v59  ;;  %v2085_v60 = vmul.f32 1.442695, %v1953_v44  ;;  %v1844_v57 = vmax.f32 %v1842_v34, %v1843_v33 }
 0x3ee   : > { %v10639_v0 = vpop.eup %7675  ;;  %v10642_v47 = vperm.slane %v12265_v55, 7  ;;  %v10645_v56 = vperm.slane %v10628_v18, 0  ;;  %v10648_v50 = vperm.slane %v10628_v18, 1  ;;  %v2087_v20 = vmul.f32 1.442695, %v1954_v4 }
 0x3ef   : > { %v10652_v15 = vpop.eup %7677  ;;  %v2412_v30 = vadd.f32 %v2411_v48, %v2410_v49  ;;  %v2417_v31 = vrot.slane %v2416_v35, 2  ;;  %v2422_v61 = vadd.f32 %v10623_v63, %v2421_v43  ;;  %v1956_v17 = vsub.f32 %v10606_v5, %v1844_v57 }
 0x3f0   : > { %12269 = vst [vmem:[#allocation57_spill] sm:$0xff] %v10642_v47  ;;  %v10656_v55 = vpop.eup %7679  ;;  %v10659_v39 = vperm.slane %v10628_v18, 2  ;;  %v2427_v27 = vrot.slane %v10637_v38, 4  ;;  %v2089_v8 = vmul.f32 1.442695, %v1955_v54  ;;  %v10663_v11 = vadd.f32 %v10650_v52, %v1315_v46 }
 0x3f1   : > { %12270 = vst [vmem:[#allocation58_spill] sm:$0xff] %v10645_v56  ;;  %v10665_v51 = vpop.eup %7681  ;;  %v2402_v40 = vadd.f32 %v2401_v41, %v2400_v21  ;;  %v2407_v24 = vrot.slane %v2406_v28, 1  ;;  %v2433_v45 = vrot.slane %v10639_v0, 4  ;;  %7687 = vpow2.f32 %v2085_v60 }
 0x3f2   : > { %12271 = vst [vmem:[#allocation80_spill] sm:$0xff] %v10648_v50  ;;  %v10668_v5 = vpop.eup %7683  ;;  %v2439_v23 = vrot.slane %v10652_v15, 4  ;;  %7689 = vpow2.f32 %v2087_v20  ;;  %v2091_v6 = vmul.f32 1.442695, %v1956_v17  ;;  %v1845_v49 = vrot.slane %v10663_v11, 4 }
 0x3f3   : > { %12272 = vst [vmem:[#allocation83_spill] sm:$0xff] %v10659_v39  ;;  %v10672_v10 = vpop.eup %7685  ;;  %v2413_v1 = vrot.slane %v2412_v30, 1  ;;  %v2418_v29 = vadd.f32 %v2417_v31, %v2416_v35  ;;  %v2423_v37 = vrot.slane %v2422_v61, 2  ;;  %v2445_v16 = vrot.slane %v10656_v55, 4 }
 0x3f4   : > { %v2428_v21 = vadd.f32 %v10637_v38, %v2427_v27  ;;  %v2451_v58 = vrot.slane %v10665_v51, 4  ;;  %7691 = vpow2.f32 %v2089_v8  ;;  %v1846_v3 = vmax.f32 %v10663_v11, %v1845_v49 }
 0x3f5   : > { %v10679_v2 = vperm.slane %v10628_v18, 3  ;;  %v2408_v59 = vadd.f32 %v2407_v24, %v2406_v28  ;;  %v2434_v44 = vadd.f32 %v10639_v0, %v2433_v45  ;;  %v2457_v34 = vrot.slane %v10668_v5, 4 }
 0x3f6   : > { %v2440_v62 = vadd.f32 %v10652_v15, %v2439_v23  ;;  %v2463_v36 = vrot.slane %v10672_v10, 4  ;;  %7693 = vpow2.f32 %v2091_v6  ;;  %v1847_v48 = vrot.slane %v1846_v3, 2 }
 0x3f7   : > { %12273 = vst [vmem:[#allocation40_spill] sm:$0xff] %v10679_v2  ;;  %v10685_v4 = vpop.eup %7687  ;;  %7695 = vrcp.f32 %v2402_v40  ;;  %v2414_v35 = vadd.f32 %v2413_v1, %v2412_v30  ;;  %v2419_v43 = vrot.slane %v2418_v29, 1  ;;  %v2446_v33 = vadd.f32 %v10656_v55, %v2445_v16  ;;  %v1317_v16 = vpop.f32.mrf.mxu3 }
 0x3f8   : > { %v10688_v41 = vpop.eup %7689  ;;  %v2424_v54 = vadd.f32 %v2423_v37, %v2422_v61  ;;  %v2429_v28 = vrot.slane %v2428_v21, 2  ;;  %v2452_v60 = vadd.f32 %v10665_v51, %v2451_v58  ;;  %v1848_v57 = vmax.f32 %v1846_v3, %v1847_v48 }
 0x3f9   : > { %v10692_v20 = vperm.slane %v10628_v18, 4  ;;  %7697 = vrcp.f32 %v2408_v59  ;;  %v2435_v31 = vrot.slane %v2434_v44, 2  ;;  %v2458_v17 = vadd.f32 %v10668_v5, %v2457_v34 }
 0x3fa   : > { %v10695_v46 = vpop.eup %7691  ;;  %v2441_v30 = vrot.slane %v2440_v62, 2  ;;  %v2464_v27 = vadd.f32 %v10672_v10, %v2463_v36  ;;  %v2469_v8 = vrot.slane %v10685_v4, 4  ;;  %v1849_v40 = vrot.slane %v1848_v57, 1 }
 0x3fb   : > { %12274 = vst [vmem:[#allocation84_spill] sm:$0xff] %v10692_v20  ;;  %7699 = vrcp.f32 %v2414_v35  ;;  %v2420_v61 = vadd.f32 %v2419_v43, %v2418_v29  ;;  %v2447_v24 = vrot.slane %v2446_v33, 2  ;;  %v2475_v45 = vrot.slane %v10688_v41, 4 }
 0x3fc   : > { %12275 = vst [vmem:[#allocation85_spill] sm:$0xff] %v10695_v46  ;;  %v10700_v23 = vpop.eup %7693  ;;  %v2425_v6 = vrot.slane %v2424_v54, 1  ;;  %v2430_v49 = vadd.f32 %v2429_v28, %v2428_v21  ;;  %v2453_v1 = vrot.slane %v2452_v60, 2  ;;  %v1850_v37 = vmax.f32 %v1848_v57, %v1849_v40 }
 0x3fd   : > { %12276 = vst [vmem:[#allocation106_spill] sm:$0xff] %v10700_v23  ;;  %v10702_v58 = vpop.eup %7695  ;;  %v2436_v3 = vadd.f32 %v2435_v31, %v2434_v44  ;;  %v2459_v59 = vrot.slane %v2458_v17, 2  ;;  %v2481_v34 = vrot.slane %v10695_v46, 4  ;;  %v10706_v36 = vadd.f32 %v10650_v52, %v1317_v16 }
 0x3fe   : > { %v2442_v29 = vadd.f32 %v2441_v30, %v2440_v62  ;;  %v2465_v48 = vrot.slane %v2464_v27, 2  ;;  %v2470_v35 = vadd.f32 %v10685_v4, %v2469_v8  ;;  %v1957_v43 = vsub.f32 %v10663_v11, %v1850_v37 }
 0x3ff   : > { %v7698_v7 = vpop.eup %7697  ;;  %v2448_v21 = vadd.f32 %v2447_v24, %v2446_v33  ;;  %v2476_v28 = vadd.f32 %v10688_v41, %v2475_v45  ;;  %v2487_v57 = vrot.slane %v10700_v23, 4  ;;  %v1851_v44 = vrot.slane %v10706_v36, 4 }
 0x400   : > { %7701 = vrcp.f32 %v2420_v61  ;;  %v2426_v31 = vadd.f32 %v2425_v6, %v2424_v54  ;;  %v2431_v40 = vrot.slane %v2430_v49, 1  ;;  %v2454_v56 = vadd.f32 %v2453_v1, %v2452_v60 }
 0x401   : > { %v7700_v16 = vpop.eup %7699  ;;  %v2437_v20 = vrot.slane %v2436_v3, 1  ;;  %v2460_v62 = vadd.f32 %v2459_v59, %v2458_v17  ;;  %v2482_v30 = vadd.f32 %v10695_v46, %v2481_v34  ;;  %v1852_v8 = vmax.f32 %v10706_v36, %v1851_v44 }
 0x402   : > { %v2443_v11 = vrot.slane %v2442_v29, 1  ;;  %v2466_v37 = vadd.f32 %v2465_v48, %v2464_v27  ;;  %v2471_v33 = vrot.slane %v2470_v35, 2  ;;  %v2093_v24 = vmul.f32 1.442695, %v1957_v43 }
 0x403   : > { %v2449_v45 = vrot.slane %v2448_v21, 1  ;;  %v2477_v2 = vrot.slane %v2476_v28, 2  ;;  %v2488_v39 = vadd.f32 %v10700_v23, %v2487_v57  ;;  %v1853_v50 = vrot.slane %v1852_v8, 2 }
 0x404   : > { %v10717_v54 = vperm.slane %v10628_v18, 5  ;;  %7703 = vrcp.f32 %v2426_v31  ;;  %v2432_v60 = vadd.f32 %v2431_v40, %v2430_v49  ;;  %v2455_v61 = vrot.slane %v2454_v56, 1 }
 0x405   : > { %v2438_v17 = vadd.f32 %v2437_v20, %v2436_v3  ;;  %v2461_v6 = vrot.slane %v2460_v62, 1  ;;  %v2483_v1 = vrot.slane %v2482_v30, 2  ;;  %v1854_v59 = vmax.f32 %v1852_v8, %v1853_v50 }
 0x406   : > { %v7702_v34 = vpop.eup %7701  ;;  %v2444_v44 = vadd.f32 %v2443_v11, %v2442_v29  ;;  %v2467_v27 = vrot.slane %v2466_v37, 1  ;;  %v2472_v48 = vadd.f32 %v2471_v33, %v2470_v35  ;;  %7705 = vpow2.f32 %v2093_v24  ;;  %v1320_v29 = vpop.f32.mrf.mxu3 }
 0x407   : > { %v2450_v43 = vadd.f32 %v2449_v45, %v2448_v21  ;;  %v2478_v47 = vadd.f32 %v2477_v2, %v2476_v28  ;;  %v2489_v46 = vrot.slane %v2488_v39, 2  ;;  %v1855_v57 = vrot.slane %v1854_v59, 1 }
 0x408   : > { %v10720_v23 = vperm.slane %v10628_v18, 6  ;;  %v10723_v31 = vperm.slane %v10628_v18, 7  ;;  %7707 = vrcp.f32 %v2432_v60  ;;  %v2456_v20 = vadd.f32 %v2455_v61, %v2454_v56 }
 0x409   : > { %7709 = vrcp.f32 %v2438_v17  ;;  %v2462_v49 = vadd.f32 %v2461_v6, %v2460_v62  ;;  %v2484_v50 = vadd.f32 %v2483_v1, %v2482_v30  ;;  %v1856_v3 = vmax.f32 %v1854_v59, %v1855_v57 }
 0x40a   : > { %v7704_v40 = vpop.eup %7703  ;;  %7711 = vrcp.f32 %v2444_v44  ;;  %v2468_v35 = vadd.f32 %v2467_v27, %v2466_v37  ;;  %v2473_v21 = vrot.slane %v2472_v48, 1  ;;  %v10726_v2 = vadd.f32 %v10650_v52, %v1320_v29 }
 0x40b   : > { %7713 = vrcp.f32 %v2450_v43  ;;  %v2479_v28 = vrot.slane %v2478_v47, 1  ;;  %v2490_v8 = vadd.f32 %v2489_v46, %v2488_v39  ;;  %v1958_v18 = vsub.f32 %v10706_v36, %v1856_v3 }
 0x40c   : > { %v10729_v11 = vpop.eup %7705  ;;  %v10733_v56 = vmul.f32 %v10702_v58, %v12264_v32  ;;  %v10736_v62 = vmul.f32 %v7698_v7, %v10591_v26  ;;  %7715 = vrcp.f32 %v2456_v20  ;;  %v1857_v30 = vrot.slane %v10726_v2, 4 }
 0x40d   : > { %12277 = vst [vmem:[#allocation46_spill] sm:$0xff] %v10729_v11  ;;  %v10740_v37 = vmul.f32 %v7700_v16, %v10596_v14  ;;  %v10743_v33 = vmul.f32 %v7702_v34, %v10615_v53  ;;  %7717 = vrcp.f32 %v2462_v49  ;;  %v2485_v39 = vrot.slane %v2484_v50, 1 }
 0x40e   : > { %v7708_v46 = vpop.eup %7707  ;;  %v10746_v36 = vmul.f32 %v7704_v40, %v10623_v63  ;;  %7719 = vrcp.f32 %v2468_v35  ;;  %v2474_v32 = vadd.f32 %v2473_v21, %v2472_v48  ;;  %v1858_v7 = vmax.f32 %v10726_v2, %v1857_v30  ;;  %v1322_v30 = vpop.f32.mrf.mxu3 }
 0x40f   : > { %v7710_v26 = vpop.eup %7709  ;;  %v2480_v58 = vadd.f32 %v2479_v28, %v2478_v47  ;;  %v2491_v24 = vrot.slane %v2490_v8, 1  ;;  %v2493_v45 = vrot.slane %v10729_v11, 4  ;;  %v2095_v14 = vmul.f32 1.442695, %v1958_v18 }
 0x410   : > { %v7712_v16 = vpop.eup %7711  ;;  %v1859_v60 = vrot.slane %v1858_v7, 2  ;;  %v2742_v53 = vmul.f32 %v10580_v12, %v10733_v56  ;;  %v2823_v61 = vmul.f32 %v10585_v25, %v10733_v56  ;;  %v3192_v63 = vmul.f32 %v10589_v19, %v10733_v56 }
 0x411   : > { %v7714_v17 = vpop.eup %7713  ;;  %v2486_v6 = vadd.f32 %v2485_v39, %v2484_v50  ;;  %v3561_v47 = vmul.f32 %v10594_v13, %v10733_v56  ;;  %v3930_v1 = vmul.f32 %v10599_v42, %v10733_v56  ;;  %v4299_v59 = vmul.f32 %v10611_v9, %v10733_v56 }
 0x412   : > { %v7716_v34 = vpop.eup %7715  ;;  %7721 = vrcp.f32 %v2474_v32  ;;  %v1860_v44 = vmax.f32 %v1858_v7, %v1859_v60  ;;  %v2967_v27 = vrot.slane %v2823_v61, 1  ;;  %v10764_v48 = vmul.f32 %v10634_v22, %v10733_v56 }
 0x413   : > { %v7718_v43 = vpop.eup %7717  ;;  %v10767_v57 = vmul.f32 %v7708_v46, %v10637_v38  ;;  %v2492_v20 = vadd.f32 %v2491_v24, %v2490_v8  ;;  %v2494_v49 = vadd.f32 %v10729_v11, %v2493_v45  ;;  %7723 = vpow2.f32 %v2095_v14 }
 0x414   : > { %v7720_v50 = vpop.eup %7719  ;;  %7725 = vrcp.f32 %v2480_v58  ;;  %v1861_v3 = vrot.slane %v1860_v44, 1  ;;  %v3111_v29 = vadd.f32 %v2967_v27, %v2742_v53  ;;  %v3336_v40 = vrot.slane %v3192_v63, 2 }
 0x415   : > { %v10771_v35 = vmul.f32 %v7710_v26, %v10639_v0  ;;  %v10774_v21 = vmul.f32 %v7712_v16, %v10652_v15  ;;  %v10777_v28 = vmul.f32 %v7714_v17, %v10656_v55  ;;  %7727 = vrcp.f32 %v2486_v6 }
 0x416   : > { %v10780_v38 = vmul.f32 %v7716_v34, %v10665_v51  ;;  %v10783_v8 = vmul.f32 %v7718_v43, %v10668_v5  ;;  %v1862_v18 = vmax.f32 %v1860_v44, %v1861_v3  ;;  %v3480_v39 = vadd.f32 %v3336_v40, %v3111_v29  ;;  %v12279_v29 = vld [vmem:[#allocation85_spill] sm:$0xff] }
 0x417   : > { %7729 = vrcp.f32 %v2492_v20  ;;  %v2495_v46 = vrot.slane %v2494_v49, 2  ;;  %v10786_v0 = vadd.f32 %v10650_v52, %v1322_v30  ;;  %v3705_v15 = vrot.slane %v3561_v47, 3 }
 0x418   : > { %v7722_v32 = vpop.eup %7721  ;;  %v1959_v55 = vsub.f32 %v10726_v2, %v1862_v18  ;;  %v2743_v7 = vmul.f32 %v10580_v12, %v10736_v62  ;;  %v2824_v51 = vmul.f32 %v10585_v25, %v10736_v62  ;;  %v4074_v5 = vrot.slane %v3930_v1, 4 }
 0x419   : > { %v10793_v26 = vpop.eup %7723  ;;  %v1863_v58 = vrot.slane %v10786_v0, 4  ;;  %v3193_v24 = vmul.f32 %v10589_v19, %v10736_v62  ;;  %v3562_v45 = vmul.f32 %v10594_v13, %v10736_v62  ;;  %v3849_v14 = vadd.f32 %v3705_v15, %v3480_v39 }
 0x41a   : > { %12278 = vst [vmem:[#allocation47_spill] sm:$0xff] %v10793_v26  ;;  %v7726_v16 = vpop.eup %7725  ;;  %v10801_v2 = vmul.f32 %v7720_v50, %v10672_v10  ;;  %v2097_v60 = vmul.f32 1.442695, %v1959_v55  ;;  %v2968_v53 = vrot.slane %v2824_v51, 1  ;;  %v3931_v61 = vmul.f32 %v10599_v42, %v10736_v62 }
 0x41b   : > { %v7728_v63 = vpop.eup %7727  ;;  %v2496_v17 = vadd.f32 %v2495_v46, %v2494_v49  ;;  %v1864_v6 = vmax.f32 %v10786_v0, %v1863_v58  ;;  %v4218_v47 = vadd.f32 %v4074_v5, %v3849_v14  ;;  %v4443_v1 = vrot.slane %v4299_v59, 5  ;;  %v12280_v46 = vld [vmem:[#allocation57_spill] sm:$0xff] }
 0x41c   : > { %v2499_v34 = vrot.slane %v10793_v26, 4  ;;  %7731 = vpow2.f32 %v2097_v60  ;;  %v3112_v44 = vadd.f32 %v2968_v53, %v2743_v7  ;;  %v3337_v27 = vrot.slane %v3193_v24, 2 }
 0x41d   : > { %v7730_v43 = vpop.eup %7729  ;;  %v10808_v10 = vmul.f32 %v7722_v32, %v10685_v4  ;;  %v1865_v20 = vrot.slane %v1864_v6, 2  ;;  %v4300_v50 = vmul.f32 %v10611_v9, %v10736_v62  ;;  %v4587_v3 = vadd.f32 %v4443_v1, %v4218_v47  ;;  %v1325_v1 = vpop.f32.mrf.mxu3 }
 0x41e   : > { %v10813_v49 = vmul.f32 %v7726_v16, %v10688_v41  ;;  %v10816_v40 = vmul.f32 %v7728_v63, %v12279_v29  ;;  %v3481_v59 = vadd.f32 %v3337_v27, %v3112_v44  ;;  %v10820_v18 = vmul.f32 %v10634_v22, %v10736_v62 }
 0x41f   : > { %v2497_v30 = vrot.slane %v2496_v17, 1  ;;  %v1866_v39 = vmax.f32 %v1864_v6, %v1865_v20  ;;  %v3706_v4 = vrot.slane %v3562_v45, 3  ;;  %v10824_v15 = vmul.f32 %v12280_v46, %v10733_v56  ;;  %v12282_v45 = vld [vmem:[#allocation106_spill] sm:$0xff] }
 0x420   : > { %v2500_v32 = vadd.f32 %v10793_v26, %v2499_v34  ;;  %v2744_v41 = vmul.f32 %v10580_v12, %v10740_v37  ;;  %v2825_v55 = vmul.f32 %v10585_v25, %v10740_v37  ;;  %v3194_v7 = vmul.f32 %v10589_v19, %v10740_v37 }
 0x421   : > { %v1867_v51 = vrot.slane %v1866_v39, 1  ;;  %v3563_v5 = vmul.f32 %v10594_v13, %v10740_v37  ;;  %v3850_v58 = vadd.f32 %v3706_v4, %v3481_v59  ;;  %v3932_v56 = vmul.f32 %v10599_v42, %v10740_v37 }
 0x422   : > { %v10837_v24 = vpop.eup %7731  ;;  %v10840_v14 = vmul.f32 %v7730_v43, %v12282_v45  ;;  %v2969_v16 = vrot.slane %v2825_v55, 1  ;;  %v4075_v60 = vrot.slane %v3931_v61, 4  ;;  %v4301_v53 = vmul.f32 %v10611_v9, %v10740_v37 }
 0x423   : > { %12281 = vst [vmem:[#allocation94_spill] sm:$0xff] %v10837_v24  ;;  %v2498_v63 = vadd.f32 %v2497_v30, %v2496_v17  ;;  %v2505_v6 = vrot.slane %v10837_v24, 4  ;;  %v1868_v47 = vmax.f32 %v1866_v39, %v1867_v51  ;;  %v4444_v34 = vrot.slane %v4300_v50, 5 }
 0x424   : > { %v10846_v44 = vadd.f32 %v10650_v52, %v1325_v1  ;;  %v3113_v27 = vadd.f32 %v2969_v16, %v2744_v41  ;;  %v3338_v20 = vrot.slane %v3194_v7, 2  ;;  %v4219_v29 = vadd.f32 %v4075_v60, %v3850_v58 }
 0x425   : > { %v2501_v59 = vrot.slane %v2500_v32, 2  ;;  %v1960_v43 = vsub.f32 %v10786_v0, %v1868_v47  ;;  %v10851_v61 = vmul.f32 %v10634_v22, %v10740_v37  ;;  %v4812_v17 = vrot.slane %v10764_v48, 6 }
 0x426   : > { %v2506_v30 = vadd.f32 %v10837_v24, %v2505_v6  ;;  %v1869_v39 = vrot.slane %v10846_v44, 4  ;;  %v3482_v50 = vadd.f32 %v3338_v20, %v3113_v27  ;;  %v4588_v4 = vadd.f32 %v4444_v34, %v4219_v29 }
 0x427   : > { %7733 = vrcp.f32 %v2498_v63  ;;  %v2099_v55 = vmul.f32 1.442695, %v1960_v43  ;;  %v3707_v41 = vrot.slane %v3563_v5, 3  ;;  %v10856_v7 = vadd.f32 %v4812_v17, %v4587_v3 }
 0x428   : > { %v1870_v51 = vmax.f32 %v10846_v44, %v1869_v39  ;;  %v2745_v0 = vmul.f32 %v10580_v12, %v10743_v33  ;;  %v2826_v58 = vmul.f32 %v10585_v25, %v10743_v33  ;;  %v3195_v48 = vmul.f32 %v10589_v19, %v10743_v33 }
 0x429   : > { %v2502_v45 = vadd.f32 %v2501_v59, %v2500_v32  ;;  %7735 = vpow2.f32 %v2099_v55  ;;  %v3564_v16 = vmul.f32 %v10594_v13, %v10743_v33  ;;  %v4076_v60 = vrot.slane %v3932_v56, 4 }
 0x42a   : > { %v2507_v5 = vrot.slane %v2506_v30, 2  ;;  %v1871_v3 = vrot.slane %v1870_v51, 2  ;;  %v2970_v63 = vrot.slane %v2826_v58, 1  ;;  %v3851_v6 = vadd.f32 %v3707_v41, %v3482_v50 }
 0x42b   : > { %v3339_v47 = vrot.slane %v3195_v48, 2  ;;  %v3933_v1 = vmul.f32 %v10599_v42, %v10743_v33  ;;  %v4302_v34 = vmul.f32 %v10611_v9, %v10743_v33  ;;  %v4445_v27 = vrot.slane %v4301_v53, 5 }
 0x42c   : > { %v1872_v20 = vmax.f32 %v1870_v51, %v1871_v3  ;;  %v3114_v29 = vadd.f32 %v2970_v63, %v2745_v0  ;;  %v4220_v32 = vadd.f32 %v4076_v60, %v3851_v6  ;;  %v10873_v59 = vmul.f32 %v10634_v22, %v10743_v33  ;;  %v1327_v63 = vpop.f32.mrf.mxu3 }
 0x42d   : > { %v10875_v56 = vpop.eup %7733  ;;  %v2503_v43 = vrot.slane %v2502_v45, 1  ;;  %v4813_v17 = vrot.slane %v10820_v18, 6  ;;  %v4814_v39 = vrot.slane %v10851_v61, 6  ;;  %v10881_v50 = vmul.f32 %v12280_v46, %v10736_v62 }
 0x42e   : > { %12283 = vst [vmem:[#allocation48_spill] sm:$0xff] %v10875_v56  ;;  %v2508_v55 = vadd.f32 %v2507_v5, %v2506_v30  ;;  %v1873_v53 = vrot.slane %v1872_v20, 1  ;;  %v3483_v41 = vadd.f32 %v3339_v47, %v3114_v29  ;;  %v4589_v51 = vadd.f32 %v4445_v27, %v4220_v32 }
 0x42f   : > { %v10883_v0 = vpop.eup %7735  ;;  %v3708_v58 = vrot.slane %v3564_v16, 3  ;;  %v4077_v48 = vrot.slane %v3933_v1, 4  ;;  %v10885_v60 = vadd.f32 %v4813_v17, %v4588_v4  ;;  %v10889_v3 = vmul.f32 %v12280_v46, %v10740_v37 }
 0x430   : > { %12284 = vst [vmem:[#allocation52_spill] sm:$0xff] %v10883_v0  ;;  %v2511_v18 = vrot.slane %v10883_v0, 4  ;;  %v1874_v61 = vmax.f32 %v1872_v20, %v1873_v53  ;;  %v2746_v62 = vmul.f32 %v10580_v12, %v10746_v36  ;;  %v2827_v30 = vmul.f32 %v10585_v25, %v10746_v36 }
 0x431   : > { %12285 = vst [vmem:[#allocation90_spill] sm:$0xff] %v10889_v3  ;;  %v10897_v5 = vadd.f32 %v10650_v52, %v1327_v63  ;;  %v3196_v4 = vmul.f32 %v10589_v19, %v10746_v36  ;;  %v3565_v37 = vmul.f32 %v10594_v13, %v10746_v36  ;;  %v3852_v16 = vadd.f32 %v3708_v58, %v3483_v41 }
 0x432   : > { %v2512_v6 = vadd.f32 %v10883_v0, %v2511_v18  ;;  %v1961_v47 = vsub.f32 %v10846_v44, %v1874_v61  ;;  %v2971_v1 = vrot.slane %v2827_v30, 1  ;;  %v3934_v27 = vmul.f32 %v10599_v42, %v10746_v36 }
 0x433   : > { %v2509_v20 = vrot.slane %v2508_v55, 1  ;;  %v1875_v29 = vrot.slane %v10897_v5, 4  ;;  %v4221_v32 = vadd.f32 %v4077_v48, %v3852_v16  ;;  %v4446_v17 = vrot.slane %v4302_v34, 5 }
 0x434   : > { %v2513_v53 = vrot.slane %v2512_v6, 2  ;;  %v2101_v63 = vmul.f32 1.442695, %v1961_v47  ;;  %v3115_v24 = vadd.f32 %v2971_v1, %v2746_v62  ;;  %v3340_v26 = vrot.slane %v3196_v4, 2 }
 0x435   : > { %v1876_v56 = vmax.f32 %v10897_v5, %v1875_v29  ;;  %v4303_v41 = vmul.f32 %v10611_v9, %v10746_v36  ;;  %v4590_v58 = vadd.f32 %v4446_v17, %v4221_v32  ;;  %v10913_v44 = vmul.f32 %v10634_v22, %v10746_v36 }
 0x436   : > { %v2504_v18 = vadd.f32 %v2503_v43, %v2502_v45  ;;  %v2514_v61 = vadd.f32 %v2513_v53, %v2512_v6  ;;  %7737 = vpow2.f32 %v2101_v63  ;;  %v3484_v30 = vadd.f32 %v3340_v26, %v3115_v24 }
 0x437   : > { %v2510_v48 = vadd.f32 %v2509_v20, %v2508_v55  ;;  %v1877_v34 = vrot.slane %v1876_v56, 2  ;;  %v3709_v16 = vrot.slane %v3565_v37, 3  ;;  %v10915_v47 = vadd.f32 %v4814_v39, %v4589_v51 }
 0x438   : > { %v2747_v62 = vmul.f32 %v10580_v12, %v10767_v57  ;;  %v2828_v4 = vmul.f32 %v10585_v25, %v10767_v57  ;;  %v3197_v1 = vmul.f32 %v10589_v19, %v10767_v57  ;;  %v4078_v29 = vrot.slane %v3934_v27, 4 }
 0x439   : > { %12286 = vst [vmem:[#allocation38_spill] sm:$0xff] %v10915_v47  ;;  %v1878_v32 = vmax.f32 %v1876_v56, %v1877_v34  ;;  %v3566_v45 = vmul.f32 %v10594_v13, %v10767_v57  ;;  %v3853_v26 = vadd.f32 %v3709_v16, %v3484_v30  ;;  %v3935_v24 = vmul.f32 %v10599_v42, %v10767_v57  ;;  %v1330_v30 = vpop.f32.mrf.mxu3 }
 0x43a   : > { %7739 = vrcp.f32 %v2504_v18  ;;  %v2515_v43 = vrot.slane %v2514_v61, 1  ;;  %v2972_v39 = vrot.slane %v2828_v4, 1  ;;  %v4304_v55 = vmul.f32 %v10611_v9, %v10767_v57 }
 0x43b   : > { %v1879_v51 = vrot.slane %v1878_v32, 1  ;;  %v4222_v37 = vadd.f32 %v4078_v29, %v3853_v26  ;;  %v4447_v6 = vrot.slane %v4303_v41, 5  ;;  %v4815_v20 = vrot.slane %v10873_v59, 6 }
 0x43c   : > { %v10930_v27 = vpop.eup %7737  ;;  %7741 = vrcp.f32 %v2510_v48  ;;  %v3116_v56 = vadd.f32 %v2972_v39, %v2747_v62  ;;  %v3341_v17 = vrot.slane %v3197_v1, 2  ;;  %v10934_v53 = vmul.f32 %v10634_v22, %v10767_v57 }
 0x43d   : > { %12287 = vst [vmem:[#allocation31_spill] sm:$0xff] %v10930_v27  ;;  %v2517_v63 = vrot.slane %v10930_v27, 4  ;;  %v1880_v18 = vmax.f32 %v1878_v32, %v1879_v51  ;;  %v4591_v34 = vadd.f32 %v4447_v6, %v4222_v37  ;;  %v10939_v16 = vmul.f32 %v12280_v46, %v10743_v33 }
 0x43e   : > { %v2516_v41 = vadd.f32 %v2515_v43, %v2514_v61  ;;  %v10942_v59 = vadd.f32 %v10650_v52, %v1330_v30  ;;  %v3485_v48 = vadd.f32 %v3341_v17, %v3116_v56  ;;  %v3710_v62 = vrot.slane %v3566_v45, 3 }
 0x43f   : > { %12288 = vst [vmem:[#allocation67_spill] sm:$0xff] %v10939_v16  ;;  %v2518_v4 = vadd.f32 %v10930_v27, %v2517_v63  ;;  %v1962_v1 = vsub.f32 %v10897_v5, %v1880_v18  ;;  %v10946_v29 = vadd.f32 %v4815_v20, %v4590_v58  ;;  %v10950_v32 = vmul.f32 %v12280_v46, %v10746_v36 }
 0x440   : > { %v10952_v26 = vpop.eup %7739  ;;  %v1881_v33 = vrot.slane %v10942_v59, 4  ;;  %v2748_v61 = vmul.f32 %v10580_v12, %v10771_v35  ;;  %v2829_v45 = vmul.f32 %v10585_v25, %v10771_v35  ;;  %v3198_v43 = vmul.f32 %v10589_v19, %v10771_v35 }
 0x441   : > { %12289 = vst [vmem:[#allocation102_spill] sm:$0xff] %v10946_v29  ;;  %v2519_v5 = vrot.slane %v2518_v4, 2  ;;  %v2103_v58 = vmul.f32 1.442695, %v1962_v1  ;;  %v3567_v39 = vmul.f32 %v10594_v13, %v10771_v35  ;;  %v3854_v36 = vadd.f32 %v3710_v62, %v3485_v48 }
 0x442   : > { %12290 = vst [vmem:[#allocation77_spill] sm:$0xff] %v10950_v32  ;;  %v10963_v51 = vpop.eup %7741  ;;  %v1882_v37 = vmax.f32 %v10942_v59, %v1881_v33  ;;  %v2973_v6 = vrot.slane %v2829_v45, 1  ;;  %v3936_v20 = vmul.f32 %v10599_v42, %v10771_v35  ;;  %v4079_v56 = vrot.slane %v3935_v24, 4 }
 0x443   : > { %12291 = vst [vmem:[#allocation41_spill] sm:$0xff] %v10952_v26  ;;  %7743 = vpow2.f32 %v2103_v58  ;;  %v4448_v17 = vrot.slane %v4304_v55, 5  ;;  %v4816_v63 = vrot.slane %v10913_v44, 6  ;;  %v3342_v27 = vrot.slane %v3198_v43, 2 }
 0x444   : > { %12292 = vst [vmem:[#allocation60_spill] sm:$0xff] %v10963_v51  ;;  %v1883_v30 = vrot.slane %v1882_v37, 2  ;;  %v3117_v1 = vadd.f32 %v2973_v6, %v2748_v61  ;;  %v4223_v0 = vadd.f32 %v4079_v56, %v3854_v36  ;;  %7745 = vrcp.f32 %v2516_v41 }
 0x445   : > { %v2520_v48 = vadd.f32 %v2519_v5, %v2518_v4  ;;  %v4305_v62 = vmul.f32 %v10611_v9, %v10771_v35  ;;  %v10974_v33 = vmul.f32 %v10634_v22, %v10771_v35  ;;  %v4817_v44 = vrot.slane %v10934_v53, 6 }
 0x446   : > { %v1884_v24 = vmax.f32 %v1882_v37, %v1883_v30  ;;  %v3486_v45 = vadd.f32 %v3342_v27, %v3117_v1  ;;  %v4592_v55 = vadd.f32 %v4448_v17, %v4223_v0  ;;  %v3711_v58 = vrot.slane %v3567_v39, 3 }
 0x447   : > { %v4080_v18 = vrot.slane %v3936_v20, 4  ;;  %v10977_v51 = vadd.f32 %v4816_v63, %v4591_v34  ;;  %v2749_v4 = vmul.f32 %v10580_v12, %v10774_v21  ;;  %v2830_v43 = vmul.f32 %v10585_v25, %v10774_v21  ;;  %v1332_v12 = vpop.f32.mrf.mxu3 }
 0x448   : > { %v1885_v41 = vrot.slane %v1884_v24, 1  ;;  %v3199_v5 = vmul.f32 %v10589_v19, %v10774_v21  ;;  %v2521_v0 = vrot.slane %v2520_v48, 1  ;;  %v3568_v53 = vmul.f32 %v10594_v13, %v10774_v21 }
 0x449   : > { %12293 = vst [vmem:[#allocation88_spill] sm:$0xff] %v10977_v51  ;;  %v10986_v27 = vpop.eup %7743  ;;  %v3855_v34 = vadd.f32 %v3711_v58, %v3486_v45  ;;  %v3937_v39 = vmul.f32 %v10599_v42, %v10774_v21  ;;  %v2974_v6 = vrot.slane %v2830_v43, 1  ;;  %v10997_v19 = vadd.f32 %v10650_v52, %v1332_v12 }
 0x44a   : > { %12294 = vst [vmem:[#allocation30_spill] sm:$0xff] %v10986_v27  ;;  %v2523_v36 = vrot.slane %v10986_v27, 4  ;;  %v1886_v37 = vmax.f32 %v1884_v24, %v1885_v41  ;;  %v10994_v20 = vpop.eup %7745  ;;  %v3343_v56 = vrot.slane %v3199_v5, 2  ;;  %v4449_v63 = vrot.slane %v4305_v62, 5 }
 0x44b   : > { %12295 = vst [vmem:[#allocation109_spill] sm:$0xff] %v10994_v20  ;;  %v4224_v17 = vadd.f32 %v4080_v18, %v3855_v34  ;;  %v3118_v42 = vadd.f32 %v2974_v6, %v2749_v4  ;;  %v4306_v1 = vmul.f32 %v10611_v9, %v10774_v21  ;;  %v1887_v24 = vrot.slane %v10997_v19, 4  ;;  %v12299_v6 = vld [vmem:[#allocation83_spill] sm:$0xff] }
 0x44c   : > { %v2524_v13 = vadd.f32 %v10986_v27, %v2523_v36  ;;  %v1963_v30 = vsub.f32 %v10942_v59, %v1886_v37  ;;  %v11008_v58 = vmul.f32 %v10634_v22, %v10774_v21  ;;  %v11012_v52 = vmul.f32 %v12280_v46, %v10767_v57  ;;  %v12298_v37 = vld [vmem:[#allocation80_spill] sm:$0xff] }
 0x44d   : > { %v11004_v45 = vadd.f32 %v4449_v63, %v4224_v17  ;;  %v3487_v41 = vadd.f32 %v3343_v56, %v3118_v42  ;;  %v2522_v4 = vadd.f32 %v2521_v0, %v2520_v48  ;;  %v1888_v9 = vmax.f32 %v10997_v19, %v1887_v24  ;;  %v12300_v48 = vld [vmem:[#allocation40_spill] sm:$0xff] }
 0x44e   : > { %12296 = vst [vmem:[#allocation97_spill] sm:$0xff] %v11012_v52  ;;  %v2525_v18 = vrot.slane %v2524_v13, 2  ;;  %v2105_v62 = vmul.f32 1.442695, %v1963_v30  ;;  %v11016_v43 = vadd.f32 %v4817_v44, %v4592_v55  ;;  %v11020_v5 = vmul.f32 %v12280_v46, %v10771_v35  ;;  %v12301_v35 = vld [vmem:[#allocation84_spill] sm:$0xff] }
 0x44f   : > { %v3712_v34 = vrot.slane %v3568_v53, 3  ;;  %v4081_v36 = vrot.slane %v3937_v39, 4  ;;  %v1889_v57 = vrot.slane %v1888_v9, 2  ;;  %v2831_v12 = vmul.f32 %v12298_v37, %v10777_v28 }
 0x450   : > { %12297 = vst [vmem:[#allocation91_spill] sm:$0xff] %v11016_v43  ;;  %v2526_v22 = vadd.f32 %v2525_v18, %v2524_v13  ;;  %7747 = vpow2.f32 %v2105_v62  ;;  %v11026_v56 = vmul.f32 %v12299_v6, %v10777_v28  ;;  %v11030_v55 = vmul.f32 %v12300_v48, %v10777_v28 }
 0x451   : > { %v3856_v0 = vadd.f32 %v3712_v34, %v3487_v41  ;;  %v11034_v17 = vmul.f32 %v12301_v35, %v10777_v28  ;;  %v11038_v53 = vmul.f32 %v10717_v54, %v10777_v28  ;;  %7749 = vrcp.f32 %v2522_v4  ;;  %v12302_v41 = vld [vmem:[#allocation58_spill] sm:$0xff] }
 0x452   : > { %v2527_v44 = vrot.slane %v2526_v22, 1  ;;  %v1890_v39 = vmax.f32 %v1888_v9, %v1889_v57  ;;  %v2975_v63 = vrot.slane %v2831_v12, 1  ;;  %v4450_v24 = vrot.slane %v4306_v1, 5 }
 0x453   : > { %v4225_v42 = vadd.f32 %v4081_v36, %v3856_v0  ;;  %v2750_v34 = vmul.f32 %v12302_v41, %v10777_v28  ;;  %v12304_v1 = vrot.slane %v10824_v15, 7  ;;  %v11060_v0 = vmul.f32 %v10720_v23, %v10777_v28 }
 0x454   : > { %v2528_v30 = vadd.f32 %v2527_v44, %v2526_v22  ;;  %v1891_v62 = vrot.slane %v1890_v39, 1  ;;  %v2751_v18 = vmul.f32 %v12302_v41, %v10780_v38  ;;  %v3201_v11 = vmul.f32 %v12299_v6, %v10780_v38 }
 0x455   : > { %v11050_v57 = vadd.f32 %v4450_v24, %v4225_v42  ;;  %v11055_v22 = vadd.f32 %v12304_v1, %v10856_v7  ;;  %v3119_v44 = vadd.f32 %v2975_v63, %v2750_v34  ;;  %v2832_v63 = vmul.f32 %v12298_v37, %v10780_v38 }
 0x456   : > { %v11046_v61 = vpop.eup %7747  ;;  %v1892_v12 = vmax.f32 %v1890_v39, %v1891_v62  ;;  %7751 = vrcp.f32 %v2528_v30  ;;  %v2752_v39 = vmul.f32 %v12302_v41, %v10783_v8  ;;  %v2833_v30 = vmul.f32 %v12298_v37, %v10783_v8 }
 0x457   : > { %12303 = vst [vmem:[#allocation107_spill] sm:$0xff] %v11046_v61  ;;  %v2529_v36 = vrot.slane %v11046_v61, 4  ;;  %v11066_v13 = vpop.eup %7749  ;;  %v2834_v62 = vmul.f32 %v12298_v37, %v10801_v2  ;;  %v2835_v34 = vmul.f32 %v12298_v37, %v10808_v10  ;;  %v2836_v1 = vmul.f32 %v12298_v37, %v10813_v49 }
 0x458   : > { %12305 = vst [vmem:[#allocation115_spill] sm:$0xff] %v11055_v22  ;;  %v1964_v7 = vsub.f32 %v10997_v19, %v1892_v12  ;;  %v2837_v12 = vmul.f32 %v12298_v37, %v10816_v40  ;;  %v2838_v24 = vmul.f32 %v12298_v37, %v10840_v14  ;;  %v2753_v42 = vmul.f32 %v12302_v41, %v10801_v2 }
 0x459   : > { %12306 = vst [vmem:[#allocation68_spill] sm:$0xff] %v11066_v13  ;;  %v2530_v15 = vadd.f32 %v11046_v61, %v2529_v36  ;;  %v2976_v9 = vrot.slane %v2832_v63, 1  ;;  %v2977_v4 = vrot.slane %v2833_v30, 1  ;;  %v2978_v25 = vrot.slane %v2834_v62, 1 }
 0x45a   : > { %v2107_v19 = vmul.f32 1.442695, %v1964_v7  ;;  %v2754_v61 = vmul.f32 %v12302_v41, %v10808_v10  ;;  %v2755_v7 = vmul.f32 %v12302_v41, %v10813_v49  ;;  %v2756_v13 = vmul.f32 %v12302_v41, %v10816_v40 }
 0x45b   : > { %v2531_v36 = vrot.slane %v2530_v15, 2  ;;  %v2757_v37 = vmul.f32 %v12302_v41, %v10840_v14  ;;  %v2979_v20 = vrot.slane %v2835_v34, 1  ;;  %v2980_v63 = vrot.slane %v2836_v1, 1 }
 0x45c   : > { %7753 = vpow2.f32 %v2107_v19  ;;  %v11092_v27 = vpop.eup %7751  ;;  %v2981_v62 = vrot.slane %v2837_v12, 1  ;;  %v3121_v19 = vadd.f32 %v2977_v4, %v2752_v39  ;;  %v3122_v26 = vadd.f32 %v2978_v25, %v2753_v42 }
 0x45d   : > { %v2532_v59 = vadd.f32 %v2531_v36, %v2530_v15  ;;  %12307 = vst [vmem:[#allocation93_spill] sm:$0xff] %v11092_v27  ;;  %v2982_v15 = vrot.slane %v2838_v24, 1  ;;  %v3120_v36 = vadd.f32 %v2976_v9, %v2751_v18  ;;  %v3202_v27 = vmul.f32 %v12299_v6, %v10783_v8 }
 0x45e   : > { %v3203_v52 = vmul.f32 %v12299_v6, %v10801_v2  ;;  %v3204_v41 = vmul.f32 %v12299_v6, %v10808_v10  ;;  %v3205_v34 = vmul.f32 %v12299_v6, %v10813_v49  ;;  %v3123_v24 = vadd.f32 %v2979_v20, %v2754_v61 }
 0x45f   : > { %v2533_v30 = vrot.slane %v2532_v59, 1  ;;  %v3124_v18 = vadd.f32 %v2980_v63, %v2755_v7  ;;  %v3206_v25 = vmul.f32 %v12299_v6, %v10816_v40  ;;  %v3207_v4 = vmul.f32 %v12299_v6, %v10840_v14 }
 0x460   : > { %v3126_v42 = vadd.f32 %v2982_v15, %v2757_v37  ;;  %v3345_v39 = vrot.slane %v3201_v11, 2  ;;  %v3346_v1 = vrot.slane %v3202_v27, 2  ;;  %v3348_v43 = vrot.slane %v3204_v41, 2 }
 0x461   : > { %v2534_v22 = vadd.f32 %v2533_v30, %v2532_v59  ;;  %v3125_v59 = vadd.f32 %v2981_v62, %v2756_v13  ;;  %v3347_v30 = vrot.slane %v3203_v52, 2  ;;  %v3349_v32 = vrot.slane %v3205_v34, 2 }
 0x462   : > { %v11112_v9 = vpop.eup %7753  ;;  %v3350_v61 = vrot.slane %v3206_v25, 2  ;;  %v3351_v20 = vrot.slane %v3207_v4, 2  ;;  %v12309_v7 = vrot.slane %v11026_v56, 2  ;;  %v3489_v6 = vadd.f32 %v3345_v39, %v3120_v36 }
 0x463   : > { %12308 = vst [vmem:[#allocation111_spill] sm:$0xff] %v11112_v9  ;;  %7755 = vrcp.f32 %v2534_v22  ;;  %v2535_v12 = vrot.slane %v11112_v9, 4  ;;  %v3490_v16 = vadd.f32 %v3346_v1, %v3121_v19  ;;  %v3491_v29 = vadd.f32 %v3347_v30, %v3122_v26 }
 0x464   : > { %v3488_v63 = vadd.f32 %v12309_v7, %v3119_v44  ;;  %v3570_v11 = vmul.f32 %v12300_v48, %v10780_v38  ;;  %v3571_v27 = vmul.f32 %v12300_v48, %v10783_v8  ;;  %v3572_v52 = vmul.f32 %v12300_v48, %v10801_v2 }
 0x465   : > { %v2536_v51 = vadd.f32 %v11112_v9, %v2535_v12  ;;  %v3573_v13 = vmul.f32 %v12300_v48, %v10808_v10  ;;  %v3574_v56 = vmul.f32 %v12300_v48, %v10813_v49  ;;  %v3575_v44 = vmul.f32 %v12300_v48, %v10816_v40 }
 0x466   : > { %v3576_v26 = vmul.f32 %v12300_v48, %v10840_v14  ;;  %v3492_v37 = vadd.f32 %v3348_v43, %v3123_v24  ;;  %v3493_v62 = vadd.f32 %v3349_v32, %v3124_v18  ;;  %v3494_v15 = vadd.f32 %v3350_v61, %v3125_v59 }
 0x467   : > { %v2537_v22 = vrot.slane %v2536_v51, 2  ;;  %v3495_v36 = vadd.f32 %v3351_v20, %v3126_v42  ;;  %v3714_v34 = vrot.slane %v3570_v11, 3  ;;  %v3715_v25 = vrot.slane %v3571_v27, 3 }
 0x468   : > { %v3716_v4 = vrot.slane %v3572_v52, 3  ;;  %v3717_v39 = vrot.slane %v3573_v13, 3  ;;  %v3718_v1 = vrot.slane %v3574_v56, 3  ;;  %v3719_v12 = vrot.slane %v3575_v44, 3 }
 0x469   : > { %v11132_v19 = vpop.eup %7755  ;;  %v2538_v41 = vadd.f32 %v2537_v22, %v2536_v51  ;;  %v3720_v30 = vrot.slane %v3576_v26, 3  ;;  %v12310_v9 = vrot.slane %v11030_v55, 3  ;;  %v3858_v47 = vadd.f32 %v3714_v34, %v3489_v6 }
 0x46a   : > { %v3859_v48 = vadd.f32 %v3715_v25, %v3490_v16  ;;  %v3860_v43 = vadd.f32 %v3716_v4, %v3491_v29  ;;  %v3861_v32 = vadd.f32 %v3717_v39, %v3492_v37  ;;  %v3939_v24 = vmul.f32 %v12301_v35, %v10780_v38 }
 0x46b   : > { %v2539_v7 = vrot.slane %v2538_v41, 1  ;;  %v3857_v3 = vadd.f32 %v12310_v9, %v3488_v63  ;;  %v3940_v51 = vmul.f32 %v12301_v35, %v10783_v8  ;;  %v3941_v59 = vmul.f32 %v12301_v35, %v10801_v2 }
 0x46c   : > { %v3942_v42 = vmul.f32 %v12301_v35, %v10808_v10  ;;  %v3943_v55 = vmul.f32 %v12301_v35, %v10813_v49  ;;  %v3862_v9 = vadd.f32 %v3718_v1, %v3493_v62  ;;  %v3863_v16 = vadd.f32 %v3719_v12, %v3494_v15 }
 0x46d   : > { %v2540_v18 = vadd.f32 %v2539_v7, %v2538_v41  ;;  %v3944_v29 = vmul.f32 %v12301_v35, %v10816_v40  ;;  %v3945_v61 = vmul.f32 %v12301_v35, %v10840_v14  ;;  %v3864_v20 = vadd.f32 %v3720_v30, %v3495_v36 }
 0x46e   : > { %v4083_v63 = vrot.slane %v3939_v24, 4  ;;  %v4084_v6 = vrot.slane %v3940_v51, 4  ;;  %v4085_v11 = vrot.slane %v3941_v59, 4  ;;  %v4086_v27 = vrot.slane %v3942_v42, 4 }
 0x46f   : > { %7757 = vrcp.f32 %v2540_v18  ;;  %v4087_v52 = vrot.slane %v3943_v55, 4  ;;  %v4088_v13 = vrot.slane %v3944_v29, 4  ;;  %v4089_v22 = vrot.slane %v3945_v61, 4 }
 0x470   : > { %v12311_v56 = vrot.slane %v11034_v17, 4  ;;  %v4227_v26 = vadd.f32 %v4083_v63, %v3858_v47  ;;  %v4228_v37 = vadd.f32 %v4084_v6, %v3859_v48  ;;  %v4229_v62 = vadd.f32 %v4085_v11, %v3860_v43 }
 0x471   : > { %v4230_v15 = vadd.f32 %v4086_v27, %v3861_v32  ;;  %v4308_v41 = vmul.f32 %v10717_v54, %v10780_v38  ;;  %v4309_v35 = vmul.f32 %v10717_v54, %v10783_v8  ;;  %v4310_v36 = vmul.f32 %v10717_v54, %v10801_v2 }
 0x472   : > { %v4226_v44 = vadd.f32 %v12311_v56, %v3857_v3  ;;  %v4311_v34 = vmul.f32 %v10717_v54, %v10808_v10  ;;  %v4312_v17 = vmul.f32 %v10717_v54, %v10813_v49  ;;  %v4313_v3 = vmul.f32 %v10717_v54, %v10816_v40 }
 0x473   : > { %v4231_v47 = vadd.f32 %v4087_v52, %v3862_v9  ;;  %v4232_v25 = vadd.f32 %v4088_v13, %v3863_v16  ;;  %v4233_v4 = vadd.f32 %v4089_v22, %v3864_v20  ;;  %v4314_v39 = vmul.f32 %v10717_v54, %v10840_v14 }
 0x474   : > { %v4452_v12 = vrot.slane %v4308_v41, 5  ;;  %v4453_v30 = vrot.slane %v4309_v35, 5  ;;  %v4454_v7 = vrot.slane %v4310_v36, 5  ;;  %v4455_v48 = vrot.slane %v4311_v34, 5 }
 0x475   : > { %v11166_v1 = vpop.eup %7757  ;;  %v4456_v43 = vrot.slane %v4312_v17, 5  ;;  %v4457_v32 = vrot.slane %v4313_v3, 5  ;;  %v4458_v24 = vrot.slane %v4314_v39, 5  ;;  %v12312_v51 = vrot.slane %v11038_v53, 5 }
 0x476   : > { %v4596_v59 = vadd.f32 %v4452_v12, %v4227_v26  ;;  %v4597_v42 = vadd.f32 %v4453_v30, %v4228_v37  ;;  %v4598_v55 = vadd.f32 %v4454_v7, %v4229_v62  ;;  %v4599_v9 = vadd.f32 %v4455_v48, %v4230_v15 }
 0x477   : > { %v4595_v18 = vadd.f32 %v12312_v51, %v4226_v44  ;;  %v4600_v16 = vadd.f32 %v4456_v43, %v4231_v47  ;;  %v4677_v54 = vmul.f32 %v10720_v23, %v10780_v38  ;;  %v4678_v29 = vmul.f32 %v10720_v23, %v10783_v8  ;;  %v12316_v51 = vld [vmem:[#allocation38_spill] sm:$0xff] }
 0x478   : > { %v4679_v61 = vmul.f32 %v10720_v23, %v10801_v2  ;;  %v4680_v20 = vmul.f32 %v10720_v23, %v10808_v10  ;;  %v4681_v53 = vmul.f32 %v10720_v23, %v10813_v49  ;;  %v4682_v63 = vmul.f32 %v10720_v23, %v10816_v40 }
 0x479   : > { %v4683_v6 = vmul.f32 %v10720_v23, %v10840_v14  ;;  %v4601_v11 = vadd.f32 %v4457_v32, %v4232_v25  ;;  %v4602_v27 = vadd.f32 %v4458_v24, %v4233_v4  ;;  %v4820_v52 = vrot.slane %v11060_v0, 6 }
 0x47a   : > { %v4821_v13 = vrot.slane %v4677_v54, 6  ;;  %v4822_v22 = vrot.slane %v4678_v29, 6  ;;  %v4823_v56 = vrot.slane %v4679_v61, 6  ;;  %v4824_v44 = vrot.slane %v4680_v20, 6  ;;  %v12325_v29 = vld [vmem:[#allocation91_spill] sm:$0xff]  ;;  %v12326_v61 = vld [vmem:[#allocation97_spill] sm:$0xff] }
 0x47b   : > { %v4825_v26 = vrot.slane %v4681_v53, 6  ;;  %v4826_v37 = vrot.slane %v4682_v63, 6  ;;  %v4827_v62 = vrot.slane %v4683_v6, 6  ;;  %v12313_v15 = vrot.slane %v10974_v33, 6 }
 0x47c   : > { %v12314_v35 = vrot.slane %v11008_v58, 6  ;;  %v4964_v23 = vadd.f32 %v4820_v52, %v4595_v18  ;;  %v4965_v34 = vadd.f32 %v4821_v13, %v4596_v59  ;;  %v4966_v17 = vadd.f32 %v4822_v22, %v4597_v42  ;;  %v12317_v18 = vld [vmem:[#allocation90_spill] sm:$0xff] }
 0x47d   : > { %v4962_v41 = vadd.f32 %v12313_v15, %v11004_v45  ;;  %v4967_v3 = vadd.f32 %v4823_v56, %v4598_v55  ;;  %v4968_v0 = vadd.f32 %v4824_v44, %v4599_v9  ;;  %v4969_v47 = vadd.f32 %v4825_v26, %v4600_v16  ;;  %v12319_v42 = vld [vmem:[#allocation102_spill] sm:$0xff]  ;;  %v12322_v55 = vld [vmem:[#allocation88_spill] sm:$0xff]  ;;  %v12323_v9 = vld [vmem:[#allocation77_spill] sm:$0xff] }
 0x47e   : > { %v4963_v36 = vadd.f32 %v12314_v35, %v11050_v57  ;;  %v5044_v25 = vmul.f32 %v12280_v46, %v10774_v21  ;;  %v5045_v4 = vmul.f32 %v10723_v31, %v10777_v28  ;;  %v5046_v33 = vmul.f32 %v10723_v31, %v10780_v38 }
 0x47f   : > { %v5047_v45 = vmul.f32 %v10723_v31, %v10783_v8  ;;  %v5048_v58 = vmul.f32 %v10723_v31, %v10801_v2  ;;  %v5049_v57 = vmul.f32 %v10723_v31, %v10808_v10  ;;  %v4970_v39 = vadd.f32 %v4826_v37, %v4601_v11  ;;  %v7324_v10 = vld [vmem:[#allocation8 + $0x38] sm:$0xff] }
 0x480   : > { %v4971_v12 = vadd.f32 %v4827_v62, %v4602_v27  ;;  %v5050_v21 = vmul.f32 %v10723_v31, %v10813_v49  ;;  %v5051_v28 = vmul.f32 %v10723_v31, %v10816_v40  ;;  %v5052_v38 = vmul.f32 %v10723_v31, %v10840_v14  ;;  %v12320_v31 = vld [vmem:[#allocation67_spill] sm:$0xff]  ;;  %6358 = vmatpush.bf16.msra.mxu1 %v7324_v10 }
 0x481   : > { %v5187_v46 = vrot.slane %v11020_v5, 7  ;;  %v5188_v8 = vrot.slane %v5044_v25, 7  ;;  %v5189_v30 = vrot.slane %v5045_v4, 7  ;;  %v5190_v7 = vrot.slane %v5046_v33, 7  ;;  %v12328_v25 = vld [vmem:[#allocation115_spill] sm:$0xff]  ;;  %v7322_v33 = vld [vmem:[#allocation8 + $0x28] sm:$0xff] }
 0x482   : > { %v5191_v2 = vrot.slane %v5047_v45, 7  ;;  %v5192_v48 = vrot.slane %v5048_v58, 7  ;;  %v5193_v43 = vrot.slane %v5049_v57, 7  ;;  %v5194_v32 = vrot.slane %v5050_v21, 7 }
 0x483   : > { %v12315_v24 = vrot.slane %v10881_v50, 7  ;;  %v12318_v40 = vrot.slane %v12317_v18, 7  ;;  %v12321_v14 = vrot.slane %v12320_v31, 7  ;;  %v12324_v16 = vrot.slane %v12323_v9, 7  ;;  %v7323_v50 = vld [vmem:[#allocation8 + $0x30] sm:$0xff] }
 0x484   : > { %v12327_v20 = vrot.slane %v12326_v61, 7  ;;  %v5331_v63 = vadd.f32 %v5187_v46, %v4962_v41  ;;  %v5332_v6 = vadd.f32 %v5188_v8, %v4963_v36  ;;  %v5334_v11 = vadd.f32 %v5190_v7, %v4965_v34  ;;  %6359 = vmatpush.bf16.msra.mxu1 %v7323_v50 }
 0x485   : > { %v5326_v49 = vadd.f32 %v12315_v24, %v10885_v60  ;;  %v5327_v59 = vadd.f32 %v12318_v40, %v12316_v51  ;;  %v5328_v5 = vadd.f32 %v12321_v14, %v12319_v42  ;;  %v5329_v54 = vadd.f32 %v12324_v16, %v12322_v55 }
 0x486   : > { %v5330_v53 = vadd.f32 %v12327_v20, %v12325_v29  ;;  %v5195_v60 = vrot.slane %v5051_v28, 7  ;;  %v5335_v27 = vadd.f32 %v5191_v2, %v4966_v17  ;;  %v5336_v52 = vadd.f32 %v5192_v48, %v4967_v3 }
 0x487   : > { %v5196_v13 = vrot.slane %v5052_v38, 7  ;;  %v5333_v22 = vadd.f32 %v5189_v30, %v4964_v23  ;;  %v5337_v56 = vadd.f32 %v5193_v43, %v4968_v0  ;;  %v5338_v44 = vadd.f32 %v5194_v32, %v4969_v47  ;;  %v7321_v30 = vld [vmem:[#allocation8 + $0x20] sm:$0xff] }
 0x488   : > { %v5339_v26 = vadd.f32 %v5195_v60, %v4970_v39  ;;  %v5398_v37 = vpack.c.bf16 %v5326_v49, %v5326_v49  ;;  %v5399_v62 = vpack.c.bf16 %v5327_v59, %v5327_v59  ;;  %v5400_v15 = vpack.c.bf16 %v5328_v5, %v5328_v5  ;;  %6360 = vmatpush.bf16.msra.mxu1 %v7322_v33 }
 0x489   : > { %v5340_v35 = vadd.f32 %v5196_v13, %v4971_v12  ;;  %v5397_v4 = vpack.c.bf16 %v12328_v25, %v12328_v25  ;;  %v5401_v41 = vpack.c.bf16 %v5329_v54, %v5329_v54  ;;  %v5402_v36 = vpack.c.bf16 %v5330_v53, %v5330_v53  ;;  %v7102_v25 = vld [vmem:[#allocation7 + $0xd8] sm:$0xf0] }
 0x48a   : > { %v5403_v45 = vpack.c.bf16 %v5331_v63, %v5331_v63  ;;  %v5406_v34 = vpack.c.bf16 %v5334_v11, %v5334_v11  ;;  %v5407_v17 = vpack.c.bf16 %v5335_v27, %v5335_v27  ;;  %v5408_v3 = vpack.c.bf16 %v5336_v52, %v5336_v52 }
 0x48b   : > { %v5404_v58 = vpack.c.bf16 %v5332_v6, %v5332_v6  ;;  %v5405_v23 = vpack.c.bf16 %v5333_v22, %v5333_v22  ;;  %v5409_v0 = vpack.c.bf16 %v5337_v56, %v5337_v56  ;;  %v5410_v47 = vpack.c.bf16 %v5338_v44, %v5338_v44  ;;  %v7314_v56 = vld [vmem:[#allocation7 + $0xec] sm:$0xf]  ;;  %v7118_v44 = vld [vmem:[#allocation7 + $0xf8] sm:$0xf0] }
 0x48c   : > { %v5411_v57 = vpack.c.bf16 %v5339_v26, %v5339_v26  ;;  %v5584_v39 = vunpack.c.l.b16 %v5398_v37  ;;  %v5585_v21 = vunpack.c.l.b16 %v5399_v62  ;;  %v5586_v28 = vunpack.c.l.b16 %v5400_v15  ;;  %6361 = vmatpush.bf16.msra.mxu1 %v7321_v30 }
 0x48d   : > { %v5412_v12 = vpack.c.bf16 %v5340_v35, %v5340_v35  ;;  %v5583_v38 = vunpack.c.l.b16 %v5397_v4  ;;  %v5587_v46 = vunpack.c.l.b16 %v5401_v41  ;;  %v5588_v8 = vunpack.c.l.b16 %v5402_v36  ;;  %v7310_v35 = vld [vmem:[#allocation7 + $0xcc] sm:$0xf]  ;;  %v12329_v36 = vld [vmem:[#allocation26_spill] sm:$0xff] }
 0x48e   : > { %v5589_v7 = vunpack.c.l.b16 %v5403_v45  ;;  %v5592_v2 = vunpack.c.l.b16 %v5406_v34  ;;  %v5593_v48 = vunpack.c.l.b16 %v5407_v17  ;;  %v5594_v43 = vunpack.c.l.b16 %v5408_v3  ;;  %v12330_v45 = vld [vmem:[#allocation46_spill] sm:$0xff]  ;;  %v12331_v34 = vld [vmem:[#allocation48_spill] sm:$0xff]  ;;  %v12332_v3 = vld [vmem:[#allocation47_spill] sm:$0xff] }
 0x48f   : > { %v5590_v10 = vunpack.c.l.b16 %v5404_v58  ;;  %v5591_v32 = vunpack.c.l.b16 %v5405_v23  ;;  %v5595_v24 = vunpack.c.l.b16 %v5409_v0  ;;  %v5596_v49 = vunpack.c.l.b16 %v5410_v47  ;;  %v12333_v58 = vld [vmem:[#allocation41_spill] sm:$0xff]  ;;  %v7306_v47 = vld [vmem:[#allocation7 + $0xac] sm:$0xf] }
 0x490   : > { %v5597_v51 = vunpack.c.l.b16 %v5411_v57  ;;  %v5698_v18 = vrot.slane %v5584_v39, 7  ;;  %v5700_v40 = vrot.slane %v5585_v21, 6  ;;  %v5702_v59 = vrot.slane %v5586_v28, 5  ;;  %v12334_v57 = vld [vmem:[#allocation94_spill] sm:$0xff]  ;;  %v12335_v39 = vld [vmem:[#allocation60_spill] sm:$0xff] }
 0x491   : > { %v5598_v42 = vunpack.c.l.b16 %v5412_v12  ;;  %v5704_v31 = vrot.slane %v5587_v46, 4  ;;  %v5706_v14 = vrot.slane %v5588_v8, 3  ;;  %v5712_v5 = vrot.slane %v5592_v2, 7  ;;  %v12336_v28 = vld [vmem:[#allocation52_spill] sm:$0xff]  ;;  %v12337_v12 = vld [vmem:[#allocation109_spill] sm:$0xff]  ;;  %v12338_v46 = vld [vmem:[#allocation31_spill] sm:$0xff] }
 0x492   : > { %v5699_v55 = vsel %vm5608_vm0, %v5698_v18, %v5583_v38  ;;  %v5714_v9 = vrot.slane %v5593_v48, 6  ;;  %v5716_v16 = vrot.slane %v5594_v43, 5  ;;  %v5718_v54 = vrot.slane %v5595_v24, 4  ;;  %v12339_v8 = vld [vmem:[#allocation68_spill] sm:$0xff]  ;;  %v7086_v2 = vld [vmem:[#allocation7 + $0xb8] sm:$0xf0] }
 0x493   : > { %v5701_v29 = vsel %vm5611_vm1, %v5700_v40, %v5699_v55  ;;  %v5708_v61 = vrot.slane %v5589_v7, 2  ;;  %v5713_v20 = vsel %vm5608_vm0, %v5712_v5, %v5591_v32  ;;  %v5720_v53 = vrot.slane %v5596_v49, 3  ;;  %v7302_v48 = vld [vmem:[#allocation7 + $0x8c] sm:$0xf]  ;;  %v7070_v43 = vld [vmem:[#allocation7 + $0x98] sm:$0xf0] }
 0x494   : > { %v5703_v63 = vsel %vm5614_vm2, %v5702_v59, %v5701_v29  ;;  %v5710_v6 = vrot.slane %v5590_v10, 1  ;;  %v5715_v50 = vsel %vm5611_vm1, %v5714_v9, %v5713_v20  ;;  %v5722_v60 = vrot.slane %v5597_v51, 2  ;;  %v12340_v32 = vld [vmem:[#allocation30_spill] sm:$0xff]  ;;  %v12341_v24 = vld [vmem:[#allocation93_spill] sm:$0xff]  ;;  %v12342_v51 = vld [vmem:[#allocation107_spill] sm:$0xff] }
 0x495   : > { %v5705_v11 = vsel %vm5617_vm3, %v5704_v31, %v5703_v63  ;;  %v5717_v27 = vsel %vm5614_vm2, %v5716_v16, %v5715_v50  ;;  %v5724_v52 = vrot.slane %v5598_v42, 1  ;;  %v7121_v41 = vor.u32 %v7314_v56, %v7118_v44  ;;  %v12343_v40 = vld [vmem:[#allocation111_spill] sm:$0xff] }
 0x496   : > { %v5707_v13 = vsel %vm5620_vm4, %v5706_v14, %v5705_v11  ;;  %v5719_v22 = vsel %vm5617_vm3, %v5718_v54, %v5717_v27  ;;  %v2693_v33 = vperm.slane %v12329_v36, 0  ;;  %v11244_v17 = vmul.f32 %v12331_v34, %v12330_v45 }
 0x497   : > { %v5709_v26 = vsel %vm5623_vm5, %v5708_v61, %v5707_v13  ;;  %v5721_v37 = vsel %vm5620_vm4, %v5720_v53, %v5719_v22  ;;  %v11248_v23 = vmul.f32 %v12333_v58, %v12332_v3  ;;  %v11254_v21 = vmul.f32 %v12335_v39, %v12334_v57  ;;  %6009 = vmatpush.bf16.msra.mxu0 %v7121_v41 }
 0x498   : > { %v5711_v62 = vsel %vm5626_vm6, %v5710_v6, %v5709_v26  ;;  %v5723_v15 = vsel %vm5623_vm5, %v5722_v60, %v5721_v37  ;;  %v11258_v38 = vmul.f32 %v12337_v12, %v12336_v28  ;;  %v11262_v30 = vmul.f32 %v12339_v8, %v12338_v46 }
 0x499   : > { %v5725_v4 = vsel %vm5626_vm6, %v5724_v52, %v5723_v15  ;;  %v7105_v7 = vor.u32 %v7310_v35, %v7102_v25  ;;  %v2774_v10 = vperm.slane %v12329_v36, 1  ;;  %v11267_v49 = vmul.f32 %v12341_v24, %v12340_v32 }
 0x49a   : > { %v11250_v0 = vpack.c.b16 %v5725_v4, %v5711_v62  ;;  %v11271_v18 = vmul.f32 %v11132_v19, %v12342_v51  ;;  %v11275_v59 = vmul.f32 %v11166_v1, %v12343_v40  ;;  %v3143_v42 = vperm.slane %v12329_v36, 2 }
 0x49b   : > { %v11281_v31 = vperm.slane %v12329_v36, 3  ;;  %v11284_v14 = vperm.slane %v12329_v36, 4  ;;  %v11287_v5 = vperm.slane %v12329_v36, 5  ;;  %v11291_v19 = vperm.slane %v12329_v36, 6  ;;  %6010 = vmatpush.bf16.msra.mxu0 %v7105_v7 }
 0x49c   : > { %5933 = vmatmul.bf16.gmra.mxu0 %v11250_v0  ;;  %5966 = vmatmul.bf16.gmra.mxu1 %v11250_v0  ;;  %v11294_v1 = vperm.slane %v12329_v36, 7  ;;  %v7089_v55 = vor.u32 %v7306_v47, %v7086_v2  ;;  %v7073_v9 = vor.u32 %v7302_v48, %v7070_v43  ;;  %v2758_v16 = vmul.f32 %v2693_v33, %v11244_v17 }
 0x49d   : > { %5999 = vmatmul.bf16.gmra.mxu2 %v11250_v0  ;;  %v2759_v54 = vmul.f32 %v2693_v33, %v11248_v23  ;;  %v2760_v29 = vmul.f32 %v2693_v33, %v11254_v21  ;;  %v2761_v61 = vmul.f32 %v2693_v33, %v11258_v38  ;;  %v2762_v20 = vmul.f32 %v2693_v33, %v11262_v30 }
 0x49e   : > { %v2763_v53 = vmul.f32 %v2693_v33, %v11267_v49  ;;  %v2764_v63 = vmul.f32 %v2693_v33, %v11271_v18  ;;  %v2765_v6 = vmul.f32 %v2693_v33, %v11275_v59  ;;  %v2839_v50 = vmul.f32 %v2774_v10, %v11244_v17 }
 0x49f   : > { %v2840_v60 = vmul.f32 %v2774_v10, %v11248_v23  ;;  %v2841_v11 = vmul.f32 %v2774_v10, %v11254_v21  ;;  %v2842_v27 = vmul.f32 %v2774_v10, %v11258_v38  ;;  %v2843_v52 = vmul.f32 %v2774_v10, %v11262_v30  ;;  %6011 = vmatpush.bf16.msra.mxu0 %v7089_v55 }
 0x4a0   : > { %v2844_v13 = vmul.f32 %v2774_v10, %v11267_v49  ;;  %v2845_v22 = vmul.f32 %v2774_v10, %v11271_v18  ;;  %v2846_v56 = vmul.f32 %v2774_v10, %v11275_v59  ;;  %v2983_v44 = vrot.slane %v2839_v50, 1 }
 0x4a1   : > { %v2984_v26 = vrot.slane %v2840_v60, 1  ;;  %v2985_v37 = vrot.slane %v2841_v11, 1  ;;  %v2986_v62 = vrot.slane %v2842_v27, 1  ;;  %v2987_v15 = vrot.slane %v2843_v52, 1 }
 0x4a2   : > { %v2988_v35 = vrot.slane %v2844_v13, 1  ;;  %v2989_v25 = vrot.slane %v2845_v22, 1  ;;  %v2990_v4 = vrot.slane %v2846_v56, 1  ;;  %v3127_v41 = vadd.f32 %v2983_v44, %v2758_v16 }
 0x4a3   : > { %v3128_v36 = vadd.f32 %v2984_v26, %v2759_v54  ;;  %v3129_v33 = vadd.f32 %v2985_v37, %v2760_v29  ;;  %v3130_v45 = vadd.f32 %v2986_v62, %v2761_v61  ;;  %v3131_v34 = vadd.f32 %v2987_v15, %v2762_v20  ;;  %6012 = vmatpush.bf16.msra.mxu0 %v7073_v9 }
 0x4a4   : > { %v3132_v3 = vadd.f32 %v2988_v35, %v2763_v53  ;;  %v3133_v58 = vadd.f32 %v2989_v25, %v2764_v63  ;;  %v3134_v47 = vadd.f32 %v2990_v4, %v2765_v6  ;;  %v3208_v57 = vmul.f32 %v3143_v42, %v11244_v17 }
 0x4a5   : > { %v3209_v39 = vmul.f32 %v3143_v42, %v11248_v23  ;;  %v3210_v28 = vmul.f32 %v3143_v42, %v11254_v21  ;;  %v3211_v12 = vmul.f32 %v3143_v42, %v11258_v38  ;;  %v3212_v46 = vmul.f32 %v3143_v42, %v11262_v30 }
 0x4a6   : > { %v3213_v8 = vmul.f32 %v3143_v42, %v11267_v49  ;;  %v3214_v7 = vmul.f32 %v3143_v42, %v11271_v18  ;;  %v3215_v2 = vmul.f32 %v3143_v42, %v11275_v59  ;;  %v3352_v48 = vrot.slane %v3208_v57, 2 }
 0x4a7   : > { %v3353_v43 = vrot.slane %v3209_v39, 2  ;;  %v3354_v10 = vrot.slane %v3210_v28, 2  ;;  %v3355_v32 = vrot.slane %v3211_v12, 2  ;;  %v3356_v24 = vrot.slane %v3212_v46, 2 }
 0x4a8   : > { %v3357_v51 = vrot.slane %v3213_v8, 2  ;;  %v3358_v40 = vrot.slane %v3214_v7, 2  ;;  %v3359_v55 = vrot.slane %v3215_v2, 2  ;;  %v3496_v9 = vadd.f32 %v3352_v48, %v3127_v41 }
 0x4a9   : > { %v3497_v16 = vadd.f32 %v3353_v43, %v3128_v36  ;;  %v3498_v54 = vadd.f32 %v3354_v10, %v3129_v33  ;;  %v3499_v29 = vadd.f32 %v3355_v32, %v3130_v45  ;;  %v3500_v61 = vadd.f32 %v3356_v24, %v3131_v34 }
 0x4aa   : > { %v3501_v20 = vadd.f32 %v3357_v51, %v3132_v3  ;;  %v3502_v53 = vadd.f32 %v3358_v40, %v3133_v58  ;;  %v3503_v63 = vadd.f32 %v3359_v55, %v3134_v47  ;;  %v3577_v6 = vmul.f32 %v11281_v31, %v11244_v17 }
 0x4ab   : > { %v3578_v42 = vmul.f32 %v11281_v31, %v11248_v23  ;;  %v3579_v50 = vmul.f32 %v11281_v31, %v11254_v21  ;;  %v3580_v60 = vmul.f32 %v11281_v31, %v11258_v38  ;;  %v3581_v11 = vmul.f32 %v11281_v31, %v11262_v30 }
 0x4ac   : > { %v3582_v27 = vmul.f32 %v11281_v31, %v11267_v49  ;;  %v3583_v52 = vmul.f32 %v11281_v31, %v11271_v18  ;;  %v3584_v13 = vmul.f32 %v11281_v31, %v11275_v59  ;;  %v3721_v22 = vrot.slane %v3577_v6, 3 }
 0x4ad   : > { %v3722_v56 = vrot.slane %v3578_v42, 3  ;;  %v3723_v44 = vrot.slane %v3579_v50, 3  ;;  %v3724_v26 = vrot.slane %v3580_v60, 3  ;;  %v3725_v37 = vrot.slane %v3581_v11, 3 }
 0x4ae   : > { %v3726_v62 = vrot.slane %v3582_v27, 3  ;;  %v3727_v15 = vrot.slane %v3583_v52, 3  ;;  %v3728_v35 = vrot.slane %v3584_v13, 3  ;;  %v3865_v25 = vadd.f32 %v3721_v22, %v3496_v9 }
 0x4af   : > { %v3866_v4 = vadd.f32 %v3722_v56, %v3497_v16  ;;  %v3867_v41 = vadd.f32 %v3723_v44, %v3498_v54  ;;  %v3868_v36 = vadd.f32 %v3724_v26, %v3499_v29  ;;  %v3869_v33 = vadd.f32 %v3725_v37, %v3500_v61 }
 0x4b0   : > { %v3870_v45 = vadd.f32 %v3726_v62, %v3501_v20  ;;  %v3871_v34 = vadd.f32 %v3727_v15, %v3502_v53  ;;  %v3872_v3 = vadd.f32 %v3728_v35, %v3503_v63  ;;  %v3946_v58 = vmul.f32 %v11284_v14, %v11244_v17 }
 0x4b1   : > { %v3947_v31 = vmul.f32 %v11284_v14, %v11248_v23  ;;  %v3948_v47 = vmul.f32 %v11284_v14, %v11254_v21  ;;  %v3949_v57 = vmul.f32 %v11284_v14, %v11258_v38  ;;  %v3950_v39 = vmul.f32 %v11284_v14, %v11262_v30 }
 0x4b2   : > { %v3951_v28 = vmul.f32 %v11284_v14, %v11267_v49  ;;  %v3952_v12 = vmul.f32 %v11284_v14, %v11271_v18  ;;  %v3953_v46 = vmul.f32 %v11284_v14, %v11275_v59  ;;  %v4090_v8 = vrot.slane %v3946_v58, 4  ;;  %v7319_v58 = vld [vmem:[#allocation8 + $0x10] sm:$0xff] }
 0x4b3   : > { %v4091_v7 = vrot.slane %v3947_v31, 4  ;;  %v4092_v2 = vrot.slane %v3948_v47, 4  ;;  %v4093_v48 = vrot.slane %v3949_v57, 4  ;;  %v4094_v43 = vrot.slane %v3950_v39, 4 }
 0x4b4   : > { %v4095_v10 = vrot.slane %v3951_v28, 4  ;;  %v4096_v32 = vrot.slane %v3952_v12, 4  ;;  %v4097_v24 = vrot.slane %v3953_v46, 4  ;;  %v4234_v51 = vadd.f32 %v4090_v8, %v3865_v25  ;;  %v7320_v25 = vld [vmem:[#allocation8 + $0x18] sm:$0xff] }
 0x4b5   : > { %v4235_v40 = vadd.f32 %v4091_v7, %v3866_v4  ;;  %v4236_v55 = vadd.f32 %v4092_v2, %v3867_v41  ;;  %v4237_v9 = vadd.f32 %v4093_v48, %v3868_v36  ;;  %v4238_v16 = vadd.f32 %v4094_v43, %v3869_v33  ;;  %6362 = vmatpush.bf16.msra.mxu1 %v7320_v25 }
 0x4b6   : > { %v4239_v54 = vadd.f32 %v4095_v10, %v3870_v45  ;;  %v4240_v29 = vadd.f32 %v4096_v32, %v3871_v34  ;;  %v4241_v61 = vadd.f32 %v4097_v24, %v3872_v3  ;;  %v4315_v20 = vmul.f32 %v11287_v5, %v11244_v17 }
 0x4b7   : > { %v4316_v14 = vmul.f32 %v11287_v5, %v11248_v23  ;;  %v4317_v53 = vmul.f32 %v11287_v5, %v11254_v21  ;;  %v4318_v63 = vmul.f32 %v11287_v5, %v11258_v38  ;;  %v4319_v6 = vmul.f32 %v11287_v5, %v11262_v30 }
 0x4b8   : > { %v4320_v42 = vmul.f32 %v11287_v5, %v11267_v49  ;;  %v4321_v50 = vmul.f32 %v11287_v5, %v11271_v18  ;;  %v4322_v60 = vmul.f32 %v11287_v5, %v11275_v59  ;;  %v4459_v11 = vrot.slane %v4315_v20, 5 }
 0x4b9   : > { %v4460_v27 = vrot.slane %v4316_v14, 5  ;;  %v4461_v52 = vrot.slane %v4317_v53, 5  ;;  %v4462_v13 = vrot.slane %v4318_v63, 5  ;;  %v4463_v22 = vrot.slane %v4319_v6, 5  ;;  %6363 = vmatpush.bf16.msra.mxu1 %v7319_v58 }
 0x4ba   : > { %v4464_v56 = vrot.slane %v4320_v42, 5  ;;  %v4465_v44 = vrot.slane %v4321_v50, 5  ;;  %v4466_v26 = vrot.slane %v4322_v60, 5  ;;  %v4603_v37 = vadd.f32 %v4459_v11, %v4234_v51 }
 0x4bb   : > { %v4604_v62 = vadd.f32 %v4460_v27, %v4235_v40  ;;  %v4605_v15 = vadd.f32 %v4461_v52, %v4236_v55  ;;  %v4606_v35 = vadd.f32 %v4462_v13, %v4237_v9  ;;  %v4607_v4 = vadd.f32 %v4463_v22, %v4238_v16  ;;  %v7318_v40 = vld [vmem:[#allocation8 + $0x8] sm:$0xff] }
 0x4bc   : > { %v4608_v41 = vadd.f32 %v4464_v56, %v4239_v54  ;;  %v4609_v36 = vadd.f32 %v4465_v44, %v4240_v29  ;;  %v4610_v33 = vadd.f32 %v4466_v26, %v4241_v61  ;;  %v4684_v5 = vmul.f32 %v11291_v19, %v11244_v17 }
 0x4bd   : > { %v4685_v45 = vmul.f32 %v11291_v19, %v11248_v23  ;;  %v4686_v34 = vmul.f32 %v11291_v19, %v11254_v21  ;;  %v4687_v3 = vmul.f32 %v11291_v19, %v11258_v38  ;;  %v4688_v31 = vmul.f32 %v11291_v19, %v11262_v30  ;;  %6364 = vmatpush.bf16.msra.mxu1 %v7318_v40 }
 0x4be   : > { %v4689_v47 = vmul.f32 %v11291_v19, %v11267_v49  ;;  %v4690_v57 = vmul.f32 %v11291_v19, %v11271_v18  ;;  %v4691_v39 = vmul.f32 %v11291_v19, %v11275_v59  ;;  %v4828_v28 = vrot.slane %v4684_v5, 6 }
 0x4bf   : > { %v4829_v12 = vrot.slane %v4685_v45, 6  ;;  %v4830_v46 = vrot.slane %v4686_v34, 6  ;;  %v4831_v8 = vrot.slane %v4687_v3, 6  ;;  %v4832_v7 = vrot.slane %v4688_v31, 6 }
 0x4c0   : > { %v4833_v2 = vrot.slane %v4689_v47, 6  ;;  %v4834_v48 = vrot.slane %v4690_v57, 6  ;;  %v4835_v43 = vrot.slane %v4691_v39, 6  ;;  %v4972_v10 = vadd.f32 %v4828_v28, %v4603_v37  ;;  %v7294_v57 = vld [vmem:[#allocation7 + $0x4c] sm:$0xf] }
 0x4c1   : > { %v4973_v32 = vadd.f32 %v4829_v12, %v4604_v62  ;;  %v4974_v24 = vadd.f32 %v4830_v46, %v4605_v15  ;;  %v4975_v51 = vadd.f32 %v4831_v8, %v4606_v35  ;;  %v4976_v55 = vadd.f32 %v4832_v7, %v4607_v4  ;;  %v7298_v4 = vld [vmem:[#allocation7 + $0x6c] sm:$0xf]  ;;  %v7038_v39 = vld [vmem:[#allocation7 + $0x58] sm:$0xf0] }
 0x4c2   : > { %v4977_v9 = vadd.f32 %v4833_v2, %v4608_v41  ;;  %v4978_v16 = vadd.f32 %v4834_v48, %v4609_v36  ;;  %v4979_v54 = vadd.f32 %v4835_v43, %v4610_v33  ;;  %v5053_v19 = vmul.f32 %v11294_v1, %v11244_v17  ;;  %v7054_v41 = vld [vmem:[#allocation7 + $0x78] sm:$0xf0]  ;;  %v5919_v36 = vpop.f32.mrf.mxu0 }
 0x4c3   : > { %v5054_v29 = vmul.f32 %v11294_v1, %v11248_v23  ;;  %v5055_v61 = vmul.f32 %v11294_v1, %v11254_v21  ;;  %v5056_v20 = vmul.f32 %v11294_v1, %v11258_v38  ;;  %v5057_v14 = vmul.f32 %v11294_v1, %v11262_v30  ;;  %v7317_v21 = vld [vmem:[#allocation8] sm:$0xff] }
 0x4c4   : > { %v5058_v53 = vmul.f32 %v11294_v1, %v11267_v49  ;;  %v5059_v63 = vmul.f32 %v11294_v1, %v11271_v18  ;;  %v5060_v17 = vmul.f32 %v11294_v1, %v11275_v59  ;;  %v5197_v6 = vrot.slane %v5053_v19, 7  ;;  %6365 = vmatpush.bf16.msra.mxu1 %v7317_v21 }
 0x4c5   : > { %v5198_v23 = vrot.slane %v5054_v29, 7  ;;  %v5199_v42 = vrot.slane %v5055_v61, 7  ;;  %v5200_v50 = vrot.slane %v5056_v20, 7  ;;  %v5201_v60 = vrot.slane %v5057_v14, 7  ;;  %v7286_v29 = vld [vmem:[#allocation7 + $0xc] sm:$0xf] }
 0x4c6   : > { %v5202_v38 = vrot.slane %v5058_v53, 7  ;;  %v5203_v11 = vrot.slane %v5059_v63, 7  ;;  %v5204_v27 = vrot.slane %v5060_v17, 7  ;;  %v5341_v30 = vadd.f32 %v5197_v6, %v4972_v10  ;;  %v7006_v61 = vld [vmem:[#allocation7 + $0x18] sm:$0xf0] }
 0x4c7   : > { %v5342_v52 = vadd.f32 %v5198_v23, %v4973_v32  ;;  %v5343_v13 = vadd.f32 %v5199_v42, %v4974_v24  ;;  %v5344_v49 = vadd.f32 %v5200_v50, %v4975_v51  ;;  %v5345_v22 = vadd.f32 %v5201_v60, %v4976_v55  ;;  %v7290_v24 = vld [vmem:[#allocation7 + $0x2c] sm:$0xf]  ;;  %v7022_v51 = vld [vmem:[#allocation7 + $0x38] sm:$0xf0]  ;;  %v11414_v17 = vld [vmem:[%s11676_s6] sm:$0xf] }
 0x4c8   : > { %v5346_v56 = vadd.f32 %v5202_v38, %v4977_v9  ;;  %v5347_v18 = vadd.f32 %v5203_v11, %v4978_v16  ;;  %v5348_v44 = vadd.f32 %v5204_v27, %v4979_v54  ;;  %v5413_v26 = vpack.c.bf16 %v5341_v30, %v5341_v30  ;;  %v12344_v27 = vld [vmem:[#allocation37_spill] sm:$0xff] }
 0x4c9   : > { %v5414_v59 = vpack.c.bf16 %v5342_v52, %v5342_v52  ;;  %v5415_v1 = vpack.c.bf16 %v5343_v13, %v5343_v13  ;;  %v5416_v37 = vpack.c.bf16 %v5344_v49, %v5344_v49  ;;  %v5417_v62 = vpack.c.bf16 %v5345_v22, %v5345_v22 }
 0x4ca   : > { %v5418_v15 = vpack.c.bf16 %v5346_v56, %v5346_v56  ;;  %v5419_v35 = vpack.c.bf16 %v5347_v18, %v5347_v18  ;;  %v5420_v25 = vpack.c.bf16 %v5348_v44, %v5348_v44  ;;  %v5599_v33 = vunpack.c.l.b16 %v5413_v26  ;;  %v5921_v20 = vpop.f32.mrf.mxu0  ;;  %v12345_v18 = vld [vmem:[#allocation54_spill] sm:$0xff] }
 0x4cb   : > { %v5600_v5 = vunpack.c.l.b16 %v5414_v59  ;;  %v5601_v45 = vunpack.c.l.b16 %v5415_v1  ;;  %v5602_v34 = vunpack.c.l.b16 %v5416_v37  ;;  %v5603_v3 = vunpack.c.l.b16 %v5417_v62  ;;  %v7332_v44 = vld [vmem:[#allocation8 + $0x78] sm:$0xff]  ;;  %v7331_v62 = vld [vmem:[#allocation8 + $0x70] sm:$0xff] }
 0x4cc   : > { %v5604_v58 = vunpack.c.l.b16 %v5418_v15  ;;  %v5605_v31 = vunpack.c.l.b16 %v5419_v35  ;;  %v5606_v47 = vunpack.c.l.b16 %v5420_v25  ;;  %v7057_v8 = vor.u32 %v7298_v4, %v7054_v41  ;;  %7358 = vmatpush.bf16.msrb.mxu1 %v7332_v44  ;;  %7359 = vmatpush.bf16.msrb.mxu2 %v7332_v44  ;;  %v7330_v35 = vld [vmem:[#allocation8 + $0x68] sm:$0xff]  ;;  %v12346_v4 = vld [vmem:[#allocation50_spill] sm:$0xff]  ;;  %v5952_v41 = vpop.f32.mrf.mxu1 }
 0x4cd   : > { %v5726_v28 = vrot.slane %v5600_v5, 7  ;;  %v5728_v12 = vrot.slane %v5601_v45, 6  ;;  %v5730_v46 = vrot.slane %v5602_v34, 5  ;;  %v5732_v7 = vrot.slane %v5603_v3, 4  ;;  %v7327_v5 = vld [vmem:[#allocation8 + $0x50] sm:$0xff]  ;;  %v11429_v45 = vpop.f32.mrf.mxu2  ;;  %v7326_v3 = vld [vmem:[#allocation8 + $0x48] sm:$0xff] }
 0x4ce   : > { %v5734_v48 = vrot.slane %v5604_v58, 3  ;;  %6013 = vmatpush.bf16.msra.mxu0 %v7057_v8  ;;  %v7041_v43 = vor.u32 %v7294_v57, %v7038_v39  ;;  %v5736_v32 = vrot.slane %v5605_v31, 2  ;;  %v5738_v55 = vrot.slane %v5606_v47, 1  ;;  %v7325_v31 = vld [vmem:[#allocation8 + $0x40] sm:$0xff]  ;;  %v7340_v47 = vld [vmem:[#allocation8 + $0xb8] sm:$0xff] }
 0x4cf   : > { %v5727_v2 = vsel %vm5608_vm0, %v5726_v28, %v5599_v33  ;;  %v7025_v54 = vor.u32 %v7290_v24, %v7022_v51  ;;  %v7009_v63 = vor.u32 %v7286_v29, %v7006_v61  ;;  %v11418_v6 = vperm.slane %v11414_v17, 0  ;;  %v7328_v33 = vld [vmem:[#allocation8 + $0x58] sm:$0xff]  ;;  %v7334_v29 = vld [vmem:[#allocation8 + $0x88] sm:$0xff] }
 0x4d0   : > { %v5729_v10 = vsel %vm5611_vm1, %v5728_v12, %v5727_v2  ;;  %7360 = vmatpush.bf16.msrb.mxu1 %v7331_v62  ;;  %7361 = vmatpush.bf16.msrb.mxu2 %v7331_v62  ;;  %v7339_v12 = vld [vmem:[#allocation8 + $0xb0] sm:$0xff]  ;;  %v7336_v24 = vld [vmem:[#allocation8 + $0x98] sm:$0xff]  ;;  %v11438_v51 = vperm.slane %v11414_v17, 1 }
 0x4d1   : > { %v5731_v40 = vsel %vm5614_vm2, %v5730_v46, %v5729_v10  ;;  %v5922_v42 = vadd.f32 %v5921_v20, %v11418_v6  ;;  %v5920_v50 = vadd.f32 %v5919_v36, %v11418_v6  ;;  %v7329_v36 = vld [vmem:[#allocation8 + $0x60] sm:$0xff] }
 0x4d2   : > { %v5733_v9 = vsel %vm5617_vm3, %v5732_v7, %v5731_v40  ;;  %6014 = vmatpush.bf16.msra.mxu0 %v7041_v43  ;;  %v5924_v23 = vpop.f32.mrf.mxu0  ;;  %v7337_v10 = vld [vmem:[#allocation8 + $0xa0] sm:$0xff] }
 0x4d3   : > { %v5735_v16 = vsel %vm5620_vm4, %v5734_v48, %v5733_v9  ;;  %v6046_v21 = vmax.f32 %v5922_v42, 0.0  ;;  %v6042_v60 = vmax.f32 %v5920_v50, 0.0  ;;  %v5925_v52 = vadd.f32 %v5924_v23, %v11418_v6  ;;  %v7335_v9 = vld [vmem:[#allocation8 + $0x90] sm:$0xff] }
 0x4d4   : > { %v5737_v19 = vsel %vm5623_vm5, %v5736_v32, %v5735_v16  ;;  %7362 = vmatpush.bf16.msrb.mxu1 %v7330_v35  ;;  %7363 = vmatpush.bf16.msrb.mxu2 %v7330_v35  ;;  %v5954_v34 = vpop.f32.mrf.mxu1  ;;  %v5953_v16 = vadd.f32 %v5952_v41, %v11438_v51  ;;  %v7345_v41 = vld [vmem:[#allocation8 + $0xe0] sm:$0xff] }
 0x4d5   : > { %v5739_v14 = vsel %vm5626_vm6, %v5738_v55, %v5737_v19  ;;  %v6078_v38 = vpack.c.bf16 %v6046_v21, %v6042_v60  ;;  %v6050_v22 = vmax.f32 %v5925_v52, 0.0  ;;  %v5987_v57 = vpop.f32.mrf.mxu2  ;;  %v5955_v40 = vadd.f32 %v5954_v34, %v11438_v51  ;;  %v7348_v52 = vld [vmem:[#allocation8 + $0xf8] sm:$0xff] }
 0x4d6   : > { %v11407_v53 = vpack.c.b16 %v5739_v14, %v5739_v14  ;;  %6015 = vmatpush.bf16.msra.mxu0 %v7025_v54  ;;  %v6043_v61 = vmax.f32 %v5953_v16, 0.0 }
 0x4d7   : > { %v6047_v19 = vmax.f32 %v5955_v40, 0.0 }
 0x4d8   : > { %5938 = vmatmul.bf16.gmra.mxu0 %v11407_v53  ;;  %5971 = vmatmul.bf16.gmra.mxu1 %v11407_v53 }
 0x4d9   : > { %6004 = vmatmul.bf16.gmra.mxu2 %v11407_v53  ;;  %7364 = vmatpush.bf16.msrb.mxu1 %v7329_v36  ;;  %v6079_v20 = vpack.c.bf16 %v6047_v19, %v6043_v61 }
 0x4da   : > { %6016 = vmatpush.bf16.msra.mxu0 %v7009_v63  ;;  %v5926_v11 = vpop.f32.mrf.mxu0  ;;  %7365 = vmatpush.bf16.msrb.mxu2 %v7329_v36 }
 0x4db   : > { %v5927_v30 = vadd.f32 %v5926_v11, %v11418_v6 }
 0x4dc   : > { %v5957_v39 = vpop.f32.mrf.mxu1 }
 0x4dd   : > { %v6054_v49 = vmax.f32 %v5927_v30, 0.0  ;;  %7366 = vmatpush.bf16.msrb.mxu1 %v7328_v33  ;;  %v11434_v48 = vpop.f32.mrf.mxu2  ;;  %v5958_v42 = vadd.f32 %v5957_v39, %v11438_v51  ;;  %v11451_v30 = vperm.slane %v11414_v17, 2 }
 0x4de   : > { %6391 = vmatpush.bf16.msrb.mxu0 %v7332_v44  ;;  %7367 = vmatpush.bf16.msrb.mxu2 %v7328_v33 }
 0x4df   : > { %v6082_v56 = vpack.c.bf16 %v6054_v49, %v6050_v22  ;;  %v5988_v49 = vadd.f32 %v5987_v57, %v11451_v30  ;;  %v5986_v22 = vadd.f32 %v11429_v45, %v11451_v30  ;;  %v7343_v57 = vld [vmem:[#allocation8 + $0xd0] sm:$0xff] }
 0x4e1   : > { %7368 = vmatpush.bf16.msrb.mxu1 %v7327_v5  ;;  %v6044_v44 = vmax.f32 %v5986_v22, 0.0 }
 0x4e2   : > { %v5929_v13 = vpop.f32.mrf.mxu0  ;;  %6392 = vmatpush.bf16.msrb.mxu0 %v7331_v62  ;;  %7369 = vmatpush.bf16.msrb.mxu2 %v7327_v5 }
 0x4e3   : > { %v5930_v1 = vadd.f32 %v5929_v13, %v11418_v6 }
 0x4e4   : > { %v5959_v32 = vpop.f32.mrf.mxu1 }
 0x4e5   : > { %v6058_v15 = vmax.f32 %v5930_v1, 0.0  ;;  %7370 = vmatpush.bf16.msrb.mxu1 %v7326_v3  ;;  %v5992_v55 = vpop.f32.mrf.mxu2  ;;  %v5960_v23 = vadd.f32 %v5959_v32, %v11438_v51 }
 0x4e6   : > { %6393 = vmatpush.bf16.msrb.mxu0 %v7330_v35  ;;  %7371 = vmatpush.bf16.msrb.mxu2 %v7326_v3 }
 0x4e7   : > { %v6055_v50 = vmax.f32 %v5960_v23, 0.0  ;;  %v5458_v23 = vperm.slane %v11414_v17, 3 }
 0x4e8   : > { %6017 = vmatmul.bf16.vlgmr.msra.gmra.mxu0 %v12344_v27  ;;  %6366 = vmatmul.bf16.vlgmr.msra.gmra.mxu1 %v6078_v38  ;;  %v6051_v38 = vmax.f32 %v5958_v42, 0.0 }
 0x4e9   : > { %7372 = vmatpush.bf16.msrb.mxu1 %v7325_v31 }
 0x4ea   : > { %v5931_v26 = vpop.f32.mrf.mxu0  ;;  %6394 = vmatpush.bf16.msrb.mxu0 %v7329_v36  ;;  %7373 = vmatpush.bf16.msrb.mxu2 %v7325_v31  ;;  %v6083_v11 = vpack.c.bf16 %v6055_v50, %v6051_v38 }
 0x4eb   : > { %v5932_v59 = vadd.f32 %v5931_v26, %v11418_v6 }
 0x4ec   : > { %v5962_v54 = vpop.f32.mrf.mxu1 }
 0x4ed   : > { %v6062_v37 = vmax.f32 %v5932_v59, 0.0  ;;  %v11442_v14 = vpop.f32.mrf.mxu2  ;;  %6457 = vmatpush.bf16.msra.mxu1 %v7348_v52  ;;  %v7346_v59 = vld [vmem:[#allocation8 + $0xe8] sm:$0xff] }
 0x4ee   : > { %6395 = vmatpush.bf16.msrb.mxu0 %v7328_v33 }
 0x4ef   : > { %v6086_v25 = vpack.c.bf16 %v6062_v37, %v6058_v15 }
 0x4f2   : > { %6396 = vmatpush.bf16.msrb.mxu0 %v7327_v5 }
 0x4f4   : > { %v5964_v63 = vpop.f32.mrf.mxu1 }
 0x4f5   : > { %v5997_v21 = vpop.f32.mrf.mxu2 }
 0x4f6   : > { %6397 = vmatpush.bf16.msrb.mxu0 %v7326_v3  ;;  %v7344_v3 = vld [vmem:[#allocation8 + $0xd8] sm:$0xff]  ;;  %v5998_v32 = vadd.f32 %v5997_v21, %v11451_v30 }
 0x4f8   : > { %6022 = vmatmul.bf16.gmra.mxu0 %v12345_v18  ;;  %6371 = vmatmul.bf16.gmra.mxu1 %v6082_v56  ;;  %v6048_v56 = vmax.f32 %v5988_v49, 0.0  ;;  %v7347_v18 = vld [vmem:[#allocation8 + $0xf0] sm:$0xff]  ;;  %v6064_v40 = vmax.f32 %v5998_v32, 0.0 }
 0x4f9   : > { %6458 = vmatpush.bf16.msra.mxu1 %v7347_v18 }
 0x4fa   : > { %6398 = vmatpush.bf16.msrb.mxu0 %v7325_v31  ;;  %v6080_v62 = vpack.c.bf16 %v6048_v56, %v6044_v44 }
 0x4fd   : > { %6459 = vmatpush.bf16.msra.mxu1 %v7346_v59 }
 0x4fe   : > { %6424 = vmatpush.bf16.msra.mxu0 %v7340_v47  ;;  %v5965_v47 = vadd.f32 %v5964_v63, %v11438_v51 }
 0x501   : > { %6460 = vmatpush.bf16.msra.mxu1 %v7345_v41 }
 0x502   : > { %6425 = vmatpush.bf16.msra.mxu0 %v7339_v12 }
 0x505   : > { %6461 = vmatpush.bf16.msra.mxu1 %v7344_v3 }
 0x508   : > { %6027 = vmatmul.bf16.gmra.mxu0 %v12346_v4  ;;  %6376 = vmatmul.bf16.gmra.mxu1 %v6086_v25 }
 0x509   : > { %6462 = vmatpush.bf16.msra.mxu1 %v7343_v57 }
 0x518   : > { %6032 = vmatmul.bf16.gmra.mxu0 %v11250_v0  ;;  %v7338_v0 = vld [vmem:[#allocation8 + $0xa8] sm:$0xff] }
 0x519   : > { %v5934_v58 = vpop.f32.mrf.mxu0  ;;  %6426 = vmatpush.bf16.msra.mxu0 %v7338_v0  ;;  %v11446_v60 = vpop.f32.mrf.mxu1 }
 0x51a   : > { %v5935_v28 = vadd.f32 %v5934_v58, %v11418_v6  ;;  %v5993_v58 = vadd.f32 %v5992_v55, %v11451_v30  ;;  %v5968_v16 = vadd.f32 %v11446_v60, %v11438_v51 }
 0x51c   : > { %v6066_v7 = vmax.f32 %v5935_v28, 0.0  ;;  %v6056_v31 = vmax.f32 %v5993_v58, 0.0  ;;  %v5963_v28 = vadd.f32 %v5962_v54, %v11438_v51  ;;  %v6067_v61 = vmax.f32 %v5968_v16, 0.0 }
 0x51d   : > { %6427 = vmatpush.bf16.msra.mxu0 %v7337_v10 }
 0x51e   : > { %v6059_v0 = vmax.f32 %v5963_v28, 0.0 }
 0x520   : > { %v11448_v27 = vpop.f32.mrf.mxu2 }
 0x521   : > { %v5936_v46 = vpop.f32.mrf.mxu0  ;;  %6428 = vmatpush.bf16.msra.mxu0 %v7336_v24  ;;  %v5969_v13 = vpop.f32.mrf.mxu1  ;;  %v5996_v24 = vadd.f32 %v11442_v14, %v11451_v30  ;;  %v6001_v14 = vadd.f32 %v11448_v27, %v11451_v30 }
 0x522   : > { %v5937_v8 = vadd.f32 %v5936_v46, %v11418_v6  ;;  %v5970_v55 = vadd.f32 %v5969_v13, %v11438_v51 }
 0x523   : > { %v6068_v21 = vmax.f32 %v6001_v14, 0.0 }
 0x524   : > { %v6070_v2 = vmax.f32 %v5937_v8, 0.0  ;;  %v7342_v8 = vld [vmem:[#allocation8 + $0xc8] sm:$0xff] }
 0x525   : > { %6429 = vmatpush.bf16.msra.mxu0 %v7335_v9  ;;  %6463 = vmatpush.bf16.msra.mxu1 %v7342_v8  ;;  %v6060_v9 = vmax.f32 %v5996_v24, 0.0 }
 0x526   : > { %v6090_v43 = vpack.c.bf16 %v6070_v2, %v6066_v7  ;;  %v6063_v2 = vmax.f32 %v5965_v47, 0.0 }
 0x527   : > { %v6088_v19 = vpack.c.bf16 %v6064_v40, %v6060_v9 }
 0x528   : > { %6381 = vmatmul.bf16.gmra.mxu1 %v6090_v43  ;;  %6037 = vmatmul.bf16.gmra.mxu0 %v11407_v53  ;;  %v7333_v53 = vld [vmem:[#allocation8 + $0x80] sm:$0xff]  ;;  %v6002_v26 = vpop.f32.mrf.mxu2  ;;  %v6087_v10 = vpack.c.bf16 %v6063_v2, %v6059_v0 }
 0x529   : > { %6430 = vmatpush.bf16.msra.mxu0 %v7334_v29  ;;  %v7341_v43 = vld [vmem:[#allocation8 + $0xc0] sm:$0xff]  ;;  %v6071_v29 = vmax.f32 %v5970_v55, 0.0  ;;  %v6003_v63 = vadd.f32 %v6002_v26, %v11451_v30 }
 0x52a   : > { %6464 = vmatpush.bf16.msra.mxu1 %v7341_v43 }
 0x52b   : > { %v6072_v42 = vmax.f32 %v6003_v63, 0.0 }
 0x52d   : > { %6431 = vmatpush.bf16.msra.mxu0 %v7333_v53  ;;  %v6092_v60 = vpack.c.bf16 %v6072_v42, %v6068_v21 }
 0x538   : > { %6399 = vmatmul.bf16.vlgmr.msrb.gmra.mxu0 %v6079_v20  ;;  %v6091_v20 = vpack.c.bf16 %v6071_v29, %v6067_v61 }
 0x548   : > { %6404 = vmatmul.bf16.gmra.mxu0 %v6083_v11 }
 0x555   : > { %v5939_v1 = vpop.f32.mrf.mxu0  ;;  %v5972_v37 = vpop.f32.mrf.mxu1 }
 0x556   : > { %v5940_v15 = vadd.f32 %v5939_v1, %v11418_v6  ;;  %v5973_v35 = vadd.f32 %v5972_v37, %v11438_v51  ;;  %v5991_v6 = vadd.f32 %v11434_v48, %v11451_v30 }
 0x558   : > { %v6074_v25 = vmax.f32 %v5940_v15, 0.0  ;;  %v6075_v4 = vmax.f32 %v5973_v35, 0.0  ;;  %6432 = vmatmul.bf16.vlgmr.msra.gmra.mxu0 %v6080_v62  ;;  %v6052_v39 = vmax.f32 %v5991_v6, 0.0 }
 0x55a   : > { %v6094_v36 = vpack.c.bf16 %v6074_v25, %v6074_v25  ;;  %v6095_v33 = vpack.c.bf16 %v6075_v4, %v6075_v4  ;;  %v6084_v7 = vpack.c.bf16 %v6056_v31, %v6052_v39 }
 0x55c   : > { %v6005_v5 = vpop.f32.mrf.mxu2  ;;  %6386 = vmatmul.bf16.gmra.mxu1 %v6094_v36  ;;  %6419 = vmatmul.bf16.vlgmr.msrb.gmra.mxu2 %v6095_v33 }
 0x55d   : > { %v5941_v45 = vpop.f32.mrf.mxu0  ;;  %v5974_v34 = vpop.f32.mrf.mxu1  ;;  %v6006_v56 = vadd.f32 %v6005_v5, %v11451_v30 }
 0x55e   : > { %v11477_v34 = vld [vmem:[%s11678_s8] ss:$0 sm:$0xff] }
 0x55f   : > { %v6076_v18 = vmax.f32 %v6006_v56, 0.0 }
 0x561   : > { %v6096_v17 = vpack.c.bf16 %v6076_v18, %v6076_v18  ;;  %v7779_v18 = vld [vmem:[%s8162_s23] sm:$0xff] }
 0x564   : > { %v6007_v12 = vpop.f32.mrf.mxu2 }
 0x565   : > { %v6018_v46 = vpop.f32.mrf.mxu0  ;;  %v6367_v49 = vpop.f32.mrf.mxu1 }
 0x566   : > { %v6019_v38 = vadd.f32 %v6018_v46, %v5458_v23  ;;  %v6368_v58 = vadd.f32 %v11477_v34, %v6367_v49 }
 0x568   : > { %6437 = vmatmul.bf16.gmra.mxu0 %v6084_v7  ;;  %v6045_v52 = vmax.f32 %v6019_v38, 0.0 }
 0x56c   : > { %6409 = vmatmul.bf16.vlgmr.msrb.gmra.mxu1 %v6087_v10 }
 0x56d   : > { %v6020_v48 = vpop.f32.mrf.mxu0  ;;  %v6369_v1 = vpop.f32.mrf.mxu1 }
 0x56e   : > { %v6021_v50 = vadd.f32 %v6020_v48, %v5458_v23  ;;  %v6370_v46 = vadd.f32 %v11477_v34, %v6369_v1  ;;  %v7780_v1 = vld [vmem:[%s8162_s23 + $0x8] sm:$0xff] }
 0x570   : > { %v6049_v11 = vmax.f32 %v6021_v50, 0.0 }
 0x572   : > { %v6081_v13 = vpack.c.bf16 %v6049_v11, %v6045_v52 }
 0x575   : > { %v6023_v54 = vpop.f32.mrf.mxu0  ;;  %v6372_v35 = vpop.f32.mrf.mxu1 }
 0x576   : > { %v6024_v27 = vadd.f32 %v6023_v54, %v5458_v23  ;;  %v6373_v43 = vadd.f32 %v11477_v34, %v6372_v35 }
 0x578   : > { %6442 = vmatmul.bf16.gmra.mxu0 %v6088_v19  ;;  %v6053_v37 = vmax.f32 %v6024_v27, 0.0 }
 0x57c   : > { %6414 = vmatmul.bf16.gmra.mxu1 %v6091_v20 }
 0x57d   : > { %v6025_v53 = vpop.f32.mrf.mxu0  ;;  %v6374_v30 = vpop.f32.mrf.mxu1 }
 0x57e   : > { %v6026_v44 = vadd.f32 %v6025_v53, %v5458_v23  ;;  %v6375_v55 = vadd.f32 %v11477_v34, %v6374_v30 }
 0x580   : > { %v6057_v59 = vmax.f32 %v6026_v44, 0.0 }
 0x582   : > { %v6085_v62 = vpack.c.bf16 %v6057_v59, %v6053_v37 }
 0x585   : > { %v6028_v51 = vpop.f32.mrf.mxu0  ;;  %v11480_v31 = vpop.f32.mrf.mxu1 }
 0x586   : > { %v6029_v4 = vadd.f32 %v6028_v51, %v5458_v23 }
 0x588   : > { %6447 = vmatmul.bf16.gmra.mxu0 %v6092_v60  ;;  %v6061_v33 = vmax.f32 %v6029_v4, 0.0  ;;  %v7781_v4 = vld [vmem:[%s8162_s23 + $0x10] sm:$0xff] }
 0x58c   : > { %6465 = vmatmul.bf16.vlgmr.msra.gmra.mxu1 %v6081_v13 }
 0x58d   : > { %v6030_v22 = vpop.f32.mrf.mxu0  ;;  %v6379_v2 = vpop.f32.mrf.mxu1 }
 0x58e   : > { %v6031_v25 = vadd.f32 %v6030_v22, %v5458_v23 }
 0x590   : > { %v6065_v36 = vmax.f32 %v6031_v25, 0.0 }
 0x592   : > { %v6089_v45 = vpack.c.bf16 %v6065_v36, %v6061_v33 }
 0x595   : > { %v6033_v26 = vpop.f32.mrf.mxu0 }
 0x596   : > { %v6034_v6 = vadd.f32 %v6033_v26, %v5458_v23 }
 0x598   : > { %6452 = vmatmul.bf16.gmra.mxu0 %v6096_v17  ;;  %v6069_v28 = vmax.f32 %v6034_v6, 0.0 }
 0x59c   : > { %6470 = vmatmul.bf16.gmra.mxu1 %v6085_v62 }
 0x59d   : > { %v6035_v15 = vpop.f32.mrf.mxu0 }
 0x59e   : > { %v6036_v3 = vadd.f32 %v6035_v15, %v5458_v23 }
 0x5a0   : > { %v6073_v57 = vmax.f32 %v6036_v3, 0.0  ;;  %v7782_v3 = vld [vmem:[%s8162_s23 + $0x18] sm:$0xff] }
 0x5a2   : > { %v6093_v12 = vpack.c.bf16 %v6073_v57, %v6069_v28  ;;  %v6380_v28 = vadd.f32 %v11477_v34, %v6379_v2 }
 0x5a5   : > { %v6038_v41 = vpop.f32.mrf.mxu0  ;;  %v11484_v24 = vpop.f32.mrf.mxu1 }
 0x5a6   : > { %v6039_v0 = vadd.f32 %v6038_v41, %v5458_v23 }
 0x5a8   : > { %v6077_v48 = vmax.f32 %v6039_v0, 0.0 }
 0x5aa   : > { %v6097_v40 = vpack.c.bf16 %v6077_v48, %v6077_v48 }
 0x5ac   : > { %6475 = vmatmul.bf16.gmra.mxu1 %v6089_v45 }
 0x5ad   : > { %v6040_v5 = vpop.f32.mrf.mxu0  ;;  %v11487_v54 = vpop.f32.mrf.mxu1 }
 0x5ae   : > { %v6378_v5 = vadd.f32 %v11477_v34, %v11480_v31 }
 0x5b5   : > { %v6400_v47 = vpop.f32.mrf.mxu0 }
 0x5b6   : > { %v6401_v39 = vadd.f32 %v6400_v47, %v6368_v58 }
 0x5bc   : > { %6480 = vmatmul.bf16.gmra.mxu1 %v6093_v12  ;;  %v7783_v12 = vld [vmem:[%s8162_s23 + $0x20] sm:$0xff] }
 0x5bd   : > { %v6402_v8 = vpop.f32.mrf.mxu0 }
 0x5be   : > { %v6403_v7 = vadd.f32 %v6402_v8, %v6370_v46 }
 0x5c5   : > { %v6405_v10 = vpop.f32.mrf.mxu0 }
 0x5c6   : > { %v6406_v32 = vadd.f32 %v6405_v10, %v6373_v43  ;;  %v6383_v43 = vadd.f32 %v11477_v34, %v11484_v24  ;;  %v7784_v10 = vld [vmem:[%s8162_s23 + $0x28] sm:$0xff]  ;;  %v7786_v24 = vld [vmem:[%s8162_s23 + $0x38] sm:$0xff] }
 0x5cc   : > { %6485 = vmatmul.bf16.gmra.mxu1 %v6097_v40 }
 0x5cd   : > { %v6407_v9 = vpop.f32.mrf.mxu0 }
 0x5ce   : > { %v6408_v16 = vadd.f32 %v6407_v9, %v6375_v55  ;;  %v6385_v9 = vadd.f32 %v11477_v34, %v11487_v54 }
 0x5d5   : > { %v6433_v19 = vpop.f32.mrf.mxu0 }
 0x5d6   : > { %v6434_v49 = vadd.f32 %v6433_v19, %v6401_v39 }
 0x5d9   : > { %v6387_v29 = vpop.f32.mrf.mxu1 }
 0x5da   : > { %v6388_v61 = vadd.f32 %v11477_v34, %v6387_v29 }
 0x5dd   : > { %v6435_v20 = vpop.f32.mrf.mxu0 }
 0x5de   : > { %v6436_v26 = vadd.f32 %v6435_v20, %v6403_v7 }
 0x5df   : > { %v6420_v53 = vpop.f32.mrf.mxu2 }
 0x5e0   : > { %v11490_v63 = vadd.f32 %v6420_v53, %v6388_v61 }
 0x5e1   : > { %v6389_v14 = vpop.f32.mrf.mxu1 }
 0x5e5   : > { %v6438_v23 = vpop.f32.mrf.mxu0 }
 0x5e6   : > { %v6439_v15 = vadd.f32 %v6438_v23, %v6406_v32 }
 0x5e7   : > { %v6422_v42 = vpop.f32.mrf.mxu2 }
 0x5e9   : > { %v6410_v50 = vpop.f32.mrf.mxu1 }
 0x5ea   : > { %v6411_v6 = vadd.f32 %v6410_v50, %v6378_v5 }
 0x5ed   : > { %v6440_v21 = vpop.f32.mrf.mxu0 }
 0x5ee   : > { %v6441_v33 = vadd.f32 %v6440_v21, %v6408_v16  ;;  %v7785_v16 = vld [vmem:[%s8162_s23 + $0x30] sm:$0xff]  ;;  %v7787_v21 = vld [vmem:[%s8162_s23 + $0x40] sm:$0xff] }
 0x5f1   : > { %v6412_v38 = vpop.f32.mrf.mxu1 }
 0x5f2   : > { %v6413_v8 = vadd.f32 %v6412_v38, %v6380_v28 }
 0x5f5   : > { %v6443_v51 = vpop.f32.mrf.mxu0 }
 0x5f6   : > { %v6444_v47 = vadd.f32 %v6443_v51, %v6411_v6 }
 0x5f9   : > { %v6415_v60 = vpop.f32.mrf.mxu1 }
 0x5fa   : > { %v6416_v32 = vadd.f32 %v6415_v60, %v6383_v43  ;;  %v7995_v60 = vmov 128.0  }
 0x5fb   : > { %7759 = vrcp.f32 %v7995_v60 }
 0x5fd   : > { %v6445_v11 = vpop.f32.mrf.mxu0 }
 0x5fe   : > { %v6446_v31 = vadd.f32 %v6445_v11, %v6413_v8 }
 0x601   : > { %v6417_v52 = vpop.f32.mrf.mxu1  ;;  %v7760_v34 = vpop.eup %7759 }
 0x602   : > { %v6418_v29 = vadd.f32 %v6417_v52, %v6385_v9  ;;  %v6518_v54 = vmul.f32 128.0, %v7760_v34  ;;  %vm6522_vm7 = vweird.f32 %v7760_v34 }
 0x604   : > { %v6519_v11 = vsub.f32 1.0, %v6518_v54 }
 0x605   : > { %v6448_v13 = vpop.f32.mrf.mxu0 }
 0x606   : > { %v6449_v40 = vadd.f32 %v6448_v13, %v6416_v32  ;;  %v6520_v52 = vmul.f32 %v7760_v34, %v6519_v11 }
 0x608   : > { %v6521_v13 = vadd.f32 %v7760_v34, %v6520_v52 }
 0x609   : > { %v6466_v22 = vpop.f32.mrf.mxu1 }
 0x60a   : > { %v6467_v56 = vadd.f32 %v6466_v22, %v6434_v49  ;;  %v11524_v49 = vsel %vm6522_vm7, %v7760_v34, %v6521_v13 }
 0x60c   : > { %v11493_v44 = vadd.f32 %v7779_v18, %v6467_v56 }
 0x60d   : > { %v6450_v27 = vpop.f32.mrf.mxu0 }
 0x60e   : > { %6499 = vadd.xlane.f32.xlu0 %v11493_v44  ;;  %v6451_v61 = vadd.f32 %v6450_v27, %v6418_v29 }
 0x611   : > { %v6468_v17 = vpop.f32.mrf.mxu1 }
 0x612   : > { %v6469_v59 = vadd.f32 %v6468_v17, %v6436_v26 }
 0x614   : > { %v11497_v37 = vadd.f32 %v7780_v1, %v6469_v59 }
 0x615   : > { %v6453_v62 = vpop.f32.mrf.mxu0 }
 0x616   : > { %6501 = vadd.xlane.f32.xlu1 %v11497_v37  ;;  %v6454_v23 = vadd.f32 %v6453_v62, %v11490_v63 }
 0x619   : > { %v6471_v35 = vpop.f32.mrf.mxu1 }
 0x61a   : > { %v6472_v25 = vadd.f32 %v6471_v35, %v6439_v15 }
 0x61c   : > { %v11501_v41 = vadd.f32 %v7781_v4, %v6472_v25 }
 0x61d   : > { %v6455_v36 = vpop.f32.mrf.mxu0 }
 0x61e   : > { %6503 = vadd.xlane.f32.xlu2 %v11501_v41 }
 0x621   : > { %v6473_v45 = vpop.f32.mrf.mxu1 }
 0x622   : > { %v6474_v30 = vadd.f32 %v6473_v45, %v6441_v33 }
 0x624   : > { %v11507_v58 = vadd.f32 %v7782_v3, %v6474_v30 }
 0x626   : > { %6505 = vadd.xlane.f32.xlu2 %v11507_v58 }
 0x629   : > { %v6476_v57 = vpop.f32.mrf.mxu1 }
 0x62a   : > { %v6477_v39 = vadd.f32 %v6476_v57, %v6444_v47 }
 0x62c   : > { %v11512_v46 = vadd.f32 %v7783_v12, %v6477_v39 }
 0x62e   : > { %6507 = vadd.xlane.f32.xlu0 %v11512_v46 }
 0x631   : > { %v6478_v7 = vpop.f32.mrf.mxu1 }
 0x632   : > { %v6479_v0 = vadd.f32 %v6478_v7, %v6446_v31 }
 0x634   : > { %v6495_v48 = vadd.f32 %v7784_v10, %v6479_v0 }
 0x636   : > { %6509 = vadd.xlane.f32.xlu1 %v6495_v48 }
 0x639   : > { %v6481_v2 = vpop.f32.mrf.mxu1 }
 0x63a   : > { %v6482_v55 = vadd.f32 %v6481_v2, %v6449_v40 }
 0x63c   : > { %v6496_v19 = vadd.f32 %v7785_v16, %v6482_v55 }
 0x63e   : > { %6511 = vadd.xlane.f32.xlu2 %v6496_v19 }
 0x641   : > { %v6483_v20 = vpop.f32.mrf.mxu1 }
 0x642   : > { %v6484_v53 = vadd.f32 %v6483_v20, %v6451_v61 }
 0x644   : > { %v6497_v14 = vadd.f32 %v7786_v24, %v6484_v53 }
 0x646   : > { %6513 = vadd.xlane.f32.xlu0 %v6497_v14 }
 0x649   : > { %v6486_v42 = vpop.f32.mrf.mxu1 }
 0x64a   : > { %v6487_v50 = vadd.f32 %v6486_v42, %v6454_v23 }
 0x64c   : > { %v6498_v38 = vadd.f32 %v7787_v21, %v6487_v50  ;;  %v11583_v50 = vld [vmem:[%s11679_s9] ss:$0 sm:$0xff] }
 0x64e   : > { %6515 = vadd.xlane.f32.xlu1 %v6498_v38 }
 0x651   : > { %v6488_v51 = vpop.f32.mrf.mxu1 }
 0x652   : > { %v11590_v51 = vld [vmem:[%s11680_s10] ss:$0 sm:$0xff] }
 0x681   : > { %v6500_v22 = vpop.xlane.xlu0 %6499 }
 0x682   : > { %v6524_v56 = vmul.f32 %v11524_v49, %v6500_v22 }
 0x684   : > { %v11528_v63 = vsub.f32 %v11493_v44, %v6524_v56 }
 0x686   : > { %v6542_v18 = vmul.f32 %v11528_v63, %v11528_v63 }
 0x688   : > { %6551 = vadd.xlane.f32.xlu2 %v6542_v18 }
 0x689   : > { %v6502_v27 = vpop.xlane.xlu1 %6501 }
 0x68a   : > { %v6525_v26 = vmul.f32 %v11524_v49, %v6502_v27 }
 0x68c   : > { %v11534_v17 = vsub.f32 %v11497_v37, %v6525_v26 }
 0x68e   : > { %v6543_v59 = vmul.f32 %v11534_v17, %v11534_v17 }
 0x690   : > { %6553 = vadd.xlane.f32.xlu0 %v6543_v59 }
 0x691   : > { %v6504_v1 = vpop.xlane.xlu2 %6503 }
 0x692   : > { %v6526_v62 = vmul.f32 %v11524_v49, %v6504_v1 }
 0x694   : > { %v11540_v44 = vsub.f32 %v11501_v41, %v6526_v62 }
 0x696   : > { %v6544_v15 = vmul.f32 %v11540_v44, %v11540_v44 }
 0x698   : > { %6555 = vadd.xlane.f32.xlu1 %v6544_v15 }
 0x699   : > { %v6506_v35 = vpop.xlane.xlu2 %6505 }
 0x69a   : > { %v6527_v25 = vmul.f32 %v11524_v49, %v6506_v35 }
 0x69c   : > { %v11546_v37 = vsub.f32 %v11507_v58, %v6527_v25 }
 0x69e   : > { %v6545_v4 = vmul.f32 %v11546_v37, %v11546_v37 }
 0x6a0   : > { %6557 = vadd.xlane.f32.xlu2 %v6545_v4 }
 0x6a1   : > { %v6508_v36 = vpop.xlane.xlu0 %6507 }
 0x6a2   : > { %v6528_v33 = vmul.f32 %v11524_v49, %v6508_v36 }
 0x6a4   : > { %v11552_v41 = vsub.f32 %v11512_v46, %v6528_v33 }
 0x6a6   : > { %v6546_v45 = vmul.f32 %v11552_v41, %v11552_v41 }
 0x6a8   : > { %6559 = vadd.xlane.f32.xlu0 %v6546_v45 }
 0x6a9   : > { %v6510_v30 = vpop.xlane.xlu1 %6509 }
 0x6aa   : > { %v6529_v5 = vmul.f32 %v11524_v49, %v6510_v30 }
 0x6ac   : > { %v11557_v3 = vsub.f32 %v6495_v48, %v6529_v5 }
 0x6ae   : > { %v6547_v58 = vmul.f32 %v11557_v3, %v11557_v3 }
 0x6b0   : > { %6561 = vadd.xlane.f32.xlu1 %v6547_v58 }
 0x6b1   : > { %v6512_v6 = vpop.xlane.xlu2 %6511 }
 0x6b2   : > { %v6530_v47 = vmul.f32 %v11524_v49, %v6512_v6 }
 0x6b4   : > { %v11562_v57 = vsub.f32 %v6496_v19, %v6530_v47 }
 0x6b6   : > { %v6548_v39 = vmul.f32 %v11562_v57, %v11562_v57 }
 0x6b8   : > { %6563 = vadd.xlane.f32.xlu2 %v6548_v39 }
 0x6b9   : > { %v6514_v28 = vpop.xlane.xlu0 %6513 }
 0x6ba   : > { %v6531_v12 = vmul.f32 %v11524_v49, %v6514_v28 }
 0x6bc   : > { %v11567_v46 = vsub.f32 %v6497_v14, %v6531_v12 }
 0x6be   : > { %v6549_v8 = vmul.f32 %v11567_v46, %v11567_v46 }
 0x6c0   : > { %6565 = vadd.xlane.f32.xlu0 %v6549_v8 }
 0x6c1   : > { %v6516_v31 = vpop.xlane.xlu1 %6515 }
 0x6c2   : > { %v6532_v7 = vmul.f32 %v11524_v49, %v6516_v31 }
 0x6c4   : > { %v11572_v0 = vsub.f32 %v6498_v38, %v6532_v7 }
 0x6c6   : > { %v6550_v43 = vmul.f32 %v11572_v0, %v11572_v0 }
 0x6c8   : > { %6567 = vadd.xlane.f32.xlu1 %v6550_v43 }
 0x6fb   : > { %v6552_v10 = vpop.xlane.xlu2 %6551 }
 0x6fc   : > { %v6569_v48 = vmul.f32 %v6552_v10, %v11524_v49 }
 0x6fe   : > { %v6578_v32 = vadd.f32 1e-05, %v6569_v48 }
 0x700   : > { %7761 = vrsqrt.f32 %v6578_v32  ;;  %vm6593_vm9 = vweird.f32 %v6578_v32 }
 0x703   : > { %v6554_v40 = vpop.xlane.xlu0 %6553 }
 0x704   : > { %v6570_v2 = vmul.f32 %v6554_v40, %v11524_v49 }
 0x706   : > { %v7762_v55 = vpop.eup %7761  ;;  %v6579_v9 = vadd.f32 1e-05, %v6570_v2 }
 0x707   : > { %v6588_v16 = vmul.f32 %v7762_v55, %v6578_v32  ;;  %vm6594_vm8 = vweird.f32 %v7762_v55 }
 0x708   : > { %7763 = vrsqrt.f32 %v6579_v9  ;;  %vm6595_vm10 = vmor %vm6593_vm9, %vm6594_vm8  ;;  %vm6603_vm12 = vweird.f32 %v6579_v9 }
 0x709   : > { %v6589_v19 = vmul.f32 %v7762_v55, %v6588_v16 }
 0x70b   : > { %v6590_v29 = vmul.f32 0.5, %v6589_v19  ;;  %v6556_v61 = vpop.xlane.xlu1 %6555 }
 0x70c   : > { %v6571_v20 = vmul.f32 %v6556_v61, %v11524_v49 }
 0x70d   : > { %v6591_v53 = vsub.f32 1.5, %v6590_v29 }
 0x70e   : > { %v7764_v24 = vpop.eup %7763  ;;  %v6580_v14 = vadd.f32 1e-05, %v6571_v20 }
 0x70f   : > { %v6592_v23 = vmul.f32 %v7762_v55, %v6591_v53  ;;  %v6598_v42 = vmul.f32 %v7764_v24, %v6579_v9  ;;  %vm6604_vm11 = vweird.f32 %v7764_v24 }
 0x710   : > { %7765 = vrsqrt.f32 %v6580_v14  ;;  %vm6605_vm13 = vmor %vm6603_vm12, %vm6604_vm11  ;;  %vm6613_vm15 = vweird.f32 %v6580_v14 }
 0x711   : > { %v6596_v21 = vsel %vm6595_vm10, %v7762_v55, %v6592_v23  ;;  %v6599_v38 = vmul.f32 %v7764_v24, %v6598_v42 }
 0x712   : > { %v6677_v60 = vmul.f32 %v6596_v21, %v11528_v63 }
 0x713   : > { %v6600_v34 = vmul.f32 0.5, %v6599_v38  ;;  %v6558_v54 = vpop.xlane.xlu2 %6557 }
 0x714   : > { %v6690_v11 = vmul.f32 %v11583_v50, %v6677_v60  ;;  %v6572_v52 = vmul.f32 %v6558_v54, %v11524_v49 }
 0x715   : > { %v6601_v13 = vsub.f32 1.5, %v6600_v34 }
 0x716   : > { %v7766_v22 = vpop.eup %7765  ;;  %v6703_v56 = vadd.f32 %v11590_v51, %v6690_v11  ;;  %v6581_v18 = vadd.f32 1e-05, %v6572_v52 }
 0x717   : > { %v6602_v27 = vmul.f32 %v7764_v24, %v6601_v13  ;;  %v6608_v26 = vmul.f32 %v7766_v22, %v6580_v14  ;;  %vm6614_vm14 = vweird.f32 %v7766_v22 }
 0x718   : > { %6712 = vst [vmem:[%s11596_s19] sm:$0xff] %v6703_v56  ;;  %7767 = vrsqrt.f32 %v6581_v18  ;;  %vm6615_vm0 = vmor %vm6613_vm15, %vm6614_vm14  ;;  %vm6623_vm2 = vweird.f32 %v6581_v18 }
 0x719   : > { %v6606_v63 = vsel %vm6605_vm13, %v7764_v24, %v6602_v27  ;;  %v6609_v59 = vmul.f32 %v7766_v22, %v6608_v26 }
 0x71a   : > { %v6678_v1 = vmul.f32 %v6606_v63, %v11534_v17 }
 0x71b   : > { %v6610_v62 = vmul.f32 0.5, %v6609_v59  ;;  %v6560_v15 = vpop.xlane.xlu0 %6559 }
 0x71c   : > { %v6691_v35 = vmul.f32 %v11583_v50, %v6678_v1  ;;  %v6573_v25 = vmul.f32 %v6560_v15, %v11524_v49 }
 0x71d   : > { %v6611_v4 = vsub.f32 1.5, %v6610_v62 }
 0x71e   : > { %v7768_v36 = vpop.eup %7767  ;;  %v6704_v33 = vadd.f32 %v11590_v51, %v6691_v35  ;;  %v6582_v45 = vadd.f32 1e-05, %v6573_v25 }
 0x71f   : > { %v6612_v30 = vmul.f32 %v7766_v22, %v6611_v4  ;;  %v6618_v5 = vmul.f32 %v7768_v36, %v6581_v18  ;;  %vm6624_vm1 = vweird.f32 %v7768_v36 }
 0x720   : > { %6713 = vst [vmem:[%s11596_s19 + $0x8] sm:$0xff] %v6704_v33  ;;  %7769 = vrsqrt.f32 %v6582_v45  ;;  %vm6625_vm3 = vmor %vm6623_vm2, %vm6624_vm1  ;;  %vm6633_vm5 = vweird.f32 %v6582_v45 }
 0x721   : > { %v6616_v17 = vsel %vm6615_vm0, %v7766_v22, %v6612_v30  ;;  %v6619_v58 = vmul.f32 %v7768_v36, %v6618_v5 }
 0x722   : > { %v6679_v6 = vmul.f32 %v6616_v17, %v11540_v44 }
 0x723   : > { %v6620_v47 = vmul.f32 0.5, %v6619_v58  ;;  %v6562_v39 = vpop.xlane.xlu1 %6561 }
 0x724   : > { %v6692_v28 = vmul.f32 %v11583_v50, %v6679_v6  ;;  %v6574_v12 = vmul.f32 %v6562_v39, %v11524_v49 }
 0x725   : > { %v6621_v8 = vsub.f32 1.5, %v6620_v47 }
 0x726   : > { %v7770_v31 = vpop.eup %7769  ;;  %v6705_v7 = vadd.f32 %v11590_v51, %v6692_v28  ;;  %v6583_v43 = vadd.f32 1e-05, %v6574_v12 }
 0x727   : > { %v6622_v10 = vmul.f32 %v7768_v36, %v6621_v8  ;;  %v6628_v48 = vmul.f32 %v7770_v31, %v6582_v45  ;;  %vm6634_vm4 = vweird.f32 %v7770_v31 }
 0x728   : > { %6714 = vst [vmem:[%s11596_s19 + $0x10] sm:$0xff] %v6705_v7  ;;  %7771 = vrsqrt.f32 %v6583_v43  ;;  %vm6635_vm6 = vmor %vm6633_vm5, %vm6634_vm4  ;;  %vm6643_vm8 = vweird.f32 %v6583_v43 }
 0x729   : > { %v6626_v44 = vsel %vm6625_vm3, %v7768_v36, %v6622_v10  ;;  %v6629_v32 = vmul.f32 %v7770_v31, %v6628_v48 }
 0x72a   : > { %v6680_v40 = vmul.f32 %v6626_v44, %v11546_v37 }
 0x72b   : > { %v6630_v2 = vmul.f32 0.5, %v6629_v32  ;;  %v6564_v55 = vpop.xlane.xlu2 %6563 }
 0x72c   : > { %v6693_v9 = vmul.f32 %v11583_v50, %v6680_v40  ;;  %v6575_v16 = vmul.f32 %v6564_v55, %v11524_v49 }
 0x72d   : > { %v6631_v19 = vsub.f32 1.5, %v6630_v2 }
 0x72e   : > { %v7772_v29 = vpop.eup %7771  ;;  %v6706_v61 = vadd.f32 %v11590_v51, %v6693_v9  ;;  %v6584_v20 = vadd.f32 1e-05, %v6575_v16 }
 0x72f   : > { %v6632_v53 = vmul.f32 %v7770_v31, %v6631_v19  ;;  %v6638_v24 = vmul.f32 %v7772_v29, %v6583_v43  ;;  %vm6644_vm7 = vweird.f32 %v7772_v29 }
 0x730   : > { %6715 = vst [vmem:[%s11596_s19 + $0x18] sm:$0xff] %v6706_v61  ;;  %7773 = vrsqrt.f32 %v6584_v20  ;;  %vm6645_vm9 = vmor %vm6643_vm8, %vm6644_vm7  ;;  %vm6653_vm11 = vweird.f32 %v6584_v20 }
 0x731   : > { %v6636_v37 = vsel %vm6635_vm6, %v7770_v31, %v6632_v53  ;;  %v6639_v14 = vmul.f32 %v7772_v29, %v6638_v24 }
 0x732   : > { %v6681_v23 = vmul.f32 %v6636_v37, %v11552_v41 }
 0x733   : > { %v6640_v42 = vmul.f32 0.5, %v6639_v14  ;;  %v6566_v21 = vpop.xlane.xlu0 %6565 }
 0x734   : > { %v6694_v38 = vmul.f32 %v11583_v50, %v6681_v23  ;;  %v6576_v60 = vmul.f32 %v6566_v21, %v11524_v49 }
 0x735   : > { %v6641_v34 = vsub.f32 1.5, %v6640_v42 }
 0x736   : > { %v7774_v54 = vpop.eup %7773  ;;  %v6707_v11 = vadd.f32 %v11590_v51, %v6694_v38  ;;  %v6585_v52 = vadd.f32 1e-05, %v6576_v60 }
 0x737   : > { %v6642_v13 = vmul.f32 %v7772_v29, %v6641_v34  ;;  %v6648_v22 = vmul.f32 %v7774_v54, %v6584_v20  ;;  %vm6654_vm10 = vweird.f32 %v7774_v54 }
 0x738   : > { %6716 = vst [vmem:[%s11596_s19 + $0x20] sm:$0xff] %v6707_v11  ;;  %7775 = vrsqrt.f32 %v6585_v52  ;;  %vm6655_vm12 = vmor %vm6653_vm11, %vm6654_vm10  ;;  %vm6663_vm14 = vweird.f32 %v6585_v52 }
 0x739   : > { %v6646_v41 = vsel %vm6645_vm9, %v7772_v29, %v6642_v13  ;;  %v6649_v56 = vmul.f32 %v7774_v54, %v6648_v22 }
 0x73a   : > { %v6682_v18 = vmul.f32 %v6646_v41, %v11557_v3 }
 0x73b   : > { %v6650_v27 = vmul.f32 0.5, %v6649_v56  ;;  %v6568_v26 = vpop.xlane.xlu1 %6567 }
 0x73c   : > { %v6695_v63 = vmul.f32 %v11583_v50, %v6682_v18  ;;  %v6577_v59 = vmul.f32 %v6568_v26, %v11524_v49 }
 0x73d   : > { %v6651_v1 = vsub.f32 1.5, %v6650_v27 }
 0x73e   : > { %v7776_v62 = vpop.eup %7775  ;;  %v6708_v15 = vadd.f32 %v11590_v51, %v6695_v63  ;;  %v6586_v35 = vadd.f32 1e-05, %v6577_v59 }
 0x73f   : > { %v6652_v25 = vmul.f32 %v7774_v54, %v6651_v1  ;;  %v6658_v4 = vmul.f32 %v7776_v62, %v6585_v52  ;;  %vm6664_vm13 = vweird.f32 %v7776_v62 }
 0x740   : > { %6717 = vst [vmem:[%s11596_s19 + $0x28] sm:$0xff] %v6708_v15  ;;  %7777 = vrsqrt.f32 %v6586_v35  ;;  %vm6665_vm15 = vmor %vm6663_vm14, %vm6664_vm13  ;;  %vm6673_vm1 = vweird.f32 %v6586_v35 }
 0x741   : > { %v6656_v3 = vsel %vm6655_vm12, %v7774_v54, %v6652_v25  ;;  %v6659_v36 = vmul.f32 %v7776_v62, %v6658_v4 }
 0x742   : > { %v6683_v33 = vmul.f32 %v6656_v3, %v11562_v57 }
 0x743   : > { %v6660_v45 = vmul.f32 0.5, %v6659_v36 }
 0x744   : > { %v6696_v49 = vmul.f32 %v11583_v50, %v6683_v33 }
 0x745   : > { %v6661_v30 = vsub.f32 1.5, %v6660_v45 }
 0x746   : > { %v7778_v5 = vpop.eup %7777  ;;  %v6709_v17 = vadd.f32 %v11590_v51, %v6696_v49 }
 0x747   : > { %v6662_v58 = vmul.f32 %v7776_v62, %v6661_v30  ;;  %v6668_v6 = vmul.f32 %v7778_v5, %v6586_v35  ;;  %vm6674_vm0 = vweird.f32 %v7778_v5 }
 0x748   : > { %6718 = vst [vmem:[%s11596_s19 + $0x30] sm:$0xff] %v6709_v17  ;;  %vm6675_vm2 = vmor %vm6673_vm1, %vm6674_vm0 }
 0x749   : > { %v6666_v47 = vsel %vm6665_vm15, %v7776_v62, %v6662_v58  ;;  %v6669_v39 = vmul.f32 %v7778_v5, %v6668_v6 }
 0x74a   : > { %v6684_v57 = vmul.f32 %v6666_v47, %v11567_v46 }
 0x74b   : > { %v6670_v28 = vmul.f32 0.5, %v6669_v39 }
 0x74c   : > { %v6697_v12 = vmul.f32 %v11583_v50, %v6684_v57 }
 0x74d   : > { %v6671_v8 = vsub.f32 1.5, %v6670_v28 }
 0x74e   : > { %v6710_v31 = vadd.f32 %v11590_v51, %v6697_v12 }
 0x74f   : > { %v6672_v7 = vmul.f32 %v7778_v5, %v6671_v8 }
 0x750   : > { %6719 = vst [vmem:[%s11596_s19 + $0x38] sm:$0xff] %v6710_v31 }
 0x751   : > { %v6676_v46 = vsel %vm6675_vm2, %v7778_v5, %v6672_v7 }
 0x752   : > { %v6685_v43 = vmul.f32 %v6676_v46, %v11572_v0 }
 0x754   : > { %v6698_v10 = vmul.f32 %v11583_v50, %v6685_v43 }
 0x756   : > { %v6711_v48 = vadd.f32 %v11590_v51, %v6698_v10 }
 0x758   : > { %6720 = vst [vmem:[%s11596_s19 + $0x40] sm:$0xff] %v6711_v48 }
 0x759   : > { %7935 = shalt.err (!%p7932_p8)
}
 0x75a   : > { %s7996_s15 = smov 128   ;;  %s7997_s12 = smov 8  }
 0x75b   : > { %7391 = dma.vmem_to_hbm [thread:$0]  (%p8096_p5), %s6735_s29, 1152, %s6737_s21, %s6722_s16, %s7996_s15, %s7996_s15, %s7997_s12  }
 0x75c PF: > { %s12347_s2 = sld [smem:[#allocation17_spill]] }
 0x75d   : > { %s12348_s17 = sld [smem:[#allocation15_spill]] }
 0x762   : > { %p7418_p9 = scmp.ge.s32.totalorder %s12347_s2, 2 }
 0x763   : > { %s6751_s20 = sand.u32 1, %s12348_s17  }
 0x764   : > { %p7407_p10 = pnand %p7418_p9, %p8100_p6  ;;  %s6752_s23 = scalar_lea.sflag [#allocation4], %s6751_s20 }
 0x766   : > { %p7408_p11 = pneg %p7407_p10 }
 0x768   : > { %7965 = dma.done.wait (%p7408_p11), %s6752_s23, 1152  }
 0x769   : > { %7967 = vsyncadd (%p7408_p11), %s6752_s23, 4294966144  ;;  %s12350_s20 = sld [smem:[#allocation18_spill]]  ;;  %s12353_s17 = smov %s7974_s18 }
 0x76a   : > { %s12351_s26 = sld [smem:[#allocation16_spill]] }
 0x76b   : > { %s12352_s19 = sld [smem:[#allocation19_spill]] }
 0x76f   : > { %p24_p12 = scmp.ge.s32.totalorder %s12350_s20, 4  }
 0x770   : > { %s12354_s18 = smov %s12351_s26 }
 0x771   :  { %26 = sbr.rel (!%p24_p12) target bundleno = 9 (0x9), region = 119 }
 0x776   :  { %6758 = vsyncpa [#allocation3], 1 }
 0x777   :  { %6760 = vsyncpa [#allocation3 + $0x1], 1 }
 0x778   :  { %6761 = vsyncpa [#allocation6], 1 }
 0x779   :  { %6762 = vsyncpa [#allocation9], 1 }
 0x77a   :  { %6763 = vsyncpa [#allocation4], 1 }
 0x77b   :  { %6765 = vsyncpa [#allocation4 + $0x1], 1 }

</bundles_post_ra>
